<compile_context>
chip_gen: v6e
topology: v6e:2x2x1
jax: 0.10.0
libtpu: 0.0.40
codegen_flags: <defaults>
</compile_context>

<pallas_src>
import functools

import jax
import jax.numpy as jnp
from jax.experimental import pallas as pl
from jax.experimental.pallas import tpu as pltpu

EPS = 1e-5
LANE = 128
VMEM_LIMIT = 48 * 1024 * 1024   # explicit scoped-VMEM limit (fits all gens)


def _round_up(x, m):
    return (x + m - 1) // m * m


def _pick_row_tile(H, W):
    """Largest divisor TR of H with TR*W <= 1024 rows of matmul M and TR <= H//2."""
    cap = max(1, min(max(H // 2, 1), max(1024 // max(W, 1), 1)))
    best = 1
    for tr in range(1, H + 1):
        if H % tr == 0 and tr <= cap:
            best = tr
    return best


# ----------------------------------------------------------------------------
# Kernel 1: [optional per-channel affine + ReLU on the input] -> 3x3 "same"
# conv (no bias, bf16 MXU operands, f32 accumulation) -> per-channel sum /
# sum-of-squares (BN partial statistics).  One grid step = TR output rows of
# one image.  All channel dims are multiples of 128 (lane-dense).
# ----------------------------------------------------------------------------
def _conv3x3_bn_kernel(x_ref, w_ref, scale_ref, shift_ref,
                       y_ref, sum_ref, ssq_ref, xpad_ref,
                       *, apply_input_act, tr):
    TR = tr
    W = y_ref.shape[1]
    Ci = x_ref.shape[2]
    Co = y_ref.shape[2]

    r = pl.program_id(1)
    row0 = pl.multiple_of(r * TR, TR)

    def act(v):
        # Previous layer's BN + ReLU fused into this conv's input read.
        if apply_input_act:
            v = jnp.maximum(
                v.astype(jnp.float32) * scale_ref[...] + shift_ref[...], 0.0)
        return v.astype(jnp.bfloat16)   # bf16 MXU operand

    # Zero ONLY the 1-pixel border of the halo'd slab (no full-buffer zero).
    zero_row = jnp.zeros((1, W + 2, Ci), jnp.bfloat16)
    zero_col = jnp.zeros((TR + 2, 1, Ci), jnp.bfloat16)
    xpad_ref[0:1, :, :] = zero_row
    xpad_ref[TR + 1:TR + 2, :, :] = zero_row
    xpad_ref[:, 0:1, :] = zero_col
    xpad_ref[:, W + 1:W + 2, :] = zero_col
    # TODO(synk): drop the W halo and implement the +/-1 column taps with
    # pltpu.roll (XLU slot) to avoid the sublane-offset-1 masked stores.

    # Interior rows of this row tile (activated, bf16).
    xpad_ref[1:TR + 1, 1:W + 1, :] = act(x_ref[pl.ds(row0, TR), :, :])

    # Top / bottom halo rows from the neighbouring row tiles (zero at edges).
    @pl.when(r > 0)
    def _():
        xpad_ref[0:1, 1:W + 1, :] = act(x_ref[pl.ds(r * TR - 1, 1), :, :])

    @pl.when(r < pl.num_programs(1) - 1)
    def _():
        xpad_ref[TR + 1:TR + 2, 1:W + 1, :] = act(
            x_ref[pl.ds(r * TR + TR, 1), :, :])

    # 3x3 conv = 9 accumulating MXU matmuls reading shifted taps directly
    # (no im2col patch-matrix round trip).  f32 accumulation.
    acc = jnp.zeros((TR * W, Co), jnp.float32)
    for dy in range(3):
        for dx in range(3):
            k = dy * 3 + dx
            tap = xpad_ref[dy:dy + TR, dx:dx + W, :].reshape(TR * W, Ci)
            acc = acc + jnp.dot(tap, w_ref[k],
                                preferred_element_type=jnp.float32)

    y_ref[...] = acc.reshape(TR, W, Co).astype(y_ref.dtype)       # bf16 store
    # Per-row-tile BN partial statistics, computed in f32 from the accumulator.
    sum_ref[...] = jnp.sum(acc, axis=0).reshape(1, 1, 1, Co)
    ssq_ref[...] = jnp.sum(acc * acc, axis=0).reshape(1, 1, 1, Co)


def conv3x3_bn_stats(x_nhwc, w9, scale_in, shift_in, *, apply_input_act):
    N, H, W, Ci = x_nhwc.shape
    _, _, Co = w9.shape
    TR = _pick_row_tile(H, W)
    RT = H // TR

    kernel = functools.partial(_conv3x3_bn_kernel,
                               apply_input_act=apply_input_act, tr=TR)
    return pl.pallas_call(
        kernel,
        out_shape=(
            jax.ShapeDtypeStruct((N, H, W, Co), jnp.bfloat16),
            jax.ShapeDtypeStruct((N, RT, 1, Co), jnp.float32),
            jax.ShapeDtypeStruct((N, RT, 1, Co), jnp.float32),
        ),
        grid=(N, RT),
        in_specs=[
            # Image block constant in r -> fetched once per image.
            pl.BlockSpec((None, H, W, Ci), lambda n, r: (n, 0, 0, 0)),
            # Weight constant over the whole grid -> fetched once.
            pl.BlockSpec((9, Ci, Co), lambda n, r: (0, 0, 0)),
            pl.BlockSpec((1, 1, Ci), lambda n, r: (0, 0, 0)),
            pl.BlockSpec((1, 1, Ci), lambda n, r: (0, 0, 0)),
        ],
        out_specs=(
            pl.BlockSpec((None, TR, W, Co), lambda n, r: (n, r, 0, 0)),
            pl.BlockSpec((1, 1, 1, Co), lambda n, r: (n, r, 0, 0)),
            pl.BlockSpec((1, 1, 1, Co), lambda n, r: (n, r, 0, 0)),
        ),
        scratch_shapes=[
            pltpu.VMEM((TR + 2, W + 2, Ci), jnp.bfloat16),   # halo'd row slab
        ],
        compiler_params=pltpu.CompilerParams(
            dimension_semantics=("parallel", "parallel"),
            vmem_limit_bytes=VMEM_LIMIT),
    )(x_nhwc, w9, scale_in, shift_in)
    # TODO(synk): for very large H*W*C the full-image input block itself
    # exceeds VMEM; switch the x BlockSpec to an element-offset (pl.Element)
    # halo'd row window so only TR+2 rows are ever resident.


# ----------------------------------------------------------------------------
# Kernel 2: BatchNorm-apply + ReLU on a flat, lane-dense (rows, Cp) view.
# ----------------------------------------------------------------------------
def _affine_relu_kernel(x_ref, scale_ref, shift_ref, o_ref):
    o_ref[...] = jnp.maximum(
        x_ref[...].astype(jnp.float32) * scale_ref[...] + shift_ref[...],
        0.0).astype(o_ref.dtype)


def affine_relu_flat(x2d, scale, shift):
    R, C = x2d.shape
    tr = R                                   # full-dim block always legal
    for cand in (4096, 2048, 1024, 512, 256, 128, 64, 32, 16, 8):
        if cand <= R and R % cand == 0:      # largest ~1 MiB-class row tile
            tr = cand
            break
    return pl.pallas_call(
        _affine_relu_kernel,
        out_shape=jax.ShapeDtypeStruct((R, C), jnp.float32),
        grid=(R // tr,),
        in_specs=[
            pl.BlockSpec((tr, C), lambda i: (i, 0)),
            pl.BlockSpec((1, C), lambda i: (0, 0)),
            pl.BlockSpec((1, C), lambda i: (0, 0)),
        ],
        out_specs=pl.BlockSpec((tr, C), lambda i: (i, 0)),
        compiler_params=pltpu.CompilerParams(
            dimension_semantics=("parallel",),
            vmem_limit_bytes=VMEM_LIMIT),
    )(x2d, scale.reshape(1, C), shift.reshape(1, C))


# ----------------------------------------------------------------------------
# Glue: turn the kernel's partial sums into a per-channel affine (scale, shift).
# ----------------------------------------------------------------------------
def _stats_to_affine(sums, ssqs, count, gamma_p, beta_p):
    s = jnp.sum(sums, axis=(0, 1, 2))               # (Cp,), f32
    q = jnp.sum(ssqs, axis=(0, 1, 2))
    mean = s / count
    var = jnp.maximum(q / count - mean * mean, 0.0)  # biased var, clamped >= 0
    scale = gamma_p / jnp.sqrt(var + EPS)
    shift = beta_p - mean * scale
    return scale, shift


def _prep_weight(w_oihw, ci_p, co_p):
    # OIHW -> (ky, kx, I, O), zero-pad channels to lane multiples, reshape to
    # the (9, Ci_p, Co_p) per-tap layout, cast to bf16 for the MXU.
    o, i, kh, kw = w_oihw.shape
    w = jnp.transpose(w_oihw, (2, 3, 1, 0)).astype(jnp.float32)
    w = jnp.pad(w, ((0, 0), (0, 0), (0, ci_p - i), (0, co_p - o)))
    return w.reshape(kh * kw, ci_p, co_p).astype(jnp.bfloat16)
    # TODO(synk): for thin input layers (Cin << 128) pack the 9 taps into one
    # lane group (K = round_up(9*Cin, 128)) to recover ~9x MXU work on layer 1.


def _pad_vec(v, c_p, fill):
    return jnp.pad(v.astype(jnp.float32), (0, c_p - v.shape[0]),
                   constant_values=fill)


@jax.jit
def double_conv2d(x_nchw, w1_oihw, g1, b1, w2_oihw, g2, b2):
    N, Cin, H, W = x_nchw.shape
    Cout = w1_oihw.shape[0]
    Cip = _round_up(Cin, LANE)
    Cop = _round_up(Cout, LANE)
    count = jnp.float32(N * H * W)

    # NCHW -> NHWC (channels-last = lane axis), zero-pad channels to 128,
    # store bf16 (MXU operands are bf16 anyway; halves the padded-input read).
    x = jnp.transpose(x_nchw, (0, 2, 3, 1)).astype(jnp.float32)
    x = jnp.pad(x, ((0, 0), (0, 0), (0, 0), (0, Cip - Cin))).astype(jnp.bfloat16)

    w1 = _prep_weight(w1_oihw, Cip, Cop)
    w2 = _prep_weight(w2_oihw, Cop, Cop)
    # Pad gamma with 0 so padded channels get scale = shift = 0 (robust).
    g1p, b1p = _pad_vec(g1, Cop, 0.0), _pad_vec(b1, Cop, 0.0)
    g2p, b2p = _pad_vec(g2, Cop, 0.0), _pad_vec(b2, Cop, 0.0)

    dummy_s = jnp.zeros((1, 1, Cip), jnp.float32)    # unused (layer 1)
    dummy_b = jnp.zeros((1, 1, Cip), jnp.float32)

    # Layer 1: conv + fused BN1 statistics (y1 stored bf16).
    y1, s1, q1 = conv3x3_bn_stats(x, w1, dummy_s, dummy_b,
                                  apply_input_act=False)
    sc1, sh1 = _stats_to_affine(s1, q1, count, g1p, b1p)

    # Layer 2: BN1-apply + ReLU fused into the conv input read, + BN2 stats.
    y2, s2, q2 = conv3x3_bn_stats(y1, w2,
                                  sc1.reshape(1, 1, Cop),
                                  sh1.reshape(1, 1, Cop),
                                  apply_input_act=True)
    sc2, sh2 = _stats_to_affine(s2, q2, count, g2p, b2p)

    # Final BN2-apply + ReLU on a flat lane-dense view, then drop channel pad.
    out = affine_relu_flat(y2.reshape(N * H * W, Cop), sc2, sh2)
    # Slice + transpose fuse into one XLA copy back to NCHW.
    # TODO(synk): return NHWC directly to drop this last HBM pass when the
    # consumer accepts channels-last.
    out = out.reshape(N, H, W, Cop)[..., :Cout]
    return jnp.transpose(out, (0, 3, 1, 2))          # back to NCHW


# ----------------------------------------------------------------------------
# Pure-JAX reference (lax conv) for the correctness check.
# ----------------------------------------------------------------------------
def _ref_double_conv(x_nchw, w1, g1, b1, w2, g2, b2):
    def block(x, w, g, b):
        y = jax.lax.conv_general_dilated(
            x, w, window_strides=(1, 1), padding="SAME",
            dimension_numbers=("NCHW", "OIHW", "NCHW"))
        mean = jnp.mean(y, axis=(0, 2, 3), keepdims=True)
        var = jnp.mean(jnp.square(y - mean), axis=(0, 2, 3), keepdims=True)
        yhat = (y - mean) / jnp.sqrt(var + EPS)
        return jnp.maximum(
            yhat * g.reshape(1, -1, 1, 1) + b.reshape(1, -1, 1, 1), 0.0)

    return block(block(x_nchw, w1, g1, b1), w2, g2, b2)


if __name__ == "__main__":
    N, Cin, Cout, H, W = 2, 4, 8, 16, 16

    key = jax.random.PRNGKey(0)
    kx, kw1, kw2 = jax.random.split(key, 3)
    x = jax.random.normal(kx, (N, Cin, H, W), dtype=jnp.float32)
    # PyTorch-shaped (OIHW) conv weights, no bias.
    w1 = 0.1 * jax.random.normal(kw1, (Cout, Cin, 3, 3), dtype=jnp.float32)
    w2 = 0.1 * jax.random.normal(kw2, (Cout, Cout, 3, 3), dtype=jnp.float32)
    # BatchNorm affine params (PyTorch default init).
    g1 = jnp.ones((Cout,), jnp.float32)
    b1 = jnp.zeros((Cout,), jnp.float32)
    g2 = jnp.ones((Cout,), jnp.float32)
    b2 = jnp.zeros((Cout,), jnp.float32)

    out = double_conv2d(x, w1, g1, b1, w2, g2, b2)
    out = jax.block_until_ready(out)

    ref = _ref_double_conv(x, w1, g1, b1, w2, g2, b2)
    assert out.shape == (N, Cout, H, W)
    # bf16 MXU operands + bf16 inter-layer activations -> looser tolerance
    # (accumulation and BN statistics are f32).
    assert jnp.allclose(out, ref, atol=3e-2, rtol=3e-2)

    print("KERNEL_OK")
</pallas_src>

<mosaic_0001>
module attributes {stable_mosaic.version = 11 : i64} {
  func.func @_conv3x3_bn_kernel(%arg0: i32, %arg1: i32, %arg2: memref<1x16x16x128xbf16, #tpu.memory_space<vmem>>, %arg3: memref<9x128x128xbf16, #tpu.memory_space<vmem>>, %arg4: memref<1x1x128xf32, #tpu.memory_space<vmem>>, %arg5: memref<1x1x128xf32, #tpu.memory_space<vmem>>, %arg6: memref<1x8x16x128xbf16, #tpu.memory_space<vmem>>, %arg7: memref<1x1x1x128xf32, #tpu.memory_space<vmem>>, %arg8: memref<1x1x1x128xf32, #tpu.memory_space<vmem>>, %arg9: memref<10x18x128xbf16, #tpu.memory_space<vmem>>) attributes {dimension_semantics = [#tpu.dimension_semantics<parallel>, #tpu.dimension_semantics<parallel>], iteration_bounds = array<i64: 2, 2>, scalar_prefetch = 0 : i64, scratch_operands = 1 : i64, tpu.core_type = #tpu.core_type<tc>, window_params = [{transform_indices = @transform_0, window_bounds = array<i64: 1, 16, 16, 128>}, {pipeline_mode = #tpu.pipeline_mode<synchronous>, transform_indices = @transform_1, window_bounds = array<i64: 9, 128, 128>}, {pipeline_mode = #tpu.pipeline_mode<synchronous>, transform_indices = @transform_2, window_bounds = array<i64: 1, 1, 128>}, {pipeline_mode = #tpu.pipeline_mode<synchronous>, transform_indices = @transform_3, window_bounds = array<i64: 1, 1, 128>}, {transform_indices = @transform_4, window_bounds = array<i64: 1, 8, 16, 128>}, {transform_indices = @transform_5, window_bounds = array<i64: 1, 1, 1, 128>}, {transform_indices = @transform_6, window_bounds = array<i64: 1, 1, 1, 128>}]} {
    %c8_i32 = arith.constant 8 : i32
    %0 = arith.muli %arg1, %c8_i32 : i32
    %1 = tpu.assume_multiple %0, 8 : i32
    %cst = arith.constant 0.000000e+00 : bf16
    %2 = vector.broadcast %cst : bf16 to vector<1x18x128xbf16>
    %cst_0 = arith.constant 0.000000e+00 : bf16
    %3 = vector.broadcast %cst_0 : bf16 to vector<10x1x128xbf16>
    %c0 = arith.constant 0 : index
    %c0_1 = arith.constant 0 : index
    %c0_2 = arith.constant 0 : index
    %4 = vector.load %arg9[%c0, %c0_1, %c0_2] : memref<10x18x128xbf16, #tpu.memory_space<vmem>>, vector<1x18x128xbf16>
    tpu.vector_store %arg9[%c0, %c0_1, %c0_2], %2 {strides = array<i32>} : memref<10x18x128xbf16, #tpu.memory_space<vmem>>, vector<1x18x128xbf16>,
    %c9 = arith.constant 9 : index
    %c0_3 = arith.constant 0 : index
    %c0_4 = arith.constant 0 : index
    %5 = vector.load %arg9[%c9, %c0_3, %c0_4] : memref<10x18x128xbf16, #tpu.memory_space<vmem>>, vector<1x18x128xbf16>
    tpu.vector_store %arg9[%c9, %c0_3, %c0_4], %2 {strides = array<i32>} : memref<10x18x128xbf16, #tpu.memory_space<vmem>>, vector<1x18x128xbf16>,
    %c0_5 = arith.constant 0 : index
    %c0_6 = arith.constant 0 : index
    %c0_7 = arith.constant 0 : index
    %6 = vector.load %arg9[%c0_5, %c0_6, %c0_7] : memref<10x18x128xbf16, #tpu.memory_space<vmem>>, vector<10x1x128xbf16>
    tpu.vector_store %arg9[%c0_5, %c0_6, %c0_7], %3 {strides = array<i32>} : memref<10x18x128xbf16, #tpu.memory_space<vmem>>, vector<10x1x128xbf16>,
    %c0_8 = arith.constant 0 : index
    %c17 = arith.constant 17 : index
    %c0_9 = arith.constant 0 : index
    %7 = vector.load %arg9[%c0_8, %c17, %c0_9] : memref<10x18x128xbf16, #tpu.memory_space<vmem>>, vector<10x1x128xbf16>
    tpu.vector_store %arg9[%c0_8, %c17, %c0_9], %3 {strides = array<i32>} : memref<10x18x128xbf16, #tpu.memory_space<vmem>>, vector<10x1x128xbf16>,
    %c0_10 = arith.constant 0 : index
    %8 = arith.index_cast %1 : i32 to index
    %c0_11 = arith.constant 0 : index
    %c0_12 = arith.constant 0 : index
    %9 = vector.load %arg2[%c0_10, %8, %c0_11, %c0_12] : memref<1x16x16x128xbf16, #tpu.memory_space<vmem>>, vector<1x8x16x128xbf16>
    %10 = vector.shape_cast %9 : vector<1x8x16x128xbf16> to vector<8x16x128xbf16>
    %c1 = arith.constant 1 : index
    %c1_13 = arith.constant 1 : index
    %c0_14 = arith.constant 0 : index
    %11 = vector.load %arg9[%c1, %c1_13, %c0_14] : memref<10x18x128xbf16, #tpu.memory_space<vmem>>, vector<8x16x128xbf16>
    tpu.vector_store %arg9[%c1, %c1_13, %c0_14], %10 {strides = array<i32>} : memref<10x18x128xbf16, #tpu.memory_space<vmem>>, vector<8x16x128xbf16>,
    %c0_i32 = arith.constant 0 : i32
    %12 = arith.cmpi sgt, %arg1, %c0_i32 : i32
    %13 = arith.extui %12 : i1 to i32
    %c0_i32_15 = arith.constant 0 : i32
    %14 = arith.cmpi ne, %13, %c0_i32_15 : i32
    scf.if %14 {
      %c8_i32_88 = arith.constant 8 : i32
      %85 = arith.muli %arg1, %c8_i32_88 : i32
      %c1_i32_89 = arith.constant 1 : i32
      %86 = arith.subi %85, %c1_i32_89 : i32
      %c0_90 = arith.constant 0 : index
      %87 = arith.index_cast %86 : i32 to index
      %c0_91 = arith.constant 0 : index
      %c0_92 = arith.constant 0 : index
      %88 = vector.load %arg2[%c0_90, %87, %c0_91, %c0_92] : memref<1x16x16x128xbf16, #tpu.memory_space<vmem>>, vector<1x1x16x128xbf16>
      %89 = vector.shape_cast %88 : vector<1x1x16x128xbf16> to vector<1x16x128xbf16>
      %c0_93 = arith.constant 0 : index
      %c1_94 = arith.constant 1 : index
      %c0_95 = arith.constant 0 : index
      %90 = vector.load %arg9[%c0_93, %c1_94, %c0_95] : memref<10x18x128xbf16, #tpu.memory_space<vmem>>, vector<1x16x128xbf16>
      tpu.vector_store %arg9[%c0_93, %c1_94, %c0_95], %89 {strides = array<i32>} : memref<10x18x128xbf16, #tpu.memory_space<vmem>>, vector<1x16x128xbf16>,
    } else {
    }
    %c1_i32 = arith.constant 1 : i32
    %15 = arith.cmpi slt, %arg1, %c1_i32 : i32
    %16 = arith.extui %15 : i1 to i32
    %c0_i32_16 = arith.constant 0 : i32
    %17 = arith.cmpi ne, %16, %c0_i32_16 : i32
    scf.if %17 {
      %c8_i32_88 = arith.constant 8 : i32
      %85 = arith.muli %arg1, %c8_i32_88 : i32
      %c8_i32_89 = arith.constant 8 : i32
      %86 = arith.addi %85, %c8_i32_89 : i32
      %c0_90 = arith.constant 0 : index
      %87 = arith.index_cast %86 : i32 to index
      %c0_91 = arith.constant 0 : index
      %c0_92 = arith.constant 0 : index
      %88 = vector.load %arg2[%c0_90, %87, %c0_91, %c0_92] : memref<1x16x16x128xbf16, #tpu.memory_space<vmem>>, vector<1x1x16x128xbf16>
      %89 = vector.shape_cast %88 : vector<1x1x16x128xbf16> to vector<1x16x128xbf16>
      %c9_93 = arith.constant 9 : index
      %c1_94 = arith.constant 1 : index
      %c0_95 = arith.constant 0 : index
      %90 = vector.load %arg9[%c9_93, %c1_94, %c0_95] : memref<10x18x128xbf16, #tpu.memory_space<vmem>>, vector<1x16x128xbf16>
      tpu.vector_store %arg9[%c9_93, %c1_94, %c0_95], %89 {strides = array<i32>} : memref<10x18x128xbf16, #tpu.memory_space<vmem>>, vector<1x16x128xbf16>,
    } else {
    }
    %cst_17 = arith.constant 0.000000e+00 : f32
    %18 = vector.broadcast %cst_17 : f32 to vector<128x128xf32>
    %c0_18 = arith.constant 0 : index
    %c0_19 = arith.constant 0 : index
    %c0_20 = arith.constant 0 : index
    %19 = vector.load %arg9[%c0_18, %c0_19, %c0_20] : memref<10x18x128xbf16, #tpu.memory_space<vmem>>, vector<8x16x128xbf16>
    %20 = vector.shape_cast %19 : vector<8x16x128xbf16> to vector<128x128xbf16>
    %c0_21 = arith.constant 0 : index
    %c0_22 = arith.constant 0 : index
    %c0_23 = arith.constant 0 : index
    %21 = vector.load %arg3[%c0_21, %c0_22, %c0_23] : memref<9x128x128xbf16, #tpu.memory_space<vmem>>, vector<1x128x128xbf16>
    %22 = vector.shape_cast %21 : vector<1x128x128xbf16> to vector<128x128xbf16>
    %cst_24 = arith.constant dense<0.000000e+00> : vector<128x128xf32>
    %23 = tpu.matmul %20, %22, %cst_24 {dimension_numbers = #tpu.dot_dimension_numbers<[1], [0], [0], [1], [0, 0, 1, 1], [], []>} : vector<128x128xbf16>, vector<128x128xbf16>, vector<128x128xf32> -> vector<128x128xf32>
    %24 = arith.addf %18, %23 : vector<128x128xf32>
    %c0_25 = arith.constant 0 : index
    %c1_26 = arith.constant 1 : index
    %c0_27 = arith.constant 0 : index
    %25 = vector.load %arg9[%c0_25, %c1_26, %c0_27] : memref<10x18x128xbf16, #tpu.memory_space<vmem>>, vector<8x16x128xbf16>
    %26 = vector.shape_cast %25 : vector<8x16x128xbf16> to vector<128x128xbf16>
    %c1_28 = arith.constant 1 : index
    %c0_29 = arith.constant 0 : index
    %c0_30 = arith.constant 0 : index
    %27 = vector.load %arg3[%c1_28, %c0_29, %c0_30] : memref<9x128x128xbf16, #tpu.memory_space<vmem>>, vector<1x128x128xbf16>
    %28 = vector.shape_cast %27 : vector<1x128x128xbf16> to vector<128x128xbf16>
    %cst_31 = arith.constant dense<0.000000e+00> : vector<128x128xf32>
    %29 = tpu.matmul %26, %28, %cst_31 {dimension_numbers = #tpu.dot_dimension_numbers<[1], [0], [0], [1], [0, 0, 1, 1], [], []>} : vector<128x128xbf16>, vector<128x128xbf16>, vector<128x128xf32> -> vector<128x128xf32>
    %30 = arith.addf %24, %29 : vector<128x128xf32>
    %c0_32 = arith.constant 0 : index
    %c2 = arith.constant 2 : index
    %c0_33 = arith.constant 0 : index
    %31 = vector.load %arg9[%c0_32, %c2, %c0_33] : memref<10x18x128xbf16, #tpu.memory_space<vmem>>, vector<8x16x128xbf16>
    %32 = vector.shape_cast %31 : vector<8x16x128xbf16> to vector<128x128xbf16>
    %c2_34 = arith.constant 2 : index
    %c0_35 = arith.constant 0 : index
    %c0_36 = arith.constant 0 : index
    %33 = vector.load %arg3[%c2_34, %c0_35, %c0_36] : memref<9x128x128xbf16, #tpu.memory_space<vmem>>, vector<1x128x128xbf16>
    %34 = vector.shape_cast %33 : vector<1x128x128xbf16> to vector<128x128xbf16>
    %cst_37 = arith.constant dense<0.000000e+00> : vector<128x128xf32>
    %35 = tpu.matmul %32, %34, %cst_37 {dimension_numbers = #tpu.dot_dimension_numbers<[1], [0], [0], [1], [0, 0, 1, 1], [], []>} : vector<128x128xbf16>, vector<128x128xbf16>, vector<128x128xf32> -> vector<128x128xf32>
    %36 = arith.addf %30, %35 : vector<128x128xf32>
    %c1_38 = arith.constant 1 : index
    %c0_39 = arith.constant 0 : index
    %c0_40 = arith.constant 0 : index
    %37 = vector.load %arg9[%c1_38, %c0_39, %c0_40] : memref<10x18x128xbf16, #tpu.memory_space<vmem>>, vector<8x16x128xbf16>
    %38 = vector.shape_cast %37 : vector<8x16x128xbf16> to vector<128x128xbf16>
    %c3 = arith.constant 3 : index
    %c0_41 = arith.constant 0 : index
    %c0_42 = arith.constant 0 : index
    %39 = vector.load %arg3[%c3, %c0_41, %c0_42] : memref<9x128x128xbf16, #tpu.memory_space<vmem>>, vector<1x128x128xbf16>
    %40 = vector.shape_cast %39 : vector<1x128x128xbf16> to vector<128x128xbf16>
    %cst_43 = arith.constant dense<0.000000e+00> : vector<128x128xf32>
    %41 = tpu.matmul %38, %40, %cst_43 {dimension_numbers = #tpu.dot_dimension_numbers<[1], [0], [0], [1], [0, 0, 1, 1], [], []>} : vector<128x128xbf16>, vector<128x128xbf16>, vector<128x128xf32> -> vector<128x128xf32>
    %42 = arith.addf %36, %41 : vector<128x128xf32>
    %c1_44 = arith.constant 1 : index
    %c1_45 = arith.constant 1 : index
    %c0_46 = arith.constant 0 : index
    %43 = vector.load %arg9[%c1_44, %c1_45, %c0_46] : memref<10x18x128xbf16, #tpu.memory_space<vmem>>, vector<8x16x128xbf16>
    %44 = vector.shape_cast %43 : vector<8x16x128xbf16> to vector<128x128xbf16>
    %c4 = arith.constant 4 : index
    %c0_47 = arith.constant 0 : index
    %c0_48 = arith.constant 0 : index
    %45 = vector.load %arg3[%c4, %c0_47, %c0_48] : memref<9x128x128xbf16, #tpu.memory_space<vmem>>, vector<1x128x128xbf16>
    %46 = vector.shape_cast %45 : vector<1x128x128xbf16> to vector<128x128xbf16>
    %cst_49 = arith.constant dense<0.000000e+00> : vector<128x128xf32>
    %47 = tpu.matmul %44, %46, %cst_49 {dimension_numbers = #tpu.dot_dimension_numbers<[1], [0], [0], [1], [0, 0, 1, 1], [], []>} : vector<128x128xbf16>, vector<128x128xbf16>, vector<128x128xf32> -> vector<128x128xf32>
    %48 = arith.addf %42, %47 : vector<128x128xf32>
    %c1_50 = arith.constant 1 : index
    %c2_51 = arith.constant 2 : index
    %c0_52 = arith.constant 0 : index
    %49 = vector.load %arg9[%c1_50, %c2_51, %c0_52] : memref<10x18x128xbf16, #tpu.memory_space<vmem>>, vector<8x16x128xbf16>
    %50 = vector.shape_cast %49 : vector<8x16x128xbf16> to vector<128x128xbf16>
    %c5 = arith.constant 5 : index
    %c0_53 = arith.constant 0 : index
    %c0_54 = arith.constant 0 : index
    %51 = vector.load %arg3[%c5, %c0_53, %c0_54] : memref<9x128x128xbf16, #tpu.memory_space<vmem>>, vector<1x128x128xbf16>
    %52 = vector.shape_cast %51 : vector<1x128x128xbf16> to vector<128x128xbf16>
    %cst_55 = arith.constant dense<0.000000e+00> : vector<128x128xf32>
    %53 = tpu.matmul %50, %52, %cst_55 {dimension_numbers = #tpu.dot_dimension_numbers<[1], [0], [0], [1], [0, 0, 1, 1], [], []>} : vector<128x128xbf16>, vector<128x128xbf16>, vector<128x128xf32> -> vector<128x128xf32>
    %54 = arith.addf %48, %53 : vector<128x128xf32>
    %c2_56 = arith.constant 2 : index
    %c0_57 = arith.constant 0 : index
    %c0_58 = arith.constant 0 : index
    %55 = vector.load %arg9[%c2_56, %c0_57, %c0_58] : memref<10x18x128xbf16, #tpu.memory_space<vmem>>, vector<8x16x128xbf16>
    %56 = vector.shape_cast %55 : vector<8x16x128xbf16> to vector<128x128xbf16>
    %c6 = arith.constant 6 : index
    %c0_59 = arith.constant 0 : index
    %c0_60 = arith.constant 0 : index
    %57 = vector.load %arg3[%c6, %c0_59, %c0_60] : memref<9x128x128xbf16, #tpu.memory_space<vmem>>, vector<1x128x128xbf16>
    %58 = vector.shape_cast %57 : vector<1x128x128xbf16> to vector<128x128xbf16>
    %cst_61 = arith.constant dense<0.000000e+00> : vector<128x128xf32>
    %59 = tpu.matmul %56, %58, %cst_61 {dimension_numbers = #tpu.dot_dimension_numbers<[1], [0], [0], [1], [0, 0, 1, 1], [], []>} : vector<128x128xbf16>, vector<128x128xbf16>, vector<128x128xf32> -> vector<128x128xf32>
    %60 = arith.addf %54, %59 : vector<128x128xf32>
    %c2_62 = arith.constant 2 : index
    %c1_63 = arith.constant 1 : index
    %c0_64 = arith.constant 0 : index
    %61 = vector.load %arg9[%c2_62, %c1_63, %c0_64] : memref<10x18x128xbf16, #tpu.memory_space<vmem>>, vector<8x16x128xbf16>
    %62 = vector.shape_cast %61 : vector<8x16x128xbf16> to vector<128x128xbf16>
    %c7 = arith.constant 7 : index
    %c0_65 = arith.constant 0 : index
    %c0_66 = arith.constant 0 : index
    %63 = vector.load %arg3[%c7, %c0_65, %c0_66] : memref<9x128x128xbf16, #tpu.memory_space<vmem>>, vector<1x128x128xbf16>
    %64 = vector.shape_cast %63 : vector<1x128x128xbf16> to vector<128x128xbf16>
    %cst_67 = arith.constant dense<0.000000e+00> : vector<128x128xf32>
    %65 = tpu.matmul %62, %64, %cst_67 {dimension_numbers = #tpu.dot_dimension_numbers<[1], [0], [0], [1], [0, 0, 1, 1], [], []>} : vector<128x128xbf16>, vector<128x128xbf16>, vector<128x128xf32> -> vector<128x128xf32>
    %66 = arith.addf %60, %65 : vector<128x128xf32>
    %c2_68 = arith.constant 2 : index
    %c2_69 = arith.constant 2 : index
    %c0_70 = arith.constant 0 : index
    %67 = vector.load %arg9[%c2_68, %c2_69, %c0_70] : memref<10x18x128xbf16, #tpu.memory_space<vmem>>, vector<8x16x128xbf16>
    %68 = vector.shape_cast %67 : vector<8x16x128xbf16> to vector<128x128xbf16>
    %c8 = arith.constant 8 : index
    %c0_71 = arith.constant 0 : index
    %c0_72 = arith.constant 0 : index
    %69 = vector.load %arg3[%c8, %c0_71, %c0_72] : memref<9x128x128xbf16, #tpu.memory_space<vmem>>, vector<1x128x128xbf16>
    %70 = vector.shape_cast %69 : vector<1x128x128xbf16> to vector<128x128xbf16>
    %cst_73 = arith.constant dense<0.000000e+00> : vector<128x128xf32>
    %71 = tpu.matmul %68, %70, %cst_73 {dimension_numbers = #tpu.dot_dimension_numbers<[1], [0], [0], [1], [0, 0, 1, 1], [], []>} : vector<128x128xbf16>, vector<128x128xbf16>, vector<128x128xf32> -> vector<128x128xf32>
    %72 = arith.addf %66, %71 : vector<128x128xf32>
    %73 = vector.shape_cast %72 : vector<128x128xf32> to vector<8x16x128xf32>
    %74 = arith.truncf %73 : vector<8x16x128xf32> to vector<8x16x128xbf16>
    %c0_74 = arith.constant 0 : index
    %c0_75 = arith.constant 0 : index
    %c0_76 = arith.constant 0 : index
    %c0_77 = arith.constant 0 : index
    %75 = vector.load %arg6[%c0_74, %c0_75, %c0_76, %c0_77] : memref<1x8x16x128xbf16, #tpu.memory_space<vmem>>, vector<1x8x16x128xbf16>
    %76 = vector.shape_cast %75 : vector<1x8x16x128xbf16> to vector<8x16x128xbf16>
    %77 = vector.shape_cast %74 : vector<8x16x128xbf16> to vector<1x8x16x128xbf16>
    tpu.vector_store %arg6[%c0_74, %c0_75, %c0_76, %c0_77], %77 {strides = array<i32>} : memref<1x8x16x128xbf16, #tpu.memory_space<vmem>>, vector<1x8x16x128xbf16>,
    %cst_78 = arith.constant dense<0.000000e+00> : vector<128xf32>
    %78 = vector.multi_reduction <add>, %72, %cst_78 [0] : vector<128x128xf32> to vector<128xf32>
    %79 = vector.shape_cast %78 : vector<128xf32> to vector<1x1x1x128xf32>
    %c0_79 = arith.constant 0 : index
    %c0_80 = arith.constant 0 : index
    %c0_81 = arith.constant 0 : index
    %c0_82 = arith.constant 0 : index
    %80 = vector.load %arg7[%c0_79, %c0_80, %c0_81, %c0_82] : memref<1x1x1x128xf32, #tpu.memory_space<vmem>>, vector<1x1x1x128xf32>
    tpu.vector_store %arg7[%c0_79, %c0_80, %c0_81, %c0_82], %79 {strides = array<i32>} : memref<1x1x1x128xf32, #tpu.memory_space<vmem>>, vector<1x1x1x128xf32>,
    %81 = arith.mulf %72, %72 : vector<128x128xf32>
    %cst_83 = arith.constant dense<0.000000e+00> : vector<128xf32>
    %82 = vector.multi_reduction <add>, %81, %cst_83 [0] : vector<128x128xf32> to vector<128xf32>
    %83 = vector.shape_cast %82 : vector<128xf32> to vector<1x1x1x128xf32>
    %c0_84 = arith.constant 0 : index
    %c0_85 = arith.constant 0 : index
    %c0_86 = arith.constant 0 : index
    %c0_87 = arith.constant 0 : index
    %84 = vector.load %arg8[%c0_84, %c0_85, %c0_86, %c0_87] : memref<1x1x1x128xf32, #tpu.memory_space<vmem>>, vector<1x1x1x128xf32>
    tpu.vector_store %arg8[%c0_84, %c0_85, %c0_86, %c0_87], %83 {strides = array<i32>} : memref<1x1x1x128xf32, #tpu.memory_space<vmem>>, vector<1x1x1x128xf32>,
    return
  }
  func.func @transform_0(%arg0: i32, %arg1: i32) -> (i32, i32, i32, i32) {
    %c0_i32 = arith.constant 0 : i32
    %c0_i32_0 = arith.constant 0 : i32
    %c0_i32_1 = arith.constant 0 : i32
    %c0_i32_2 = arith.constant 0 : i32
    return %arg0, %c0_i32, %c0_i32_0, %c0_i32_1 : i32, i32, i32, i32
  }
  func.func @transform_1(%arg0: i32, %arg1: i32) -> (i32, i32, i32) {
    %c0_i32 = arith.constant 0 : i32
    %c0_i32_0 = arith.constant 0 : i32
    %c0_i32_1 = arith.constant 0 : i32
    %c0_i32_2 = arith.constant 0 : i32
    return %c0_i32, %c0_i32_0, %c0_i32_1 : i32, i32, i32
  }
  func.func @transform_2(%arg0: i32, %arg1: i32) -> (i32, i32, i32) {
    %c0_i32 = arith.constant 0 : i32
    %c0_i32_0 = arith.constant 0 : i32
    %c0_i32_1 = arith.constant 0 : i32
    %c0_i32_2 = arith.constant 0 : i32
    return %c0_i32, %c0_i32_0, %c0_i32_1 : i32, i32, i32
  }
  func.func @transform_3(%arg0: i32, %arg1: i32) -> (i32, i32, i32) {
    %c0_i32 = arith.constant 0 : i32
    %c0_i32_0 = arith.constant 0 : i32
    %c0_i32_1 = arith.constant 0 : i32
    %c0_i32_2 = arith.constant 0 : i32
    return %c0_i32, %c0_i32_0, %c0_i32_1 : i32, i32, i32
  }
  func.func @transform_4(%arg0: i32, %arg1: i32) -> (i32, i32, i32, i32) {
    %c0_i32 = arith.constant 0 : i32
    %c0_i32_0 = arith.constant 0 : i32
    %c0_i32_1 = arith.constant 0 : i32
    return %arg0, %arg1, %c0_i32, %c0_i32_0 : i32, i32, i32, i32
  }
  func.func @transform_5(%arg0: i32, %arg1: i32) -> (i32, i32, i32, i32) {
    %c0_i32 = arith.constant 0 : i32
    %c0_i32_0 = arith.constant 0 : i32
    %c0_i32_1 = arith.constant 0 : i32
    return %arg0, %arg1, %c0_i32, %c0_i32_0 : i32, i32, i32, i32
  }
  func.func @transform_6(%arg0: i32, %arg1: i32) -> (i32, i32, i32, i32) {
    %c0_i32 = arith.constant 0 : i32
    %c0_i32_0 = arith.constant 0 : i32
    %c0_i32_1 = arith.constant 0 : i32
    return %arg0, %arg1, %c0_i32, %c0_i32_0 : i32, i32, i32, i32
  }
}

module attributes {stable_mosaic.version = 11 : i64} {
  func.func @_conv3x3_bn_kernel(%arg0: i32, %arg1: i32, %arg2: memref<1x16x16x128xbf16, #tpu.memory_space<vmem>>, %arg3: memref<9x128x128xbf16, #tpu.memory_space<vmem>>, %arg4: memref<1x1x128xf32, #tpu.memory_space<vmem>>, %arg5: memref<1x1x128xf32, #tpu.memory_space<vmem>>, %arg6: memref<1x8x16x128xbf16, #tpu.memory_space<vmem>>, %arg7: memref<1x1x1x128xf32, #tpu.memory_space<vmem>>, %arg8: memref<1x1x1x128xf32, #tpu.memory_space<vmem>>, %arg9: memref<10x18x128xbf16, #tpu.memory_space<vmem>>) attributes {dimension_semantics = [#tpu.dimension_semantics<parallel>, #tpu.dimension_semantics<parallel>], iteration_bounds = array<i64: 2, 2>, scalar_prefetch = 0 : i64, scratch_operands = 1 : i64, tpu.core_type = #tpu.core_type<tc>, window_params = [{transform_indices = @transform_0, window_bounds = array<i64: 1, 16, 16, 128>}, {pipeline_mode = #tpu.pipeline_mode<synchronous>, transform_indices = @transform_1, window_bounds = array<i64: 9, 128, 128>}, {pipeline_mode = #tpu.pipeline_mode<synchronous>, transform_indices = @transform_2, window_bounds = array<i64: 1, 1, 128>}, {pipeline_mode = #tpu.pipeline_mode<synchronous>, transform_indices = @transform_3, window_bounds = array<i64: 1, 1, 128>}, {transform_indices = @transform_4, window_bounds = array<i64: 1, 8, 16, 128>}, {transform_indices = @transform_5, window_bounds = array<i64: 1, 1, 1, 128>}, {transform_indices = @transform_6, window_bounds = array<i64: 1, 1, 1, 128>}]} {
    %c8_i32 = arith.constant 8 : i32
    %0 = arith.muli %arg1, %c8_i32 : i32
    %1 = tpu.assume_multiple %0, 8 : i32
    %cst = arith.constant 0.000000e+00 : bf16
    %2 = vector.broadcast %cst : bf16 to vector<1x18x128xbf16>
    %cst_0 = arith.constant 0.000000e+00 : bf16
    %3 = vector.broadcast %cst_0 : bf16 to vector<10x1x128xbf16>
    %c0 = arith.constant 0 : index
    %c0_1 = arith.constant 0 : index
    %c0_2 = arith.constant 0 : index
    %4 = vector.load %arg9[%c0, %c0_1, %c0_2] : memref<10x18x128xbf16, #tpu.memory_space<vmem>>, vector<1x18x128xbf16>
    tpu.vector_store %arg9[%c0, %c0_1, %c0_2], %2 {strides = array<i32>} : memref<10x18x128xbf16, #tpu.memory_space<vmem>>, vector<1x18x128xbf16>,
    %c9 = arith.constant 9 : index
    %c0_3 = arith.constant 0 : index
    %c0_4 = arith.constant 0 : index
    %5 = vector.load %arg9[%c9, %c0_3, %c0_4] : memref<10x18x128xbf16, #tpu.memory_space<vmem>>, vector<1x18x128xbf16>
    tpu.vector_store %arg9[%c9, %c0_3, %c0_4], %2 {strides = array<i32>} : memref<10x18x128xbf16, #tpu.memory_space<vmem>>, vector<1x18x128xbf16>,
    %c0_5 = arith.constant 0 : index
    %c0_6 = arith.constant 0 : index
    %c0_7 = arith.constant 0 : index
    %6 = vector.load %arg9[%c0_5, %c0_6, %c0_7] : memref<10x18x128xbf16, #tpu.memory_space<vmem>>, vector<10x1x128xbf16>
    tpu.vector_store %arg9[%c0_5, %c0_6, %c0_7], %3 {strides = array<i32>} : memref<10x18x128xbf16, #tpu.memory_space<vmem>>, vector<10x1x128xbf16>,
    %c0_8 = arith.constant 0 : index
    %c17 = arith.constant 17 : index
    %c0_9 = arith.constant 0 : index
    %7 = vector.load %arg9[%c0_8, %c17, %c0_9] : memref<10x18x128xbf16, #tpu.memory_space<vmem>>, vector<10x1x128xbf16>
    tpu.vector_store %arg9[%c0_8, %c17, %c0_9], %3 {strides = array<i32>} : memref<10x18x128xbf16, #tpu.memory_space<vmem>>, vector<10x1x128xbf16>,
    %c0_10 = arith.constant 0 : index
    %8 = arith.index_cast %1 : i32 to index
    %c0_11 = arith.constant 0 : index
    %c0_12 = arith.constant 0 : index
    %9 = vector.load %arg2[%c0_10, %8, %c0_11, %c0_12] : memref<1x16x16x128xbf16, #tpu.memory_space<vmem>>, vector<1x8x16x128xbf16>
    %10 = vector.shape_cast %9 : vector<1x8x16x128xbf16> to vector<8x16x128xbf16>
    %11 = arith.extf %10 : vector<8x16x128xbf16> to vector<8x16x128xf32>
    %c0_13 = arith.constant 0 : index
    %c0_14 = arith.constant 0 : index
    %c0_15 = arith.constant 0 : index
    %12 = vector.load %arg4[%c0_13, %c0_14, %c0_15] : memref<1x1x128xf32, #tpu.memory_space<vmem>>, vector<1x1x128xf32>
    %13 = vector.broadcast %12 : vector<1x1x128xf32> to vector<8x16x128xf32>
    %14 = arith.mulf %11, %13 : vector<8x16x128xf32>
    %c0_16 = arith.constant 0 : index
    %c0_17 = arith.constant 0 : index
    %c0_18 = arith.constant 0 : index
    %15 = vector.load %arg5[%c0_16, %c0_17, %c0_18] : memref<1x1x128xf32, #tpu.memory_space<vmem>>, vector<1x1x128xf32>
    %16 = vector.broadcast %15 : vector<1x1x128xf32> to vector<8x16x128xf32>
    %17 = arith.addf %14, %16 : vector<8x16x128xf32>
    %cst_19 = arith.constant 0.000000e+00 : f32
    %18 = vector.broadcast %cst_19 : f32 to vector<8x16x128xf32>
    %19 = arith.maximumf %17, %18 : vector<8x16x128xf32>
    %20 = arith.truncf %19 : vector<8x16x128xf32> to vector<8x16x128xbf16>
    %c1 = arith.constant 1 : index
    %c1_20 = arith.constant 1 : index
    %c0_21 = arith.constant 0 : index
    %21 = vector.load %arg9[%c1, %c1_20, %c0_21] : memref<10x18x128xbf16, #tpu.memory_space<vmem>>, vector<8x16x128xbf16>
    tpu.vector_store %arg9[%c1, %c1_20, %c0_21], %20 {strides = array<i32>} : memref<10x18x128xbf16, #tpu.memory_space<vmem>>, vector<8x16x128xbf16>,
    %c0_i32 = arith.constant 0 : i32
    %22 = arith.cmpi sgt, %arg1, %c0_i32 : i32
    %23 = arith.extui %22 : i1 to i32
    %c0_i32_22 = arith.constant 0 : i32
    %24 = arith.cmpi ne, %23, %c0_i32_22 : i32
    scf.if %24 {
      %c8_i32_95 = arith.constant 8 : i32
      %95 = arith.muli %arg1, %c8_i32_95 : i32
      %c1_i32_96 = arith.constant 1 : i32
      %96 = arith.subi %95, %c1_i32_96 : i32
      %c0_97 = arith.constant 0 : index
      %97 = arith.index_cast %96 : i32 to index
      %c0_98 = arith.constant 0 : index
      %c0_99 = arith.constant 0 : index
      %98 = vector.load %arg2[%c0_97, %97, %c0_98, %c0_99] : memref<1x16x16x128xbf16, #tpu.memory_space<vmem>>, vector<1x1x16x128xbf16>
      %99 = vector.shape_cast %98 : vector<1x1x16x128xbf16> to vector<1x16x128xbf16>
      %100 = arith.extf %99 : vector<1x16x128xbf16> to vector<1x16x128xf32>
      %c0_100 = arith.constant 0 : index
      %c0_101 = arith.constant 0 : index
      %c0_102 = arith.constant 0 : index
      %101 = vector.load %arg4[%c0_100, %c0_101, %c0_102] : memref<1x1x128xf32, #tpu.memory_space<vmem>>, vector<1x1x128xf32>
      %102 = vector.broadcast %101 : vector<1x1x128xf32> to vector<1x16x128xf32>
      %103 = arith.mulf %100, %102 : vector<1x16x128xf32>
      %c0_103 = arith.constant 0 : index
      %c0_104 = arith.constant 0 : index
      %c0_105 = arith.constant 0 : index
      %104 = vector.load %arg5[%c0_103, %c0_104, %c0_105] : memref<1x1x128xf32, #tpu.memory_space<vmem>>, vector<1x1x128xf32>
      %105 = vector.broadcast %104 : vector<1x1x128xf32> to vector<1x16x128xf32>
      %106 = arith.addf %103, %105 : vector<1x16x128xf32>
      %cst_106 = arith.constant 0.000000e+00 : f32
      %107 = vector.broadcast %cst_106 : f32 to vector<1x16x128xf32>
      %108 = arith.maximumf %106, %107 : vector<1x16x128xf32>
      %109 = arith.truncf %108 : vector<1x16x128xf32> to vector<1x16x128xbf16>
      %c0_107 = arith.constant 0 : index
      %c1_108 = arith.constant 1 : index
      %c0_109 = arith.constant 0 : index
      %110 = vector.load %arg9[%c0_107, %c1_108, %c0_109] : memref<10x18x128xbf16, #tpu.memory_space<vmem>>, vector<1x16x128xbf16>
      tpu.vector_store %arg9[%c0_107, %c1_108, %c0_109], %109 {strides = array<i32>} : memref<10x18x128xbf16, #tpu.memory_space<vmem>>, vector<1x16x128xbf16>,
    } else {
    }
    %c1_i32 = arith.constant 1 : i32
    %25 = arith.cmpi slt, %arg1, %c1_i32 : i32
    %26 = arith.extui %25 : i1 to i32
    %c0_i32_23 = arith.constant 0 : i32
    %27 = arith.cmpi ne, %26, %c0_i32_23 : i32
    scf.if %27 {
      %c8_i32_95 = arith.constant 8 : i32
      %95 = arith.muli %arg1, %c8_i32_95 : i32
      %c8_i32_96 = arith.constant 8 : i32
      %96 = arith.addi %95, %c8_i32_96 : i32
      %c0_97 = arith.constant 0 : index
      %97 = arith.index_cast %96 : i32 to index
      %c0_98 = arith.constant 0 : index
      %c0_99 = arith.constant 0 : index
      %98 = vector.load %arg2[%c0_97, %97, %c0_98, %c0_99] : memref<1x16x16x128xbf16, #tpu.memory_space<vmem>>, vector<1x1x16x128xbf16>
      %99 = vector.shape_cast %98 : vector<1x1x16x128xbf16> to vector<1x16x128xbf16>
      %100 = arith.extf %99 : vector<1x16x128xbf16> to vector<1x16x128xf32>
      %c0_100 = arith.constant 0 : index
      %c0_101 = arith.constant 0 : index
      %c0_102 = arith.constant 0 : index
      %101 = vector.load %arg4[%c0_100, %c0_101, %c0_102] : memref<1x1x128xf32, #tpu.memory_space<vmem>>, vector<1x1x128xf32>
      %102 = vector.broadcast %101 : vector<1x1x128xf32> to vector<1x16x128xf32>
      %103 = arith.mulf %100, %102 : vector<1x16x128xf32>
      %c0_103 = arith.constant 0 : index
      %c0_104 = arith.constant 0 : index
      %c0_105 = arith.constant 0 : index
      %104 = vector.load %arg5[%c0_103, %c0_104, %c0_105] : memref<1x1x128xf32, #tpu.memory_space<vmem>>, vector<1x1x128xf32>
      %105 = vector.broadcast %104 : vector<1x1x128xf32> to vector<1x16x128xf32>
      %106 = arith.addf %103, %105 : vector<1x16x128xf32>
      %cst_106 = arith.constant 0.000000e+00 : f32
      %107 = vector.broadcast %cst_106 : f32 to vector<1x16x128xf32>
      %108 = arith.maximumf %106, %107 : vector<1x16x128xf32>
      %109 = arith.truncf %108 : vector<1x16x128xf32> to vector<1x16x128xbf16>
      %c9_107 = arith.constant 9 : index
      %c1_108 = arith.constant 1 : index
      %c0_109 = arith.constant 0 : index
      %110 = vector.load %arg9[%c9_107, %c1_108, %c0_109] : memref<10x18x128xbf16, #tpu.memory_space<vmem>>, vector<1x16x128xbf16>
      tpu.vector_store %arg9[%c9_107, %c1_108, %c0_109], %109 {strides = array<i32>} : memref<10x18x128xbf16, #tpu.memory_space<vmem>>, vector<1x16x128xbf16>,
    } else {
    }
    %cst_24 = arith.constant 0.000000e+00 : f32
    %28 = vector.broadcast %cst_24 : f32 to vector<128x128xf32>
    %c0_25 = arith.constant 0 : index
    %c0_26 = arith.constant 0 : index
    %c0_27 = arith.constant 0 : index
    %29 = vector.load %arg9[%c0_25, %c0_26, %c0_27] : memref<10x18x128xbf16, #tpu.memory_space<vmem>>, vector<8x16x128xbf16>
    %30 = vector.shape_cast %29 : vector<8x16x128xbf16> to vector<128x128xbf16>
    %c0_28 = arith.constant 0 : index
    %c0_29 = arith.constant 0 : index
    %c0_30 = arith.constant 0 : index
    %31 = vector.load %arg3[%c0_28, %c0_29, %c0_30] : memref<9x128x128xbf16, #tpu.memory_space<vmem>>, vector<1x128x128xbf16>
    %32 = vector.shape_cast %31 : vector<1x128x128xbf16> to vector<128x128xbf16>
    %cst_31 = arith.constant dense<0.000000e+00> : vector<128x128xf32>
    %33 = tpu.matmul %30, %32, %cst_31 {dimension_numbers = #tpu.dot_dimension_numbers<[1], [0], [0], [1], [0, 0, 1, 1], [], []>} : vector<128x128xbf16>, vector<128x128xbf16>, vector<128x128xf32> -> vector<128x128xf32>
    %34 = arith.addf %28, %33 : vector<128x128xf32>
    %c0_32 = arith.constant 0 : index
    %c1_33 = arith.constant 1 : index
    %c0_34 = arith.constant 0 : index
    %35 = vector.load %arg9[%c0_32, %c1_33, %c0_34] : memref<10x18x128xbf16, #tpu.memory_space<vmem>>, vector<8x16x128xbf16>
    %36 = vector.shape_cast %35 : vector<8x16x128xbf16> to vector<128x128xbf16>
    %c1_35 = arith.constant 1 : index
    %c0_36 = arith.constant 0 : index
    %c0_37 = arith.constant 0 : index
    %37 = vector.load %arg3[%c1_35, %c0_36, %c0_37] : memref<9x128x128xbf16, #tpu.memory_space<vmem>>, vector<1x128x128xbf16>
    %38 = vector.shape_cast %37 : vector<1x128x128xbf16> to vector<128x128xbf16>
    %cst_38 = arith.constant dense<0.000000e+00> : vector<128x128xf32>
    %39 = tpu.matmul %36, %38, %cst_38 {dimension_numbers = #tpu.dot_dimension_numbers<[1], [0], [0], [1], [0, 0, 1, 1], [], []>} : vector<128x128xbf16>, vector<128x128xbf16>, vector<128x128xf32> -> vector<128x128xf32>
    %40 = arith.addf %34, %39 : vector<128x128xf32>
    %c0_39 = arith.constant 0 : index
    %c2 = arith.constant 2 : index
    %c0_40 = arith.constant 0 : index
    %41 = vector.load %arg9[%c0_39, %c2, %c0_40] : memref<10x18x128xbf16, #tpu.memory_space<vmem>>, vector<8x16x128xbf16>
    %42 = vector.shape_cast %41 : vector<8x16x128xbf16> to vector<128x128xbf16>
    %c2_41 = arith.constant 2 : index
    %c0_42 = arith.constant 0 : index
    %c0_43 = arith.constant 0 : index
    %43 = vector.load %arg3[%c2_41, %c0_42, %c0_43] : memref<9x128x128xbf16, #tpu.memory_space<vmem>>, vector<1x128x128xbf16>
    %44 = vector.shape_cast %43 : vector<1x128x128xbf16> to vector<128x128xbf16>
    %cst_44 = arith.constant dense<0.000000e+00> : vector<128x128xf32>
    %45 = tpu.matmul %42, %44, %cst_44 {dimension_numbers = #tpu.dot_dimension_numbers<[1], [0], [0], [1], [0, 0, 1, 1], [], []>} : vector<128x128xbf16>, vector<128x128xbf16>, vector<128x128xf32> -> vector<128x128xf32>
    %46 = arith.addf %40, %45 : vector<128x128xf32>
    %c1_45 = arith.constant 1 : index
    %c0_46 = arith.constant 0 : index
    %c0_47 = arith.constant 0 : index
    %47 = vector.load %arg9[%c1_45, %c0_46, %c0_47] : memref<10x18x128xbf16, #tpu.memory_space<vmem>>, vector<8x16x128xbf16>
    %48 = vector.shape_cast %47 : vector<8x16x128xbf16> to vector<128x128xbf16>
    %c3 = arith.constant 3 : index
    %c0_48 = arith.constant 0 : index
    %c0_49 = arith.constant 0 : index
    %49 = vector.load %arg3[%c3, %c0_48, %c0_49] : memref<9x128x128xbf16, #tpu.memory_space<vmem>>, vector<1x128x128xbf16>
    %50 = vector.shape_cast %49 : vector<1x128x128xbf16> to vector<128x128xbf16>
    %cst_50 = arith.constant dense<0.000000e+00> : vector<128x128xf32>
    %51 = tpu.matmul %48, %50, %cst_50 {dimension_numbers = #tpu.dot_dimension_numbers<[1], [0], [0], [1], [0, 0, 1, 1], [], []>} : vector<128x128xbf16>, vector<128x128xbf16>, vector<128x128xf32> -> vector<128x128xf32>
    %52 = arith.addf %46, %51 : vector<128x128xf32>
    %c1_51 = arith.constant 1 : index
    %c1_52 = arith.constant 1 : index
    %c0_53 = arith.constant 0 : index
    %53 = vector.load %arg9[%c1_51, %c1_52, %c0_53] : memref<10x18x128xbf16, #tpu.memory_space<vmem>>, vector<8x16x128xbf16>
    %54 = vector.shape_cast %53 : vector<8x16x128xbf16> to vector<128x128xbf16>
    %c4 = arith.constant 4 : index
    %c0_54 = arith.constant 0 : index
    %c0_55 = arith.constant 0 : index
    %55 = vector.load %arg3[%c4, %c0_54, %c0_55] : memref<9x128x128xbf16, #tpu.memory_space<vmem>>, vector<1x128x128xbf16>
    %56 = vector.shape_cast %55 : vector<1x128x128xbf16> to vector<128x128xbf16>
    %cst_56 = arith.constant dense<0.000000e+00> : vector<128x128xf32>
    %57 = tpu.matmul %54, %56, %cst_56 {dimension_numbers = #tpu.dot_dimension_numbers<[1], [0], [0], [1], [0, 0, 1, 1], [], []>} : vector<128x128xbf16>, vector<128x128xbf16>, vector<128x128xf32> -> vector<128x128xf32>
    %58 = arith.addf %52, %57 : vector<128x128xf32>
    %c1_57 = arith.constant 1 : index
    %c2_58 = arith.constant 2 : index
    %c0_59 = arith.constant 0 : index
    %59 = vector.load %arg9[%c1_57, %c2_58, %c0_59] : memref<10x18x128xbf16, #tpu.memory_space<vmem>>, vector<8x16x128xbf16>
    %60 = vector.shape_cast %59 : vector<8x16x128xbf16> to vector<128x128xbf16>
    %c5 = arith.constant 5 : index
    %c0_60 = arith.constant 0 : index
    %c0_61 = arith.constant 0 : index
    %61 = vector.load %arg3[%c5, %c0_60, %c0_61] : memref<9x128x128xbf16, #tpu.memory_space<vmem>>, vector<1x128x128xbf16>
    %62 = vector.shape_cast %61 : vector<1x128x128xbf16> to vector<128x128xbf16>
    %cst_62 = arith.constant dense<0.000000e+00> : vector<128x128xf32>
    %63 = tpu.matmul %60, %62, %cst_62 {dimension_numbers = #tpu.dot_dimension_numbers<[1], [0], [0], [1], [0, 0, 1, 1], [], []>} : vector<128x128xbf16>, vector<128x128xbf16>, vector<128x128xf32> -> vector<128x128xf32>
    %64 = arith.addf %58, %63 : vector<128x128xf32>
    %c2_63 = arith.constant 2 : index
    %c0_64 = arith.constant 0 : index
    %c0_65 = arith.constant 0 : index
    %65 = vector.load %arg9[%c2_63, %c0_64, %c0_65] : memref<10x18x128xbf16, #tpu.memory_space<vmem>>, vector<8x16x128xbf16>
    %66 = vector.shape_cast %65 : vector<8x16x128xbf16> to vector<128x128xbf16>
    %c6 = arith.constant 6 : index
    %c0_66 = arith.constant 0 : index
    %c0_67 = arith.constant 0 : index
    %67 = vector.load %arg3[%c6, %c0_66, %c0_67] : memref<9x128x128xbf16, #tpu.memory_space<vmem>>, vector<1x128x128xbf16>
    %68 = vector.shape_cast %67 : vector<1x128x128xbf16> to vector<128x128xbf16>
    %cst_68 = arith.constant dense<0.000000e+00> : vector<128x128xf32>
    %69 = tpu.matmul %66, %68, %cst_68 {dimension_numbers = #tpu.dot_dimension_numbers<[1], [0], [0], [1], [0, 0, 1, 1], [], []>} : vector<128x128xbf16>, vector<128x128xbf16>, vector<128x128xf32> -> vector<128x128xf32>
    %70 = arith.addf %64, %69 : vector<128x128xf32>
    %c2_69 = arith.constant 2 : index
    %c1_70 = arith.constant 1 : index
    %c0_71 = arith.constant 0 : index
    %71 = vector.load %arg9[%c2_69, %c1_70, %c0_71] : memref<10x18x128xbf16, #tpu.memory_space<vmem>>, vector<8x16x128xbf16>
    %72 = vector.shape_cast %71 : vector<8x16x128xbf16> to vector<128x128xbf16>
    %c7 = arith.constant 7 : index
    %c0_72 = arith.constant 0 : index
    %c0_73 = arith.constant 0 : index
    %73 = vector.load %arg3[%c7, %c0_72, %c0_73] : memref<9x128x128xbf16, #tpu.memory_space<vmem>>, vector<1x128x128xbf16>
    %74 = vector.shape_cast %73 : vector<1x128x128xbf16> to vector<128x128xbf16>
    %cst_74 = arith.constant dense<0.000000e+00> : vector<128x128xf32>
    %75 = tpu.matmul %72, %74, %cst_74 {dimension_numbers = #tpu.dot_dimension_numbers<[1], [0], [0], [1], [0, 0, 1, 1], [], []>} : vector<128x128xbf16>, vector<128x128xbf16>, vector<128x128xf32> -> vector<128x128xf32>
    %76 = arith.addf %70, %75 : vector<128x128xf32>
    %c2_75 = arith.constant 2 : index
    %c2_76 = arith.constant 2 : index
    %c0_77 = arith.constant 0 : index
    %77 = vector.load %arg9[%c2_75, %c2_76, %c0_77] : memref<10x18x128xbf16, #tpu.memory_space<vmem>>, vector<8x16x128xbf16>
    %78 = vector.shape_cast %77 : vector<8x16x128xbf16> to vector<128x128xbf16>
    %c8 = arith.constant 8 : index
    %c0_78 = arith.constant 0 : index
    %c0_79 = arith.constant 0 : index
    %79 = vector.load %arg3[%c8, %c0_78, %c0_79] : memref<9x128x128xbf16, #tpu.memory_space<vmem>>, vector<1x128x128xbf16>
    %80 = vector.shape_cast %79 : vector<1x128x128xbf16> to vector<128x128xbf16>
    %cst_80 = arith.constant dense<0.000000e+00> : vector<128x128xf32>
    %81 = tpu.matmul %78, %80, %cst_80 {dimension_numbers = #tpu.dot_dimension_numbers<[1], [0], [0], [1], [0, 0, 1, 1], [], []>} : vector<128x128xbf16>, vector<128x128xbf16>, vector<128x128xf32> -> vector<128x128xf32>
    %82 = arith.addf %76, %81 : vector<128x128xf32>
    %83 = vector.shape_cast %82 : vector<128x128xf32> to vector<8x16x128xf32>
    %84 = arith.truncf %83 : vector<8x16x128xf32> to vector<8x16x128xbf16>
    %c0_81 = arith.constant 0 : index
    %c0_82 = arith.constant 0 : index
    %c0_83 = arith.constant 0 : index
    %c0_84 = arith.constant 0 : index
    %85 = vector.load %arg6[%c0_81, %c0_82, %c0_83, %c0_84] : memref<1x8x16x128xbf16, #tpu.memory_space<vmem>>, vector<1x8x16x128xbf16>
    %86 = vector.shape_cast %85 : vector<1x8x16x128xbf16> to vector<8x16x128xbf16>
    %87 = vector.shape_cast %84 : vector<8x16x128xbf16> to vector<1x8x16x128xbf16>
    tpu.vector_store %arg6[%c0_81, %c0_82, %c0_83, %c0_84], %87 {strides = array<i32>} : memref<1x8x16x128xbf16, #tpu.memory_space<vmem>>, vector<1x8x16x128xbf16>,
    %cst_85 = arith.constant dense<0.000000e+00> : vector<128xf32>
    %88 = vector.multi_reduction <add>, %82, %cst_85 [0] : vector<128x128xf32> to vector<128xf32>
    %89 = vector.shape_cast %88 : vector<128xf32> to vector<1x1x1x128xf32>
    %c0_86 = arith.constant 0 : index
    %c0_87 = arith.constant 0 : index
    %c0_88 = arith.constant 0 : index
    %c0_89 = arith.constant 0 : index
    %90 = vector.load %arg7[%c0_86, %c0_87, %c0_88, %c0_89] : memref<1x1x1x128xf32, #tpu.memory_space<vmem>>, vector<1x1x1x128xf32>
    tpu.vector_store %arg7[%c0_86, %c0_87, %c0_88, %c0_89], %89 {strides = array<i32>} : memref<1x1x1x128xf32, #tpu.memory_space<vmem>>, vector<1x1x1x128xf32>,
    %91 = arith.mulf %82, %82 : vector<128x128xf32>
    %cst_90 = arith.constant dense<0.000000e+00> : vector<128xf32>
    %92 = vector.multi_reduction <add>, %91, %cst_90 [0] : vector<128x128xf32> to vector<128xf32>
    %93 = vector.shape_cast %92 : vector<128xf32> to vector<1x1x1x128xf32>
    %c0_91 = arith.constant 0 : index
    %c0_92 = arith.constant 0 : index
    %c0_93 = arith.constant 0 : index
    %c0_94 = arith.constant 0 : index
    %94 = vector.load %arg8[%c0_91, %c0_92, %c0_93, %c0_94] : memref<1x1x1x128xf32, #tpu.memory_space<vmem>>, vector<1x1x1x128xf32>
    tpu.vector_store %arg8[%c0_91, %c0_92, %c0_93, %c0_94], %93 {strides = array<i32>} : memref<1x1x1x128xf32, #tpu.memory_space<vmem>>, vector<1x1x1x128xf32>,
    return
  }
  func.func @transform_0(%arg0: i32, %arg1: i32) -> (i32, i32, i32, i32) {
    %c0_i32 = arith.constant 0 : i32
    %c0_i32_0 = arith.constant 0 : i32
    %c0_i32_1 = arith.constant 0 : i32
    %c0_i32_2 = arith.constant 0 : i32
    return %arg0, %c0_i32, %c0_i32_0, %c0_i32_1 : i32, i32, i32, i32
  }
  func.func @transform_1(%arg0: i32, %arg1: i32) -> (i32, i32, i32) {
    %c0_i32 = arith.constant 0 : i32
    %c0_i32_0 = arith.constant 0 : i32
    %c0_i32_1 = arith.constant 0 : i32
    %c0_i32_2 = arith.constant 0 : i32
    return %c0_i32, %c0_i32_0, %c0_i32_1 : i32, i32, i32
  }
  func.func @transform_2(%arg0: i32, %arg1: i32) -> (i32, i32, i32) {
    %c0_i32 = arith.constant 0 : i32
    %c0_i32_0 = arith.constant 0 : i32
    %c0_i32_1 = arith.constant 0 : i32
    %c0_i32_2 = arith.constant 0 : i32
    return %c0_i32, %c0_i32_0, %c0_i32_1 : i32, i32, i32
  }
  func.func @transform_3(%arg0: i32, %arg1: i32) -> (i32, i32, i32) {
    %c0_i32 = arith.constant 0 : i32
    %c0_i32_0 = arith.constant 0 : i32
    %c0_i32_1 = arith.constant 0 : i32
    %c0_i32_2 = arith.constant 0 : i32
    return %c0_i32, %c0_i32_0, %c0_i32_1 : i32, i32, i32
  }
  func.func @transform_4(%arg0: i32, %arg1: i32) -> (i32, i32, i32, i32) {
    %c0_i32 = arith.constant 0 : i32
    %c0_i32_0 = arith.constant 0 : i32
    %c0_i32_1 = arith.constant 0 : i32
    return %arg0, %arg1, %c0_i32, %c0_i32_0 : i32, i32, i32, i32
  }
  func.func @transform_5(%arg0: i32, %arg1: i32) -> (i32, i32, i32, i32) {
    %c0_i32 = arith.constant 0 : i32
    %c0_i32_0 = arith.constant 0 : i32
    %c0_i32_1 = arith.constant 0 : i32
    return %arg0, %arg1, %c0_i32, %c0_i32_0 : i32, i32, i32, i32
  }
  func.func @transform_6(%arg0: i32, %arg1: i32) -> (i32, i32, i32, i32) {
    %c0_i32 = arith.constant 0 : i32
    %c0_i32_0 = arith.constant 0 : i32
    %c0_i32_1 = arith.constant 0 : i32
    return %arg0, %arg1, %c0_i32, %c0_i32_0 : i32, i32, i32, i32
  }
}

module attributes {stable_mosaic.version = 11 : i64} {
  func.func @_affine_relu_kernel(%arg0: i32, %arg1: memref<512x128xbf16, #tpu.memory_space<vmem>>, %arg2: memref<1x128xf32, #tpu.memory_space<vmem>>, %arg3: memref<1x128xf32, #tpu.memory_space<vmem>>, %arg4: memref<512x128xf32, #tpu.memory_space<vmem>>) attributes {dimension_semantics = [#tpu.dimension_semantics<parallel>], iteration_bounds = array<i64: 1>, scalar_prefetch = 0 : i64, scratch_operands = 0 : i64, tpu.core_type = #tpu.core_type<tc>, window_params = [{transform_indices = @transform_0, window_bounds = array<i64: 512, 128>}, {pipeline_mode = #tpu.pipeline_mode<synchronous>, transform_indices = @transform_1, window_bounds = array<i64: 1, 128>}, {pipeline_mode = #tpu.pipeline_mode<synchronous>, transform_indices = @transform_2, window_bounds = array<i64: 1, 128>}, {transform_indices = @transform_3, window_bounds = array<i64: 512, 128>}]} {
    %c0 = arith.constant 0 : index
    %c0_0 = arith.constant 0 : index
    %0 = vector.load %arg1[%c0, %c0_0] : memref<512x128xbf16, #tpu.memory_space<vmem>>, vector<512x128xbf16>
    %1 = arith.extf %0 : vector<512x128xbf16> to vector<512x128xf32>
    %c0_1 = arith.constant 0 : index
    %c0_2 = arith.constant 0 : index
    %2 = vector.load %arg2[%c0_1, %c0_2] : memref<1x128xf32, #tpu.memory_space<vmem>>, vector<1x128xf32>
    %3 = vector.broadcast %2 : vector<1x128xf32> to vector<512x128xf32>
    %4 = arith.mulf %1, %3 : vector<512x128xf32>
    %c0_3 = arith.constant 0 : index
    %c0_4 = arith.constant 0 : index
    %5 = vector.load %arg3[%c0_3, %c0_4] : memref<1x128xf32, #tpu.memory_space<vmem>>, vector<1x128xf32>
    %6 = vector.broadcast %5 : vector<1x128xf32> to vector<512x128xf32>
    %7 = arith.addf %4, %6 : vector<512x128xf32>
    %cst = arith.constant 0.000000e+00 : f32
    %8 = vector.broadcast %cst : f32 to vector<512x128xf32>
    %9 = arith.maximumf %7, %8 : vector<512x128xf32>
    %c0_5 = arith.constant 0 : index
    %c0_6 = arith.constant 0 : index
    %10 = vector.load %arg4[%c0_5, %c0_6] : memref<512x128xf32, #tpu.memory_space<vmem>>, vector<512x128xf32>
    tpu.vector_store %arg4[%c0_5, %c0_6], %9 {strides = array<i32>} : memref<512x128xf32, #tpu.memory_space<vmem>>, vector<512x128xf32>,
    return
  }
  func.func @transform_0(%arg0: i32) -> (i32, i32) {
    %c0_i32 = arith.constant 0 : i32
    %c0_i32_0 = arith.constant 0 : i32
    return %arg0, %c0_i32 : i32, i32
  }
  func.func @transform_1(%arg0: i32) -> (i32, i32) {
    %c0_i32 = arith.constant 0 : i32
    %c0_i32_0 = arith.constant 0 : i32
    %c0_i32_1 = arith.constant 0 : i32
    return %c0_i32, %c0_i32_0 : i32, i32
  }
  func.func @transform_2(%arg0: i32) -> (i32, i32) {
    %c0_i32 = arith.constant 0 : i32
    %c0_i32_0 = arith.constant 0 : i32
    %c0_i32_1 = arith.constant 0 : i32
    return %c0_i32, %c0_i32_0 : i32, i32
  }
  func.func @transform_3(%arg0: i32) -> (i32, i32) {
    %c0_i32 = arith.constant 0 : i32
    %c0_i32_0 = arith.constant 0 : i32
    return %arg0, %c0_i32 : i32, i32
  }
}

</mosaic_0001>

<bundles_post_ra>
// kernel: double_conv2d.5
= control target key start
LH: loop header
LB: loop body
LE: loop exit
PB: predicated region body
PF: predicated region fallthrough
CT: control target
= control target key end

     0   :  { %s1023_s0 = inlined_call_operand.vmem [shape: bf16[512,128], index: 0, kind: input, shape index: {}]   ;;  %s1024_s1 = inlined_call_operand.vmem [shape: f32[1,128], index: 1, kind: input, shape index: {}]   ;;  %s1025_s2 = inlined_call_operand.vmem [shape: f32[1,128], index: 2, kind: input, shape index: {}]   ;;  %s1026_s3 = inlined_call_operand.vmem [shape: f32[512,128], index: 3, kind: output, shape index: {}]  }
   0x1   :  { %v419_v0 = vld [vmem:[%s1023_s0] sm:$0xff]   ;;  %v546_v4 = vld [vmem:[%s1023_s0 + $0x8] sm:$0xff]   ;;  %v547_v5 = vld [vmem:[%s1023_s0 + $0x10] sm:$0xff]  }
   0x2   :  { %v603_v1 = vld [vmem:[%s1024_s1] ss:$0 sm:$0xff]  ;;  %v420_v2 = vunpack.c.l.bf16 %v419_v0  ;;  %v421_v3 = vunpack.c.h.bf16 %v419_v0  ;;  %v548_v6 = vld [vmem:[%s1023_s0 + $0x18] sm:$0xff]   ;;  %v424_v8 = vunpack.c.l.bf16 %v546_v4  ;;  %v425_v9 = vunpack.c.h.bf16 %v546_v4  ;;  %v550_v33 = vld [vmem:[%s1023_s0 + $0x28] sm:$0xff]  }
   0x3   :  { %v617_v7 = vld [vmem:[%s1025_s2] ss:$0 sm:$0xff]  ;;  %v428_v10 = vunpack.c.l.bf16 %v547_v5  ;;  %v429_v11 = vunpack.c.h.bf16 %v547_v5  ;;  %v432_v14 = vunpack.c.l.bf16 %v548_v6  ;;  %v433_v15 = vunpack.c.h.bf16 %v548_v6  ;;  %v551_v34 = vld [vmem:[%s1023_s0 + $0x30] sm:$0xff]   ;;  %v552_v39 = vld [vmem:[%s1023_s0 + $0x38] sm:$0xff]  }
   0x4   :  { %v149_v12 = vmul.f32 %v420_v2, %v603_v1  ;;  %v150_v13 = vmul.f32 %v421_v3, %v603_v1  ;;  %v151_v16 = vmul.f32 %v424_v8, %v603_v1  ;;  %v152_v17 = vmul.f32 %v425_v9, %v603_v1  ;;  %v549_v28 = vld [vmem:[%s1023_s0 + $0x20] sm:$0xff]   ;;  %v554_v6 = vld [vmem:[%s1023_s0 + $0x48] sm:$0xff]   ;;  %v555_v8 = vld [vmem:[%s1023_s0 + $0x50] sm:$0xff]  }
   0x5   :  { %v153_v18 = vmul.f32 %v428_v10, %v603_v1  ;;  %v154_v19 = vmul.f32 %v429_v11, %v603_v1  ;;  %v155_v22 = vmul.f32 %v432_v14, %v603_v1  ;;  %v156_v23 = vmul.f32 %v433_v15, %v603_v1  ;;  %v553_v0 = vld [vmem:[%s1023_s0 + $0x40] sm:$0xff]  }
   0x6   :  { %v220_v20 = vadd.f32 %v617_v7, %v149_v12  ;;  %v221_v21 = vadd.f32 %v617_v7, %v150_v13  ;;  %v222_v24 = vadd.f32 %v617_v7, %v151_v16  ;;  %v223_v25 = vadd.f32 %v617_v7, %v152_v17  ;;  %v556_v13 = vld [vmem:[%s1023_s0 + $0x58] sm:$0xff]  }
   0x7   :  { %v224_v26 = vadd.f32 %v617_v7, %v153_v18  ;;  %v225_v27 = vadd.f32 %v617_v7, %v154_v19  ;;  %v226_v31 = vadd.f32 %v617_v7, %v155_v22  ;;  %v227_v32 = vadd.f32 %v617_v7, %v156_v23 }
   0x8   :  { %v284_v29 = vmax.f32 %v220_v20, 0.0  ;;  %v285_v30 = vmax.f32 %v221_v21, 0.0  ;;  %v286_v35 = vmax.f32 %v222_v24, 0.0  ;;  %v287_v36 = vmax.f32 %v223_v25, 0.0 }
   0x9   :  { %v288_v37 = vmax.f32 %v224_v26, 0.0  ;;  %v289_v38 = vmax.f32 %v225_v27, 0.0  ;;  %v290_v40 = vmax.f32 %v226_v31, 0.0  ;;  %v291_v41 = vmax.f32 %v227_v32, 0.0 }
   0xa   :  { %348 = vst [vmem:[%s1026_s3] sm:$0xff] %v284_v29  ;;  %349 = vst [vmem:[%s1026_s3 + $0x8] sm:$0xff] %v285_v30  ;;  %v436_v42 = vunpack.c.l.bf16 %v549_v28  ;;  %v437_v43 = vunpack.c.h.bf16 %v549_v28  ;;  %v440_v44 = vunpack.c.l.bf16 %v550_v33  ;;  %v441_v45 = vunpack.c.h.bf16 %v550_v33 }
   0xb   :  { %350 = vst [vmem:[%s1026_s3 + $0x10] sm:$0xff] %v286_v35  ;;  %351 = vst [vmem:[%s1026_s3 + $0x18] sm:$0xff] %v287_v36  ;;  %v444_v46 = vunpack.c.l.bf16 %v551_v34  ;;  %v445_v47 = vunpack.c.h.bf16 %v551_v34  ;;  %v448_v50 = vunpack.c.l.bf16 %v552_v39  ;;  %v449_v51 = vunpack.c.h.bf16 %v552_v39 }
   0xc   :  { %352 = vst [vmem:[%s1026_s3 + $0x20] sm:$0xff] %v288_v37  ;;  %353 = vst [vmem:[%s1026_s3 + $0x28] sm:$0xff] %v289_v38  ;;  %v157_v48 = vmul.f32 %v436_v42, %v603_v1  ;;  %v158_v49 = vmul.f32 %v437_v43, %v603_v1  ;;  %v159_v52 = vmul.f32 %v440_v44, %v603_v1  ;;  %v452_v16 = vunpack.c.l.bf16 %v553_v0  ;;  %v557_v38 = vld [vmem:[%s1023_s0 + $0x60] sm:$0xff]   ;;  %v558_v43 = vld [vmem:[%s1023_s0 + $0x68] sm:$0xff]  }
   0xd   :  { %354 = vst [vmem:[%s1026_s3 + $0x30] sm:$0xff] %v290_v40  ;;  %355 = vst [vmem:[%s1026_s3 + $0x38] sm:$0xff] %v291_v41  ;;  %v160_v53 = vmul.f32 %v441_v45, %v603_v1  ;;  %v161_v54 = vmul.f32 %v444_v46, %v603_v1  ;;  %v162_v55 = vmul.f32 %v445_v47, %v603_v1  ;;  %v453_v17 = vunpack.c.h.bf16 %v553_v0  ;;  %v559_v44 = vld [vmem:[%s1023_s0 + $0x70] sm:$0xff]  }
   0xe   :  { %v228_v56 = vadd.f32 %v617_v7, %v157_v48  ;;  %v229_v57 = vadd.f32 %v617_v7, %v158_v49  ;;  %v163_v58 = vmul.f32 %v448_v50, %v603_v1  ;;  %v164_v59 = vmul.f32 %v449_v51, %v603_v1  ;;  %v560_v49 = vld [vmem:[%s1023_s0 + $0x78] sm:$0xff]  }
   0xf   :  { %v230_v60 = vadd.f32 %v617_v7, %v159_v52  ;;  %v231_v61 = vadd.f32 %v617_v7, %v160_v53  ;;  %v232_v62 = vadd.f32 %v617_v7, %v161_v54  ;;  %v233_v63 = vadd.f32 %v617_v7, %v162_v55 }
  0x10   :  { %v292_v2 = vmax.f32 %v228_v56, 0.0  ;;  %v293_v3 = vmax.f32 %v229_v57, 0.0  ;;  %v234_v4 = vadd.f32 %v617_v7, %v163_v58  ;;  %v235_v5 = vadd.f32 %v617_v7, %v164_v59 }
  0x11   :  { %v294_v9 = vmax.f32 %v230_v60, 0.0  ;;  %v295_v10 = vmax.f32 %v231_v61, 0.0  ;;  %v296_v11 = vmax.f32 %v232_v62, 0.0  ;;  %v297_v12 = vmax.f32 %v233_v63, 0.0 }
  0x12   :  { %356 = vst [vmem:[%s1026_s3 + $0x40] sm:$0xff] %v292_v2  ;;  %357 = vst [vmem:[%s1026_s3 + $0x48] sm:$0xff] %v293_v3  ;;  %v298_v14 = vmax.f32 %v234_v4, 0.0  ;;  %v299_v15 = vmax.f32 %v235_v5, 0.0  ;;  %v456_v18 = vunpack.c.l.bf16 %v554_v6  ;;  %v457_v19 = vunpack.c.h.bf16 %v554_v6 }
  0x13   :  { %358 = vst [vmem:[%s1026_s3 + $0x50] sm:$0xff] %v294_v9  ;;  %359 = vst [vmem:[%s1026_s3 + $0x58] sm:$0xff] %v295_v10  ;;  %v460_v20 = vunpack.c.l.bf16 %v555_v8  ;;  %v461_v21 = vunpack.c.h.bf16 %v555_v8  ;;  %v165_v22 = vmul.f32 %v452_v16, %v603_v1  ;;  %v166_v23 = vmul.f32 %v453_v17, %v603_v1  ;;  %v562_v17 = vld [vmem:[%s1023_s0 + $0x88] sm:$0xff]  }
  0x14   :  { %360 = vst [vmem:[%s1026_s3 + $0x60] sm:$0xff] %v296_v11  ;;  %361 = vst [vmem:[%s1026_s3 + $0x68] sm:$0xff] %v297_v12  ;;  %v464_v24 = vunpack.c.l.bf16 %v556_v13  ;;  %v465_v25 = vunpack.c.h.bf16 %v556_v13  ;;  %v167_v26 = vmul.f32 %v456_v18, %v603_v1  ;;  %v168_v27 = vmul.f32 %v457_v19, %v603_v1  ;;  %v561_v12 = vld [vmem:[%s1023_s0 + $0x80] sm:$0xff]   ;;  %v563_v18 = vld [vmem:[%s1023_s0 + $0x90] sm:$0xff]  }
  0x15   :  { %362 = vst [vmem:[%s1026_s3 + $0x70] sm:$0xff] %v298_v14  ;;  %363 = vst [vmem:[%s1026_s3 + $0x78] sm:$0xff] %v299_v15  ;;  %v169_v28 = vmul.f32 %v460_v20, %v603_v1  ;;  %v170_v29 = vmul.f32 %v461_v21, %v603_v1  ;;  %v236_v30 = vadd.f32 %v617_v7, %v165_v22  ;;  %v468_v52 = vunpack.c.l.bf16 %v557_v38 }
  0x16   :  { %v237_v31 = vadd.f32 %v617_v7, %v166_v23  ;;  %v171_v32 = vmul.f32 %v464_v24, %v603_v1  ;;  %v172_v33 = vmul.f32 %v465_v25, %v603_v1  ;;  %v238_v34 = vadd.f32 %v617_v7, %v167_v26  ;;  %v564_v23 = vld [vmem:[%s1023_s0 + $0x98] sm:$0xff]  }
  0x17   :  { %v239_v35 = vadd.f32 %v617_v7, %v168_v27  ;;  %v240_v36 = vadd.f32 %v617_v7, %v169_v28  ;;  %v241_v37 = vadd.f32 %v617_v7, %v170_v29  ;;  %v300_v39 = vmax.f32 %v236_v30, 0.0 }
  0x18   :  { %v301_v40 = vmax.f32 %v237_v31, 0.0  ;;  %v242_v41 = vadd.f32 %v617_v7, %v171_v32  ;;  %v243_v42 = vadd.f32 %v617_v7, %v172_v33  ;;  %v302_v45 = vmax.f32 %v238_v34, 0.0 }
  0x19   :  { %v303_v46 = vmax.f32 %v239_v35, 0.0  ;;  %v304_v47 = vmax.f32 %v240_v36, 0.0  ;;  %v305_v48 = vmax.f32 %v241_v37, 0.0  ;;  %364 = vst [vmem:[%s1026_s3 + $0x80] sm:$0xff] %v300_v39  ;;  %v469_v53 = vunpack.c.h.bf16 %v557_v38 }
  0x1a   :  { %365 = vst [vmem:[%s1026_s3 + $0x88] sm:$0xff] %v301_v40  ;;  %v306_v50 = vmax.f32 %v242_v41, 0.0  ;;  %v307_v51 = vmax.f32 %v243_v42, 0.0  ;;  %366 = vst [vmem:[%s1026_s3 + $0x90] sm:$0xff] %v302_v45  ;;  %v472_v54 = vunpack.c.l.bf16 %v558_v43  ;;  %v473_v55 = vunpack.c.h.bf16 %v558_v43 }
  0x1b   :  { %367 = vst [vmem:[%s1026_s3 + $0x98] sm:$0xff] %v303_v46  ;;  %368 = vst [vmem:[%s1026_s3 + $0xa0] sm:$0xff] %v304_v47  ;;  %v476_v56 = vunpack.c.l.bf16 %v559_v44  ;;  %v477_v57 = vunpack.c.h.bf16 %v559_v44  ;;  %v173_v58 = vmul.f32 %v468_v52, %v603_v1  ;;  %v174_v59 = vmul.f32 %v469_v53, %v603_v1  ;;  %v566_v53 = vld [vmem:[%s1023_s0 + $0xa8] sm:$0xff]  }
  0x1c   :  { %369 = vst [vmem:[%s1026_s3 + $0xa8] sm:$0xff] %v305_v48  ;;  %370 = vst [vmem:[%s1026_s3 + $0xb0] sm:$0xff] %v306_v50  ;;  %v480_v60 = vunpack.c.l.bf16 %v560_v49  ;;  %v481_v61 = vunpack.c.h.bf16 %v560_v49  ;;  %v175_v62 = vmul.f32 %v472_v54, %v603_v1  ;;  %v176_v63 = vmul.f32 %v473_v55, %v603_v1  ;;  %v565_v48 = vld [vmem:[%s1023_s0 + $0xa0] sm:$0xff]   ;;  %v567_v54 = vld [vmem:[%s1023_s0 + $0xb0] sm:$0xff]  }
  0x1d   :  { %371 = vst [vmem:[%s1026_s3 + $0xb8] sm:$0xff] %v307_v51  ;;  %v177_v0 = vmul.f32 %v476_v56, %v603_v1  ;;  %v178_v2 = vmul.f32 %v477_v57, %v603_v1  ;;  %v244_v3 = vadd.f32 %v617_v7, %v173_v58  ;;  %v245_v4 = vadd.f32 %v617_v7, %v174_v59  ;;  %v568_v59 = vld [vmem:[%s1023_s0 + $0xb8] sm:$0xff]  }
  0x1e   :  { %v179_v5 = vmul.f32 %v480_v60, %v603_v1  ;;  %v180_v6 = vmul.f32 %v481_v61, %v603_v1  ;;  %v246_v8 = vadd.f32 %v617_v7, %v175_v62  ;;  %v247_v9 = vadd.f32 %v617_v7, %v176_v63 }
  0x1f   :  { %v248_v10 = vadd.f32 %v617_v7, %v177_v0  ;;  %v249_v11 = vadd.f32 %v617_v7, %v178_v2  ;;  %v308_v13 = vmax.f32 %v244_v3, 0.0  ;;  %v309_v14 = vmax.f32 %v245_v4, 0.0 }
  0x20   :  { %v250_v15 = vadd.f32 %v617_v7, %v179_v5  ;;  %v251_v16 = vadd.f32 %v617_v7, %v180_v6  ;;  %v310_v19 = vmax.f32 %v246_v8, 0.0  ;;  %v311_v20 = vmax.f32 %v247_v9, 0.0 }
  0x21   :  { %v312_v21 = vmax.f32 %v248_v10, 0.0  ;;  %v313_v22 = vmax.f32 %v249_v11, 0.0  ;;  %372 = vst [vmem:[%s1026_s3 + $0xc0] sm:$0xff] %v308_v13  ;;  %373 = vst [vmem:[%s1026_s3 + $0xc8] sm:$0xff] %v309_v14  ;;  %v484_v26 = vunpack.c.l.bf16 %v561_v12  ;;  %v485_v27 = vunpack.c.h.bf16 %v561_v12 }
  0x22   :  { %v314_v24 = vmax.f32 %v250_v15, 0.0  ;;  %v315_v25 = vmax.f32 %v251_v16, 0.0  ;;  %374 = vst [vmem:[%s1026_s3 + $0xd0] sm:$0xff] %v310_v19  ;;  %375 = vst [vmem:[%s1026_s3 + $0xd8] sm:$0xff] %v311_v20  ;;  %v488_v28 = vunpack.c.l.bf16 %v562_v17  ;;  %v489_v29 = vunpack.c.h.bf16 %v562_v17 }
  0x23   :  { %376 = vst [vmem:[%s1026_s3 + $0xe0] sm:$0xff] %v312_v21  ;;  %377 = vst [vmem:[%s1026_s3 + $0xe8] sm:$0xff] %v313_v22  ;;  %v492_v30 = vunpack.c.l.bf16 %v563_v18  ;;  %v493_v31 = vunpack.c.h.bf16 %v563_v18  ;;  %v181_v32 = vmul.f32 %v484_v26, %v603_v1  ;;  %v182_v33 = vmul.f32 %v485_v27, %v603_v1  ;;  %v569_v22 = vld [vmem:[%s1023_s0 + $0xc0] sm:$0xff]   ;;  %v570_v27 = vld [vmem:[%s1023_s0 + $0xc8] sm:$0xff]  }
  0x24   :  { %378 = vst [vmem:[%s1026_s3 + $0xf0] sm:$0xff] %v314_v24  ;;  %379 = vst [vmem:[%s1026_s3 + $0xf8] sm:$0xff] %v315_v25  ;;  %v496_v34 = vunpack.c.l.bf16 %v564_v23  ;;  %v497_v35 = vunpack.c.h.bf16 %v564_v23  ;;  %v183_v36 = vmul.f32 %v488_v28, %v603_v1  ;;  %v184_v37 = vmul.f32 %v489_v29, %v603_v1  ;;  %v571_v28 = vld [vmem:[%s1023_s0 + $0xd0] sm:$0xff]  }
  0x25   :  { %v185_v38 = vmul.f32 %v492_v30, %v603_v1  ;;  %v186_v39 = vmul.f32 %v493_v31, %v603_v1  ;;  %v252_v40 = vadd.f32 %v617_v7, %v181_v32  ;;  %v253_v41 = vadd.f32 %v617_v7, %v182_v33  ;;  %v572_v33 = vld [vmem:[%s1023_s0 + $0xd8] sm:$0xff]  }
  0x26   :  { %v187_v42 = vmul.f32 %v496_v34, %v603_v1  ;;  %v188_v43 = vmul.f32 %v497_v35, %v603_v1  ;;  %v254_v44 = vadd.f32 %v617_v7, %v183_v36  ;;  %v255_v45 = vadd.f32 %v617_v7, %v184_v37 }
  0x27   :  { %v256_v46 = vadd.f32 %v617_v7, %v185_v38  ;;  %v257_v47 = vadd.f32 %v617_v7, %v186_v39  ;;  %v316_v49 = vmax.f32 %v252_v40, 0.0  ;;  %v317_v50 = vmax.f32 %v253_v41, 0.0 }
  0x28   :  { %v258_v51 = vadd.f32 %v617_v7, %v187_v42  ;;  %v259_v52 = vadd.f32 %v617_v7, %v188_v43  ;;  %v318_v55 = vmax.f32 %v254_v44, 0.0  ;;  %v319_v56 = vmax.f32 %v255_v45, 0.0 }
  0x29   :  { %v320_v57 = vmax.f32 %v256_v46, 0.0  ;;  %v321_v58 = vmax.f32 %v257_v47, 0.0  ;;  %380 = vst [vmem:[%s1026_s3 + $0x100] sm:$0xff] %v316_v49  ;;  %381 = vst [vmem:[%s1026_s3 + $0x108] sm:$0xff] %v317_v50  ;;  %v500_v62 = vunpack.c.l.bf16 %v565_v48  ;;  %v501_v63 = vunpack.c.h.bf16 %v565_v48 }
  0x2a   :  { %v322_v60 = vmax.f32 %v258_v51, 0.0  ;;  %v323_v61 = vmax.f32 %v259_v52, 0.0  ;;  %382 = vst [vmem:[%s1026_s3 + $0x110] sm:$0xff] %v318_v55  ;;  %383 = vst [vmem:[%s1026_s3 + $0x118] sm:$0xff] %v319_v56  ;;  %v504_v0 = vunpack.c.l.bf16 %v566_v53  ;;  %v505_v2 = vunpack.c.h.bf16 %v566_v53 }
  0x2b   :  { %384 = vst [vmem:[%s1026_s3 + $0x120] sm:$0xff] %v320_v57  ;;  %385 = vst [vmem:[%s1026_s3 + $0x128] sm:$0xff] %v321_v58  ;;  %v508_v3 = vunpack.c.l.bf16 %v567_v54  ;;  %v509_v4 = vunpack.c.h.bf16 %v567_v54  ;;  %v189_v5 = vmul.f32 %v500_v62, %v603_v1  ;;  %v190_v6 = vmul.f32 %v501_v63, %v603_v1  ;;  %v573_v58 = vld [vmem:[%s1023_s0 + $0xe0] sm:$0xff]   ;;  %v574_v63 = vld [vmem:[%s1023_s0 + $0xe8] sm:$0xff]  }
  0x2c   :  { %386 = vst [vmem:[%s1026_s3 + $0x130] sm:$0xff] %v322_v60  ;;  %387 = vst [vmem:[%s1026_s3 + $0x138] sm:$0xff] %v323_v61  ;;  %v512_v8 = vunpack.c.l.bf16 %v568_v59  ;;  %v513_v9 = vunpack.c.h.bf16 %v568_v59  ;;  %v191_v10 = vmul.f32 %v504_v0, %v603_v1  ;;  %v192_v11 = vmul.f32 %v505_v2, %v603_v1  ;;  %v575_v0 = vld [vmem:[%s1023_s0 + $0xf0] sm:$0xff]  }
  0x2d   :  { %v193_v12 = vmul.f32 %v508_v3, %v603_v1  ;;  %v194_v13 = vmul.f32 %v509_v4, %v603_v1  ;;  %v260_v14 = vadd.f32 %v617_v7, %v189_v5  ;;  %v261_v15 = vadd.f32 %v617_v7, %v190_v6  ;;  %v576_v6 = vld [vmem:[%s1023_s0 + $0xf8] sm:$0xff]  }
  0x2e   :  { %v195_v16 = vmul.f32 %v512_v8, %v603_v1  ;;  %v196_v17 = vmul.f32 %v513_v9, %v603_v1  ;;  %v262_v18 = vadd.f32 %v617_v7, %v191_v10  ;;  %v263_v19 = vadd.f32 %v617_v7, %v192_v11 }
  0x2f   :  { %v264_v20 = vadd.f32 %v617_v7, %v193_v12  ;;  %v265_v21 = vadd.f32 %v617_v7, %v194_v13  ;;  %v324_v23 = vmax.f32 %v260_v14, 0.0  ;;  %v325_v24 = vmax.f32 %v261_v15, 0.0 }
  0x30   :  { %v266_v25 = vadd.f32 %v617_v7, %v195_v16  ;;  %v267_v26 = vadd.f32 %v617_v7, %v196_v17  ;;  %v326_v29 = vmax.f32 %v262_v18, 0.0  ;;  %v327_v30 = vmax.f32 %v263_v19, 0.0 }
  0x31   :  { %v328_v31 = vmax.f32 %v264_v20, 0.0  ;;  %v329_v32 = vmax.f32 %v265_v21, 0.0  ;;  %388 = vst [vmem:[%s1026_s3 + $0x140] sm:$0xff] %v324_v23  ;;  %389 = vst [vmem:[%s1026_s3 + $0x148] sm:$0xff] %v325_v24  ;;  %v516_v36 = vunpack.c.l.bf16 %v569_v22  ;;  %v517_v37 = vunpack.c.h.bf16 %v569_v22 }
  0x32   :  { %v330_v34 = vmax.f32 %v266_v25, 0.0  ;;  %v331_v35 = vmax.f32 %v267_v26, 0.0  ;;  %390 = vst [vmem:[%s1026_s3 + $0x150] sm:$0xff] %v326_v29  ;;  %391 = vst [vmem:[%s1026_s3 + $0x158] sm:$0xff] %v327_v30  ;;  %v520_v38 = vunpack.c.l.bf16 %v570_v27  ;;  %v521_v39 = vunpack.c.h.bf16 %v570_v27 }
  0x33   :  { %392 = vst [vmem:[%s1026_s3 + $0x160] sm:$0xff] %v328_v31  ;;  %393 = vst [vmem:[%s1026_s3 + $0x168] sm:$0xff] %v329_v32  ;;  %v524_v40 = vunpack.c.l.bf16 %v571_v28  ;;  %v525_v41 = vunpack.c.h.bf16 %v571_v28  ;;  %v197_v42 = vmul.f32 %v516_v36, %v603_v1  ;;  %v198_v43 = vmul.f32 %v517_v37, %v603_v1 }
  0x34   :  { %394 = vst [vmem:[%s1026_s3 + $0x170] sm:$0xff] %v330_v34  ;;  %395 = vst [vmem:[%s1026_s3 + $0x178] sm:$0xff] %v331_v35  ;;  %v528_v44 = vunpack.c.l.bf16 %v572_v33  ;;  %v529_v45 = vunpack.c.h.bf16 %v572_v33  ;;  %v199_v46 = vmul.f32 %v520_v38, %v603_v1  ;;  %v200_v47 = vmul.f32 %v521_v39, %v603_v1 }
  0x35   :  { %v201_v48 = vmul.f32 %v524_v40, %v603_v1  ;;  %v202_v49 = vmul.f32 %v525_v41, %v603_v1  ;;  %v268_v50 = vadd.f32 %v617_v7, %v197_v42  ;;  %v269_v51 = vadd.f32 %v617_v7, %v198_v43 }
  0x36   :  { %v203_v52 = vmul.f32 %v528_v44, %v603_v1  ;;  %v204_v53 = vmul.f32 %v529_v45, %v603_v1  ;;  %v270_v54 = vadd.f32 %v617_v7, %v199_v46  ;;  %v271_v55 = vadd.f32 %v617_v7, %v200_v47 }
  0x37   :  { %v272_v56 = vadd.f32 %v617_v7, %v201_v48  ;;  %v273_v57 = vadd.f32 %v617_v7, %v202_v49  ;;  %v332_v59 = vmax.f32 %v268_v50, 0.0  ;;  %v333_v60 = vmax.f32 %v269_v51, 0.0 }
  0x38   :  { %v274_v61 = vadd.f32 %v617_v7, %v203_v52  ;;  %v275_v62 = vadd.f32 %v617_v7, %v204_v53  ;;  %v334_v2 = vmax.f32 %v270_v54, 0.0  ;;  %v335_v3 = vmax.f32 %v271_v55, 0.0 }
  0x39   :  { %v336_v4 = vmax.f32 %v272_v56, 0.0  ;;  %v337_v5 = vmax.f32 %v273_v57, 0.0  ;;  %396 = vst [vmem:[%s1026_s3 + $0x180] sm:$0xff] %v332_v59  ;;  %397 = vst [vmem:[%s1026_s3 + $0x188] sm:$0xff] %v333_v60  ;;  %v532_v10 = vunpack.c.l.bf16 %v573_v58  ;;  %v533_v11 = vunpack.c.h.bf16 %v573_v58 }
  0x3a   :  { %v338_v8 = vmax.f32 %v274_v61, 0.0  ;;  %v339_v9 = vmax.f32 %v275_v62, 0.0  ;;  %398 = vst [vmem:[%s1026_s3 + $0x190] sm:$0xff] %v334_v2  ;;  %399 = vst [vmem:[%s1026_s3 + $0x198] sm:$0xff] %v335_v3  ;;  %v536_v12 = vunpack.c.l.bf16 %v574_v63  ;;  %v537_v13 = vunpack.c.h.bf16 %v574_v63 }
  0x3b   :  { %400 = vst [vmem:[%s1026_s3 + $0x1a0] sm:$0xff] %v336_v4  ;;  %401 = vst [vmem:[%s1026_s3 + $0x1a8] sm:$0xff] %v337_v5  ;;  %v540_v14 = vunpack.c.l.bf16 %v575_v0  ;;  %v541_v15 = vunpack.c.h.bf16 %v575_v0  ;;  %v205_v16 = vmul.f32 %v532_v10, %v603_v1  ;;  %v206_v17 = vmul.f32 %v533_v11, %v603_v1 }
  0x3c   :  { %402 = vst [vmem:[%s1026_s3 + $0x1b0] sm:$0xff] %v338_v8  ;;  %403 = vst [vmem:[%s1026_s3 + $0x1b8] sm:$0xff] %v339_v9  ;;  %v544_v18 = vunpack.c.l.bf16 %v576_v6  ;;  %v545_v19 = vunpack.c.h.bf16 %v576_v6  ;;  %v207_v20 = vmul.f32 %v536_v12, %v603_v1  ;;  %v208_v21 = vmul.f32 %v537_v13, %v603_v1 }
  0x3d   :  { %v209_v22 = vmul.f32 %v540_v14, %v603_v1  ;;  %v210_v23 = vmul.f32 %v541_v15, %v603_v1  ;;  %v276_v24 = vadd.f32 %v617_v7, %v205_v16  ;;  %v277_v25 = vadd.f32 %v617_v7, %v206_v17 }
  0x3e   :  { %v211_v26 = vmul.f32 %v544_v18, %v603_v1  ;;  %v212_v27 = vmul.f32 %v545_v19, %v603_v1  ;;  %v278_v28 = vadd.f32 %v617_v7, %v207_v20  ;;  %v279_v29 = vadd.f32 %v617_v7, %v208_v21 }
  0x3f   :  { %v280_v30 = vadd.f32 %v617_v7, %v209_v22  ;;  %v281_v31 = vadd.f32 %v617_v7, %v210_v23  ;;  %v340_v32 = vmax.f32 %v276_v24, 0.0  ;;  %v341_v33 = vmax.f32 %v277_v25, 0.0 }
  0x40   :  { %v282_v34 = vadd.f32 %v617_v7, %v211_v26  ;;  %v283_v35 = vadd.f32 %v617_v7, %v212_v27  ;;  %v342_v36 = vmax.f32 %v278_v28, 0.0  ;;  %v343_v37 = vmax.f32 %v279_v29, 0.0 }
  0x41   :  { %v344_v38 = vmax.f32 %v280_v30, 0.0  ;;  %v345_v39 = vmax.f32 %v281_v31, 0.0  ;;  %404 = vst [vmem:[%s1026_s3 + $0x1c0] sm:$0xff] %v340_v32  ;;  %405 = vst [vmem:[%s1026_s3 + $0x1c8] sm:$0xff] %v341_v33 }
  0x42   :  { %v346_v1 = vmax.f32 %v282_v34, 0.0  ;;  %v347_v40 = vmax.f32 %v283_v35, 0.0  ;;  %406 = vst [vmem:[%s1026_s3 + $0x1d0] sm:$0xff] %v342_v36  ;;  %407 = vst [vmem:[%s1026_s3 + $0x1d8] sm:$0xff] %v343_v37 }
  0x43   :  { %408 = vst [vmem:[%s1026_s3 + $0x1e0] sm:$0xff] %v344_v38  ;;  %409 = vst [vmem:[%s1026_s3 + $0x1e8] sm:$0xff] %v345_v39 }
  0x44   :  { %410 = vst [vmem:[%s1026_s3 + $0x1f0] sm:$0xff] %v346_v1  ;;  %411 = vst [vmem:[%s1026_s3 + $0x1f8] sm:$0xff] %v347_v40 }

// kernel: double_conv2d.3
= control target key start
LH: loop header
LB: loop body
LE: loop exit
PB: predicated region body
PF: predicated region fallthrough
CT: control target
= control target key end

     0   :  { %s4938_s21 = smov 0   ;;  %s4940_s22 = smov 0   ;;  %s6042_s0 = inlined_call_operand.vmem [shape: bf16[2,16,16,128], index: 0, kind: input, shape index: {}]   ;;  %s6043_s1 = inlined_call_operand.vmem [shape: bf16[9,128,128], index: 1, kind: input, shape index: {}]   ;;  %s6044_s2 = inlined_call_operand.vmem [shape: f32[1,1,128], index: 2, kind: input, shape index: {}, may-alias: {2,3}]   ;;  %s6045_s3 = inlined_call_operand.vmem [shape: f32[1,1,128], index: 3, kind: input, shape index: {}, may-alias: {2,3}]   ;;  %s6046_s4 = inlined_call_operand.vmem [shape: bf16[2,16,16,128], index: 4, kind: output, shape index: {0}]   ;;  %s6047_s5 = inlined_call_operand.vmem [shape: f32[2,2,1,128], index: 5, kind: output, shape index: {1}]   ;;  %s6048_s6 = inlined_call_operand.vmem [shape: f32[2,2,1,128], index: 6, kind: output, shape index: {2}]  }
   0x1   :  { %s4942_s23 = smov 0   ;;  %s4944_s24 = smov 0  }
   0x2   :  { %s4946_s2 = smov 0  }
   0x3 LB: > { %s26_s3 = sadd.s32 1, %s4892_s23  ;;  %s29_s25 = sadd.s32 1, %s4896_s24  ;;  %s4900_s2 = sphi %s4946_s2, %s17_s2   ;;  %s4896_s24 = sphi %s4944_s24, %s6100_s24   ;;  %s4892_s23 = sphi %s4942_s23, %s6099_s23   ;;  %s4888_s22 = sphi %s4940_s22, %s6098_s22   ;;  %s4884_s21 = sphi %s4938_s21, %s6097_s21  }
   0x4   : > { %p27_p0 = scmp.ge.s32.totalorder %s26_s3, 2  ;;  %p3874_p1 = scmp.ge.s32.totalorder %s4900_s2, 1 }
   0x5   : > { %p235_p2 = scmp.lt.s32.totalorder %s4900_s2, 5 }
   0x6   : > { %s6102_s3 = smov (%p27_p0, %s26_s3), 0  ;;  %s6104_s25 = smov (!%p27_p0, %s29_s25), %s4896_s24 }
   0x7   : > { %p236_p3 = pnand %p3874_p1, %p235_p2  ;;  %p31_p4 = scmp.ge.s32.totalorder %s6104_s25, 2 }
   0x9   : > { %s6106_s25 = smov (%p31_p4, %s6104_s25), 0  ;;  %239 = sbr.rel (%p236_p3) target bundleno = 512 (0x200), region = 36 }
   0xe   : > { %vm323_vm0 = vcmask 1040384   ;;  %vm324_vm1 = vsmask.f32 256  ;;  %v329_v0 = vld [vmem:[#allocation2 + $0xc] sm:$0x1]  ;;  %v4902_v1 = vmov 0  }
   0xf   : > { %316 = vst [vmem:[#allocation2] sm:$0xf] %v4902_v1  ;;  %317 = vst [vmem:[#allocation2 + $0x4] sm:$0xf] %v4902_v1  ;;  %v332_v3 = vld [vmem:[#allocation2 + $0x18] sm:$0x1] }
  0x10   : > { %318 = vst [vmem:[#allocation2 + $0x8] sm:$0x1] %v4902_v1  ;;  %320 = vst [vmem:[#allocation2 + $0x6c] sm:$0xf] %v4902_v1  ;;  %v335_v4 = vld [vmem:[#allocation2 + $0x24] sm:$0x1] }
  0x11   : > { %321 = vst [vmem:[#allocation2 + $0x70] sm:$0xf] %v4902_v1  ;;  %322 = vst [vmem:[#allocation2 + $0x74] sm:$0x1] %v4902_v1  ;;  %vm356_vm3 = vsmask.f32 7938 }
  0x12   : > { %vm4974_vm2 = vmand %vm323_vm0, %vm324_vm1  ;;  %v338_v8 = vld [vmem:[#allocation2 + $0x30] sm:$0x1]  ;;  %p284_p5 = scmp.lt.s32.totalorder %s4888_s22, 1  ;;  %v341_v10 = vld [vmem:[#allocation2 + $0x3c] sm:$0x1]  ;;  %s4994_s26 = sshll.u32 %s4884_s21, 3 }
  0x13   : > { %v330_v5 = vsel %vm4974_vm2, 0, %v329_v0  ;;  %v333_v6 = vsel %vm4974_vm2, 0, %v332_v3  ;;  %v336_v7 = vsel %vm4974_vm2, 0, %v335_v4  ;;  %v339_v9 = vsel %vm4974_vm2, 0, %v338_v8  ;;  %v344_v11 = vld [vmem:[#allocation2 + $0x48] sm:$0x1]  ;;  %vm4989_vm4 = vmand %vm323_vm0, %vm356_vm3 }
  0x14   : > { %331 = vst [vmem:[#allocation2 + $0xc] sm:$0x1] %v330_v5  ;;  %334 = vst [vmem:[#allocation2 + $0x18] sm:$0x1] %v333_v6  ;;  %v342_v13 = vsel %vm4974_vm2, 0, %v341_v10  ;;  %v345_v14 = vsel %vm4974_vm2, 0, %v344_v11 }
  0x15   : > { %337 = vst [vmem:[#allocation2 + $0x24] sm:$0x1] %v336_v7  ;;  %340 = vst [vmem:[#allocation2 + $0x30] sm:$0x1] %v339_v9  ;;  %v347_v15 = vld [vmem:[#allocation2 + $0x54] sm:$0x1] }
  0x16   : > { %v350_v16 = vld [vmem:[#allocation2 + $0x60] sm:$0x1]  ;;  %343 = vst [vmem:[#allocation2 + $0x3c] sm:$0x1] %v342_v13  ;;  %346 = vst [vmem:[#allocation2 + $0x48] sm:$0x1] %v345_v14 }
  0x17   : > { %v348_v17 = vsel %vm4974_vm2, 0, %v347_v15  ;;  %v351_v18 = vsel %vm4974_vm2, 0, %v350_v16  ;;  %v361_v19 = vld [vmem:[#allocation2 + $0x14] sm:$0x1]  ;;  %v364_v20 = vld [vmem:[#allocation2 + $0x20] sm:$0x1] }
  0x18   : > { %349 = vst [vmem:[#allocation2 + $0x54] sm:$0x1] %v348_v17  ;;  %352 = vst [vmem:[#allocation2 + $0x60] sm:$0x1] %v351_v18  ;;  %v362_v21 = vsel %vm4989_vm4, 0, %v361_v19  ;;  %v365_v22 = vsel %vm4989_vm4, 0, %v364_v20 }
  0x19   : > { %v367_v23 = vld [vmem:[#allocation2 + $0x2c] sm:$0x1]  ;;  %v370_v24 = vld [vmem:[#allocation2 + $0x38] sm:$0x1]  ;;  %363 = vst [vmem:[#allocation2 + $0x14] sm:$0x1] %v362_v21 }
  0x1a   : > { %366 = vst [vmem:[#allocation2 + $0x20] sm:$0x1] %v365_v22  ;;  %v368_v25 = vsel %vm4989_vm4, 0, %v367_v23  ;;  %v371_v26 = vsel %vm4989_vm4, 0, %v370_v24  ;;  %v373_v27 = vld [vmem:[#allocation2 + $0x44] sm:$0x1] }
  0x1b   : > { %v376_v28 = vld [vmem:[#allocation2 + $0x50] sm:$0x1]  ;;  %369 = vst [vmem:[#allocation2 + $0x2c] sm:$0x1] %v368_v25  ;;  %372 = vst [vmem:[#allocation2 + $0x38] sm:$0x1] %v371_v26 }
  0x1c   : > { %v374_v29 = vsel %vm4989_vm4, 0, %v373_v27  ;;  %v377_v30 = vsel %vm4989_vm4, 0, %v376_v28  ;;  %v379_v31 = vld [vmem:[#allocation2 + $0x5c] sm:$0x1]  ;;  %v382_v32 = vld [vmem:[#allocation2 + $0x68] sm:$0x1] }
  0x1d   : > { %375 = vst [vmem:[#allocation2 + $0x44] sm:$0x1] %v374_v29  ;;  %378 = vst [vmem:[#allocation2 + $0x50] sm:$0x1] %v377_v30  ;;  %v380_v33 = vsel %vm4989_vm4, 0, %v379_v31  ;;  %v383_v34 = vsel %vm4989_vm4, 0, %v382_v32 }
  0x1e   : > { %v326_v35 = vld [vmem:[#allocation2] sm:$0x1]  ;;  %v353_v36 = vld [vmem:[#allocation2 + $0x6c] sm:$0x1]  ;;  %381 = vst [vmem:[#allocation2 + $0x5c] sm:$0x1] %v380_v33 }
  0x1f   : > { %384 = vst [vmem:[#allocation2 + $0x68] sm:$0x1] %v383_v34  ;;  %v327_v37 = vsel %vm4974_vm2, 0, %v326_v35  ;;  %v354_v38 = vsel %vm4974_vm2, 0, %v353_v36  ;;  %v358_v39 = vld [vmem:[#allocation2 + $0x8] sm:$0x1] }
  0x20   : > { %v385_v40 = vld [vmem:[#allocation2 + $0x74] sm:$0x1]  ;;  %328 = vst [vmem:[#allocation2] sm:$0x1] %v327_v37  ;;  %355 = vst [vmem:[#allocation2 + $0x6c] sm:$0x1] %v354_v38 }
  0x21   : > { %v359_v41 = vsel %vm4989_vm4, 0, %v358_v39  ;;  %v386_v42 = vsel %vm4989_vm4, 0, %v385_v40  ;;  %s6108_s22 = smov (!%p284_p5, %s4888_s22), 1  ;;  %p292_p6 = scmp.lt.s32.totalorder %s4994_s26, 15  ;;  %vm570_vm5 = vcmask 1043456  }
  0x22   : > { %360 = vst [vmem:[#allocation2 + $0x8] sm:$0x1] %v359_v41  ;;  %387 = vst [vmem:[#allocation2 + $0x74] sm:$0x1] %v386_v42  ;;  %p302_p7 = scmp.lt.s32.totalorder %s4884_s21, 1  ;;  %s4209_s27 = sshll.u32 %s6108_s22, 7 }
  0x23   : > { %s3879_s28 = sshll.u32 %s6108_s22, 5  ;;  %s5036_s7 = scalar_lea.vmem %s6042_s0, %s4209_s27  ;;  %vm407_vm6 = vsmask.f32 4368  ;;  %v572_v51 = vld [vmem:[#allocation2 + $0xc] sm:$0xf]  ;;  %vm5066_vm7 = vmand %vm570_vm5, %vm356_vm3 }
  0x24   : > { %s3881_s8 = sshll.u32 %s6108_s22, 1  ;;  %s4211_s12 = sshll.u32 %s4884_s21, 6  ;;  %vm5073_vm8 = vmor %vm324_vm1, %vm407_vm6  ;;  %v576_v0 = vld [vmem:[#allocation2 + $0x14] sm:$0x1]  ;;  %v579_v10 = vld [vmem:[#allocation2 + $0x18] sm:$0xf] }
  0x25   : > { %s293_s9 = scalar_select %p292_p6, %s4994_s26, 15  ;;  %v583_v11 = vld [vmem:[#allocation2 + $0x20] sm:$0x1]  ;;  %v586_v21 = vld [vmem:[#allocation2 + $0x24] sm:$0xf] }
  0x26   : > { %s303_s10 = scalar_select %p302_p7, %s4884_s21, 1  ;;  %v590_v27 = vld [vmem:[#allocation2 + $0x2c] sm:$0x1] }
  0x27   : > { %s3878_s11 = sshll.u32 %s293_s9, 1  ;;  %s5057_s9 = scalar_lea.vmem %s5036_s7, %s4211_s12 }
  0x28   : > { %s296_s13 = sadd.s32 %s3879_s28, %s3878_s11  ;;  %s5041_s14 = sadd.s32 %s3881_s8, %s303_s10  ;;  %v391_v43 = vld [vmem:[%s5057_s9] sm:$0xf]  ;;  %v392_v44 = vld [vmem:[%s5057_s9 + $0x4] sm:$0xf]  ;;  %v393_v45 = vld [vmem:[%s5057_s9 + $0x8] sm:$0xf] }
  0x29   : > { %s3880_s15 = sshll.u32 %s296_s13, 2  ;;  %s306_s18 = scalar_lea.vmem %s6047_s5, %s5041_s14  ;;  %v410_v46 = vshrl.u32 %v391_v43, 16  ;;  %v413_v47 = vshll.u32 %v391_v43, 16  ;;  %v418_v48 = vshrl.u32 %v392_v44, 16  ;;  %v421_v49 = vshll.u32 %v392_v44, 16 }
  0x2a   : > { %s5050_s27 = scalar_lea.vmem %s6046_s4, %s3880_s15  ;;  %s313_s30 = scalar_lea.vmem %s6048_s6, %s5041_s14  ;;  %v394_v50 = vld [vmem:[%s5057_s9 + $0xc] sm:$0xf]  ;;  %v427_v52 = vshrl.u32 %v393_v45, 16  ;;  %v430_v53 = vshll.u32 %v393_v45, 16  ;;  %v395_v56 = vld [vmem:[%s5057_s9 + $0x10] sm:$0xf] }
  0x2b   : > { %v435_v54 = vshrl.u32 %v394_v50, 16  ;;  %v438_v55 = vshll.u32 %v394_v50, 16  ;;  %v412_v57 = vrot.slane %v410_v46, 7  ;;  %v420_v59 = vrot.slane %v418_v48, 7  ;;  %v396_v62 = vld [vmem:[%s5057_s9 + $0x14] sm:$0xf] }
  0x2c   : > { %v444_v60 = vshrl.u32 %v395_v56, 16  ;;  %v447_v61 = vshll.u32 %v395_v56, 16  ;;  %v429_v1 = vrot.slane %v427_v52, 7  ;;  %v452_v4 = vshrl.u32 %v396_v62, 16  ;;  %v397_v16 = vld [vmem:[%s5057_s9 + $0x18] sm:$0xf] }
  0x2d   : > { %v437_v3 = vrot.slane %v435_v54, 7  ;;  %v455_v5 = vshll.u32 %v396_v62, 16  ;;  %v415_v6 = vor.u32 %v413_v47, %v412_v57  ;;  %v416_v7 = vrot.slane %v412_v57, 4  ;;  %v398_v22 = vld [vmem:[%s5057_s9 + $0x1c] sm:$0xf]  ;;  %p3886_p8 = scmp.le.s32.totalorder %s4884_s21, 0 }
  0x2e   : > { %v423_v8 = vor.u32 %v421_v49, %v420_v59  ;;  %v425_v9 = vrot.slane %v420_v59, 4  ;;  %v432_v12 = vor.u32 %v430_v53, %v429_v1  ;;  %v433_v13 = vrot.slane %v429_v1, 4  ;;  %v399_v28 = vld [vmem:[%s5057_s9 + $0x20] sm:$0xf]  ;;  %v400_v33 = vld [vmem:[%s5057_s9 + $0x24] sm:$0xf] }
  0x2f   : > { %v440_v14 = vor.u32 %v438_v55, %v437_v3  ;;  %v442_v15 = vrot.slane %v437_v3, 4  ;;  %v573_v17 = vsel %vm5066_vm7, %v415_v6, %v572_v51  ;;  %v446_v20 = vrot.slane %v444_v60, 7  ;;  %v401_v42 = vld [vmem:[%s5057_s9 + $0x28] sm:$0xf]  ;;  %v593_v45 = vld [vmem:[#allocation2 + $0x30] sm:$0xf] }
  0x30   : > { %v424_v18 = vsel %vm5073_vm8, %v416_v7, %v423_v8  ;;  %v577_v19 = vsel %vm4974_vm2, %v425_v9, %v576_v0  ;;  %574 = vst [vmem:[#allocation2 + $0xc] sm:$0xf] %v573_v17  ;;  %v580_v23 = vsel %vm5066_vm7, %v432_v12, %v579_v10  ;;  %v454_v26 = vrot.slane %v452_v4, 7  ;;  %v597_v47 = vld [vmem:[#allocation2 + $0x38] sm:$0x1]  ;;  %s3887_s28 = sadd.s32 (!%p3886_p8), 4294967295, %s4994_s26 }
  0x31   : > { %575 = vst [vmem:[#allocation2 + $0x10] sm:$0xf] %v424_v18  ;;  %578 = vst [vmem:[#allocation2 + $0x14] sm:$0x1] %v577_v19  ;;  %v441_v24 = vsel %vm5073_vm8, %v433_v13, %v440_v14  ;;  %v584_v25 = vsel %vm4974_vm2, %v442_v15, %v583_v11  ;;  %v449_v29 = vor.u32 %v447_v61, %v446_v20  ;;  %v450_v30 = vrot.slane %v446_v20, 4  ;;  %s4212_s8 = sshll.u32 (!%p3886_p8), %s3887_s28, 3 }
  0x32   : > { %581 = vst [vmem:[#allocation2 + $0x18] sm:$0xf] %v580_v23  ;;  %582 = vst [vmem:[#allocation2 + $0x1c] sm:$0xf] %v441_v24  ;;  %v461_v31 = vshrl.u32 %v397_v16, 16  ;;  %v464_v32 = vshll.u32 %v397_v16, 16  ;;  %v457_v34 = vor.u32 %v455_v5, %v454_v26  ;;  %s635_s10 = scalar_lea.vmem (!%p3886_p8), %s5036_s7, %s4212_s8 }
  0x33   : > { %585 = vst [vmem:[#allocation2 + $0x20] sm:$0x1] %v584_v25  ;;  %v459_v35 = vrot.slane %v454_v26, 4  ;;  %v469_v36 = vshrl.u32 %v398_v22, 16  ;;  %v472_v37 = vshll.u32 %v398_v22, 16  ;;  %v587_v38 = vsel %vm5066_vm7, %v449_v29, %v586_v21 }
  0x34   : > { %v463_v39 = vrot.slane %v461_v31, 7  ;;  %v478_v40 = vshrl.u32 %v399_v28, 16  ;;  %v481_v41 = vshll.u32 %v399_v28, 16  ;;  %588 = vst [vmem:[#allocation2 + $0x24] sm:$0xf] %v587_v38  ;;  %v458_v43 = vsel %vm5073_vm8, %v450_v30, %v457_v34 }
  0x35   : > { %v591_v44 = vsel %vm4974_vm2, %v459_v35, %v590_v27  ;;  %v471_v46 = vrot.slane %v469_v36, 7  ;;  %v486_v48 = vshrl.u32 %v400_v33, 16  ;;  %589 = vst [vmem:[#allocation2 + $0x28] sm:$0xf] %v458_v43  ;;  %v600_v52 = vld [vmem:[#allocation2 + $0x3c] sm:$0xf] }
  0x36   : > { %592 = vst [vmem:[#allocation2 + $0x2c] sm:$0x1] %v591_v44  ;;  %v466_v49 = vor.u32 %v464_v32, %v463_v39  ;;  %v467_v50 = vrot.slane %v463_v39, 4  ;;  %v480_v51 = vrot.slane %v478_v40, 7  ;;  %v489_v53 = vshll.u32 %v400_v33, 16 }
  0x37   : > { %v474_v54 = vor.u32 %v472_v37, %v471_v46  ;;  %v476_v55 = vrot.slane %v471_v46, 4  ;;  %v488_v56 = vrot.slane %v486_v48, 7  ;;  %v495_v57 = vshrl.u32 %v401_v42, 16  ;;  %v402_v59 = vld [vmem:[%s5057_s9 + $0x2c] sm:$0xf] }
  0x38   : > { %v594_v60 = vsel %vm5066_vm7, %v466_v49, %v593_v45  ;;  %v483_v61 = vor.u32 %v481_v41, %v480_v51  ;;  %v484_v62 = vrot.slane %v480_v51, 4  ;;  %v604_v0 = vld [vmem:[#allocation2 + $0x44] sm:$0x1]  ;;  %v498_v1 = vshll.u32 %v401_v42, 16  ;;  %v403_v3 = vld [vmem:[%s5057_s9 + $0x30] sm:$0xf] }
  0x39   : > { %595 = vst [vmem:[#allocation2 + $0x30] sm:$0xf] %v594_v60  ;;  %v475_v4 = vsel %vm5073_vm8, %v467_v50, %v474_v54  ;;  %v598_v5 = vsel %vm4974_vm2, %v476_v55, %v597_v47  ;;  %v491_v6 = vor.u32 %v489_v53, %v488_v56  ;;  %v493_v7 = vrot.slane %v488_v56, 4  ;;  %v404_v8 = vld [vmem:[%s5057_s9 + $0x34] sm:$0xf] }
  0x3a   : > { %596 = vst [vmem:[#allocation2 + $0x34] sm:$0xf] %v475_v4  ;;  %599 = vst [vmem:[#allocation2 + $0x38] sm:$0x1] %v598_v5  ;;  %v601_v9 = vsel %vm5066_vm7, %v483_v61, %v600_v52  ;;  %v497_v10 = vrot.slane %v495_v57, 7  ;;  %v503_v11 = vshrl.u32 %v402_v59, 16 }
  0x3b   : > { %v506_v12 = vshll.u32 %v402_v59, 16  ;;  %v405_v13 = vld [vmem:[%s5057_s9 + $0x38] sm:$0xf]  ;;  %602 = vst [vmem:[#allocation2 + $0x3c] sm:$0xf] %v601_v9  ;;  %v492_v14 = vsel %vm5073_vm8, %v484_v62, %v491_v6  ;;  %v605_v15 = vsel %vm4974_vm2, %v493_v7, %v604_v0  ;;  %v512_v17 = vshrl.u32 %v403_v3, 16 }
  0x3c   : > { %v607_v16 = vld [vmem:[#allocation2 + $0x48] sm:$0xf]  ;;  %v515_v18 = vshll.u32 %v403_v3, 16  ;;  %603 = vst [vmem:[#allocation2 + $0x40] sm:$0xf] %v492_v14  ;;  %v500_v19 = vor.u32 %v498_v1, %v497_v10  ;;  %v501_v20 = vrot.slane %v497_v10, 4 }
  0x3d   : > { %606 = vst [vmem:[#allocation2 + $0x44] sm:$0x1] %v605_v15  ;;  %v505_v21 = vrot.slane %v503_v11, 7  ;;  %v520_v22 = vshrl.u32 %v404_v8, 16  ;;  %v406_v23 = vld [vmem:[%s5057_s9 + $0x3c] sm:$0xf] }
  0x3e   : > { %v611_v24 = vld [vmem:[#allocation2 + $0x50] sm:$0x1]  ;;  %v514_v25 = vrot.slane %v512_v17, 7  ;;  %v523_v26 = vshll.u32 %v404_v8, 16  ;;  %v529_v27 = vshrl.u32 %v405_v13, 16  ;;  %v532_v28 = vshll.u32 %v405_v13, 16 }
  0x3f   : > { %v608_v29 = vsel %vm5066_vm7, %v500_v19, %v607_v16  ;;  %v508_v30 = vor.u32 %v506_v12, %v505_v21  ;;  %v510_v31 = vrot.slane %v505_v21, 4  ;;  %v614_v32 = vld [vmem:[#allocation2 + $0x54] sm:$0xf]  ;;  %v522_v33 = vrot.slane %v520_v22, 7  ;;  %v618_v36 = vld [vmem:[#allocation2 + $0x5c] sm:$0x1] }
  0x40   : > { %609 = vst [vmem:[#allocation2 + $0x48] sm:$0xf] %v608_v29  ;;  %v517_v34 = vor.u32 %v515_v18, %v514_v25  ;;  %v518_v35 = vrot.slane %v514_v25, 4  ;;  %v531_v37 = vrot.slane %v529_v27, 7  ;;  %v537_v38 = vshrl.u32 %v406_v23, 16 }
  0x41   : > { %v509_v39 = vsel %vm5073_vm8, %v501_v20, %v508_v30  ;;  %v612_v40 = vsel %vm4974_vm2, %v510_v31, %v611_v24  ;;  %v525_v41 = vor.u32 %v523_v26, %v522_v33  ;;  %v527_v42 = vrot.slane %v522_v33, 4  ;;  %v621_v43 = vld [vmem:[#allocation2 + $0x60] sm:$0xf]  ;;  %v625_v51 = vld [vmem:[#allocation2 + $0x68] sm:$0x1] }
  0x42   : > { %610 = vst [vmem:[#allocation2 + $0x4c] sm:$0xf] %v509_v39  ;;  %613 = vst [vmem:[#allocation2 + $0x50] sm:$0x1] %v612_v40  ;;  %v615_v44 = vsel %vm5066_vm7, %v517_v34, %v614_v32  ;;  %v534_v45 = vor.u32 %v532_v28, %v531_v37  ;;  %v539_v46 = vrot.slane %v537_v38, 7  ;;  %v535_v49 = vrot.slane %v531_v37, 4 }
  0x43   : > { %616 = vst [vmem:[#allocation2 + $0x54] sm:$0xf] %v615_v44  ;;  %v526_v47 = vsel %vm5073_vm8, %v518_v35, %v525_v41  ;;  %v619_v48 = vsel %vm4974_vm2, %v527_v42, %v618_v36  ;;  %v540_v50 = vshll.u32 %v406_v23, 16 }
  0x44   : > { %617 = vst [vmem:[#allocation2 + $0x58] sm:$0xf] %v526_v47  ;;  %620 = vst [vmem:[#allocation2 + $0x5c] sm:$0x1] %v619_v48  ;;  %v622_v52 = vsel %vm5066_vm7, %v534_v45, %v621_v43  ;;  %v544_v53 = vrot.slane %v539_v46, 4  ;;  %631 = sbr.rel (%p3886_p8) target bundleno = 83 (0x53), region = 40 }
  0x45   : > { %623 = vst [vmem:[#allocation2 + $0x60] sm:$0xf] %v622_v52  ;;  %v542_v54 = vor.u32 %v540_v50, %v539_v46 }
  0x46   : > { %v626_v55 = vsel %vm4974_vm2, %v544_v53, %v625_v51 }
  0x47   : > { %v543_v56 = vsel %vm5073_vm8, %v535_v49, %v542_v54  ;;  %627 = vst [vmem:[#allocation2 + $0x68] sm:$0x1] %v626_v55 }
  0x48   : > { %624 = vst [vmem:[#allocation2 + $0x64] sm:$0xf] %v543_v56 }
  0x49   : > { %v636_v57 = vld [vmem:[%s635_s10] sm:$0xf]  ;;  %v637_v59 = vld [vmem:[%s635_s10 + $0x4] sm:$0xf]  ;;  %v662_v5 = vld [vmem:[#allocation2 + $0x8] sm:$0x1] }
  0x4a   : > { %v639_v60 = vshrl.u32 %v636_v57, 16  ;;  %v642_v61 = vshll.u32 %v636_v57, 16  ;;  %v647_v62 = vshrl.u32 %v637_v59, 16  ;;  %v650_v0 = vshll.u32 %v637_v59, 16  ;;  %v658_v4 = vld [vmem:[#allocation2] sm:$0xf] }
  0x4c   : > { %v641_v1 = vrot.slane %v639_v60, 7  ;;  %v649_v3 = vrot.slane %v647_v62, 7 }
  0x4e   : > { %v644_v6 = vor.u32 %v642_v61, %v641_v1  ;;  %v645_v7 = vrot.slane %v641_v1, 4  ;;  %v652_v8 = vor.u32 %v650_v0, %v649_v3  ;;  %v654_v9 = vrot.slane %v649_v3, 4 }
  0x50   : > { %v659_v10 = vsel %vm5066_vm7, %v644_v6, %v658_v4  ;;  %v653_v11 = vsel %vm5073_vm8, %v645_v7, %v652_v8  ;;  %v663_v12 = vsel %vm4974_vm2, %v654_v9, %v662_v5 }
  0x51   : > { %660 = vst [vmem:[#allocation2] sm:$0xf] %v659_v10  ;;  %661 = vst [vmem:[#allocation2 + $0x4] sm:$0xf] %v653_v11 }
  0x52   : > { %664 = vst [vmem:[#allocation2 + $0x8] sm:$0x1] %v663_v12 }
  0x53 PF: > { %p3890_p9 = scmp.ge.s32.totalorder %s4884_s21, 1 }
  0x55   : > { %668 = sbr.rel (%p3890_p9) target bundleno = 100 (0x64), region = 44 }
  0x5a   : > { %v3893_v13 = vld [vmem:[%s5057_s9 + $0x40] sm:$0xf]  ;;  %v3894_v14 = vld [vmem:[%s5057_s9 + $0x44] sm:$0xf]  ;;  %v695_v21 = vld [vmem:[#allocation2 + $0x6c] sm:$0xf] }
  0x5b   : > { %v676_v15 = vshrl.u32 %v3893_v13, 16  ;;  %v679_v16 = vshll.u32 %v3893_v13, 16  ;;  %v684_v17 = vshrl.u32 %v3894_v14, 16  ;;  %v687_v18 = vshll.u32 %v3894_v14, 16  ;;  %v699_v22 = vld [vmem:[#allocation2 + $0x74] sm:$0x1] }
  0x5d   : > { %v678_v19 = vrot.slane %v676_v15, 7  ;;  %v686_v20 = vrot.slane %v684_v17, 7 }
  0x5f   : > { %v681_v23 = vor.u32 %v679_v16, %v678_v19  ;;  %v682_v24 = vrot.slane %v678_v19, 4  ;;  %v689_v25 = vor.u32 %v687_v18, %v686_v20  ;;  %v691_v26 = vrot.slane %v686_v20, 4 }
  0x61   : > { %v696_v27 = vsel %vm5066_vm7, %v681_v23, %v695_v21  ;;  %v690_v28 = vsel %vm5073_vm8, %v682_v24, %v689_v25  ;;  %v700_v29 = vsel %vm4974_vm2, %v691_v26, %v699_v22 }
  0x62   : > { %697 = vst [vmem:[#allocation2 + $0x6c] sm:$0xf] %v696_v27  ;;  %698 = vst [vmem:[#allocation2 + $0x70] sm:$0xf] %v690_v28 }
  0x63   : > { %701 = vst [vmem:[#allocation2 + $0x74] sm:$0x1] %v700_v29 }
  0x64 PF: > { %v4766_v30 = vld [vmem:[%s6043_s1 + $0x78] sm:$0xff]   ;;  %v4768_v58 = vld [vmem:[%s6043_s1 + $0x70] sm:$0xff]   ;;  %v4770_v63 = vld [vmem:[%s6043_s1 + $0x68] sm:$0xff]   ;;  %vm742_vm9 = vsmask.f32 3328  ;;  %vm1348_vm12 = vcmask 1042432  }
  0x65   : > { %v4767_v31 = vld [vmem:[%s6043_s1 + $0x38] sm:$0xff]   ;;  %4421 = vmatprep.subr.bf16.mxu0 %v4766_v30  ;;  %v4769_v2 = vld [vmem:[%s6043_s1 + $0x30] sm:$0xff]   ;;  %v4771_v32 = vld [vmem:[%s6043_s1 + $0x28] sm:$0xff]   ;;  %vm743_vm10 = vsmask.f32 7440  ;;  %vm1349_vm13 = vcmask 1046532  }
  0x66   : > { %4453 = vmatprep.subr.bf16.mxu1 %v4767_v31  ;;  %4422 = vmatpush3.bf16.msra.mxu0 %v4766_v30  ;;  %v4772_v33 = vld [vmem:[%s6043_s1 + $0x60] sm:$0xff]   ;;  %v4774_v35 = vld [vmem:[%s6043_s1 + $0x58] sm:$0xff]   ;;  %v4776_v37 = vld [vmem:[%s6043_s1 + $0x50] sm:$0xff]  }
  0x67   : > { %4454 = vmatpush3.bf16.msra.mxu1 %v4767_v31  ;;  %4423 = vmatprep.subr.bf16.mxu0 %v4768_v58  ;;  %v4773_v34 = vld [vmem:[%s6043_s1 + $0x20] sm:$0xff]   ;;  %v4775_v36 = vld [vmem:[%s6043_s1 + $0x18] sm:$0xff]   ;;  %v4777_v38 = vld [vmem:[%s6043_s1 + $0x10] sm:$0xff]  }
  0x68   : > { %4455 = vmatprep.subr.bf16.mxu1 %v4769_v2  ;;  %v702_v39 = vld [vmem:[#allocation2] sm:$0xf]  ;;  %v5189_v40 = vld [vmem:[#allocation2 + $0x4] sm:$0xf]  ;;  %v5191_v41 = vld [vmem:[#allocation2 + $0x8] sm:$0x1] }
  0x69   : > { %v746_v42 = vshrl.u32 %v702_v39, 16  ;;  %v749_v43 = vshll.u32 %v702_v39, 16  ;;  %v755_v44 = vshll.u32 %v5189_v40, 16  ;;  %v759_v45 = vshrl.u32 %v5189_v40, 16  ;;  %v5196_v47 = vld [vmem:[#allocation2 + $0xc] sm:$0xf]  ;;  %vm5218_vm11 = vmor %vm742_vm9, %vm743_vm10 }
  0x6a   : > { %4424 = vmatpush3.bf16.msra.mxu0 %v4768_v58  ;;  %v765_v46 = vshll.u32 %v5191_v41, 16  ;;  %v3927_v50 = vcombine.low %v702_v39, %v5189_v40  ;;  %v5199_v51 = vld [vmem:[#allocation2 + $0x10] sm:$0xf]  ;;  %v5201_v52 = vld [vmem:[#allocation2 + $0x14] sm:$0x1]  ;;  %v4778_v53 = vld [vmem:[%s6043_s1 + $0x48] sm:$0xff]  }
  0x6b   : > { %4456 = vmatpush3.bf16.msra.mxu1 %v4769_v2  ;;  %4425 = vmatprep.subr.bf16.mxu0 %v4770_v63  ;;  %v748_v48 = vrot.slane %v746_v42, 4  ;;  %v751_v49 = vrot.slane %v749_v43, 5  ;;  %v757_v54 = vrot.slane %v755_v44, 5  ;;  %v761_v55 = vrot.slane %v759_v45, 4  ;;  %v4779_v57 = vld [vmem:[%s6043_s1 + $0x8] sm:$0xff]   ;;  %v4780_v0 = vld [vmem:[%s6043_s1 + $0x40] sm:$0xff]   ;;  %vm5372_vm14 = vmor %vm1348_vm12, %vm1349_vm13 }
  0x6c   : > { %4457 = vmatprep.subr.bf16.mxu1 %v4771_v32  ;;  %v770_v56 = vshrl.u32 %v5196_v47, 16  ;;  %4469 = vmatprep.mubr.bf16.mxu1 %v3927_v50  ;;  %v773_v60 = vshll.u32 %v5196_v47, 16  ;;  %v779_v61 = vshll.u32 %v5199_v51, 16  ;;  %v783_v62 = vshrl.u32 %v5199_v51, 16  ;;  %v4781_v13 = vld [vmem:[%s6043_s1] sm:$0xff]   ;;  %v4784_v21 = vld [vmem:[%s6043_s1 + $0xb8] sm:$0xff]  }
  0x6d   : > { %v752_v59 = vor.u32 %v751_v49, %v748_v48  ;;  %v762_v3 = vor.u32 %v761_v55, %v757_v54  ;;  %v767_v4 = vrot.slane %v765_v46, 5  ;;  %v789_v6 = vshll.u32 %v5201_v52, 16  ;;  %v5237_v22 = vld [vmem:[#allocation2 + $0x18] sm:$0xf]  ;;  %v5239_v23 = vld [vmem:[#allocation2 + $0x1c] sm:$0xf] }
  0x6e   : > { %4426 = vmatpush3.bf16.msra.mxu0 %v4770_v63  ;;  %v772_v5 = vrot.slane %v770_v56, 4  ;;  %v775_v8 = vrot.slane %v773_v60, 5  ;;  %v781_v9 = vrot.slane %v779_v61, 5  ;;  %v785_v10 = vrot.slane %v783_v62, 4  ;;  %v4785_v27 = vld [vmem:[%s6043_s1 + $0xf8] sm:$0xff]   ;;  %v4786_v39 = vld [vmem:[%s6043_s1 + $0xb0] sm:$0xff]  }
  0x6f   : > { %4458 = vmatpush3.bf16.msra.mxu1 %v4771_v32  ;;  %4427 = vmatprep.subr.bf16.mxu0 %v4772_v33  ;;  %v753_v7 = vrot.slane %v752_v59, 4  ;;  %v763_v11 = vrot.slane %v762_v3, 4  ;;  %v1356_v12 = vrot.slane %v5191_v41, 5  ;;  %v791_v17 = vrot.slane %v789_v6, 5  ;;  %v5244_v28 = vld [vmem:[#allocation2 + $0x20] sm:$0x1] }
  0x70   : > { %4459 = vmatprep.subr.bf16.mxu1 %v4773_v34  ;;  %v776_v15 = vor.u32 %v775_v8, %v772_v5  ;;  %v786_v16 = vor.u32 %v785_v10, %v781_v9  ;;  %v1363_v19 = vrot.slane %v5201_v52, 5  ;;  %v3928_v20 = vcombine.low %v5196_v47, %v5199_v51  ;;  %v5251_v63 = vld [vmem:[#allocation2 + $0x24] sm:$0xf]  ;;  %v4787_v55 = vld [vmem:[%s6043_s1 + $0xf0] sm:$0xff]   ;;  %v4790_v10 = vld [vmem:[%s6043_s1 + $0xa8] sm:$0xff]  }
  0x71   : > { %v758_v14 = vsel %vm5218_vm11, %v753_v7, %v757_v54  ;;  %v768_v18 = vsel %vm5218_vm11, %v763_v11, %v767_v4  ;;  %v794_v29 = vshrl.u32 %v5237_v22, 16  ;;  %v797_v30 = vshll.u32 %v5237_v22, 16  ;;  %v5277_v6 = vld [vmem:[#allocation2 + $0x30] sm:$0xf]  ;;  %v5286_v11 = vld [vmem:[#allocation2 + $0x34] sm:$0xf] }
  0x72   : > { %4428 = vmatpush3.bf16.msra.mxu0 %v4772_v33  ;;  %v3911_v24 = vcombine.low %v758_v14, %v768_v18  ;;  %v777_v25 = vrot.slane %v776_v15, 4  ;;  %v787_v26 = vrot.slane %v786_v16, 4  ;;  %v803_v31 = vshll.u32 %v5239_v23, 16  ;;  %v4810_v52 = vld [vmem:[%s6043_s1 + $0x130] sm:$0xff]  }
  0x73   : > { %4460 = vmatpush3.bf16.msra.mxu1 %v4773_v34  ;;  %4429 = vmatprep.subr.bf16.mxu0 %v4774_v35  ;;  %v807_v58 = vshrl.u32 %v5239_v23, 16  ;;  %v813_v2 = vshll.u32 %v5244_v28, 16  ;;  %v796_v34 = vrot.slane %v794_v29, 4  ;;  %v799_v42 = vrot.slane %v797_v30, 5  ;;  %v4792_v30 = vld [vmem:[%s6043_s1 + $0xa0] sm:$0xff]  }
  0x74   : > { %4461 = vmatprep.subr.bf16.mxu1 %v4775_v36  ;;  %4437 = vmatprep.mubr.bf16.mxu0 %v3911_v24  ;;  %v782_v32 = vsel %vm5218_vm11, %v777_v25, %v781_v9  ;;  %v792_v33 = vsel %vm5218_vm11, %v787_v26, %v791_v17  ;;  %v805_v43 = vrot.slane %v803_v31, 5  ;;  %v818_v46 = vshrl.u32 %v5251_v63, 16  ;;  %v4791_v17 = vld [vmem:[%s6043_s1 + $0xe8] sm:$0xff]  }
  0x75   : > { %v809_v44 = vrot.slane %v807_v58, 4  ;;  %v815_v45 = vrot.slane %v813_v2, 5  ;;  %v821_v47 = vshll.u32 %v5251_v63, 16  ;;  %v800_v49 = vor.u32 %v799_v42, %v796_v34 }
  0x76   : > { %4430 = vmatpush3.bf16.msra.mxu0 %v4774_v35  ;;  %v5257_v35 = vld [vmem:[#allocation2 + $0x28] sm:$0xf]  ;;  %v3929_v56 = vcombine.low %v5237_v22, %v5239_v23  ;;  %v842_v14 = vshrl.u32 %v5277_v6, 16  ;;  %v845_v18 = vshll.u32 %v5277_v6, 16  ;;  %v855_v25 = vshrl.u32 %v5286_v11, 16 }
  0x77   : > { %4462 = vmatpush3.bf16.msra.mxu1 %v4775_v36  ;;  %4431 = vmatprep.subr.bf16.mxu0 %v4776_v37  ;;  %v5259_v36 = vld [vmem:[#allocation2 + $0x2c] sm:$0x1]  ;;  %v827_v48 = vshll.u32 %v5257_v35, 16  ;;  %v810_v50 = vor.u32 %v809_v44, %v805_v43  ;;  %v823_v59 = vrot.slane %v821_v47, 5  ;;  %v801_v61 = vrot.slane %v800_v49, 4 }
  0x78   : > { %4463 = vmatprep.subr.bf16.mxu1 %v4777_v38  ;;  %v837_v54 = vshll.u32 %v5259_v36, 16  ;;  %v3930_v5 = vcombine.low %v5251_v63, %v5257_v35  ;;  %v844_v24 = vrot.slane %v842_v14, 4  ;;  %v847_v31 = vrot.slane %v845_v18, 5  ;;  %v5309_v63 = vld [vmem:[#allocation2 + $0x44] sm:$0x1] }
  0x79   : > { %v829_v60 = vrot.slane %v827_v48, 5  ;;  %v811_v62 = vrot.slane %v810_v50, 4  ;;  %v806_v7 = vsel %vm5218_vm11, %v801_v61, %v805_v43  ;;  %v3931_v2 = vcombine.low %v5277_v6, %v5286_v11 }
  0x7a   : > { %4432 = vmatpush3.bf16.msra.mxu0 %v4776_v37  ;;  %v1353_v37 = vrot.slane %v5189_v40, 5  ;;  %v839_v3 = vrot.slane %v837_v54, 5  ;;  %v857_v34 = vrot.slane %v855_v25, 4  ;;  %v848_v43 = vor.u32 %v847_v31, %v844_v24 }
  0x7b   : > { %4464 = vmatpush3.bf16.msra.mxu1 %v4777_v38  ;;  %4433 = vmatprep.subr.bf16.mxu0 %v4778_v53  ;;  %v3912_v38 = vcombine.low %v782_v32, %v792_v33  ;;  %v816_v8 = vsel %vm5218_vm11, %v811_v62, %v815_v45  ;;  %v4793_v33 = vld [vmem:[%s6043_s1 + $0xe0] sm:$0xff]   ;;  %v885_v49 = vshll.u32 %v5309_v63, 16  ;;  %v1367_v40 = vrot.slane %v5239_v23, 5  ;;  %v4807_v23 = vld [vmem:[#allocation2 + $0x18] sm:$0xff]  }
  0x7c   : > { %4465 = vmatprep.subr.bf16.mxu1 %v4779_v57  ;;  %v3913_v15 = vcombine.low %v806_v7, %v816_v8  ;;  %v849_v50 = vrot.slane %v848_v43, 4  ;;  %v5335_v7 = vld [vmem:[#allocation2 + $0x50] sm:$0x1] }
  0x7e   : > { %4434 = vmatpush3.bf16.msra.mxu0 %v4778_v53  ;;  %v831_v53 = vshrl.u32 %v5257_v35, 16 }
  0x7f   : > { %4466 = vmatpush3.bf16.msra.mxu1 %v4779_v57  ;;  %4435 = vmatprep.subr.bf16.mxu0 %v4780_v0  ;;  %v820_v57 = vrot.slane %v818_v46, 4 }
  0x80   : > { %4467 = vmatprep.subr.bf16.mxu1 %v4781_v13 }
  0x81   : > { %v824_v4 = vor.u32 %v823_v59, %v820_v57  ;;  %v887_v59 = vrot.slane %v885_v49, 5 }
  0x82   : > { %4436 = vmatpush3.bf16.msra.mxu0 %v4780_v0  ;;  %v833_v0 = vrot.slane %v831_v53, 4 }
  0x83   : > { %4468 = vmatpush3.bf16.msra.mxu1 %v4781_v13  ;;  %4485 = vmatprep.subr.bf16.mxu0 %v4784_v21  ;;  %v5288_v13 = vld [vmem:[#allocation2 + $0x38] sm:$0x1]  ;;  %v825_v16 = vrot.slane %v824_v4, 4  ;;  %v5331_v4 = vld [vmem:[#allocation2 + $0x4c] sm:$0xf] }
  0x84   : > { %4517 = vmatprep.subr.bf16.mxu1 %v4785_v27  ;;  %v834_v9 = vor.u32 %v833_v0, %v829_v60  ;;  %v861_v26 = vshll.u32 %v5288_v13, 16  ;;  %v903_v18 = vshrl.u32 %v5331_v4, 16 }
  0x85   : > { %4438 = vmatmul.mubr.bf16.vlgmr.msra.gmra.mxu0 %v3912_v38  ;;  %v830_v29 = vsel %vm5218_vm11, %v825_v16, %v829_v60  ;;  %v4797_v60 = vld [vmem:[%s6043_s1 + $0xd8] sm:$0xff]   ;;  %v4798_v16 = vld [vmem:[%s6043_s1 + $0x90] sm:$0xff]  }
  0x86   : > { %4470 = vmatmul.mubr.bf16.vlgmr.msra.gmra.mxu1 %v3928_v20  ;;  %4486 = vmatpush3.bf16.msra.mxu0 %v4784_v21  ;;  %v851_v20 = vshll.u32 %v5286_v11, 16  ;;  %v5296_v21 = vld [vmem:[#allocation2 + $0x3c] sm:$0xf]  ;;  %v835_v22 = vrot.slane %v834_v9, 4  ;;  %v863_v38 = vrot.slane %v861_v26, 5  ;;  %v909_v26 = vshll.u32 %v5335_v7, 16 }
  0x87   : > { %4518 = vmatpush3.bf16.msra.mxu1 %v4785_v27  ;;  %4487 = vmatprep.subr.bf16.mxu0 %v4786_v39  ;;  %v5300_v27 = vld [vmem:[#allocation2 + $0x40] sm:$0xf]  ;;  %v869_v44 = vshll.u32 %v5296_v21, 16 }
  0x88   : > { %4519 = vmatprep.subr.bf16.mxu1 %v4787_v55  ;;  %4473 = vmatprep.mubr.bf16.mxu1 %v3929_v56  ;;  %v853_v58 = vrot.slane %v851_v20, 5  ;;  %v840_v32 = vsel %vm5218_vm11, %v835_v22, %v839_v3  ;;  %v875_v45 = vshll.u32 %v5300_v27, 16  ;;  %v879_v48 = vshrl.u32 %v5300_v27, 16  ;;  %v714_v3 = vld [vmem:[#allocation2 + $0x48] sm:$0xf]  ;;  %v4799_v22 = vld [vmem:[%s6043_s1 + $0xd0] sm:$0xff]  }
  0x89   : > { %4441 = vmatprep.mubr.bf16.mxu0 %v3913_v15  ;;  %v3914_v42 = vcombine.low %v830_v29, %v840_v32  ;;  %v871_v53 = vrot.slane %v869_v44, 5  ;;  %v3932_v0 = vcombine.low %v5296_v21, %v5300_v27  ;;  %v890_v8 = vshrl.u32 %v714_v3, 16  ;;  %v5344_v20 = vld [vmem:[#allocation2 + $0x58] sm:$0xf]  ;;  %v5350_v29 = vld [vmem:[#allocation2 + $0x5c] sm:$0x1] }
  0x8a   : > { %4488 = vmatpush3.bf16.msra.mxu0 %v4786_v39  ;;  %v866_v39 = vshrl.u32 %v5296_v21, 16  ;;  %v858_v46 = vor.u32 %v857_v34, %v853_v58  ;;  %v877_v54 = vrot.slane %v875_v45, 5  ;;  %v881_v57 = vrot.slane %v879_v48, 4  ;;  %v4802_v45 = vld [vmem:[%s6043_s1 + $0x88] sm:$0xff]  }
  0x8b   : > { %4520 = vmatpush3.bf16.msra.mxu1 %v4787_v55  ;;  %4489 = vmatprep.subr.bf16.mxu0 %v4790_v10  ;;  %v4796_v55 = vld [vmem:[%s6043_s1 + $0x98] sm:$0xff]   ;;  %v854_v61 = vsel %vm5218_vm11, %v849_v50, %v853_v58  ;;  %v893_v9 = vshll.u32 %v714_v3, 16  ;;  %v892_v24 = vrot.slane %v890_v8, 4  ;;  %v911_v34 = vrot.slane %v909_v26, 5 }
  0x8c   : > { %4521 = vmatprep.subr.bf16.mxu1 %v4791_v17  ;;  %v868_v47 = vrot.slane %v866_v39, 4  ;;  %v859_v56 = vrot.slane %v858_v46, 4  ;;  %v882_v6 = vor.u32 %v881_v57, %v877_v54  ;;  %v923_v44 = vshll.u32 %v5344_v20, 16 }
  0x8d   : > { %4442 = vmatmul.mubr.bf16.gmra.mxu0 %v3914_v42  ;;  %v895_v25 = vrot.slane %v893_v9, 5  ;;  %v927_v48 = vshrl.u32 %v5344_v20, 16  ;;  %v933_v49 = vshll.u32 %v5350_v29, 16 }
  0x8e   : > { %4474 = vmatmul.mubr.bf16.gmra.mxu1 %v3930_v5  ;;  %4490 = vmatpush3.bf16.msra.mxu0 %v4790_v10  ;;  %v872_v62 = vor.u32 %v871_v53, %v868_v47  ;;  %v864_v5 = vsel %vm5218_vm11, %v859_v56, %v863_v38  ;;  %v5337_v10 = vld [vmem:[#allocation2 + $0x54] sm:$0xf]  ;;  %v883_v21 = vrot.slane %v882_v6, 4  ;;  %v4803_v56 = vld [vmem:[%s6043_s1 + $0xc8] sm:$0xff]   ;;  %v4804_v6 = vld [vmem:[%s6043_s1 + $0x80] sm:$0xff]  }
  0x8f   : > { %4522 = vmatpush3.bf16.msra.mxu1 %v4791_v17  ;;  %4491 = vmatprep.subr.bf16.mxu0 %v4792_v30  ;;  %v3915_v14 = vcombine.low %v854_v61, %v864_v5  ;;  %v899_v17 = vshll.u32 %v5331_v4, 16  ;;  %v914_v38 = vshrl.u32 %v5337_v10, 16  ;;  %v917_v43 = vshll.u32 %v5337_v10, 16 }
  0x90   : > { %4523 = vmatprep.subr.bf16.mxu1 %v4793_v33  ;;  %4477 = vmatprep.mubr.bf16.mxu1 %v3931_v2  ;;  %v873_v15 = vrot.slane %v872_v62, 4  ;;  %v905_v2 = vrot.slane %v903_v18, 4  ;;  %v888_v32 = vsel %vm5218_vm11, %v883_v21, %v887_v59  ;;  %v929_v57 = vrot.slane %v927_v48, 4  ;;  %v1324_v59 = vld [vmem:[#allocation2] sm:$0xe]  ;;  %v4806_v18 = vld [vmem:[#allocation2 + $0xc] sm:$0xff]  }
  0x91   : > { %4445 = vmatprep.mubr.bf16.mxu0 %v3915_v14  ;;  %v901_v58 = vrot.slane %v899_v17, 5  ;;  %v916_v47 = vrot.slane %v914_v38, 4  ;;  %v919_v53 = vrot.slane %v917_v43, 5  ;;  %v1355_v61 = vrot.slane %v1353_v37, 4  ;;  %v1325_v21 = vld [vmem:[#allocation2 + $0xc] sm:$0xe] }
  0x92   : > { %4492 = vmatpush3.bf16.msra.mxu0 %v4792_v30  ;;  %v878_v31 = vsel %vm5218_vm11, %v873_v15, %v877_v54  ;;  %v3933_v30 = vcombine.low %v714_v3, %v5331_v4  ;;  %v925_v54 = vrot.slane %v923_v44, 5  ;;  %v1360_v62 = vrot.slane %v5199_v51, 5  ;;  %v4805_v51 = vld [vmem:[%s6043_s1 + $0xc0] sm:$0xff]  }
  0x93   : > { %4524 = vmatpush3.bf16.msra.mxu1 %v4793_v33  ;;  %4493 = vmatprep.subr.bf16.mxu0 %v4796_v55  ;;  %v896_v33 = vor.u32 %v895_v25, %v892_v24  ;;  %v3916_v39 = vcombine.low %v878_v31, %v888_v32  ;;  %v906_v42 = vor.u32 %v905_v2, %v901_v58  ;;  %v3943_v8 = vrot.slane %v1324_v59, 9  ;;  %v4809_v2 = vld [vmem:[%s6043_s1 + $0x178] sm:$0xff]   ;;  %v4817_v59 = vld [vmem:[%s6043_s1 + $0x160] sm:$0xff]  }
  0x94   : > { %4525 = vmatprep.subr.bf16.mxu1 %v4797_v60  ;;  %v920_v3 = vor.u32 %v919_v53, %v916_v47  ;;  %v3934_v5 = vcombine.low %v5337_v10, %v5344_v20  ;;  %v930_v14 = vor.u32 %v929_v57, %v925_v54  ;;  %v935_v15 = vrot.slane %v933_v49, 5  ;;  %v1328_v49 = vld [vmem:[#allocation2 + $0x30] sm:$0xe] }
  0x95   : > { %v897_v46 = vrot.slane %v896_v33, 4  ;;  %4446 = vmatmul.mubr.bf16.gmra.mxu0 %v3916_v39  ;;  %v907_v50 = vrot.slane %v906_v42, 4  ;;  %v1362_v24 = vrot.slane %v1360_v62, 4  ;;  %v3944_v31 = vrot.slane %v1325_v21, 9  ;;  %v4812_v42 = vld [vmem:[#allocation2 + $0x24] sm:$0xff]   ;;  %v4813_v53 = vld [vmem:[#allocation2 + $0x30] sm:$0xff]  }
  0x96   : > { %4478 = vmatmul.mubr.bf16.gmra.mxu1 %v3932_v0  ;;  %4494 = vmatpush3.bf16.msra.mxu0 %v4796_v55  ;;  %v921_v17 = vrot.slane %v920_v3, 4  ;;  %v931_v10 = vrot.slane %v930_v14, 4  ;;  %v1369_v32 = vrot.slane %v1367_v40, 4  ;;  %v1370_v33 = vrot.slane %v5244_v28, 5  ;;  %v1327_v28 = vld [vmem:[#allocation2 + $0x24] sm:$0xe] }
  0x97   : > { %4526 = vmatpush3.bf16.msra.mxu1 %v4797_v60  ;;  %4495 = vmatprep.subr.bf16.mxu0 %v4798_v16  ;;  %v902_v55 = vsel %vm5218_vm11, %v897_v46, %v901_v58  ;;  %v912_v0 = vsel %vm5218_vm11, %v907_v50, %v911_v34  ;;  %v4811_v34 = vld [vmem:[%s6043_s1 + $0x170] sm:$0xff]   ;;  %v1361_v38 = vsel %vm5372_vm14, %v3944_v31, %v1360_v62  ;;  %v1374_v43 = vrot.slane %v5257_v35, 5 }
  0x98   : > { %4527 = vmatprep.subr.bf16.mxu1 %v4799_v22  ;;  %4481 = vmatprep.mubr.bf16.mxu1 %v3933_v30  ;;  %v3917_v9 = vcombine.low %v902_v55, %v912_v0  ;;  %v926_v25 = vsel %vm5218_vm11, %v921_v17, %v925_v54  ;;  %v936_v26 = vsel %vm5218_vm11, %v931_v10, %v935_v15  ;;  %v1381_v46 = vrot.slane %v5286_v11, 5  ;;  %v4815_v11 = vld [vmem:[%s6043_s1 + $0x168] sm:$0xff]   ;;  %v4818_v0 = vld [vmem:[#allocation2 + $0x3c] sm:$0xff]   ;;  %v1331_v10 = vld [vmem:[#allocation2 + $0x54] sm:$0xe] }
  0x99   : > { %v3918_v58 = vcombine.low %v926_v25, %v936_v26  ;;  %v1364_v39 = vsel %vm5372_vm14, %v1362_v24, %v1363_v19  ;;  %v1377_v19 = vrot.slane %v5259_v36, 5  ;;  %v3946_v35 = vrot.slane %v1327_v28, 9  ;;  %v4814_v36 = vld [vmem:[%s6043_s1 + $0x128] sm:$0xff]  }
  0x9a   : > { %4496 = vmatpush3.bf16.msra.mxu0 %v4798_v16  ;;  %4449 = vmatprep.mubr.bf16.mxu0 %v3917_v9  ;;  %v1354_v16 = vsel %vm5372_vm14, %v3943_v8, %v1353_v37  ;;  %v1326_v37 = vld [vmem:[#allocation2 + $0x18] sm:$0xe]  ;;  %v3968_v47 = vcombine.low %v1361_v38, %v1364_v39  ;;  %v1376_v48 = vrot.slane %v1374_v43, 4  ;;  %v1388_v54 = vrot.slane %v5300_v27, 5  ;;  %v4819_v26 = vld [vmem:[#allocation2 + $0x48] sm:$0xff]  }
  0x9b   : > { %4528 = vmatpush3.bf16.msra.mxu1 %v4799_v22  ;;  %4497 = vmatprep.subr.bf16.mxu0 %v4802_v45  ;;  %v1357_v22 = vsel %vm5372_vm14, %v1355_v61, %v1356_v12  ;;  %v4808_v12 = vld [vmem:[%s6043_s1 + $0x138] sm:$0xff]   ;;  %v3945_v30 = vrot.slane %v1326_v37, 9  ;;  %v1383_v55 = vrot.slane %v1381_v46, 4  ;;  %v1384_v57 = vrot.slane %v5288_v13, 5  ;;  %v1861_v38 = vld [vmem:[#allocation2 + $0x14] sm:$0x1] }
  0x9c   : > { %4529 = vmatprep.subr.bf16.mxu1 %v4803_v56  ;;  %v3967_v41 = vcombine.low %v1354_v16, %v1357_v22  ;;  %v1329_v61 = vld [vmem:[#allocation2 + $0x3c] sm:$0xe]  ;;  %v1375_v27 = vsel %vm5372_vm14, %v3946_v35, %v1374_v43  ;;  %v1378_v62 = vsel %vm5372_vm14, %v1376_v48, %v1377_v19  ;;  %v1395_v13 = vrot.slane %v5331_v4, 5  ;;  %v4827_v43 = vld [vmem:[%s6043_s1 + $0x148] sm:$0xff]  }
  0x9d   : > { %4450 = vmatmul.mubr.bf16.gmra.mxu0 %v3918_v58  ;;  %v1368_v44 = vsel %vm5372_vm14, %v3945_v30, %v1367_v40  ;;  %v1390_v3 = vrot.slane %v1388_v54, 4  ;;  %v1385_v8 = vsel %vm5372_vm14, %v1383_v55, %v1384_v57  ;;  %v3948_v9 = vrot.slane %v1329_v61, 9  ;;  %v4821_v22 = vld [vmem:[%s6043_s1 + $0x158] sm:$0xff]   ;;  %v1859_v30 = vld [vmem:[#allocation2 + $0xc] sm:$0xf] }
  0x9e   : > { %4482 = vmatmul.mubr.bf16.gmra.mxu1 %v3934_v5  ;;  %4498 = vmatpush3.bf16.msra.mxu0 %v4802_v45  ;;  %v1371_v45 = vsel %vm5372_vm14, %v1369_v32, %v1370_v33  ;;  %v1391_v5 = vrot.slane %v5309_v63, 5  ;;  %v1398_v14 = vrot.slane %v5335_v7, 5  ;;  %v3970_v15 = vcombine.low %v1375_v27, %v1378_v62  ;;  %v4816_v63 = vld [vmem:[%s6043_s1 + $0x120] sm:$0xff]   ;;  %v4822_v32 = vld [vmem:[%s6043_s1 + $0x110] sm:$0xff]   ;;  %v1863_v55 = vld [vmem:[#allocation2 + $0x1c] sm:$0xf] }
  0x9f   : > { %4530 = vmatpush3.bf16.msra.mxu1 %v4803_v56  ;;  %4499 = vmatprep.subr.bf16.mxu0 %v4804_v6  ;;  %v3969_v50 = vcombine.low %v1368_v44, %v1371_v45  ;;  %v3947_v56 = vrot.slane %v1328_v49, 9  ;;  %v1397_v17 = vrot.slane %v1395_v13, 4  ;;  %v1402_v4 = vrot.slane %v5344_v20, 5  ;;  %v4826_v57 = vld [vmem:[%s6043_s1 + $0x108] sm:$0xff]   ;;  %v1864_v61 = vld [vmem:[#allocation2 + $0x20] sm:$0x1] }
  0xa0   : > { %4531 = vmatprep.subr.bf16.mxu1 %v4805_v51  ;;  %4533 = vmatprep.mubr.bf16.mxu1 %v4806_v18  ;;  %v1405_v7 = vrot.slane %v5350_v29, 5  ;;  %v3950_v20 = vrot.slane %v1331_v10, 9  ;;  %v1389_v24 = vsel %vm5372_vm14, %v3948_v9, %v1388_v54  ;;  %v1392_v25 = vsel %vm5372_vm14, %v1390_v3, %v1391_v5  ;;  %v4820_v29 = vld [vmem:[%s6043_s1 + $0x118] sm:$0xff]  }
  0xa1   : > { %4501 = vmatprep.mubr.bf16.mxu0 %v3967_v41  ;;  %v1404_v16 = vrot.slane %v1402_v4, 4  ;;  %v1399_v31 = vsel %vm5372_vm14, %v1397_v17, %v1398_v14  ;;  %v3972_v37 = vcombine.low %v1389_v24, %v1392_v25  ;;  %v1884_v39 = vshrl.u32 %v1859_v30, 16 }
  0xa2   : > { %4500 = vmatpush3.bf16.msra.mxu0 %v4804_v6  ;;  %v1382_v6 = vsel %vm5372_vm14, %v3947_v56, %v1381_v46  ;;  %v5471_v58 = vsel %vm5372_vm14, %v3950_v20, %v1402_v4  ;;  %v1903_v45 = vshll.u32 %v1861_v38, 16  ;;  %v2285_v46 = vld [vmem:[#allocation2 + $0xc] sm:$0xe]  ;;  %v2322_v49 = vrot.slane %v1861_v38, 5  ;;  %v1867_v38 = vld [vmem:[#allocation2 + $0x2c] sm:$0x1] }
  0xa3   : > { %4532 = vmatpush3.bf16.msra.mxu1 %v4805_v51  ;;  %4549 = vmatprep.subr.bf16.mxu0 %v4808_v12  ;;  %v1330_v51 = vld [vmem:[#allocation2 + $0x48] sm:$0xe]  ;;  %v3971_v21 = vcombine.low %v1382_v6, %v1385_v8  ;;  %v5475_v41 = vsel %vm5372_vm14, %v1404_v16, %v1405_v7  ;;  %v1886_v19 = vrot.slane %v1884_v39, 4  ;;  %v4047_v48 = vrot.slane %v2285_v46, 9  ;;  %v4829_v8 = vld [vmem:[%s6043_s1 + $0x140] sm:$0xff]  }
  0xa4   : > { %4581 = vmatprep.subr.bf16.mxu1 %v4809_v2  ;;  %v3949_v18 = vrot.slane %v1330_v51, 9  ;;  %v1917_v5 = vshll.u32 %v1863_v55, 16  ;;  %v1921_v6 = vshrl.u32 %v1863_v55, 16  ;;  %v2326_v7 = vrot.slane %v1863_v55, 5 }
  0xa5   : > { %4502 = vmatmul.mubr.bf16.vlgmr.msra.gmra.mxu0 %v3968_v47  ;;  %v2329_v25 = vrot.slane %v1864_v61, 5 }
  0xa6   : > { %4534 = vmatmul.mubr.bf16.vlgmr.msra.gmra.mxu1 %v4807_v23  ;;  %4550 = vmatpush3.bf16.msra.mxu0 %v4808_v12  ;;  %v1396_v40 = vsel %vm5372_vm14, %v3949_v18, %v1395_v13  ;;  %v4823_v12 = vld [vmem:[%s6043_s1 + $0x150] sm:$0xff]   ;;  %v3974_v23 = vcombine.low %v5471_v58, %v5475_v41  ;;  %v1919_v4 = vrot.slane %v1917_v5, 5  ;;  %v1927_v18 = vshll.u32 %v1864_v61, 16  ;;  %v4830_v58 = vld [vmem:[%s6043_s1 + $0x1b8] sm:$0xff]  }
  0xa7   : > { %4582 = vmatpush3.bf16.msra.mxu1 %v4809_v2  ;;  %4537 = vmatprep.mubr.bf16.mxu1 %v4812_v42  ;;  %v4824_v2 = vld [vmem:[#allocation2 + $0x54] sm:$0xff]   ;;  %v3973_v33 = vcombine.low %v1396_v40, %v1399_v31  ;;  %v1887_v42 = vshll.u32 %v1859_v30, 16  ;;  %v1865_v30 = vld [vmem:[#allocation2 + $0x24] sm:$0xf]  ;;  %v2288_v61 = vld [vmem:[#allocation2 + $0x30] sm:$0xe] }
  0xa8   : > { %4583 = vmatprep.subr.bf16.mxu1 %v4811_v34  ;;  %4551 = vmatprep.subr.bf16.mxu0 %v4810_v52  ;;  %v1929_v24 = vrot.slane %v1927_v18, 5  ;;  %v1932_v39 = vshrl.u32 %v1865_v30, 16 }
  0xa9   : > { %4505 = vmatprep.mubr.bf16.mxu0 %v3969_v50  ;;  %v1889_v35 = vrot.slane %v1887_v42, 5  ;;  %v1862_v50 = vld [vmem:[#allocation2 + $0x18] sm:$0xf]  ;;  %v1935_v42 = vshll.u32 %v1865_v30, 16 }
  0xaa   : > { %4552 = vmatpush3.bf16.msra.mxu0 %v4810_v52  ;;  %v4825_v52 = vld [vmem:[#allocation2 + $0x60] sm:$0xff]   ;;  %v1908_v27 = vshrl.u32 %v1862_v50, 16  ;;  %v1911_v62 = vshll.u32 %v1862_v50, 16 }
  0xab   : > { %4584 = vmatpush3.bf16.msra.mxu1 %v4811_v34  ;;  %4553 = vmatprep.subr.bf16.mxu0 %v4814_v36  ;;  %v1860_v34 = vld [vmem:[#allocation2 + $0x10] sm:$0xf] }
  0xac   : > { %4585 = vmatprep.subr.bf16.mxu1 %v4815_v11  ;;  %v1893_v28 = vshll.u32 %v1860_v34, 16  ;;  %v1897_v44 = vshrl.u32 %v1860_v34, 16  ;;  %v2319_v47 = vrot.slane %v1860_v34, 5  ;;  %v1913_v51 = vrot.slane %v1911_v62, 5 }
  0xad   : > { %4506 = vmatmul.mubr.bf16.gmra.mxu0 %v3970_v15  ;;  %v1910_v15 = vrot.slane %v1908_v27, 4 }
  0xae   : > { %4538 = vmatmul.mubr.bf16.gmra.mxu1 %v4813_v53  ;;  %4554 = vmatpush3.bf16.msra.mxu0 %v4814_v36  ;;  %v1895_v53 = vrot.slane %v1893_v28, 5  ;;  %v1899_v54 = vrot.slane %v1897_v44, 4  ;;  %v2321_v56 = vrot.slane %v2319_v47, 4  ;;  %v1890_v36 = vor.u32 %v1889_v35, %v1886_v19 }
  0xaf   : > { %4586 = vmatpush3.bf16.msra.mxu1 %v4815_v11  ;;  %4541 = vmatprep.mubr.bf16.mxu1 %v4818_v0  ;;  %v1905_v11 = vrot.slane %v1903_v45, 5  ;;  %v2286_v0 = vld [vmem:[#allocation2 + $0x18] sm:$0xe]  ;;  %v1914_v10 = vor.u32 %v1913_v51, %v1910_v15  ;;  %v1868_v45 = vld [vmem:[#allocation2 + $0x30] sm:$0xf]  ;;  %v1937_v19 = vrot.slane %v1935_v42, 5 }
  0xb0   : > { %4587 = vmatprep.subr.bf16.mxu1 %v4817_v59  ;;  %4555 = vmatprep.subr.bf16.mxu0 %v4816_v63  ;;  %v1900_v13 = vor.u32 %v1899_v54, %v1895_v53  ;;  %v2323_v3 = vsel %vm5372_vm14, %v2321_v56, %v2322_v49  ;;  %v1891_v9 = vrot.slane %v1890_v36, 4  ;;  %v4048_v16 = vrot.slane %v2286_v0, 9  ;;  %v4832_v56 = vld [vmem:[%s6043_s1 + $0x1b0] sm:$0xff]  }
  0xb1   : > { %4509 = vmatprep.mubr.bf16.mxu0 %v3971_v21  ;;  %v1951_v35 = vshll.u32 %v1867_v38, 16  ;;  %v2336_v36 = vrot.slane %v1867_v38, 5 }
  0xb2   : > { %4556 = vmatpush3.bf16.msra.mxu0 %v4816_v63  ;;  %v1901_v17 = vrot.slane %v1900_v13, 4  ;;  %v1923_v63 = vrot.slane %v1921_v6, 4  ;;  %v1896_v21 = vsel %vm5218_vm11, %v1891_v9, %v1895_v53  ;;  %v2327_v40 = vsel %vm5372_vm14, %v4048_v16, %v2326_v7 }
  0xb3   : > { %4588 = vmatpush3.bf16.msra.mxu1 %v4817_v59  ;;  %4557 = vmatprep.subr.bf16.mxu0 %v4820_v29  ;;  %v2320_v59 = vsel %vm5372_vm14, %v4047_v48, %v2319_v47  ;;  %v4833_v47 = vld [vmem:[%s6043_s1 + $0x1f0] sm:$0xff]   ;;  %v1959_v13 = vshll.u32 %v1868_v45, 16 }
  0xb4   : > { %4589 = vmatprep.subr.bf16.mxu1 %v4821_v22  ;;  %v4071_v14 = vcombine.low %v2320_v59, %v2323_v3  ;;  %v1924_v20 = vor.u32 %v1923_v63, %v1919_v4  ;;  %v1869_v48 = vld [vmem:[#allocation2 + $0x34] sm:$0xf]  ;;  %v1956_v59 = vshrl.u32 %v1868_v45, 16 }
  0xb5   : > { %4510 = vmatmul.mubr.bf16.gmra.mxu0 %v3972_v37  ;;  %v1965_v6 = vshll.u32 %v1869_v48, 16  ;;  %v1961_v15 = vrot.slane %v1959_v13, 5 }
  0xb6   : > { %4542 = vmatmul.mubr.bf16.gmra.mxu1 %v4819_v26  ;;  %4558 = vmatpush3.bf16.msra.mxu0 %v4820_v29  ;;  %v4828_v26 = vld [vmem:[%s6043_s1 + $0x100] sm:$0xff]   ;;  %v1915_v29 = vrot.slane %v1914_v10, 4  ;;  %v1925_v37 = vrot.slane %v1924_v20, 4  ;;  %v1958_v5 = vrot.slane %v1956_v59, 4  ;;  %v1871_v20 = vld [vmem:[#allocation2 + $0x3c] sm:$0xf] }
  0xb7   : > { %4590 = vmatpush3.bf16.msra.mxu1 %v4821_v22  ;;  %4545 = vmatprep.mubr.bf16.mxu1 %v4824_v2  ;;  %v1906_v22 = vsel %vm5218_vm11, %v1901_v17, %v1905_v11  ;;  %v4831_v2 = vld [vmem:[%s6043_s1 + $0x1f8] sm:$0xff]   ;;  %v4835_v17 = vld [vmem:[%s6043_s1 + $0x1e8] sm:$0xff]   ;;  %v1967_v18 = vrot.slane %v1965_v6, 5  ;;  %v1980_v30 = vshrl.u32 %v1871_v20, 16 }
  0xb8   : > { %4591 = vmatprep.subr.bf16.mxu1 %v4823_v12  ;;  %4559 = vmatprep.subr.bf16.mxu0 %v4822_v32  ;;  %v4031_v31 = vcombine.low %v1896_v21, %v1906_v22  ;;  %v1930_v28 = vsel %vm5218_vm11, %v1925_v37, %v1929_v24  ;;  %v5525_v11 = vld [vmem:[#allocation2 + $0x38] sm:$0x1]  ;;  %v1962_v16 = vor.u32 %v1961_v15, %v1958_v5  ;;  %v4050_v22 = vrot.slane %v2288_v61, 9  ;;  %v2290_v59 = vld [vmem:[#allocation2 + $0x48] sm:$0xe] }
  0xb9   : > { %4513 = vmatprep.mubr.bf16.mxu0 %v3973_v33  ;;  %v1920_v33 = vsel %vm5218_vm11, %v1915_v29, %v1919_v4  ;;  %v1975_v51 = vshll.u32 %v5525_v11, 16  ;;  %v4834_v29 = vld [vmem:[%s6043_s1 + $0x1a8] sm:$0xff]  }
  0xba   : > { %4560 = vmatpush3.bf16.msra.mxu0 %v4822_v32  ;;  %v1866_v32 = vld [vmem:[#allocation2 + $0x28] sm:$0xf]  ;;  %v4032_v46 = vcombine.low %v1920_v33, %v1930_v28  ;;  %v1963_v37 = vrot.slane %v1962_v16, 4 }
  0xbb   : > { %4592 = vmatpush3.bf16.msra.mxu1 %v4823_v12  ;;  %4561 = vmatprep.subr.bf16.mxu0 %v4826_v57  ;;  %v2328_v12 = vrot.slane %v2326_v7, 4  ;;  %v1941_v41 = vshll.u32 %v1866_v32, 16  ;;  %v2333_v54 = vrot.slane %v1866_v32, 5  ;;  %v1977_v7 = vrot.slane %v1975_v51, 5 }
  0xbc   : > { %4593 = vmatprep.subr.bf16.mxu1 %v4827_v43  ;;  %v1968_v28 = vsel %vm5218_vm11, %v1963_v37, %v1967_v18 }
  0xbd   : > { %4514 = vmatmul.mubr.bf16.gmra.mxu0 %v3974_v23  ;;  %v2330_v34 = vsel %vm5372_vm14, %v2328_v12, %v2329_v25  ;;  %v1945_v23 = vshrl.u32 %v1866_v32, 16  ;;  %v1943_v49 = vrot.slane %v1941_v41, 5  ;;  %v2335_v0 = vrot.slane %v2333_v54, 4  ;;  %v1872_v12 = vld [vmem:[#allocation2 + $0x40] sm:$0xf] }
  0xbe   : > { %4546 = vmatmul.mubr.bf16.gmra.mxu1 %v4825_v52  ;;  %4562 = vmatpush3.bf16.msra.mxu0 %v4826_v57  ;;  %v4072_v44 = vcombine.low %v2327_v40, %v2330_v34  ;;  %v1934_v52 = vrot.slane %v1932_v39, 4  ;;  %v1953_v57 = vrot.slane %v1951_v35, 5  ;;  %v4837_v40 = vld [vmem:[%s6043_s1 + $0x1e0] sm:$0xff]   ;;  %v1983_v32 = vshll.u32 %v1871_v20, 16  ;;  %v1875_v35 = vld [vmem:[#allocation2 + $0x4c] sm:$0xf] }
  0xbf   : > { %4594 = vmatpush3.bf16.msra.mxu1 %v4827_v43  ;;  %4597 = vmatprep.mubr.bf16.mxu1 %v4071_v14  ;;  %v2287_v43 = vld [vmem:[#allocation2 + $0x24] sm:$0xe]  ;;  %v1947_v50 = vrot.slane %v1945_v23, 4  ;;  %v2337_v14 = vsel %vm5372_vm14, %v2335_v0, %v2336_v36  ;;  %v1989_v33 = vshll.u32 %v1872_v12, 16  ;;  %v1993_v42 = vshrl.u32 %v1872_v12, 16 }
  0xc0   : > { %4595 = vmatprep.subr.bf16.mxu1 %v4829_v8  ;;  %4563 = vmatprep.subr.bf16.mxu0 %v4828_v26  ;;  %v4049_v53 = vrot.slane %v2287_v43, 9  ;;  %v1938_v55 = vor.u32 %v1937_v19, %v1934_v52  ;;  %v2289_v43 = vld [vmem:[#allocation2 + $0x3c] sm:$0xe]  ;;  %v1985_v41 = vrot.slane %v1983_v32, 5  ;;  %v1874_v19 = vld [vmem:[#allocation2 + $0x48] sm:$0xf] }
  0xc1   : > { %4565 = vmatprep.mubr.bf16.mxu0 %v4031_v31  ;;  %v1948_v27 = vor.u32 %v1947_v50, %v1943_v49  ;;  %v2343_v31 = vrot.slane %v5525_v11, 5  ;;  %v1991_v23 = vrot.slane %v1989_v33, 5  ;;  %v4839_v11 = vld [vmem:[%s6043_s1 + $0x1d8] sm:$0xff]   ;;  %v2013_v0 = vshll.u32 %v1875_v35, 16  ;;  %v1877_v20 = vld [vmem:[#allocation2 + $0x54] sm:$0xf] }
  0xc2   : > { %4564 = vmatpush3.bf16.msra.mxu0 %v4828_v26  ;;  %v2334_v62 = vsel %vm5372_vm14, %v4049_v53, %v2333_v54  ;;  %v1939_v3 = vrot.slane %v1938_v55, 4  ;;  %v2340_v26 = vrot.slane %v1869_v48, 5  ;;  %v4051_v53 = vrot.slane %v2289_v43, 9  ;;  %v5560_v54 = vld [vmem:[#allocation2 + $0x50] sm:$0x1] }
  0xc3   : > { %4596 = vmatpush3.bf16.msra.mxu1 %v4829_v8  ;;  %4613 = vmatprep.subr.bf16.mxu0 %v4830_v58  ;;  %v1969_v8 = vshrl.u32 %v1869_v48, 16  ;;  %v1949_v9 = vrot.slane %v1948_v27, 4  ;;  %v4073_v63 = vcombine.low %v2334_v62, %v2337_v14  ;;  %v2004_v27 = vshrl.u32 %v1874_v19, 16  ;;  %v2291_v43 = vld [vmem:[#allocation2 + $0x54] sm:$0xe] }
  0xc4   : > { %4645 = vmatprep.subr.bf16.mxu1 %v4831_v2  ;;  %v1944_v4 = vsel %vm5218_vm11, %v1939_v3, %v1943_v49  ;;  %v2341_v38 = vsel %vm5372_vm14, %v4050_v22, %v2340_v26  ;;  %v2342_v39 = vrot.slane %v2340_v26, 4  ;;  %v2007_v62 = vshll.u32 %v1874_v19, 16  ;;  %v1880_v19 = vld [vmem:[#allocation2 + $0x60] sm:$0xf] }
  0xc5   : > { %4566 = vmatmul.mubr.bf16.vlgmr.msra.gmra.mxu0 %v4032_v46  ;;  %v1971_v21 = vrot.slane %v1969_v8, 4  ;;  %v1954_v10 = vsel %vm5218_vm11, %v1949_v9, %v1953_v57  ;;  %v2347_v57 = vrot.slane %v1872_v12, 5  ;;  %v2017_v6 = vshrl.u32 %v1875_v35, 16  ;;  %v4838_v8 = vld [vmem:[%s6043_s1 + $0x198] sm:$0xff]   ;;  %v4843_v12 = vld [vmem:[%s6043_s1 + $0x1c8] sm:$0xff]  }
  0xc6   : > { %4598 = vmatmul.mubr.bf16.vlgmr.msra.gmra.mxu1 %v4072_v44  ;;  %4614 = vmatpush3.bf16.msra.mxu0 %v4830_v58  ;;  %v4033_v24 = vcombine.low %v1944_v4, %v1954_v10  ;;  %v4836_v44 = vld [vmem:[%s6043_s1 + $0x1a0] sm:$0xff]   ;;  %v1982_v58 = vrot.slane %v1980_v30, 4  ;;  %v2344_v46 = vsel %vm5372_vm14, %v2342_v39, %v2343_v31  ;;  %v2006_v14 = vrot.slane %v2004_v27, 4 }
  0xc7   : > { %4646 = vmatpush3.bf16.msra.mxu1 %v4831_v2  ;;  %4615 = vmatprep.subr.bf16.mxu0 %v4832_v56  ;;  %v1972_v25 = vor.u32 %v1971_v21, %v1967_v18  ;;  %v1873_v2 = vld [vmem:[#allocation2 + $0x44] sm:$0x1]  ;;  %v4074_v49 = vcombine.low %v2341_v38, %v2344_v46  ;;  %v2348_v3 = vsel %vm5372_vm14, %v4051_v53, %v2347_v57  ;;  %v2349_v5 = vrot.slane %v2347_v57, 4 }
  0xc8   : > { %4647 = vmatprep.subr.bf16.mxu1 %v4833_v47  ;;  %4601 = vmatprep.mubr.bf16.mxu1 %v4073_v63  ;;  %v1999_v52 = vshll.u32 %v1873_v2, 16  ;;  %v1986_v50 = vor.u32 %v1985_v41, %v1982_v58  ;;  %v2350_v36 = vrot.slane %v1873_v2, 5  ;;  %v2009_v15 = vrot.slane %v2007_v62, 5  ;;  %v1879_v2 = vld [vmem:[#allocation2 + $0x5c] sm:$0x1] }
  0xc9   : > { %4569 = vmatprep.mubr.bf16.mxu0 %v4033_v24  ;;  %v1973_v34 = vrot.slane %v1972_v25, 4  ;;  %v2015_v51 = vrot.slane %v2013_v0, 5  ;;  %v2019_v18 = vrot.slane %v2017_v6, 4  ;;  %v2023_v21 = vshll.u32 %v5560_v54, 16  ;;  %v1878_v24 = vld [vmem:[#allocation2 + $0x58] sm:$0xf] }
  0xca   : > { %4616 = vmatpush3.bf16.msra.mxu0 %v4832_v56  ;;  %v2001_v55 = vrot.slane %v1999_v52, 5  ;;  %v1987_v61 = vrot.slane %v1986_v50, 4  ;;  %v2351_v63 = vsel %vm5372_vm14, %v2349_v5, %v2350_v36  ;;  %v4052_v22 = vrot.slane %v2290_v59, 9  ;;  %v2292_v59 = vld [vmem:[#allocation2 + $0x60] sm:$0xe] }
  0xcb   : > { %4648 = vmatpush3.bf16.msra.mxu1 %v4833_v47  ;;  %v1978_v45 = vsel %vm5218_vm11, %v1973_v34, %v1977_v7  ;;  %4617 = vmatprep.subr.bf16.mxu0 %v4834_v29  ;;  %v1995_v47 = vrot.slane %v1993_v42, 4  ;;  %v4075_v16 = vcombine.low %v2348_v3, %v2351_v63  ;;  %v2010_v7 = vor.u32 %v2009_v15, %v2006_v14 }
  0xcc   : > { %4649 = vmatprep.subr.bf16.mxu1 %v4835_v17  ;;  %v4034_v48 = vcombine.low %v1968_v28, %v1978_v45  ;;  %v1992_v9 = vsel %vm5218_vm11, %v1987_v61, %v1991_v23  ;;  %v2020_v25 = vor.u32 %v2019_v18, %v2015_v51  ;;  %v2025_v26 = vrot.slane %v2023_v21, 5 }
  0xcd   : > { %v1996_v56 = vor.u32 %v1995_v47, %v1991_v23  ;;  %v2354_v31 = vrot.slane %v1875_v35, 5  ;;  %v2011_v37 = vrot.slane %v2010_v7, 4  ;;  %v2028_v30 = vshrl.u32 %v1877_v20, 16  ;;  %v4842_v23 = vld [vmem:[%s6043_s1 + $0x188] sm:$0xff]   ;;  %v1881_v35 = vld [vmem:[#allocation2 + $0x64] sm:$0xf] }
  0xce   : > { %4570 = vmatmul.mubr.bf16.gmra.mxu0 %v4034_v48  ;;  %4602 = vmatmul.mubr.bf16.gmra.mxu1 %v4074_v49  ;;  %v2031_v32 = vshll.u32 %v1877_v20, 16  ;;  %v2037_v33 = vshll.u32 %v1878_v24, 16  ;;  %v2021_v34 = vrot.slane %v2020_v25, 4  ;;  %v2041_v42 = vshrl.u32 %v1878_v24, 16 }
  0xcf   : > { %4650 = vmatpush3.bf16.msra.mxu1 %v4835_v17  ;;  %4618 = vmatpush3.bf16.msra.mxu0 %v4834_v29  ;;  %v1997_v13 = vrot.slane %v1996_v56, 4  ;;  %v4841_v17 = vld [vmem:[%s6043_s1 + $0x1d0] sm:$0xff]   ;;  %v2357_v29 = vrot.slane %v5560_v54, 5  ;;  %v2355_v38 = vsel %vm5372_vm14, %v4052_v22, %v2354_v31  ;;  %v2356_v39 = vrot.slane %v2354_v31, 4  ;;  %v5598_v54 = vld [vmem:[#allocation2 + $0x68] sm:$0x1] }
  0xd0   : > { %4651 = vmatprep.subr.bf16.mxu1 %v4837_v40  ;;  %4619 = vmatprep.subr.bf16.mxu0 %v4836_v44  ;;  %v2016_v28 = vsel %vm5218_vm11, %v2011_v37, %v2015_v51  ;;  %v2033_v58 = vrot.slane %v2031_v32, 5  ;;  %v2039_v41 = vrot.slane %v2037_v33, 5  ;;  %v2026_v45 = vsel %vm5218_vm11, %v2021_v34, %v2025_v26  ;;  %v2826_v31 = vld [vmem:[#allocation2 + $0x18] sm:$0xf] }
  0xd1   : > { %v2002_v4 = vsel %vm5218_vm11, %v1997_v13, %v2001_v55  ;;  %4605 = vmatprep.mubr.bf16.mxu1 %v4075_v16  ;;  %v2358_v46 = vsel %vm5372_vm14, %v2356_v39, %v2357_v29  ;;  %v2043_v47 = vrot.slane %v2041_v42, 4  ;;  %v2047_v52 = vshll.u32 %v1879_v2, 16 }
  0xd2   : > { %v4035_v10 = vcombine.low %v1992_v9, %v2002_v4  ;;  %v4036_v48 = vcombine.low %v2016_v28, %v2026_v45  ;;  %v4076_v49 = vcombine.low %v2355_v38, %v2358_v46  ;;  %v4053_v53 = vrot.slane %v2291_v43, 9  ;;  %v4846_v38 = vld [vmem:[#allocation2 + $0x18] sm:$0xff]   ;;  %v5637_v45 = vld [vmem:[#allocation2 + $0x28] sm:$0xf] }
  0xd3   : > { %4652 = vmatpush3.bf16.msra.mxu1 %v4837_v40  ;;  %4620 = vmatpush3.bf16.msra.mxu0 %v4836_v44  ;;  %v4840_v40 = vld [vmem:[%s6043_s1 + $0x190] sm:$0xff]   ;;  %v2030_v44 = vrot.slane %v2028_v30, 4  ;;  %v2044_v56 = vor.u32 %v2043_v47, %v2039_v41  ;;  %v2049_v55 = vrot.slane %v2047_v52, 5  ;;  %v2361_v57 = vrot.slane %v1878_v24, 5 }
  0xd4   : > { %4653 = vmatprep.subr.bf16.mxu1 %v4839_v11  ;;  %4573 = vmatprep.mubr.bf16.mxu0 %v4035_v10  ;;  %v2364_v36 = vrot.slane %v1879_v2, 5  ;;  %v2052_v27 = vshrl.u32 %v1880_v19, 16  ;;  %v2055_v62 = vshll.u32 %v1880_v19, 16  ;;  %v2061_v0 = vshll.u32 %v1881_v35, 16 }
  0xd5   : > { %4621 = vmatprep.subr.bf16.mxu0 %v4838_v8  ;;  %v2034_v50 = vor.u32 %v2033_v58, %v2030_v44  ;;  %v2045_v13 = vrot.slane %v2044_v56, 4  ;;  %v2362_v3 = vsel %vm5372_vm14, %v4053_v53, %v2361_v57  ;;  %v2363_v5 = vrot.slane %v2361_v57, 4 }
  0xd6   : > { %4574 = vmatmul.mubr.bf16.gmra.mxu0 %v4036_v48  ;;  %4606 = vmatmul.mubr.bf16.gmra.mxu1 %v4076_v49  ;;  %v2065_v6 = vshrl.u32 %v1881_v35, 16  ;;  %v2054_v14 = vrot.slane %v2052_v27, 4  ;;  %v2057_v15 = vrot.slane %v2055_v62, 5  ;;  %v2063_v51 = vrot.slane %v2061_v0, 5  ;;  %v4847_v27 = vld [vmem:[#allocation2 + $0x24] sm:$0xff]  }
  0xd7   : > { %4654 = vmatpush3.bf16.msra.mxu1 %v4839_v11  ;;  %4622 = vmatpush3.bf16.msra.mxu0 %v4838_v8  ;;  %v4845_v11 = vld [vmem:[%s6043_s1 + $0x1c0] sm:$0xff]   ;;  %v2035_v61 = vrot.slane %v2034_v50, 4  ;;  %v2050_v4 = vsel %vm5218_vm11, %v2045_v13, %v2049_v55  ;;  %v2365_v63 = vsel %vm5372_vm14, %v2363_v5, %v2364_v36  ;;  %v2071_v21 = vshll.u32 %v5598_v54, 16 }
  0xd8   : > { %4655 = vmatprep.subr.bf16.mxu1 %v4841_v17  ;;  %4623 = vmatprep.subr.bf16.mxu0 %v4840_v40  ;;  %v4844_v8 = vld [vmem:[%s6043_s1 + $0x180] sm:$0xff]   ;;  %v2067_v18 = vrot.slane %v2065_v6, 4  ;;  %v4077_v16 = vcombine.low %v2362_v3, %v2365_v63  ;;  %v2058_v7 = vor.u32 %v2057_v15, %v2054_v14  ;;  %v4054_v22 = vrot.slane %v2292_v59, 9  ;;  %v2832_v6 = vld [vmem:[#allocation2 + $0x30] sm:$0xf] }
  0xd9   : > { %v2040_v9 = vsel %vm5218_vm11, %v2035_v61, %v2039_v41  ;;  %v2073_v24 = vrot.slane %v2071_v21, 5  ;;  %v2368_v25 = vrot.slane %v1881_v35, 5  ;;  %v2371_v26 = vrot.slane %v5598_v54, 5  ;;  %v5639_v35 = vld [vmem:[#allocation2 + $0x2c] sm:$0x1]  ;;  %v5654_v15 = vld [vmem:[%s6043_s1 + $0x230] sm:$0xff]  }
  0xda   : > { %v4037_v10 = vcombine.low %v2040_v9, %v2050_v4  ;;  %v2068_v20 = vor.u32 %v2067_v18, %v2063_v51  ;;  %4609 = vmatprep.mubr.bf16.mxu1 %v4077_v16  ;;  %v2059_v29 = vrot.slane %v2058_v7, 4  ;;  %v2851_v37 = vshrl.u32 %v2826_v31, 16 }
  0xdb   : > { %4656 = vmatpush3.bf16.msra.mxu1 %v4841_v17  ;;  %4624 = vmatpush3.bf16.msra.mxu0 %v4840_v40  ;;  %v5613_v17 = vld [vmem:[%s6043_s1 + $0x238] sm:$0xff]   ;;  %v2369_v30 = vsel %vm5372_vm14, %v4054_v22, %v2368_v25  ;;  %v2370_v32 = vrot.slane %v2368_v25, 4  ;;  %v2854_v33 = vshll.u32 %v2826_v31, 16  ;;  %v2888_v56 = vshrl.u32 %v5637_v45, 16 }
  0xdc   : > { %4657 = vmatprep.subr.bf16.mxu1 %v4843_v12  ;;  %4625 = vmatprep.subr.bf16.mxu0 %v4842_v23  ;;  %v5621_v40 = vld [vmem:[#allocation2 + $0x1c] sm:$0xf]  ;;  %v2069_v2 = vrot.slane %v2068_v20, 4  ;;  %v2064_v34 = vsel %vm5218_vm11, %v2059_v29, %v2063_v51  ;;  %v2853_v39 = vrot.slane %v2851_v37, 4  ;;  %v2894_v55 = vshll.u32 %v5639_v35, 16 }
  0xdd   : > { %4577 = vmatprep.mubr.bf16.mxu0 %v4037_v10  ;;  %v2860_v42 = vshll.u32 %v5621_v40, 16  ;;  %v2864_v43 = vshrl.u32 %v5621_v40, 16  ;;  %v2372_v44 = vsel %vm5372_vm14, %v2370_v32, %v2371_v26  ;;  %v2856_v58 = vrot.slane %v2854_v33, 5  ;;  %v5656_v51 = vld [vmem:[#allocation2 + $0x38] sm:$0x1]  ;;  %v4850_v10 = vld [vmem:[#allocation2 + $0x30] sm:$0xff]  }
  0xde   : > { %v2074_v28 = vsel %vm5218_vm11, %v2069_v2, %v2073_v24  ;;  %v4078_v47 = vcombine.low %v2369_v30, %v2372_v44  ;;  %v2890_v0 = vrot.slane %v2888_v56, 4  ;;  %v2896_v13 = vrot.slane %v2894_v55, 5  ;;  %v2835_v26 = vld [vmem:[#allocation2 + $0x3c] sm:$0xf]  ;;  %v5663_v2 = vld [vmem:[#allocation2 + $0x40] sm:$0xf] }
  0xdf   : > { %4658 = vmatpush3.bf16.msra.mxu1 %v4843_v12  ;;  %4626 = vmatpush3.bf16.msra.mxu0 %v4842_v23  ;;  %v5623_v12 = vld [vmem:[#allocation2 + $0x20] sm:$0x1]  ;;  %v2829_v23 = vld [vmem:[#allocation2 + $0x24] sm:$0xf]  ;;  %v4038_v46 = vcombine.low %v2064_v34, %v2074_v28  ;;  %v2862_v52 = vrot.slane %v2860_v42, 5  ;;  %v2866_v19 = vrot.slane %v2864_v43, 4  ;;  %v2857_v48 = vor.u32 %v2856_v58, %v2853_v39 }
  0xe0   : > { %4659 = vmatprep.subr.bf16.mxu1 %v4845_v11  ;;  %4627 = vmatprep.subr.bf16.mxu0 %v4844_v8  ;;  %v2870_v41 = vshll.u32 %v5623_v12, 16  ;;  %v2875_v50 = vshrl.u32 %v2829_v23, 16  ;;  %v2878_v53 = vshll.u32 %v2829_v23, 16  ;;  %v2899_v4 = vshrl.u32 %v2832_v6, 16  ;;  %v5665_v30 = vld [vmem:[#allocation2 + $0x44] sm:$0x1] }
  0xe1   : > { %4578 = vmatmul.mubr.bf16.gmra.mxu0 %v4038_v46  ;;  %4610 = vmatmul.mubr.bf16.gmra.mxu1 %v4078_v47  ;;  %v2867_v54 = vor.u32 %v2866_v19, %v2862_v52  ;;  %v2858_v57 = vrot.slane %v2857_v48, 4  ;;  %v2902_v63 = vshll.u32 %v2832_v6, 16  ;;  %v2918_v25 = vshll.u32 %v5656_v51, 16  ;;  %v5672_v39 = vld [vmem:[%s6043_s1 + $0x228] sm:$0xff]  }
  0xe2   : > { %v2872_v49 = vrot.slane %v2870_v41, 5  ;;  %4629 = vmatprep.mubr.bf16.mxu0 %v4846_v38  ;;  %v2877_v36 = vrot.slane %v2875_v50, 4  ;;  %v2880_v59 = vrot.slane %v2878_v53, 5  ;;  %v2901_v20 = vrot.slane %v2899_v4, 4  ;;  %v5682_v56 = vld [vmem:[#allocation2 + $0x4c] sm:$0xf] }
  0xe3   : > { %4660 = vmatpush3.bf16.msra.mxu1 %v4845_v11  ;;  %4628 = vmatpush3.bf16.msra.mxu0 %v4844_v8  ;;  %v2884_v11 = vshll.u32 %v5637_v45, 16  ;;  %v2868_v61 = vrot.slane %v2867_v54, 4  ;;  %v2863_v3 = vsel %vm5218_vm11, %v2858_v57, %v2862_v52  ;;  %v5647_v8 = vld [vmem:[#allocation2 + $0x34] sm:$0xf]  ;;  %v2904_v24 = vrot.slane %v2902_v63, 5  ;;  %v4851_v52 = vld [vmem:[#allocation2 + $0x3c] sm:$0xff]  }
  0xe4   : > { %4709 = vmatprep.subr.bf16.mxu1 %v5613_v17  ;;  %4677 = vmatprep.subr.bf16.mxu0 %v5613_v17  ;;  %v2881_v5 = vor.u32 %v2880_v59, %v2877_v36  ;;  %v2908_v16 = vshll.u32 %v5647_v8, 16  ;;  %v2912_v7 = vshrl.u32 %v5647_v8, 16  ;;  %v2920_v34 = vrot.slane %v2918_v25, 5  ;;  %v4854_v54 = vld [vmem:[#allocation2 + $0x48] sm:$0xff]   ;;  %v5693_v36 = vld [vmem:[#allocation2 + $0x50] sm:$0x1] }
  0xe5   : > { %v2886_v62 = vrot.slane %v2884_v11, 5  ;;  %v2873_v9 = vsel %vm5218_vm11, %v2868_v61, %v2872_v49  ;;  %v2905_v33 = vor.u32 %v2904_v24, %v2901_v20  ;;  %v2923_v38 = vshrl.u32 %v2835_v26, 16  ;;  %v2838_v11 = vld [vmem:[#allocation2 + $0x48] sm:$0xf]  ;;  %v5699_v4 = vld [vmem:[#allocation2 + $0x58] sm:$0xf] }
  0xe6   : > { %v4135_v18 = vcombine.low %v2863_v3, %v2873_v9  ;;  %v2882_v21 = vrot.slane %v2881_v5, 4  ;;  %v2910_v29 = vrot.slane %v2908_v16, 5  ;;  %v2914_v37 = vrot.slane %v2912_v7, 4  ;;  %v2841_v3 = vld [vmem:[#allocation2 + $0x54] sm:$0xf] }
  0xe7   : > { %v2891_v14 = vor.u32 %v2890_v0, %v2886_v62  ;;  %v2926_v28 = vshll.u32 %v2835_v26, 16  ;;  %v2932_v44 = vshll.u32 %v5663_v2, 16  ;;  %v2906_v58 = vrot.slane %v2905_v33, 4 }
  0xe8   : > { %4661 = vmatprep.mubr.bf16.mxu1 %v4135_v18  ;;  %v2887_v31 = vsel %vm5218_vm11, %v2882_v21, %v2886_v62  ;;  %v2915_v43 = vor.u32 %v2914_v37, %v2910_v29  ;;  %v2925_v41 = vrot.slane %v2923_v38, 4  ;;  %v2936_v23 = vshrl.u32 %v5663_v2, 16  ;;  %v4856_v38 = vld [vmem:[%s6043_s1 + $0x218] sm:$0xff]  }
  0xe9   : > { %v2892_v22 = vrot.slane %v2891_v14, 4  ;;  %4630 = vmatmul.mubr.bf16.vlgmr.msra.gmra.mxu0 %v4847_v27  ;;  %v2942_v46 = vshll.u32 %v5665_v30, 16  ;;  %v2928_v19 = vrot.slane %v2926_v28, 5  ;;  %v2934_v48 = vrot.slane %v2932_v44, 5 }
  0xea   : > { %4678 = vmatpush3.bf16.msra.mxu0 %v5613_v17  ;;  %4633 = vmatprep.mubr.bf16.mxu0 %v4850_v10  ;;  %v2916_v47 = vrot.slane %v2915_v43, 4  ;;  %v2911_v49 = vsel %vm5218_vm11, %v2906_v58, %v2910_v29  ;;  %v2938_v50 = vrot.slane %v2936_v23, 4  ;;  %v2947_v59 = vshrl.u32 %v2838_v11, 16  ;;  %v5702_v10 = vld [vmem:[#allocation2 + $0x5c] sm:$0x1] }
  0xeb   : > { %v2897_v32 = vsel %vm5218_vm11, %v2892_v22, %v2896_v13  ;;  %4679 = vmatprep.subr.bf16.mxu0 %v5654_v15  ;;  %v2944_v53 = vrot.slane %v2942_v46, 5  ;;  %v2929_v57 = vor.u32 %v2928_v19, %v2925_v41  ;;  %v2950_v61 = vshll.u32 %v2838_v11, 16 }
  0xec   : > { %v4136_v42 = vcombine.low %v2887_v31, %v2897_v32  ;;  %v2921_v55 = vsel %vm5218_vm11, %v2916_v47, %v2920_v34  ;;  %v2939_v62 = vor.u32 %v2938_v50, %v2934_v48  ;;  %v2956_v0 = vshll.u32 %v5682_v56, 16  ;;  %v4855_v32 = vld [vmem:[#allocation2 + $0x54] sm:$0xff]   ;;  %v2844_v47 = vld [vmem:[#allocation2 + $0x60] sm:$0xf] }
  0xed   : > { %v4137_v27 = vcombine.low %v2911_v49, %v2921_v55  ;;  %v2960_v13 = vshrl.u32 %v5682_v56, 16  ;;  %v2930_v5 = vrot.slane %v2929_v57, 4  ;;  %v2949_v6 = vrot.slane %v2947_v59, 4  ;;  %v4858_v50 = vld [vmem:[#allocation2 + $0x60] sm:$0xff]  }
  0xee   : > { %4662 = vmatmul.mubr.bf16.vlgmr.msra.gmra.mxu1 %v4136_v42  ;;  %4680 = vmatpush3.bf16.msra.mxu0 %v5654_v15  ;;  %v2952_v9 = vrot.slane %v2950_v61, 5  ;;  %v2966_v14 = vshll.u32 %v5693_v36, 16  ;;  %v2940_v63 = vrot.slane %v2939_v62, 4  ;;  %v2958_v18 = vrot.slane %v2956_v0, 5 }
  0xef   : > { %4717 = vmatpush3.bf16.msra.mxu1 %v5613_v17  ;;  %v5691_v17 = vld [vmem:[%s6043_s1 + $0x220] sm:$0xff]   ;;  %4681 = vmatprep.subr.bf16.mxu0 %v5672_v39  ;;  %v2962_v21 = vrot.slane %v2960_v13, 4  ;;  %v2971_v16 = vshrl.u32 %v2841_v3, 16  ;;  %v2935_v7 = vsel %vm5218_vm11, %v2930_v5, %v2934_v48  ;;  %v2974_v24 = vshll.u32 %v2841_v3, 16  ;;  %v2847_v13 = vld [vmem:[#allocation2 + $0x6c] sm:$0xf] }
  0xf0   : > { %4710 = vmatprep.subr.bf16.mxu1 %v5654_v15  ;;  %4665 = vmatprep.mubr.bf16.mxu1 %v4137_v27  ;;  %v2953_v22 = vor.u32 %v2952_v9, %v2949_v6  ;;  %v2968_v20 = vrot.slane %v2966_v14, 5  ;;  %v2945_v25 = vsel %vm5218_vm11, %v2940_v63, %v2944_v53  ;;  %v2980_v31 = vshll.u32 %v5699_v4, 16  ;;  %v5737_v53 = vld [vmem:[#allocation2 + $0x68] sm:$0x1]  ;;  %v5745_v9 = vld [vmem:[#allocation2 + $0x70] sm:$0xf] }
  0xf1   : > { %4634 = vmatmul.mubr.bf16.gmra.mxu0 %v4851_v52  ;;  %v2973_v26 = vrot.slane %v2971_v16, 4  ;;  %v4138_v29 = vcombine.low %v2935_v7, %v2945_v25  ;;  %v2976_v33 = vrot.slane %v2974_v24, 5  ;;  %v2984_v34 = vshrl.u32 %v5699_v4, 16  ;;  %v5728_v52 = vld [vmem:[#allocation2 + $0x64] sm:$0xf] }
  0xf2   : > { %4682 = vmatpush3.bf16.msra.mxu0 %v5672_v39  ;;  %4637 = vmatprep.mubr.bf16.mxu0 %v4854_v54  ;;  %v2954_v37 = vrot.slane %v2953_v22, 4  ;;  %v2982_v43 = vrot.slane %v2980_v31, 5  ;;  %v2990_v28 = vshll.u32 %v5702_v10, 16  ;;  %v3321_v44 = vrot.slane %v5699_v4, 5  ;;  %v5747_v14 = vld [vmem:[#allocation2 + $0x74] sm:$0x1] }
  0xf3   : > { %4718 = vmatpush3.bf16.msra.mxu1 %v5654_v15  ;;  %v2963_v15 = vor.u32 %v2962_v21, %v2958_v18  ;;  %4683 = vmatprep.subr.bf16.mxu0 %v5691_v17  ;;  %v2977_v41 = vor.u32 %v2976_v33, %v2973_v26  ;;  %v2986_v23 = vrot.slane %v2984_v34, 4  ;;  %v3324_v46 = vrot.slane %v5702_v10, 5 }
  0xf4   : > { %4711 = vmatprep.subr.bf16.mxu1 %v5672_v39  ;;  %v2959_v58 = vsel %vm5218_vm11, %v2954_v37, %v2958_v18  ;;  %v2992_v48 = vrot.slane %v2990_v28, 5  ;;  %v5735_v49 = vrot.slane %v3321_v44, 4  ;;  %v2995_v54 = vshrl.u32 %v2844_v47, 16 }
  0xf5   : > { %v2964_v42 = vrot.slane %v2963_v15, 4  ;;  %v2978_v55 = vrot.slane %v2977_v41, 4  ;;  %v2987_v57 = vor.u32 %v2986_v23, %v2982_v43  ;;  %v2998_v59 = vshll.u32 %v2844_v47, 16  ;;  %v3256_v41 = vld [vmem:[#allocation2 + $0x48] sm:$0xe] }
  0xf6   : > { %4666 = vmatmul.mubr.bf16.gmra.mxu1 %v4138_v29  ;;  %4684 = vmatpush3.bf16.msra.mxu0 %v5691_v17  ;;  %v2997_v61 = vrot.slane %v2995_v54, 4  ;;  %v3004_v27 = vshll.u32 %v5728_v52, 16  ;;  %v3008_v62 = vshrl.u32 %v5728_v52, 16  ;;  %v3014_v0 = vshll.u32 %v5737_v53, 16  ;;  %v3252_v29 = vld [vmem:[#allocation2 + $0x18] sm:$0xe] }
  0xf7   : > { %4719 = vmatpush3.bf16.msra.mxu1 %v5672_v39  ;;  %v5726_v39 = vld [vmem:[%s6043_s1 + $0x210] sm:$0xff]   ;;  %v2969_v19 = vsel %vm5218_vm11, %v2964_v42, %v2968_v20  ;;  %4685 = vmatprep.subr.bf16.mxu0 %v4856_v38  ;;  %v2983_v3 = vsel %vm5218_vm11, %v2978_v55, %v2982_v43  ;;  %v2988_v5 = vrot.slane %v2987_v57, 4  ;;  %v3000_v6 = vrot.slane %v2998_v59, 5  ;;  %v3253_v54 = vld [vmem:[#allocation2 + $0x24] sm:$0xe] }
  0xf8   : > { %4712 = vmatprep.subr.bf16.mxu1 %v5691_v17  ;;  %v4139_v11 = vcombine.low %v2959_v58, %v2969_v19  ;;  %v3006_v63 = vrot.slane %v3004_v27, 5  ;;  %v3010_v18 = vrot.slane %v3008_v62, 4  ;;  %v3016_v21 = vrot.slane %v3014_v0, 5 }
  0xf9   : > { %4638 = vmatmul.mubr.bf16.gmra.mxu0 %v4855_v32  ;;  %v3019_v16 = vshrl.u32 %v2847_v13, 16  ;;  %v2993_v7 = vsel %vm5218_vm11, %v2988_v5, %v2992_v48  ;;  %v3001_v22 = vor.u32 %v3000_v6, %v2997_v61  ;;  %v3022_v20 = vshll.u32 %v2847_v13, 16  ;;  %v4859_v32 = vld [vmem:[#allocation2 + $0x6c] sm:$0xff]   ;;  %v4861_v48 = vld [vmem:[%s6043_s1 + $0x200] sm:$0xff]  }
  0xfa   : > { %4669 = vmatprep.mubr.bf16.mxu1 %v4139_v11  ;;  %4686 = vmatpush3.bf16.msra.mxu0 %v4856_v38  ;;  %v3028_v24 = vshll.u32 %v5745_v9, 16  ;;  %v4140_v25 = vcombine.low %v2983_v3, %v2993_v7  ;;  %v3011_v15 = vor.u32 %v3010_v18, %v3006_v63  ;;  %v3032_v31 = vshrl.u32 %v5745_v9, 16  ;;  %v3254_v5 = vld [vmem:[#allocation2 + $0x30] sm:$0xe] }
  0xfb   : > { %4720 = vmatpush3.bf16.msra.mxu1 %v5691_v17  ;;  %v5752_v17 = vld [vmem:[%s6043_s1 + $0x208] sm:$0xff]   ;;  %4687 = vmatprep.subr.bf16.mxu0 %v5726_v39  ;;  %v3021_v26 = vrot.slane %v3019_v16, 4  ;;  %v3002_v37 = vrot.slane %v3001_v22, 4  ;;  %v3024_v33 = vrot.slane %v3022_v20, 5  ;;  %v3038_v42 = vshll.u32 %v5747_v14, 16 }
  0xfc   : > { %4713 = vmatprep.subr.bf16.mxu1 %v4856_v38  ;;  %4641 = vmatprep.mubr.bf16.mxu0 %v4858_v50  ;;  %v3030_v34 = vrot.slane %v3028_v24, 5  ;;  %v3012_v43 = vrot.slane %v3011_v15, 4  ;;  %v3034_v28 = vrot.slane %v3032_v31, 4  ;;  %v4151_v58 = vrot.slane %v3252_v29, 9  ;;  %v3258_v15 = vld [vmem:[#allocation2 + $0x60] sm:$0xe] }
  0xfd   : > { %v3007_v23 = vsel %vm5218_vm11, %v3002_v37, %v3006_v63  ;;  %v3025_v47 = vor.u32 %v3024_v33, %v3021_v26  ;;  %v3040_v19 = vrot.slane %v3038_v42, 5  ;;  %v3289_v50 = vrot.slane %v5623_v12, 5  ;;  %v3257_v12 = vld [vmem:[#allocation2 + $0x54] sm:$0xe]  ;;  %v3259_v42 = vld [vmem:[#allocation2 + $0x6c] sm:$0xe] }
  0xfe   : > { %4670 = vmatmul.mubr.bf16.gmra.mxu1 %v4140_v25  ;;  %4688 = vmatpush3.bf16.msra.mxu0 %v5726_v39  ;;  %v3035_v11 = vor.u32 %v3034_v28, %v3030_v34  ;;  %v4155_v27 = vrot.slane %v3256_v41, 9  ;;  %v3314_v62 = vrot.slane %v5682_v56, 5  ;;  %v3317_v13 = vrot.slane %v5693_v36, 5 }
  0xff   : > { %4721 = vmatpush3.bf16.msra.mxu1 %v4856_v38  ;;  %v3286_v38 = vrot.slane %v5621_v40, 5  ;;  %4689 = vmatprep.subr.bf16.mxu0 %v5752_v17  ;;  %v3017_v40 = vsel %vm5218_vm11, %v3012_v43, %v3016_v21  ;;  %v3026_v61 = vrot.slane %v3025_v47, 4  ;;  %v4152_v3 = vrot.slane %v3253_v54, 9 }
 0x100   : > { %4714 = vmatprep.subr.bf16.mxu1 %v5726_v39  ;;  %v4141_v59 = vcombine.low %v3007_v23, %v3017_v40  ;;  %v3036_v0 = vrot.slane %v3035_v11, 4  ;;  %v3315_v56 = vsel %vm5372_vm14, %v4155_v27, %v3314_v62  ;;  %v3316_v18 = vrot.slane %v3314_v62, 4 }
 0x101   : > { %v3287_v55 = vsel %vm5372_vm14, %v4151_v58, %v3286_v38  ;;  %v3288_v57 = vrot.slane %v3286_v38, 4  ;;  %4642 = vmatmul.mubr.bf16.gmra.mxu0 %v4859_v32  ;;  %v3031_v6 = vsel %vm5218_vm11, %v3026_v61, %v3030_v34  ;;  %v3293_v16 = vrot.slane %v5637_v45, 5 }
 0x102   : > { %4690 = vmatpush3.bf16.msra.mxu0 %v5752_v17  ;;  %4673 = vmatprep.mubr.bf16.mxu1 %v4141_v59  ;;  %v3041_v21 = vsel %vm5218_vm11, %v3036_v0, %v3040_v19  ;;  %v3296_v36 = vrot.slane %v5639_v35, 5  ;;  %v4156_v7 = vrot.slane %v3257_v12, 9  ;;  %v3318_v20 = vsel %vm5372_vm14, %v3316_v18, %v3317_v13  ;;  %v3255_v35 = vld [vmem:[#allocation2 + $0x3c] sm:$0xe] }
 0x103   : > { %4722 = vmatpush3.bf16.msra.mxu1 %v5726_v39  ;;  %v3290_v39 = vsel %vm5372_vm14, %v3288_v57, %v3289_v50  ;;  %4691 = vmatprep.subr.bf16.mxu0 %v4861_v48  ;;  %v4142_v22 = vcombine.low %v3031_v6, %v3041_v21  ;;  %v4153_v24 = vrot.slane %v3254_v5, 9  ;;  %v3300_v25 = vrot.slane %v5647_v8, 5 }
 0x104   : > { %4715 = vmatprep.subr.bf16.mxu1 %v5752_v17  ;;  %v4175_v63 = vcombine.low %v3287_v55, %v3290_v39  ;;  %v4179_v1 = vcombine.low %v3315_v56, %v3318_v20  ;;  %v3295_v26 = vrot.slane %v3293_v16, 4  ;;  %v3325_v45 = vsel %vm5372_vm14, %v5735_v49, %v3324_v46 }
 0x105   : > { %v3322_v8 = vsel %vm5372_vm14, %v4156_v7, %v3321_v44  ;;  %v3301_v31 = vsel %vm5372_vm14, %v4153_v24, %v3300_v25  ;;  %v3302_v29 = vrot.slane %v3300_v25, 4  ;;  %v3303_v37 = vrot.slane %v5656_v51, 5 }
 0x106   : > { %4693 = vmatprep.mubr.bf16.mxu0 %v4175_v63  ;;  %4692 = vmatpush3.bf16.msra.mxu0 %v4861_v48  ;;  %v3297_v10 = vsel %vm5372_vm14, %v3295_v26, %v3296_v36  ;;  %v4157_v32 = vrot.slane %v3258_v15, 9  ;;  %v3328_v46 = vrot.slane %v5728_v52, 5  ;;  %v3331_v49 = vrot.slane %v5737_v53, 5 }
 0x107   : > { %4723 = vmatpush3.bf16.msra.mxu1 %v5752_v17  ;;  %v3294_v17 = vsel %vm5372_vm14, %v4152_v3, %v3293_v16  ;;  %v3304_v44 = vsel %vm5372_vm14, %v3302_v29, %v3303_v37  ;;  %v4154_v33 = vrot.slane %v3255_v35, 9  ;;  %v3307_v34 = vrot.slane %v5663_v2, 5 }
 0x108   : > { %4716 = vmatprep.subr.bf16.mxu1 %v4861_v48  ;;  %4674 = vmatmul.mubr.bf16.gmra.mxu1 %v4142_v22  ;;  %v4176_v4 = vcombine.low %v3294_v17, %v3297_v10  ;;  %v4177_v43 = vcombine.low %v3301_v31, %v3304_v44  ;;  %v3329_v51 = vsel %vm5372_vm14, %v4157_v32, %v3328_v46  ;;  %v3330_v28 = vrot.slane %v3328_v46, 4 }
 0x109   : > { %4701 = vmatprep.mubr.bf16.mxu1 %v4179_v1  ;;  %v3310_v58 = vrot.slane %v5665_v30, 5  ;;  %v4180_v38 = vcombine.low %v3322_v8, %v3325_v45  ;;  %v3309_v52 = vrot.slane %v3307_v34, 4  ;;  %v3335_v53 = vrot.slane %v5745_v9, 5 }
 0x10a   : > { %4694 = vmatmul.mubr.bf16.vlgmr.msra.gmra.mxu0 %v4176_v4  ;;  %v3332_v41 = vsel %vm5372_vm14, %v3330_v28, %v3331_v49  ;;  %v3308_v2 = vsel %vm5372_vm14, %v4154_v33, %v3307_v34  ;;  %v4158_v23 = vrot.slane %v3259_v42, 9  ;;  %v3338_v47 = vrot.slane %v5747_v14, 5 }
 0x10b   : > { %4724 = vmatpush3.bf16.msra.mxu1 %v4861_v48  ;;  %4697 = vmatprep.mubr.bf16.mxu0 %v4177_v43  ;;  %v4181_v19 = vcombine.low %v3329_v51, %v3332_v41  ;;  %v3311_v48 = vsel %vm5372_vm14, %v3309_v52, %v3310_v58  ;;  %v3337_v30 = vrot.slane %v3335_v53, 4 }
 0x10c   : > { %v4178_v50 = vcombine.low %v3308_v2, %v3311_v48  ;;  %v3336_v9 = vsel %vm5372_vm14, %v4158_v23, %v3335_v53 }
 0x10d   : > { %v3339_v54 = vsel %vm5372_vm14, %v3337_v30, %v3338_v47 }
 0x10e   : > { %v4182_v40 = vcombine.low %v3336_v9, %v3339_v54 }
 0x110   : > { %4702 = vmatmul.mubr.bf16.vlgmr.msra.gmra.mxu1 %v4180_v38 }
 0x111   : > { %4705 = vmatprep.mubr.bf16.mxu1 %v4181_v19 }
 0x112   : > { %4698 = vmatmul.mubr.bf16.gmra.mxu0 %v4178_v50 }
 0x118   : > { %4706 = vmatmul.mubr.bf16.gmra.mxu1 %v4182_v40 }
 0x145   : > { %v4439_v11 = vpop.f32.mrf.mxu0 }
 0x146   : > { %v4471_v55 = vpop.f32.mrf.mxu1 }
 0x147   : > { %v1270_v14 = vadd.f32 %v4471_v55, %v4439_v11  ;;  %v1068_v57 = vpop.f32.mrf.mxu0 }
 0x148   : > { %v1261_v59 = vpop.f32.mrf.mxu1 }
 0x149   : > { %v1262_v61 = vadd.f32 %v1261_v59, %v1068_v57  ;;  %v4440_v27 = vpop.f32.mrf.mxu0 }
 0x14a   : > { %v4472_v62 = vpop.f32.mrf.mxu1 }
 0x14b   : > { %v1273_v12 = vadd.f32 %v4472_v62, %v4440_v27  ;;  %v1071_v0 = vpop.f32.mrf.mxu0 }
 0x14c   : > { %v1264_v39 = vpop.f32.mrf.mxu1 }
 0x14d   : > { %v1265_v13 = vadd.f32 %v1264_v39, %v1071_v0  ;;  %v4443_v3 = vpop.f32.mrf.mxu0 }
 0x14e   : > { %v4475_v5 = vpop.f32.mrf.mxu1 }
 0x14f   : > { %v1286_v6 = vadd.f32 %v4475_v5, %v4443_v3  ;;  %v1084_v60 = vpop.f32.mrf.mxu0 }
 0x150   : > { %v1277_v63 = vpop.f32.mrf.mxu1 }
 0x151   : > { %v1278_v56 = vadd.f32 %v1277_v63, %v1084_v60  ;;  %v4444_v18 = vpop.f32.mrf.mxu0 }
 0x152   : > { %v4476_v21 = vpop.f32.mrf.mxu1 }
 0x153   : > { %v1289_v16 = vadd.f32 %v4476_v21, %v4444_v18  ;;  %v1087_v36 = vpop.f32.mrf.mxu0 }
 0x154   : > { %v1280_v7 = vpop.f32.mrf.mxu1 }
 0x155   : > { %v1281_v22 = vadd.f32 %v1280_v7, %v1087_v36  ;;  %v4447_v24 = vpop.f32.mrf.mxu0 }
 0x156   : > { %v4479_v20 = vpop.f32.mrf.mxu1 }
 0x157   : > { %v1302_v15 = vadd.f32 %v4479_v20, %v4447_v24  ;;  %v1100_v1 = vpop.f32.mrf.mxu0 }
 0x158   : > { %v1293_v25 = vpop.f32.mrf.mxu1 }
 0x159   : > { %v1294_v26 = vadd.f32 %v1293_v25, %v1100_v1  ;;  %v4448_v45 = vpop.f32.mrf.mxu0 }
 0x15a   : > { %v4480_v17 = vpop.f32.mrf.mxu1 }
 0x15b   : > { %v1305_v8 = vadd.f32 %v4480_v17, %v4448_v45  ;;  %v1103_v31 = vpop.f32.mrf.mxu0 }
 0x15c   : > { %v1296_v35 = vpop.f32.mrf.mxu1 }
 0x15d   : > { %v1297_v37 = vadd.f32 %v1296_v35, %v1103_v31  ;;  %v4451_v32 = vpop.f32.mrf.mxu0 }
 0x15e   : > { %v4483_v29 = vpop.f32.mrf.mxu1 }
 0x15f   : > { %v1318_v49 = vadd.f32 %v4483_v29, %v4451_v32  ;;  %v1116_v4 = vpop.f32.mrf.mxu0 }
 0x160   : > { %v1309_v10 = vpop.f32.mrf.mxu1 }
 0x161   : > { %v1310_v33 = vadd.f32 %v1309_v10, %v1116_v4  ;;  %v4452_v34 = vpop.f32.mrf.mxu0 }
 0x162   : > { %v4484_v46 = vpop.f32.mrf.mxu1 }
 0x163   : > { %v1321_v43 = vadd.f32 %v4484_v46, %v4452_v34  ;;  %v1119_v51 = vpop.f32.mrf.mxu0 }
 0x164   : > { %v1312_v44 = vpop.f32.mrf.mxu1 }
 0x165   : > { %v5829_v58 = vadd.f32 %v1312_v44, %v1119_v51  ;;  %v4503_v38 = vpop.f32.mrf.mxu0 }
 0x166   : > { %v4535_v42 = vpop.f32.mrf.mxu1  ;;  %v1603_v53 = vadd.f32 %v4503_v38, %v1270_v14 }
 0x167   : > { %v1538_v41 = vpop.f32.mrf.mxu0 }
 0x168   : > { %v1780_v28 = vpop.f32.mrf.mxu1  ;;  %v5831_v23 = vadd.f32 %v4535_v42, %v1603_v53  ;;  %v1601_v47 = vadd.f32 %v1538_v41, %v1262_v61 }
 0x169   : > { %v4504_v19 = vpop.f32.mrf.mxu0 }
 0x16a   : > { %v4536_v52 = vpop.f32.mrf.mxu1  ;;  %v5833_v30 = vadd.f32 %v1780_v28, %v1601_v47  ;;  %v1604_v50 = vadd.f32 %v4504_v19, %v1273_v12 }
 0x16b   : > { %v1541_v9 = vpop.f32.mrf.mxu0 }
 0x16c   : > { %v1783_v2 = vpop.f32.mrf.mxu1  ;;  %v5835_v40 = vadd.f32 %v4536_v52, %v1604_v50  ;;  %v1602_v11 = vadd.f32 %v1541_v9, %v1265_v13 }
 0x16d   : > { %v4507_v55 = vpop.f32.mrf.mxu0 }
 0x16e   : > { %v4539_v48 = vpop.f32.mrf.mxu1  ;;  %v5837_v59 = vadd.f32 %v1783_v2, %v1602_v11  ;;  %v1607_v14 = vadd.f32 %v4507_v55, %v1286_v6 }
 0x16f   : > { %v1554_v27 = vpop.f32.mrf.mxu0 }
 0x170   : > { %v1796_v54 = vpop.f32.mrf.mxu1  ;;  %v5839_v0 = vadd.f32 %v4539_v48, %v1607_v14  ;;  %v1605_v61 = vadd.f32 %v1554_v27, %v1278_v56 }
 0x171   : > { %v4508_v39 = vpop.f32.mrf.mxu0 }
 0x172   : > { %v4540_v57 = vpop.f32.mrf.mxu1  ;;  %v5841_v5 = vadd.f32 %v1796_v54, %v1605_v61  ;;  %v1608_v12 = vadd.f32 %v4508_v39, %v1289_v16 }
 0x173   : > { %v1557_v60 = vpop.f32.mrf.mxu0 }
 0x174   : > { %v1799_v62 = vpop.f32.mrf.mxu1  ;;  %v5843_v18 = vadd.f32 %v4540_v57, %v1608_v12  ;;  %v1606_v13 = vadd.f32 %v1557_v60, %v1281_v22 }
 0x175   : > { %v4511_v21 = vpop.f32.mrf.mxu0 }
 0x176   : > { %v4543_v3 = vpop.f32.mrf.mxu1  ;;  %v5845_v7 = vadd.f32 %v1799_v62, %v1606_v13  ;;  %v1611_v6 = vadd.f32 %v4511_v21, %v1302_v15 }
 0x177   : > { %v1570_v20 = vpop.f32.mrf.mxu0 }
 0x178   : > { %v1812_v63 = vpop.f32.mrf.mxu1  ;;  %v5847_v25 = vadd.f32 %v4543_v3, %v1611_v6  ;;  %v1609_v56 = vadd.f32 %v1570_v20, %v1294_v26 }
 0x179   : > { %v4512_v1 = vpop.f32.mrf.mxu0 }
 0x17a   : > { %v4544_v36 = vpop.f32.mrf.mxu1  ;;  %v5849_v45 = vadd.f32 %v1812_v63, %v1609_v56  ;;  %v1612_v16 = vadd.f32 %v4512_v1, %v1305_v8 }
 0x17b   : > { %v1573_v35 = vpop.f32.mrf.mxu0 }
 0x17c   : > { %v1815_v24 = vpop.f32.mrf.mxu1  ;;  %v5851_v29 = vadd.f32 %v4544_v36, %v1612_v16  ;;  %v1610_v22 = vadd.f32 %v1573_v35, %v1297_v37 }
 0x17d   : > { %v4515_v10 = vpop.f32.mrf.mxu0 }
 0x17e   : > { %v4547_v17 = vpop.f32.mrf.mxu1  ;;  %v5853_v46 = vadd.f32 %v1815_v24, %v1610_v22  ;;  %v1615_v15 = vadd.f32 %v4515_v10, %v1318_v49 }
 0x17f   : > { %v1586_v4 = vpop.f32.mrf.mxu0 }
 0x180   : > { %v1828_v31 = vpop.f32.mrf.mxu1  ;;  %v5855_v34 = vadd.f32 %v4547_v17, %v1615_v15  ;;  %v1613_v26 = vadd.f32 %v1586_v4, %v1310_v33 }
 0x181   : > { %v4516_v42 = vpop.f32.mrf.mxu0 }
 0x182   : > { %v4548_v32 = vpop.f32.mrf.mxu1  ;;  %v5859_v28 = vadd.f32 %v1828_v31, %v1613_v26  ;;  %v1616_v8 = vadd.f32 %v4516_v42, %v1321_v43 }
 0x183   : > { %v1589_v38 = vpop.f32.mrf.mxu0 }
 0x184   : > { %v1831_v44 = vpop.f32.mrf.mxu1  ;;  %v5863_v37 = vadd.f32 %v4548_v32, %v1616_v8  ;;  %v1614_v53 = vadd.f32 %v1589_v38, %v5829_v58 }
 0x185   : > { %v4567_v41 = vpop.f32.mrf.mxu0 }
 0x186   : > { %v5857_v51 = vpop.f32.mrf.mxu1  ;;  %v5866_v49 = vadd.f32 %v1831_v44, %v1614_v53 }
 0x187   : > { %v2206_v47 = vpop.f32.mrf.mxu0 }
 0x188   : > { %v5861_v52 = vpop.f32.mrf.mxu1  ;;  %6061 = vst [vmem:[#allocation3_spill] sm:$0xff] %v5866_v49 }
 0x189   : > { %v4568_v33 = vpop.f32.mrf.mxu0 }
 0x18a   : > { %v5868_v2 = vpop.f32.mrf.mxu1 }
 0x18b   : > { %v2209_v48 = vpop.f32.mrf.mxu0 }
 0x18c   : > { %v5870_v19 = vpop.f32.mrf.mxu1 }
 0x18e   : > { %v4571_v50 = vpop.f32.mrf.mxu0  ;;  %v5872_v9 = vpop.f32.mrf.mxu1 }
 0x190   : > { %v2222_v43 = vpop.f32.mrf.mxu0  ;;  %v5874_v54 = vpop.f32.mrf.mxu1 }
 0x192   : > { %v4572_v11 = vpop.f32.mrf.mxu0  ;;  %v5876_v55 = vpop.f32.mrf.mxu1 }
 0x194   : > { %v2225_v58 = vpop.f32.mrf.mxu0  ;;  %v5878_v57 = vpop.f32.mrf.mxu1 }
 0x196   : > { %v4575_v14 = vpop.f32.mrf.mxu0  ;;  %v5880_v27 = vpop.f32.mrf.mxu1 }
 0x198   : > { %v2238_v62 = vpop.f32.mrf.mxu0  ;;  %v5882_v61 = vpop.f32.mrf.mxu1 }
 0x19a   : > { %v4576_v39 = vpop.f32.mrf.mxu0  ;;  %v5884_v3 = vpop.f32.mrf.mxu1 }
 0x19c   : > { %v2241_v12 = vpop.f32.mrf.mxu0  ;;  %v5886_v60 = vpop.f32.mrf.mxu1 }
 0x1a1   : > { %v4579_v63 = vpop.f32.mrf.mxu0  ;;  %v5888_v13 = vpop.f32.mrf.mxu1 }
 0x1a3   : > { %v2254_v21 = vpop.f32.mrf.mxu0  ;;  %v5890_v36 = vpop.f32.mrf.mxu1 }
 0x1a4   : > { %6062 = vst [vmem:[#allocation4_spill] sm:$0xff] %v5890_v36 }
 0x1a5   : > { %v4580_v6 = vpop.f32.mrf.mxu0  ;;  %v5892_v20 = vpop.f32.mrf.mxu1 }
 0x1a6   : > { %6063 = vst [vmem:[#allocation5_spill] sm:$0xff] %v5892_v20 }
 0x1a7   : > { %v5894_v24 = vpop.f32.mrf.mxu0  ;;  %v5896_v56 = vpop.f32.mrf.mxu1 }
 0x1a8   : > { %6064 = vst [vmem:[#allocation6_spill] sm:$0xff] %v5894_v24  ;;  %6065 = vst [vmem:[#allocation7_spill] sm:$0xff] %v5896_v56  ;;  %v2270_v24 = vadd.f32 %v2209_v48, %v5837_v59 }
 0x1a9   : > { %v4631_v1 = vpop.f32.mrf.mxu0 }
 0x1ab   : > { %v2747_v17 = vpop.f32.mrf.mxu0 }
 0x1ad   : > { %v4632_v35 = vpop.f32.mrf.mxu0 }
 0x1ae   : > { %v5898_v16 = vpop.f32.mrf.mxu1 }
 0x1af   : > { %6066 = vst [vmem:[#allocation8_spill] sm:$0xff] %v5898_v16  ;;  %v2750_v22 = vpop.f32.mrf.mxu0 }
 0x1b0   : > { %v5900_v31 = vpop.f32.mrf.mxu1 }
 0x1b1   : > { %6067 = vst [vmem:[#allocation9_spill] sm:$0xff] %v5900_v31  ;;  %v4635_v15 = vpop.f32.mrf.mxu0 }
 0x1b2   : > { %v5902_v10 = vpop.f32.mrf.mxu1 }
 0x1b3   : > { %6068 = vst [vmem:[#allocation10_spill] sm:$0xff] %v5902_v10  ;;  %v2763_v4 = vpop.f32.mrf.mxu0 }
 0x1b4   : > { %v5904_v32 = vpop.f32.mrf.mxu1 }
 0x1b5   : > { %6069 = vst [vmem:[#allocation11_spill] sm:$0xff] %v5904_v32  ;;  %v5908_v26 = vpop.f32.mrf.mxu0 }
 0x1b6   : > { %v5906_v44 = vpop.f32.mrf.mxu1  ;;  %6071 = vst [vmem:[#allocation13_spill] sm:$0xff] %v5908_v26 }
 0x1b7   : > { %6070 = vst [vmem:[#allocation12_spill] sm:$0xff] %v5906_v44  ;;  %v5912_v8 = vpop.f32.mrf.mxu0 }
 0x1b8   : > { %v5910_v42 = vpop.f32.mrf.mxu1  ;;  %6073 = vst [vmem:[#allocation15_spill] sm:$0xff] %v5912_v8  ;;  %v2269_v8 = vadd.f32 %v2206_v47, %v5833_v30  ;;  %v2277_v47 = vadd.f32 %v2238_v62, %v5849_v45  ;;  %v2281_v45 = vadd.f32 %v2254_v21, %v5859_v28 }
 0x1b9   : > { %6072 = vst [vmem:[#allocation14_spill] sm:$0xff] %v5910_v42  ;;  %v4639_v53 = vpop.f32.mrf.mxu0  ;;  %v2271_v42 = vadd.f32 %v4567_v41, %v5831_v23  ;;  %v2274_v23 = vadd.f32 %v2225_v58, %v5845_v7  ;;  %v2283_v7 = vadd.f32 %v4579_v63, %v5855_v34 }
 0x1ba   : > { %v5914_v38 = vpop.f32.mrf.mxu1  ;;  %v2567_v41 = vadd.f32 %v5861_v52, %v2269_v8  ;;  %v2575_v34 = vadd.f32 %v5882_v61, %v2277_v47 }
 0x1bb   : > { %6074 = vst [vmem:[#allocation16_spill] sm:$0xff] %v5914_v38  ;;  %v2779_v31 = vpop.f32.mrf.mxu0  ;;  %v2272_v38 = vadd.f32 %v4568_v33, %v5835_v40  ;;  %v2569_v30 = vadd.f32 %v5857_v51, %v2271_v42  ;;  %v2279_v40 = vadd.f32 %v4575_v14, %v5847_v25  ;;  %v2568_v51 = vadd.f32 %v5870_v19, %v2270_v24  ;;  %v6079_v14 = vld [vmem:[#allocation3_spill] sm:$0xff]  ;;  %v6083_v24 = vld [vmem:[#allocation10_spill] sm:$0xff] }
 0x1bc   : > { %v5916_v56 = vpop.f32.mrf.mxu1  ;;  %v2284_v19 = vadd.f32 %v4580_v6, %v5863_v37  ;;  %v2818_v8 = vadd.f32 %v2779_v31, %v2575_v34 }
 0x1bd   : > { %6075 = vst [vmem:[#allocation17_spill] sm:$0xff] %v5916_v56  ;;  %v4640_v20 = vpop.f32.mrf.mxu0 }
 0x1be   : > { %v5918_v10 = vpop.f32.mrf.mxu1 }
 0x1bf   : > { %6076 = vst [vmem:[#allocation18_spill] sm:$0xff] %v5918_v10  ;;  %v2782_v32 = vpop.f32.mrf.mxu0  ;;  %v2275_v10 = vadd.f32 %v4571_v50, %v5839_v0  ;;  %v2570_v0 = vadd.f32 %v5868_v2, %v2272_v38  ;;  %v2572_v2 = vadd.f32 %v5878_v57, %v2274_v23  ;;  %v6080_v57 = vld [vmem:[#allocation6_spill] sm:$0xff] }
 0x1c0   : > { %v5920_v16 = vpop.f32.mrf.mxu1  ;;  %v2282_v62 = vadd.f32 %v6080_v57, %v6079_v14 }
 0x1c1   : > { %6077 = vst [vmem:[#allocation19_spill] sm:$0xff] %v5920_v16  ;;  %v5922_v36 = vpop.f32.mrf.mxu0  ;;  %v2273_v16 = vadd.f32 %v2222_v43, %v5841_v5  ;;  %v2280_v5 = vadd.f32 %v4576_v39, %v5851_v29  ;;  %v2573_v52 = vadd.f32 %v5872_v9, %v2275_v10  ;;  %v2812_v43 = vadd.f32 %v4631_v1, %v2569_v30  ;;  %v6081_v39 = vld [vmem:[#allocation4_spill] sm:$0xff]  ;;  %v6086_v10 = vld [vmem:[#allocation13_spill] sm:$0xff] }
 0x1c2   : > { %6078 = vst [vmem:[#allocation20_spill] sm:$0xff] %v5922_v36  ;;  %v5924_v44 = vpop.f32.mrf.mxu1  ;;  %v2276_v36 = vadd.f32 %v4572_v11, %v5843_v18  ;;  %v2278_v18 = vadd.f32 %v2241_v12, %v5853_v46  ;;  %v2813_v29 = vadd.f32 %v4632_v35, %v2570_v0  ;;  %v2577_v46 = vadd.f32 %v5880_v27, %v2279_v40  ;;  %v6088_v40 = vld [vmem:[#allocation11_spill] sm:$0xff]  ;;  %v6089_v0 = vld [vmem:[#allocation12_spill] sm:$0xff] }
 0x1c3   : > { %v5928_v26 = vpop.f32.mrf.mxu0  ;;  %v2571_v25 = vadd.f32 %v5874_v54, %v2273_v16  ;;  %v2810_v11 = vadd.f32 %v2747_v17, %v2567_v41  ;;  %v2578_v28 = vadd.f32 %v5884_v3, %v2280_v5  ;;  %v2579_v12 = vadd.f32 %v6081_v39, %v2281_v45 }
 0x1c4   : > { %v5931_v56 = vpop.f32.mrf.mxu1  ;;  %v2574_v50 = vadd.f32 %v5876_v55, %v2276_v36  ;;  %v2576_v58 = vadd.f32 %v5886_v60, %v2278_v18  ;;  %v2581_v55 = vadd.f32 %v5888_v13, %v2283_v7  ;;  %v2811_v27 = vadd.f32 %v2750_v22, %v2568_v51  ;;  %v6082_v36 = vld [vmem:[#allocation8_spill] sm:$0xff]  ;;  %v6084_v60 = vld [vmem:[#allocation5_spill] sm:$0xff] }
 0x1c5   : > { %v5936_v49 = vpop.f32.mrf.mxu0  ;;  %v2816_v63 = vadd.f32 %v4635_v15, %v2573_v52  ;;  %v2814_v61 = vadd.f32 %v2763_v4, %v2571_v25  ;;  %v3238_v6 = vadd.f32 %v6082_v36, %v2812_v43  ;;  %v3239_v1 = vadd.f32 %v6083_v24, %v2813_v29  ;;  %v6085_v13 = vld [vmem:[#allocation9_spill] sm:$0xff]  ;;  %v6087_v15 = vld [vmem:[#allocation7_spill] sm:$0xff] }
 0x1c6   : > { %v2820_v3 = vadd.f32 %v4639_v53, %v2577_v46  ;;  %v2821_v17 = vadd.f32 %v4640_v20, %v2578_v28  ;;  %v2582_v16 = vadd.f32 %v6084_v60, %v2284_v19  ;;  %v3236_v35 = vadd.f32 %v6085_v13, %v2810_v11  ;;  %v6090_v53 = vld [vmem:[#allocation14_spill] sm:$0xff]  ;;  %v6091_v52 = vld [vmem:[#allocation15_spill] sm:$0xff] }
 0x1c7   : > { %v5946_v59 = vpop.f32.mrf.mxu0  ;;  %v2817_v42 = vadd.f32 %v6086_v10, %v2574_v50  ;;  %v2580_v4 = vadd.f32 %v6087_v15, %v2282_v62  ;;  %v2819_v23 = vadd.f32 %v2782_v32, %v2576_v58  ;;  %v3237_v47 = vadd.f32 %v6088_v40, %v2811_v27  ;;  %v6092_v31 = vld [vmem:[#allocation18_spill] sm:$0xff]  ;;  %v6093_v32 = vld [vmem:[#allocation16_spill] sm:$0xff] }
 0x1c8   : > { %v5944_v33 = vpop.f32.mrf.mxu1  ;;  %v3242_v5 = vadd.f32 %v6089_v0, %v2816_v63  ;;  %v3240_v20 = vadd.f32 %v6090_v53, %v2814_v61  ;;  %v2815_v25 = vadd.f32 %v6091_v52, %v2572_v2  ;;  %v3246_v45 = vadd.f32 %v6092_v31, %v2820_v3  ;;  %v6094_v46 = vld [vmem:[#allocation19_spill] sm:$0xff] }
 0x1c9   : > { %v3247_v50 = vadd.f32 %v5924_v44, %v2821_v17  ;;  %v3243_v29 = vadd.f32 %v6093_v32, %v2817_v42  ;;  %v3244_v34 = vadd.f32 %v6094_v46, %v2818_v8  ;;  %v6095_v19 = vld [vmem:[#allocation20_spill] sm:$0xff]  ;;  %v3245_v14 = vadd.f32 %v5931_v56, %v2819_v23 }
 0x1ca   : > { %v5956_v48 = vpop.f32.mrf.mxu1  ;;  %v4695_v54 = vpop.f32.mrf.mxu0  ;;  %v2824_v11 = vadd.f32 %v6095_v19, %v2581_v55  ;;  %v2822_v57 = vadd.f32 %v5928_v26, %v2579_v12  ;;  %v2823_v60 = vadd.f32 %v5946_v59, %v2580_v4 }
 0x1cb   : > { %v3536_v30 = vadd.f32 %v4695_v54, %v3238_v6 }
 0x1cc   : > { %v5963_v9 = vpop.f32.mrf.mxu1  ;;  %v3471_v37 = vpop.f32.mrf.mxu0  ;;  %v3250_v23 = vadd.f32 %v5944_v33, %v2824_v11  ;;  %v3248_v53 = vadd.f32 %v5956_v48, %v2822_v57 }
 0x1cd   : > { %v3534_v18 = vadd.f32 %v3471_v37, %v3236_v35  ;;  %v2825_v37 = vadd.f32 %v5936_v49, %v2582_v16  ;;  %v3654_v26 = vmul.f32 %v3536_v30, %v3536_v30  ;;  %v6096_v49 = vld [vmem:[#allocation17_spill] sm:$0xff] }
 0x1ce   : > { %v5971_v21 = vpop.f32.mrf.mxu1  ;;  %v4696_v22 = vpop.f32.mrf.mxu0  ;;  %v3241_v16 = vadd.f32 %v6096_v49, %v2815_v25 }
 0x1cf   : > { %v3537_v41 = vadd.f32 %v4696_v22, %v3239_v1  ;;  %v3652_v44 = vmul.f32 %v3534_v18, %v3534_v18 }
 0x1d0   : > { %v4703_v38 = vpop.f32.mrf.mxu1  ;;  %v3474_v51 = vpop.f32.mrf.mxu0 }
 0x1d1   : > { %v4238_v43 = vpack.c.bf16 %v3537_v41, %v3536_v30  ;;  %v3535_v28 = vadd.f32 %v3474_v51, %v3237_v47  ;;  %v5990_v2 = vadd.f32 %v4703_v38, %v3246_v45  ;;  %v3655_v42 = vmul.f32 %v3537_v41, %v3537_v41 }
 0x1d2   : > { %v3503_v7 = vpop.f32.mrf.mxu1  ;;  %v4699_v58 = vpop.f32.mrf.mxu0 }
 0x1d3   : > { %4270 = vst [vmem:[%s5050_s27 + $0x8] sm:$0xff] %v4238_v43   ;;  %v4233_v39 = vpack.c.bf16 %v3535_v28, %v3534_v18  ;;  %v3630_v27 = vadd.f32 %v3535_v28, %v3534_v18  ;;  %v3653_v63 = vmul.f32 %v3535_v28, %v3535_v28  ;;  %v3542_v36 = vadd.f32 %v3503_v7, %v3244_v34 }
 0x1d4   : > { %v4704_v54 = vpop.f32.mrf.mxu1  ;;  %v3487_v55 = vpop.f32.mrf.mxu0  ;;  %v3540_v35 = vadd.f32 %v4699_v58, %v3242_v5 }
 0x1d5   : > { %v5993_v62 = vadd.f32 %v4704_v54, %v3247_v50  ;;  %4234 = vst [vmem:[%s5050_s27] sm:$0xff] %v4233_v39   ;;  %v3631_v12 = vadd.f32 %v3630_v27, %v3536_v30  ;;  %v3668_v24 = vadd.f32 %v3653_v63, %v3652_v44  ;;  %v3538_v3 = vadd.f32 %v3487_v55, %v3240_v20 }
 0x1d6   : > { %v3506_v61 = vpop.f32.mrf.mxu1  ;;  %v4700_v17 = vpop.f32.mrf.mxu0  ;;  %v3251_v30 = vadd.f32 %v5963_v9, %v2825_v37  ;;  %v3249_v20 = vadd.f32 %v5971_v21, %v2823_v60  ;;  %v3658_v50 = vmul.f32 %v3540_v35, %v3540_v35  ;;  %v3660_v34 = vmul.f32 %v3542_v36, %v3542_v36 }
 0x1d7   : > { %v4258_v56 = vpack.c.bf16 %v5993_v62, %v5990_v2  ;;  %v3543_v6 = vadd.f32 %v3506_v61, %v3245_v14  ;;  %v3541_v10 = vadd.f32 %v4700_v17, %v3243_v29  ;;  %v3669_v8 = vadd.f32 %v3668_v24, %v3654_v26 }
 0x1d8   : > { %v4707_v1 = vpop.f32.mrf.mxu1  ;;  %v3632_v38 = vadd.f32 %v3631_v12, %v3537_v41  ;;  %v3490_v15 = vpop.f32.mrf.mxu0  ;;  %v3656_v59 = vmul.f32 %v3538_v3, %v3538_v3  ;;  %v3662_v14 = vmul.f32 %v5990_v2, %v5990_v2  ;;  %v3663_v39 = vmul.f32 %v5993_v62, %v5993_v62 }
 0x1d9   : > { %4274 = vst [vmem:[%s5050_s27 + $0x28] sm:$0xff] %v4258_v56   ;;  %v4253_v13 = vpack.c.bf16 %v3543_v6, %v3542_v36  ;;  %v4248_v40 = vpack.c.bf16 %v3541_v10, %v3540_v35  ;;  %v3670_v4 = vadd.f32 %v3669_v8, %v3655_v42  ;;  %v3539_v5 = vadd.f32 %v3490_v15, %v3241_v16 }
 0x1da   : > { %v3519_v22 = vpop.f32.mrf.mxu1  ;;  %v3633_v47 = vadd.f32 %v3632_v38, %v3538_v3  ;;  %v3548_v41 = vadd.f32 %v4707_v1, %v3250_v23  ;;  %v3659_v21 = vmul.f32 %v3541_v10, %v3541_v10  ;;  %v3661_v54 = vmul.f32 %v3543_v6, %v3543_v6 }
 0x1db   : > { %4273 = vst [vmem:[%s5050_s27 + $0x20] sm:$0xff] %v4253_v13   ;;  %4272 = vst [vmem:[%s5050_s27 + $0x18] sm:$0xff] %v4248_v40   ;;  %v3671_v7 = vadd.f32 %v3670_v4, %v3656_v59  ;;  %v4243_v33 = vpack.c.bf16 %v3539_v5, %v3538_v3  ;;  %v3657_v51 = vmul.f32 %v3539_v5, %v3539_v5 }
 0x1dc   : > { %v4708_v0 = vpop.f32.mrf.mxu1  ;;  %v3634_v9 = vadd.f32 %v3633_v47, %v3539_v5  ;;  %v3546_v25 = vadd.f32 %v3519_v22, %v3248_v53  ;;  %v3666_v12 = vmul.f32 %v3548_v41, %v3548_v41 }
 0x1dd   : > { %v3549_v18 = vadd.f32 %v4708_v0, %v3251_v30  ;;  %4271 = vst [vmem:[%s5050_s27 + $0x10] sm:$0xff] %v4243_v33   ;;  %v3672_v32 = vadd.f32 %v3671_v7, %v3657_v51 }
 0x1de   : > { %v3522_v52 = vpop.f32.mrf.mxu1  ;;  %v3635_v43 = vadd.f32 %v3634_v9, %v3540_v35  ;;  %v3664_v61 = vmul.f32 %v3546_v25, %v3546_v25 }
 0x1df   : > { %v4268_v31 = vpack.c.bf16 %v3549_v18, %v3548_v41  ;;  %v3547_v45 = vadd.f32 %v3522_v52, %v3249_v20  ;;  %v3673_v46 = vadd.f32 %v3672_v32, %v3658_v50  ;;  %v3667_v1 = vmul.f32 %v3549_v18, %v3549_v18 }
 0x1e0   : > { %v3636_v29 = vadd.f32 %v3635_v43, %v3541_v10 }
 0x1e1   : > { %4276 = vst [vmem:[%s5050_s27 + $0x38] sm:$0xff] %v4268_v31   ;;  %v4263_v48 = vpack.c.bf16 %v3547_v45, %v3546_v25  ;;  %v3674_v11 = vadd.f32 %v3673_v46, %v3659_v21  ;;  %v3665_v56 = vmul.f32 %v3547_v45, %v3547_v45 }
 0x1e2   : > { %v3637_v19 = vadd.f32 %v3636_v29, %v3542_v36 }
 0x1e3   : > { %4275 = vst [vmem:[%s5050_s27 + $0x30] sm:$0xff] %v4263_v48   ;;  %v3675_v28 = vadd.f32 %v3674_v11, %v3660_v34 }
 0x1e4   : > { %v3638_v58 = vadd.f32 %v3637_v19, %v3543_v6 }
 0x1e5   : > { %v3676_v44 = vadd.f32 %v3675_v28, %v3661_v54 }
 0x1e6   : > { %v3639_v57 = vadd.f32 %v3638_v58, %v5990_v2 }
 0x1e7   : > { %v3677_v63 = vadd.f32 %v3676_v44, %v3662_v14 }
 0x1e8   : > { %v3640_v27 = vadd.f32 %v3639_v57, %v5993_v62 }
 0x1e9   : > { %v3678_v37 = vadd.f32 %v3677_v63, %v3663_v39 }
 0x1ea   : > { %v3641_v55 = vadd.f32 %v3640_v27, %v3546_v25 }
 0x1eb   : > { %v3679_v26 = vadd.f32 %v3678_v37, %v3664_v61 }
 0x1ec   : > { %v3642_v36 = vadd.f32 %v3641_v55, %v3547_v45 }
 0x1ed   : > { %v3680_v24 = vadd.f32 %v3679_v26, %v3665_v56 }
 0x1ee   : > { %v3643_v6 = vadd.f32 %v3642_v36, %v3548_v41 }
 0x1ef   : > { %v3681_v2 = vadd.f32 %v3680_v24, %v3666_v12 }
 0x1f0   : > { %v3644_v3 = vadd.f32 %v3643_v6, %v3549_v18 }
 0x1f1   : > { %v3682_v60 = vadd.f32 %v3681_v2, %v3667_v1 }
 0x1f2   : > { %v3645_v17 = vrot.slane %v3644_v3, 4 }
 0x1f3   : > { %v3683_v35 = vrot.slane %v3682_v60, 4 }
 0x1f4   : > { %v3646_v13 = vadd.f32 %v3645_v17, %v3644_v3 }
 0x1f5   : > { %v3684_v10 = vadd.f32 %v3683_v35, %v3682_v60 }
 0x1f6   : > { %v3647_v62 = vrot.slane %v3646_v13, 2 }
 0x1f7   : > { %v3685_v16 = vrot.slane %v3684_v10, 2 }
 0x1f8   : > { %v3648_v49 = vadd.f32 %v3647_v62, %v3646_v13 }
 0x1f9   : > { %v3686_v8 = vadd.f32 %v3685_v16, %v3684_v10 }
 0x1fa   : > { %v3649_v42 = vrot.slane %v3648_v49, 1 }
 0x1fb   : > { %v3687_v22 = vrot.slane %v3686_v8, 1 }
 0x1fc   : > { %v3650_v38 = vadd.f32 %v3649_v42, %v3648_v49 }
 0x1fd   : > { %v3688_v15 = vadd.f32 %v3687_v22, %v3686_v8 }
 0x1fe   : > { %3651 = vst [vmem:[%s306_s18] sm:$0x1] %v3650_v38 }
 0x1ff   : > { %3689 = vst [vmem:[%s313_s30] sm:$0x1] %v3688_v15 }
 0x200 PF: > { %s17_s2 = sadd.s32 1, %s4900_s2   ;;  %s6097_s21 = smov %s4892_s23 }
 0x201   : > { %p14_p10 = scmp.ge.s32.totalorder %s17_s2, 6   ;;  %s6098_s22 = smov %s4896_s24 }
 0x202   : > { %s6099_s23 = smov %s6102_s3  ;;  %s6100_s24 = smov %s6106_s25 }
 0x203   :  { %16 = sbr.rel (!%p14_p10) target bundleno = 3 (0x3), region = 112 }

// kernel: double_conv2d.4
= control target key start
LH: loop header
LB: loop body
LE: loop exit
PB: predicated region body
PF: predicated region fallthrough
CT: control target
= control target key end

     0   :  { %s5214_s21 = smov 0   ;;  %s5216_s22 = smov 0   ;;  %s6371_s0 = inlined_call_operand.vmem [shape: bf16[2,16,16,128], index: 0, kind: input, shape index: {}]   ;;  %s6372_s1 = inlined_call_operand.vmem [shape: bf16[9,128,128], index: 1, kind: input, shape index: {}]   ;;  %s6373_s2 = inlined_call_operand.vmem [shape: f32[1,1,128], index: 2, kind: input, shape index: {}]   ;;  %s6374_s3 = inlined_call_operand.vmem [shape: f32[1,1,128], index: 3, kind: input, shape index: {}]   ;;  %s6375_s4 = inlined_call_operand.vmem [shape: bf16[2,16,16,128], index: 4, kind: output, shape index: {0}]   ;;  %s6376_s5 = inlined_call_operand.vmem [shape: f32[2,2,1,128], index: 5, kind: output, shape index: {1}]   ;;  %s6377_s6 = inlined_call_operand.vmem [shape: f32[2,2,1,128], index: 6, kind: output, shape index: {2}]  }
   0x1   :  { %6378 = sst [smem:[#allocation22_spill]] %s6371_s0  ;;  %s5218_s23 = smov 0  }
   0x2   :  { %s5220_s24 = smov 0   ;;  %s5222_s25 = smov 0  }
   0x3 LB: > { %s26_s26 = sadd.s32 1, %s5168_s23  ;;  %s29_s27 = sadd.s32 1, %s5172_s24  ;;  %s5176_s25 = sphi %s5222_s25, %s17_s25   ;;  %s5172_s24 = sphi %s5220_s24, %s6433_s24   ;;  %s5168_s23 = sphi %s5218_s23, %s6432_s23   ;;  %s5164_s22 = sphi %s5216_s22, %s6431_s22   ;;  %s5160_s21 = sphi %s5214_s21, %s6430_s21  }
   0x4   : > { %p27_p0 = scmp.ge.s32.totalorder %s26_s26, 2  ;;  %p4056_p1 = scmp.ge.s32.totalorder %s5176_s25, 1 }
   0x5   : > { %p235_p2 = scmp.lt.s32.totalorder %s5176_s25, 5 }
   0x6   : > { %s6435_s26 = smov (%p27_p0, %s26_s26), 0  ;;  %s6437_s27 = smov (!%p27_p0, %s29_s27), %s5172_s24 }
   0x7   : > { %p236_p3 = pnand %p4056_p1, %p235_p2  ;;  %p31_p4 = scmp.ge.s32.totalorder %s6437_s27, 2 }
   0x9   : > { %s6439_s27 = smov (%p31_p4, %s6437_s27), 0  ;;  %239 = sbr.rel (%p236_p3) target bundleno = 557 (0x22d), region = 36 }
   0xa   : > { %6379 = sst [smem:[#allocation3_spill]] %s6439_s27 }
   0xe   : > { %vm323_vm0 = vcmask 1040384   ;;  %vm324_vm1 = vsmask.f32 256  ;;  %v329_v0 = vld [vmem:[#allocation2 + $0xc] sm:$0x1]  ;;  %v5178_v1 = vmov 0  }
   0xf   : > { %316 = vst [vmem:[#allocation2] sm:$0xf] %v5178_v1  ;;  %317 = vst [vmem:[#allocation2 + $0x4] sm:$0xf] %v5178_v1  ;;  %v332_v3 = vld [vmem:[#allocation2 + $0x18] sm:$0x1] }
  0x10   : > { %318 = vst [vmem:[#allocation2 + $0x8] sm:$0x1] %v5178_v1  ;;  %320 = vst [vmem:[#allocation2 + $0x6c] sm:$0xf] %v5178_v1  ;;  %v335_v4 = vld [vmem:[#allocation2 + $0x24] sm:$0x1] }
  0x11   : > { %321 = vst [vmem:[#allocation2 + $0x70] sm:$0xf] %v5178_v1  ;;  %322 = vst [vmem:[#allocation2 + $0x74] sm:$0x1] %v5178_v1  ;;  %vm356_vm3 = vsmask.f32 7938 }
  0x12   : > { %vm5250_vm2 = vmand %vm323_vm0, %vm324_vm1  ;;  %v338_v8 = vld [vmem:[#allocation2 + $0x30] sm:$0x1]  ;;  %p284_p5 = scmp.lt.s32.totalorder %s5164_s22, 1  ;;  %v341_v10 = vld [vmem:[#allocation2 + $0x3c] sm:$0x1]  ;;  %s5270_s28 = sshll.u32 %s5160_s21, 3 }
  0x13   : > { %v330_v5 = vsel %vm5250_vm2, 0, %v329_v0  ;;  %v333_v6 = vsel %vm5250_vm2, 0, %v332_v3  ;;  %v336_v7 = vsel %vm5250_vm2, 0, %v335_v4  ;;  %v339_v9 = vsel %vm5250_vm2, 0, %v338_v8  ;;  %v344_v11 = vld [vmem:[#allocation2 + $0x48] sm:$0x1]  ;;  %vm5265_vm4 = vmand %vm323_vm0, %vm356_vm3 }
  0x14   : > { %331 = vst [vmem:[#allocation2 + $0xc] sm:$0x1] %v330_v5  ;;  %334 = vst [vmem:[#allocation2 + $0x18] sm:$0x1] %v333_v6  ;;  %v342_v13 = vsel %vm5250_vm2, 0, %v341_v10  ;;  %v345_v14 = vsel %vm5250_vm2, 0, %v344_v11 }
  0x15   : > { %337 = vst [vmem:[#allocation2 + $0x24] sm:$0x1] %v336_v7  ;;  %340 = vst [vmem:[#allocation2 + $0x30] sm:$0x1] %v339_v9  ;;  %v347_v15 = vld [vmem:[#allocation2 + $0x54] sm:$0x1] }
  0x16   : > { %v350_v16 = vld [vmem:[#allocation2 + $0x60] sm:$0x1]  ;;  %343 = vst [vmem:[#allocation2 + $0x3c] sm:$0x1] %v342_v13  ;;  %346 = vst [vmem:[#allocation2 + $0x48] sm:$0x1] %v345_v14 }
  0x17   : > { %v348_v17 = vsel %vm5250_vm2, 0, %v347_v15  ;;  %v351_v18 = vsel %vm5250_vm2, 0, %v350_v16  ;;  %v361_v19 = vld [vmem:[#allocation2 + $0x14] sm:$0x1]  ;;  %v364_v20 = vld [vmem:[#allocation2 + $0x20] sm:$0x1] }
  0x18   : > { %349 = vst [vmem:[#allocation2 + $0x54] sm:$0x1] %v348_v17  ;;  %352 = vst [vmem:[#allocation2 + $0x60] sm:$0x1] %v351_v18  ;;  %v362_v21 = vsel %vm5265_vm4, 0, %v361_v19  ;;  %v365_v22 = vsel %vm5265_vm4, 0, %v364_v20 }
  0x19   : > { %v367_v23 = vld [vmem:[#allocation2 + $0x2c] sm:$0x1]  ;;  %v370_v24 = vld [vmem:[#allocation2 + $0x38] sm:$0x1]  ;;  %363 = vst [vmem:[#allocation2 + $0x14] sm:$0x1] %v362_v21 }
  0x1a   : > { %366 = vst [vmem:[#allocation2 + $0x20] sm:$0x1] %v365_v22  ;;  %v368_v25 = vsel %vm5265_vm4, 0, %v367_v23  ;;  %v371_v26 = vsel %vm5265_vm4, 0, %v370_v24  ;;  %v373_v27 = vld [vmem:[#allocation2 + $0x44] sm:$0x1] }
  0x1b   : > { %v376_v28 = vld [vmem:[#allocation2 + $0x50] sm:$0x1]  ;;  %369 = vst [vmem:[#allocation2 + $0x2c] sm:$0x1] %v368_v25  ;;  %372 = vst [vmem:[#allocation2 + $0x38] sm:$0x1] %v371_v26 }
  0x1c   : > { %v374_v29 = vsel %vm5265_vm4, 0, %v373_v27  ;;  %v377_v30 = vsel %vm5265_vm4, 0, %v376_v28  ;;  %v379_v31 = vld [vmem:[#allocation2 + $0x5c] sm:$0x1]  ;;  %v382_v32 = vld [vmem:[#allocation2 + $0x68] sm:$0x1] }
  0x1d   : > { %375 = vst [vmem:[#allocation2 + $0x44] sm:$0x1] %v374_v29  ;;  %378 = vst [vmem:[#allocation2 + $0x50] sm:$0x1] %v377_v30  ;;  %v380_v33 = vsel %vm5265_vm4, 0, %v379_v31  ;;  %v383_v34 = vsel %vm5265_vm4, 0, %v382_v32 }
  0x1e   : > { %v326_v35 = vld [vmem:[#allocation2] sm:$0x1]  ;;  %v353_v36 = vld [vmem:[#allocation2 + $0x6c] sm:$0x1]  ;;  %381 = vst [vmem:[#allocation2 + $0x5c] sm:$0x1] %v380_v33 }
  0x1f   : > { %384 = vst [vmem:[#allocation2 + $0x68] sm:$0x1] %v383_v34  ;;  %v327_v37 = vsel %vm5250_vm2, 0, %v326_v35  ;;  %v354_v38 = vsel %vm5250_vm2, 0, %v353_v36  ;;  %v358_v39 = vld [vmem:[#allocation2 + $0x8] sm:$0x1] }
  0x20   : > { %v385_v40 = vld [vmem:[#allocation2 + $0x74] sm:$0x1]  ;;  %328 = vst [vmem:[#allocation2] sm:$0x1] %v327_v37  ;;  %355 = vst [vmem:[#allocation2 + $0x6c] sm:$0x1] %v354_v38 }
  0x21   : > { %v359_v41 = vsel %vm5265_vm4, 0, %v358_v39  ;;  %v386_v42 = vsel %vm5265_vm4, 0, %v385_v40  ;;  %s6441_s22 = smov (!%p284_p5, %s5164_s22), 1  ;;  %p292_p6 = scmp.lt.s32.totalorder %s5270_s28, 15  ;;  %v5338_v43 = vld [vmem:[%s6373_s2] ss:$0 sm:$0xff] }
  0x22   : > { %360 = vst [vmem:[#allocation2 + $0x8] sm:$0x1] %v359_v41  ;;  %387 = vst [vmem:[#allocation2 + $0x74] sm:$0x1] %v386_v42  ;;  %p302_p7 = scmp.lt.s32.totalorder %s5160_s21, 1  ;;  %s4417_s29 = sshll.u32 %s6441_s22, 7 }
  0x23   : > { %s4061_s30 = sshll.u32 %s6441_s22, 5  ;;  %s6384_s0 = sld [smem:[#allocation22_spill]]  ;;  %v5347_v52 = vld [vmem:[%s6374_s3] ss:$0 sm:$0xff]  ;;  %vm696_vm5 = vcmask 1043456  }
  0x24   : > { %s4063_s10 = sshll.u32 %s6441_s22, 1  ;;  %s4419_s14 = sshll.u32 %s5160_s21, 6  ;;  %vm533_vm6 = vsmask.f32 4368  ;;  %vm5371_vm7 = vmand %vm696_vm5, %vm356_vm3  ;;  %v698_v36 = vld [vmem:[#allocation2 + $0xc] sm:$0xf] }
  0x25   : > { %s293_s11 = scalar_select %p292_p6, %s5270_s28, 15  ;;  %vm5377_vm8 = vmor %vm324_vm1, %vm533_vm6  ;;  %v702_v41 = vld [vmem:[#allocation2 + $0x14] sm:$0x1] }
  0x26   : > { %s303_s12 = scalar_select %p302_p7, %s5160_s21, 1 }
  0x27   : > { %s4060_s13 = sshll.u32 %s293_s11, 1  ;;  %p4086_p8 = scmp.le.s32.totalorder %s5160_s21, 0 }
  0x28   : > { %s296_s15 = sadd.s32 %s4061_s30, %s4060_s13  ;;  %s5317_s16 = sadd.s32 %s4063_s10, %s303_s12 }
  0x29   : > { %s5312_s9 = scalar_lea.vmem %s6384_s0, %s4417_s29  ;;  %s4062_s17 = sshll.u32 %s296_s15, 2 }
  0x2a   : > { %s306_s20 = scalar_lea.vmem %s6376_s5, %s5317_s16  ;;  %s5326_s29 = scalar_lea.vmem %s6375_s4, %s4062_s17 }
  0x2b   : > { %s313_s11 = scalar_lea.vmem %s6377_s6, %s5317_s16  ;;  %s5333_s0 = scalar_lea.vmem %s5312_s9, %s4419_s14 }
  0x2c   : > { %v4459_v44 = vld [vmem:[%s5333_s0] sm:$0xff]   ;;  %v4538_v45 = vld [vmem:[%s5333_s0 + $0x8] sm:$0xff]   ;;  %v4539_v46 = vld [vmem:[%s5333_s0 + $0x10] sm:$0xff]   ;;  %s4087_s13 = sadd.s32 (!%p4086_p8), 4294967295, %s5270_s28 }
  0x2d   : > { %v4460_v47 = vunpack.c.l.bf16 %v4459_v44  ;;  %v4461_v48 = vunpack.c.h.bf16 %v4459_v44  ;;  %v4464_v49 = vunpack.c.l.bf16 %v4538_v45  ;;  %v4465_v50 = vunpack.c.h.bf16 %v4538_v45  ;;  %v4540_v51 = vld [vmem:[%s5333_s0 + $0x18] sm:$0xff]   ;;  %s4436_s14 = sshll.u32 (!%p4086_p8), %s4087_s13, 3 }
  0x2e   : > { %v4468_v53 = vunpack.c.l.bf16 %v4539_v46  ;;  %v4469_v54 = vunpack.c.h.bf16 %v4539_v46  ;;  %v4472_v55 = vunpack.c.l.bf16 %v4540_v51  ;;  %v4473_v56 = vunpack.c.h.bf16 %v4540_v51  ;;  %v705_v51 = vld [vmem:[#allocation2 + $0x18] sm:$0xf]  ;;  %s761_s15 = scalar_lea.vmem (!%p4086_p8), %s5312_s9, %s4436_s14 }
  0x2f   : > { %v430_v57 = vmul.f32 %v4460_v47, %v5338_v43  ;;  %v431_v58 = vmul.f32 %v4461_v48, %v5338_v43  ;;  %v432_v59 = vmul.f32 %v4464_v49, %v5338_v43  ;;  %v433_v60 = vmul.f32 %v4465_v50, %v5338_v43 }
  0x30   : > { %v434_v61 = vmul.f32 %v4468_v53, %v5338_v43  ;;  %v435_v62 = vmul.f32 %v4469_v54, %v5338_v43  ;;  %v436_v63 = vmul.f32 %v4472_v55, %v5338_v43  ;;  %v437_v0 = vmul.f32 %v4473_v56, %v5338_v43  ;;  %v709_v53 = vld [vmem:[#allocation2 + $0x20] sm:$0x1] }
  0x31   : > { %v453_v1 = vadd.f32 %v5347_v52, %v430_v57  ;;  %v454_v3 = vadd.f32 %v5347_v52, %v431_v58  ;;  %v455_v4 = vadd.f32 %v5347_v52, %v432_v59  ;;  %v456_v5 = vadd.f32 %v5347_v52, %v433_v60 }
  0x32   : > { %v457_v6 = vadd.f32 %v5347_v52, %v434_v61  ;;  %v458_v7 = vadd.f32 %v5347_v52, %v435_v62  ;;  %v459_v8 = vadd.f32 %v5347_v52, %v436_v63  ;;  %v460_v9 = vadd.f32 %v5347_v52, %v437_v0 }
  0x33   : > { %v469_v10 = vmax.f32 %v453_v1, 0.0  ;;  %v470_v11 = vmax.f32 %v454_v3, 0.0  ;;  %v471_v12 = vmax.f32 %v455_v4, 0.0  ;;  %v472_v13 = vmax.f32 %v456_v5, 0.0  ;;  %v712_v1 = vld [vmem:[#allocation2 + $0x24] sm:$0xf] }
  0x34   : > { %v473_v14 = vmax.f32 %v457_v6, 0.0  ;;  %v474_v15 = vmax.f32 %v458_v7, 0.0  ;;  %v475_v16 = vmax.f32 %v459_v8, 0.0  ;;  %v476_v17 = vmax.f32 %v460_v9, 0.0  ;;  %v4541_v4 = vld [vmem:[%s5333_s0 + $0x20] sm:$0xff]  }
  0x35   : > { %v4420_v18 = vpack.c.bf16 %v469_v10, %v469_v10  ;;  %v4421_v19 = vpack.c.bf16 %v470_v11, %v470_v11  ;;  %v4422_v20 = vpack.c.bf16 %v471_v12, %v471_v12  ;;  %v4423_v21 = vpack.c.bf16 %v472_v13, %v472_v13  ;;  %v716_v7 = vld [vmem:[#allocation2 + $0x2c] sm:$0x1] }
  0x36   : > { %v4424_v22 = vpack.c.bf16 %v473_v14, %v473_v14  ;;  %v4425_v23 = vpack.c.bf16 %v474_v15, %v474_v15  ;;  %v5365_v24 = vpack.c.bf16 %v475_v16, %v475_v16  ;;  %v5367_v25 = vpack.c.bf16 %v476_v17, %v476_v17  ;;  %v4542_v10 = vld [vmem:[%s5333_s0 + $0x28] sm:$0xff]  }
  0x37   : > { %v536_v26 = vshrl.u32 %v4420_v18, 16  ;;  %v539_v27 = vshll.u32 %v4420_v18, 16  ;;  %v544_v28 = vshrl.u32 %v4421_v19, 16  ;;  %v547_v29 = vshll.u32 %v4421_v19, 16 }
  0x38   : > { %v553_v30 = vshrl.u32 %v4422_v20, 16  ;;  %v556_v31 = vshll.u32 %v4422_v20, 16  ;;  %v561_v32 = vshrl.u32 %v4423_v21, 16  ;;  %v564_v33 = vshll.u32 %v4423_v21, 16  ;;  %v719_v21 = vld [vmem:[#allocation2 + $0x30] sm:$0xf] }
  0x39   : > { %v538_v34 = vrot.slane %v536_v26, 7  ;;  %v546_v37 = vrot.slane %v544_v28, 7  ;;  %v570_v38 = vshrl.u32 %v4424_v22, 16  ;;  %v573_v39 = vshll.u32 %v4424_v22, 16 }
  0x3a   : > { %v555_v42 = vrot.slane %v553_v30, 7  ;;  %v563_v44 = vrot.slane %v561_v32, 7  ;;  %v578_v45 = vshrl.u32 %v4425_v23, 16  ;;  %v581_v46 = vshll.u32 %v4425_v23, 16 }
  0x3b   : > { %v541_v47 = vor.u32 %v539_v27, %v538_v34  ;;  %v542_v48 = vrot.slane %v538_v34, 4  ;;  %v549_v49 = vor.u32 %v547_v29, %v546_v37  ;;  %v551_v50 = vrot.slane %v546_v37, 4  ;;  %v723_v27 = vld [vmem:[#allocation2 + $0x38] sm:$0x1] }
  0x3c   : > { %v558_v54 = vor.u32 %v556_v31, %v555_v42  ;;  %v559_v55 = vrot.slane %v555_v42, 4  ;;  %v566_v56 = vor.u32 %v564_v33, %v563_v44  ;;  %v568_v57 = vrot.slane %v563_v44, 4 }
  0x3d   : > { %v699_v58 = vsel %vm5371_vm7, %v541_v47, %v698_v36  ;;  %v550_v59 = vsel %vm5377_vm8, %v542_v48, %v549_v49  ;;  %v703_v60 = vsel %vm5250_vm2, %v551_v50, %v702_v41  ;;  %v572_v61 = vrot.slane %v570_v38, 7 }
  0x3e   : > { %700 = vst [vmem:[#allocation2 + $0xc] sm:$0xf] %v699_v58  ;;  %701 = vst [vmem:[#allocation2 + $0x10] sm:$0xf] %v550_v59  ;;  %v706_v62 = vsel %vm5371_vm7, %v558_v54, %v705_v51  ;;  %v567_v63 = vsel %vm5377_vm8, %v559_v55, %v566_v56  ;;  %v710_v0 = vsel %vm5250_vm2, %v568_v57, %v709_v53  ;;  %v580_v3 = vrot.slane %v578_v45, 7 }
  0x3f   : > { %704 = vst [vmem:[#allocation2 + $0x14] sm:$0x1] %v703_v60  ;;  %707 = vst [vmem:[#allocation2 + $0x18] sm:$0xf] %v706_v62  ;;  %v575_v5 = vor.u32 %v573_v39, %v572_v61  ;;  %v576_v6 = vrot.slane %v572_v61, 4  ;;  %v587_v8 = vshrl.u32 %v5365_v24, 16  ;;  %v4476_v17 = vunpack.c.l.bf16 %v4541_v4 }
  0x40   : > { %708 = vst [vmem:[#allocation2 + $0x1c] sm:$0xf] %v567_v63  ;;  %711 = vst [vmem:[#allocation2 + $0x20] sm:$0x1] %v710_v0  ;;  %v590_v9 = vshll.u32 %v5365_v24, 16  ;;  %v583_v11 = vor.u32 %v581_v46, %v580_v3  ;;  %v585_v12 = vrot.slane %v580_v3, 4  ;;  %v4477_v18 = vunpack.c.h.bf16 %v4541_v4 }
  0x41   : > { %v595_v13 = vshrl.u32 %v5367_v25, 16  ;;  %v598_v14 = vshll.u32 %v5367_v25, 16  ;;  %v713_v15 = vsel %vm5371_vm7, %v575_v5, %v712_v1  ;;  %v589_v16 = vrot.slane %v587_v8, 7  ;;  %v4543_v24 = vld [vmem:[%s5333_s0 + $0x30] sm:$0xff]   ;;  %v4544_v39 = vld [vmem:[%s5333_s0 + $0x38] sm:$0xff]  }
  0x42   : > { %714 = vst [vmem:[#allocation2 + $0x24] sm:$0xf] %v713_v15  ;;  %v584_v19 = vsel %vm5377_vm8, %v576_v6, %v583_v11  ;;  %v717_v20 = vsel %vm5250_vm2, %v585_v12, %v716_v7  ;;  %v4480_v23 = vunpack.c.l.bf16 %v4542_v10  ;;  %v438_v28 = vmul.f32 %v4476_v17, %v5338_v43 }
  0x43   : > { %v597_v22 = vrot.slane %v595_v13, 7  ;;  %715 = vst [vmem:[#allocation2 + $0x28] sm:$0xf] %v584_v19  ;;  %718 = vst [vmem:[#allocation2 + $0x2c] sm:$0x1] %v717_v20  ;;  %v592_v25 = vor.u32 %v590_v9, %v589_v16  ;;  %v593_v26 = vrot.slane %v589_v16, 4  ;;  %v439_v29 = vmul.f32 %v4477_v18, %v5338_v43 }
  0x44   : > { %v440_v32 = vmul.f32 %v4480_v23, %v5338_v43  ;;  %v4481_v33 = vunpack.c.h.bf16 %v4542_v10  ;;  %v461_v36 = vadd.f32 %v5347_v52, %v438_v28  ;;  %v4484_v38 = vunpack.c.l.bf16 %v4543_v24  ;;  %v726_v9 = vld [vmem:[#allocation2 + $0x3c] sm:$0xf]  ;;  %v730_v13 = vld [vmem:[#allocation2 + $0x44] sm:$0x1] }
  0x45   : > { %v600_v30 = vor.u32 %v598_v14, %v597_v22  ;;  %v602_v31 = vrot.slane %v597_v22, 4  ;;  %v720_v34 = vsel %vm5371_vm7, %v592_v25, %v719_v21  ;;  %v462_v37 = vadd.f32 %v5347_v52, %v439_v29  ;;  %v733_v21 = vld [vmem:[#allocation2 + $0x48] sm:$0xf]  ;;  %v737_v29 = vld [vmem:[#allocation2 + $0x50] sm:$0x1] }
  0x46   : > { %721 = vst [vmem:[#allocation2 + $0x30] sm:$0xf] %v720_v34  ;;  %v463_v44 = vadd.f32 %v5347_v52, %v440_v32  ;;  %v441_v45 = vmul.f32 %v4481_v33, %v5338_v43  ;;  %v477_v46 = vmax.f32 %v461_v36, 0.0  ;;  %v442_v48 = vmul.f32 %v4484_v38, %v5338_v43  ;;  %v740_v36 = vld [vmem:[#allocation2 + $0x54] sm:$0xf] }
  0x47   : > { %v601_v41 = vsel %vm5377_vm8, %v593_v26, %v600_v30  ;;  %v724_v42 = vsel %vm5250_vm2, %v602_v31, %v723_v27  ;;  %v478_v47 = vmax.f32 %v462_v37, 0.0  ;;  %v4485_v49 = vunpack.c.h.bf16 %v4543_v24 }
  0x48   : > { %722 = vst [vmem:[#allocation2 + $0x34] sm:$0xf] %v601_v41  ;;  %725 = vst [vmem:[#allocation2 + $0x38] sm:$0x1] %v724_v42  ;;  %v479_v50 = vmax.f32 %v463_v44, 0.0  ;;  %v464_v51 = vadd.f32 %v5347_v52, %v441_v45  ;;  %v4488_v53 = vunpack.c.l.bf16 %v4544_v39  ;;  %v4489_v54 = vunpack.c.h.bf16 %v4544_v39 }
  0x49   : > { %v4428_v55 = vpack.c.bf16 %v477_v46, %v477_v46  ;;  %v4429_v56 = vpack.c.bf16 %v478_v47, %v478_v47  ;;  %v465_v57 = vadd.f32 %v5347_v52, %v442_v48  ;;  %v443_v58 = vmul.f32 %v4485_v49, %v5338_v43 }
  0x4a   : > { %v4430_v59 = vpack.c.bf16 %v479_v50, %v479_v50  ;;  %v480_v60 = vmax.f32 %v464_v51, 0.0  ;;  %v444_v61 = vmul.f32 %v4488_v53, %v5338_v43  ;;  %v445_v62 = vmul.f32 %v4489_v54, %v5338_v43 }
  0x4b   : > { %v604_v63 = vshrl.u32 %v4428_v55, 16  ;;  %v607_v0 = vshll.u32 %v4428_v55, 16  ;;  %v612_v1 = vshrl.u32 %v4429_v56, 16  ;;  %v615_v3 = vshll.u32 %v4429_v56, 16 }
  0x4c   : > { %v621_v4 = vshrl.u32 %v4430_v59, 16  ;;  %v624_v5 = vshll.u32 %v4430_v59, 16  ;;  %v4431_v6 = vpack.c.bf16 %v480_v60, %v480_v60  ;;  %v481_v7 = vmax.f32 %v465_v57, 0.0  ;;  %v744_v57 = vld [vmem:[#allocation2 + $0x5c] sm:$0x1] }
  0x4d   : > { %v606_v8 = vrot.slane %v604_v63, 7  ;;  %v614_v10 = vrot.slane %v612_v1, 7  ;;  %v466_v11 = vadd.f32 %v5347_v52, %v443_v58  ;;  %v467_v12 = vadd.f32 %v5347_v52, %v444_v61  ;;  %v747_v58 = vld [vmem:[#allocation2 + $0x60] sm:$0xf] }
  0x4e   : > { %v623_v14 = vrot.slane %v621_v4, 7  ;;  %v629_v15 = vshrl.u32 %v4431_v6, 16  ;;  %v632_v16 = vshll.u32 %v4431_v6, 16  ;;  %v4432_v43 = vpack.c.bf16 %v481_v7, %v481_v7  ;;  %v751_v6 = vld [vmem:[#allocation2 + $0x68] sm:$0x1] }
  0x4f   : > { %v609_v17 = vor.u32 %v607_v0, %v606_v8  ;;  %v610_v18 = vrot.slane %v606_v8, 4  ;;  %v617_v19 = vor.u32 %v615_v3, %v614_v10  ;;  %v619_v20 = vrot.slane %v614_v10, 4 }
  0x50   : > { %v626_v22 = vor.u32 %v624_v5, %v623_v14  ;;  %v627_v23 = vrot.slane %v623_v14, 4  ;;  %v631_v24 = vrot.slane %v629_v15, 7  ;;  %v638_v25 = vshrl.u32 %v4432_v43, 16 }
  0x51   : > { %v727_v26 = vsel %vm5371_vm7, %v609_v17, %v726_v9  ;;  %v618_v27 = vsel %vm5377_vm8, %v610_v18, %v617_v19  ;;  %v731_v28 = vsel %vm5250_vm2, %v619_v20, %v730_v13  ;;  %v641_v30 = vshll.u32 %v4432_v43, 16 }
  0x52   : > { %728 = vst [vmem:[#allocation2 + $0x3c] sm:$0xf] %v727_v26  ;;  %729 = vst [vmem:[#allocation2 + $0x40] sm:$0xf] %v618_v27  ;;  %v734_v31 = vsel %vm5371_vm7, %v626_v22, %v733_v21  ;;  %v634_v32 = vor.u32 %v632_v16, %v631_v24  ;;  %v636_v33 = vrot.slane %v631_v24, 4  ;;  %v640_v34 = vrot.slane %v638_v25, 7 }
  0x53   : > { %732 = vst [vmem:[#allocation2 + $0x44] sm:$0x1] %v731_v28  ;;  %735 = vst [vmem:[#allocation2 + $0x48] sm:$0xf] %v734_v31  ;;  %v482_v37 = vmax.f32 %v466_v11, 0.0  ;;  %v483_v38 = vmax.f32 %v467_v12, 0.0  ;;  %v468_v39 = vadd.f32 %v5347_v52, %v445_v62 }
  0x54   : > { %v635_v41 = vsel %vm5377_vm8, %v627_v23, %v634_v32  ;;  %v738_v42 = vsel %vm5250_vm2, %v636_v33, %v737_v29  ;;  %v643_v44 = vor.u32 %v641_v30, %v640_v34  ;;  %v644_v54 = vrot.slane %v640_v34, 4 }
  0x55   : > { %736 = vst [vmem:[#allocation2 + $0x4c] sm:$0xf] %v635_v41  ;;  %739 = vst [vmem:[#allocation2 + $0x50] sm:$0x1] %v738_v42  ;;  %v4433_v45 = vpack.c.bf16 %v482_v37, %v482_v37  ;;  %v4434_v46 = vpack.c.bf16 %v483_v38, %v483_v38  ;;  %v484_v47 = vmax.f32 %v468_v39, 0.0 }
  0x56   : > { %v741_v48 = vsel %vm5371_vm7, %v643_v44, %v740_v36 }
  0x57   : > { %742 = vst [vmem:[#allocation2 + $0x54] sm:$0xf] %v741_v48  ;;  %v646_v49 = vshrl.u32 %v4433_v45, 16  ;;  %v649_v50 = vshll.u32 %v4433_v45, 16  ;;  %v655_v51 = vshrl.u32 %v4434_v46, 16  ;;  %v658_v52 = vshll.u32 %v4434_v46, 16 }
  0x58   : > { %v4435_v53 = vpack.c.bf16 %v484_v47, %v484_v47 }
  0x59   : > { %v648_v55 = vrot.slane %v646_v49, 7  ;;  %v657_v56 = vrot.slane %v655_v51, 7 }
  0x5a   : > { %v663_v59 = vshrl.u32 %v4435_v53, 16  ;;  %v666_v60 = vshll.u32 %v4435_v53, 16 }
  0x5b   : > { %v651_v61 = vor.u32 %v649_v50, %v648_v55  ;;  %v653_v62 = vrot.slane %v648_v55, 4  ;;  %v660_v63 = vor.u32 %v658_v52, %v657_v56  ;;  %v661_v0 = vrot.slane %v657_v56, 4 }
  0x5c   : > { %v665_v1 = vrot.slane %v663_v59, 7 }
  0x5d   : > { %v652_v3 = vsel %vm5377_vm8, %v644_v54, %v651_v61  ;;  %v745_v4 = vsel %vm5250_vm2, %v653_v62, %v744_v57  ;;  %v748_v5 = vsel %vm5371_vm7, %v660_v63, %v747_v58  ;;  %757 = sbr.rel (%p4086_p8) target bundleno = 118 (0x76), region = 40 }
  0x5e   : > { %743 = vst [vmem:[#allocation2 + $0x58] sm:$0xf] %v652_v3  ;;  %746 = vst [vmem:[#allocation2 + $0x5c] sm:$0x1] %v745_v4  ;;  %v668_v7 = vor.u32 %v666_v60, %v665_v1  ;;  %v670_v8 = vrot.slane %v665_v1, 4 }
  0x5f   : > { %749 = vst [vmem:[#allocation2 + $0x60] sm:$0xf] %v748_v5 }
  0x60   : > { %v669_v9 = vsel %vm5377_vm8, %v661_v0, %v668_v7  ;;  %v752_v10 = vsel %vm5250_vm2, %v670_v8, %v751_v6 }
  0x61   : > { %750 = vst [vmem:[#allocation2 + $0x64] sm:$0xf] %v669_v9  ;;  %753 = vst [vmem:[#allocation2 + $0x68] sm:$0x1] %v752_v10 }
  0x62   : > { %v4491_v11 = vld [vmem:[%s761_s15] sm:$0xff]   ;;  %v816_v30 = vld [vmem:[#allocation2 + $0x8] sm:$0x1] }
  0x63   : > { %v4090_v12 = vld [vmem:[%s6373_s2] ss:$0 sm:$0xff]  ;;  %v4492_v13 = vunpack.c.l.bf16 %v4491_v11  ;;  %v4493_v14 = vunpack.c.h.bf16 %v4491_v11 }
  0x64   : > { %v4091_v15 = vld [vmem:[%s6374_s3] ss:$0 sm:$0xff] }
  0x65   : > { %v773_v16 = vmul.f32 %v4492_v13, %v4090_v12  ;;  %v774_v43 = vmul.f32 %v4493_v14, %v4090_v12  ;;  %v812_v29 = vld [vmem:[#allocation2] sm:$0xf] }
  0x67   : > { %v782_v17 = vadd.f32 %v4091_v15, %v773_v16  ;;  %v783_v18 = vadd.f32 %v4091_v15, %v774_v43 }
  0x69   : > { %v784_v19 = vmax.f32 %v782_v17, 0.0  ;;  %v785_v20 = vmax.f32 %v783_v18, 0.0 }
  0x6b   : > { %v4437_v21 = vpack.c.bf16 %v784_v19, %v784_v19  ;;  %v4438_v22 = vpack.c.bf16 %v785_v20, %v785_v20 }
  0x6d   : > { %v793_v23 = vshrl.u32 %v4437_v21, 16  ;;  %v796_v24 = vshll.u32 %v4437_v21, 16  ;;  %v801_v25 = vshrl.u32 %v4438_v22, 16  ;;  %v804_v26 = vshll.u32 %v4438_v22, 16 }
  0x6f   : > { %v795_v27 = vrot.slane %v793_v23, 7  ;;  %v803_v28 = vrot.slane %v801_v25, 7 }
  0x71   : > { %v798_v31 = vor.u32 %v796_v24, %v795_v27  ;;  %v799_v32 = vrot.slane %v795_v27, 4  ;;  %v806_v33 = vor.u32 %v804_v26, %v803_v28  ;;  %v808_v34 = vrot.slane %v803_v28, 4 }
  0x73   : > { %v813_v36 = vsel %vm5371_vm7, %v798_v31, %v812_v29  ;;  %v807_v37 = vsel %vm5377_vm8, %v799_v32, %v806_v33  ;;  %v817_v38 = vsel %vm5250_vm2, %v808_v34, %v816_v30 }
  0x74   : > { %814 = vst [vmem:[#allocation2] sm:$0xf] %v813_v36  ;;  %815 = vst [vmem:[#allocation2 + $0x4] sm:$0xf] %v807_v37 }
  0x75   : > { %818 = vst [vmem:[#allocation2 + $0x8] sm:$0x1] %v817_v38 }
  0x76 PF: > { %p4094_p9 = scmp.ge.s32.totalorder %s5160_s21, 1 }
  0x78   : > { %822 = sbr.rel (%p4094_p9) target bundleno = 145 (0x91), region = 44 }
  0x7d   : > { %v4545_v39 = vld [vmem:[%s5333_s0 + $0x40] sm:$0xff]   ;;  %v877_v60 = vld [vmem:[#allocation2 + $0x6c] sm:$0xf]  ;;  %v881_v61 = vld [vmem:[#allocation2 + $0x74] sm:$0x1] }
  0x7e   : > { %v4099_v41 = vld [vmem:[%s6373_s2] ss:$0 sm:$0xff]  ;;  %v4496_v42 = vunpack.c.l.bf16 %v4545_v39  ;;  %v4497_v44 = vunpack.c.h.bf16 %v4545_v39 }
  0x7f   : > { %v4100_v45 = vld [vmem:[%s6374_s3] ss:$0 sm:$0xff] }
  0x80   : > { %v838_v46 = vmul.f32 %v4496_v42, %v4099_v41  ;;  %v839_v47 = vmul.f32 %v4497_v44, %v4099_v41 }
  0x82   : > { %v847_v48 = vadd.f32 %v4100_v45, %v838_v46  ;;  %v848_v49 = vadd.f32 %v4100_v45, %v839_v47 }
  0x84   : > { %v849_v50 = vmax.f32 %v847_v48, 0.0  ;;  %v850_v51 = vmax.f32 %v848_v49, 0.0 }
  0x86   : > { %v4440_v52 = vpack.c.bf16 %v849_v50, %v849_v50  ;;  %v4441_v53 = vpack.c.bf16 %v850_v51, %v850_v51 }
  0x88   : > { %v858_v54 = vshrl.u32 %v4440_v52, 16  ;;  %v861_v55 = vshll.u32 %v4440_v52, 16  ;;  %v866_v56 = vshrl.u32 %v4441_v53, 16  ;;  %v869_v57 = vshll.u32 %v4441_v53, 16 }
  0x8a   : > { %v860_v58 = vrot.slane %v858_v54, 7  ;;  %v868_v59 = vrot.slane %v866_v56, 7 }
  0x8c   : > { %v863_v62 = vor.u32 %v861_v55, %v860_v58  ;;  %v864_v63 = vrot.slane %v860_v58, 4  ;;  %v871_v0 = vor.u32 %v869_v57, %v868_v59  ;;  %v873_v1 = vrot.slane %v868_v59, 4 }
  0x8e   : > { %v878_v3 = vsel %vm5371_vm7, %v863_v62, %v877_v60  ;;  %v872_v4 = vsel %vm5377_vm8, %v864_v63, %v871_v0  ;;  %v882_v5 = vsel %vm5250_vm2, %v873_v1, %v881_v61 }
  0x8f   : > { %879 = vst [vmem:[#allocation2 + $0x6c] sm:$0xf] %v878_v3  ;;  %880 = vst [vmem:[#allocation2 + $0x70] sm:$0xf] %v872_v4 }
  0x90   : > { %883 = vst [vmem:[#allocation2 + $0x74] sm:$0x1] %v882_v5 }
  0x91 PF: > { %v5042_v6 = vld [vmem:[%s6372_s1 + $0x78] sm:$0xff]   ;;  %v5044_v35 = vld [vmem:[%s6372_s1 + $0x70] sm:$0xff]   ;;  %v5046_v40 = vld [vmem:[%s6372_s1 + $0x68] sm:$0xff]   ;;  %vm924_vm9 = vsmask.f32 3328  ;;  %vm1530_vm12 = vcmask 1042432  }
  0x92   : > { %v5043_v7 = vld [vmem:[%s6372_s1 + $0x38] sm:$0xff]   ;;  %4697 = vmatprep.subr.bf16.mxu0 %v5042_v6  ;;  %v5045_v2 = vld [vmem:[%s6372_s1 + $0x30] sm:$0xff]   ;;  %v5047_v8 = vld [vmem:[%s6372_s1 + $0x28] sm:$0xff]   ;;  %vm925_vm10 = vsmask.f32 7440  ;;  %vm1531_vm13 = vcmask 1046532  }
  0x93   : > { %4729 = vmatprep.subr.bf16.mxu1 %v5043_v7  ;;  %4698 = vmatpush3.bf16.msra.mxu0 %v5042_v6  ;;  %v5048_v9 = vld [vmem:[%s6372_s1 + $0x60] sm:$0xff]   ;;  %v5050_v11 = vld [vmem:[%s6372_s1 + $0x58] sm:$0xff]   ;;  %v5052_v13 = vld [vmem:[%s6372_s1 + $0x50] sm:$0xff]  }
  0x94   : > { %4730 = vmatpush3.bf16.msra.mxu1 %v5043_v7  ;;  %4699 = vmatprep.subr.bf16.mxu0 %v5044_v35  ;;  %v5049_v10 = vld [vmem:[%s6372_s1 + $0x20] sm:$0xff]   ;;  %v5051_v12 = vld [vmem:[%s6372_s1 + $0x18] sm:$0xff]   ;;  %v5053_v14 = vld [vmem:[%s6372_s1 + $0x10] sm:$0xff]  }
  0x95   : > { %4731 = vmatprep.subr.bf16.mxu1 %v5045_v2  ;;  %v884_v15 = vld [vmem:[#allocation2] sm:$0xf]  ;;  %v5518_v16 = vld [vmem:[#allocation2 + $0x4] sm:$0xf]  ;;  %v5520_v43 = vld [vmem:[#allocation2 + $0x8] sm:$0x1] }
  0x96   : > { %v928_v17 = vshrl.u32 %v884_v15, 16  ;;  %v931_v18 = vshll.u32 %v884_v15, 16  ;;  %v937_v19 = vshll.u32 %v5518_v16, 16  ;;  %v941_v20 = vshrl.u32 %v5518_v16, 16  ;;  %v5525_v22 = vld [vmem:[#allocation2 + $0xc] sm:$0xf]  ;;  %vm5547_vm11 = vmor %vm924_vm9, %vm925_vm10 }
  0x97   : > { %4700 = vmatpush3.bf16.msra.mxu0 %v5044_v35  ;;  %v947_v21 = vshll.u32 %v5520_v43, 16  ;;  %v4135_v25 = vcombine.low %v884_v15, %v5518_v16  ;;  %v5528_v26 = vld [vmem:[#allocation2 + $0x10] sm:$0xf]  ;;  %v5530_v27 = vld [vmem:[#allocation2 + $0x14] sm:$0x1]  ;;  %v5054_v28 = vld [vmem:[%s6372_s1 + $0x48] sm:$0xff]  }
  0x98   : > { %4732 = vmatpush3.bf16.msra.mxu1 %v5045_v2  ;;  %4701 = vmatprep.subr.bf16.mxu0 %v5046_v40  ;;  %v930_v23 = vrot.slane %v928_v17, 4  ;;  %v933_v24 = vrot.slane %v931_v18, 5  ;;  %v939_v29 = vrot.slane %v937_v19, 5  ;;  %v943_v30 = vrot.slane %v941_v20, 4  ;;  %v5055_v32 = vld [vmem:[%s6372_s1 + $0x8] sm:$0xff]   ;;  %v5056_v38 = vld [vmem:[%s6372_s1 + $0x40] sm:$0xff]   ;;  %vm5701_vm14 = vmor %vm1530_vm12, %vm1531_vm13 }
  0x99   : > { %4733 = vmatprep.subr.bf16.mxu1 %v5047_v8  ;;  %v952_v31 = vshrl.u32 %v5525_v22, 16  ;;  %4745 = vmatprep.mubr.bf16.mxu1 %v4135_v25  ;;  %v955_v34 = vshll.u32 %v5525_v22, 16  ;;  %v961_v36 = vshll.u32 %v5528_v26, 16  ;;  %v965_v37 = vshrl.u32 %v5528_v26, 16  ;;  %v5057_v52 = vld [vmem:[%s6372_s1] sm:$0xff]   ;;  %v5060_v60 = vld [vmem:[%s6372_s1 + $0xb8] sm:$0xff]  }
  0x9a   : > { %v934_v33 = vor.u32 %v933_v24, %v930_v23  ;;  %v944_v41 = vor.u32 %v943_v30, %v939_v29  ;;  %v949_v42 = vrot.slane %v947_v21, 5  ;;  %v971_v45 = vshll.u32 %v5530_v27, 16  ;;  %v5566_v61 = vld [vmem:[#allocation2 + $0x18] sm:$0xf]  ;;  %v5568_v62 = vld [vmem:[#allocation2 + $0x1c] sm:$0xf] }
  0x9b   : > { %4702 = vmatpush3.bf16.msra.mxu0 %v5046_v40  ;;  %v954_v44 = vrot.slane %v952_v31, 4  ;;  %v957_v47 = vrot.slane %v955_v34, 5  ;;  %v963_v48 = vrot.slane %v961_v36, 5  ;;  %v967_v49 = vrot.slane %v965_v37, 4  ;;  %v5061_v3 = vld [vmem:[%s6372_s1 + $0xf8] sm:$0xff]   ;;  %v5062_v15 = vld [vmem:[%s6372_s1 + $0xb0] sm:$0xff]  }
  0x9c   : > { %4734 = vmatpush3.bf16.msra.mxu1 %v5047_v8  ;;  %4703 = vmatprep.subr.bf16.mxu0 %v5048_v9  ;;  %v935_v46 = vrot.slane %v934_v33, 4  ;;  %v945_v50 = vrot.slane %v944_v41, 4  ;;  %v1538_v51 = vrot.slane %v5520_v43, 5  ;;  %v973_v56 = vrot.slane %v971_v45, 5  ;;  %v5573_v4 = vld [vmem:[#allocation2 + $0x20] sm:$0x1] }
  0x9d   : > { %4735 = vmatprep.subr.bf16.mxu1 %v5049_v10  ;;  %v958_v54 = vor.u32 %v957_v47, %v954_v44  ;;  %v968_v55 = vor.u32 %v967_v49, %v963_v48  ;;  %v1545_v58 = vrot.slane %v5530_v27, 5  ;;  %v4136_v59 = vcombine.low %v5525_v22, %v5528_v26  ;;  %v5580_v40 = vld [vmem:[#allocation2 + $0x24] sm:$0xf]  ;;  %v5063_v30 = vld [vmem:[%s6372_s1 + $0xf0] sm:$0xff]   ;;  %v5066_v49 = vld [vmem:[%s6372_s1 + $0xa8] sm:$0xff]  }
  0x9e   : > { %v940_v53 = vsel %vm5547_vm11, %v935_v46, %v939_v29  ;;  %v950_v57 = vsel %vm5547_vm11, %v945_v50, %v949_v42  ;;  %v976_v5 = vshrl.u32 %v5566_v61, 16  ;;  %v979_v6 = vshll.u32 %v5566_v61, 16  ;;  %v5606_v45 = vld [vmem:[#allocation2 + $0x30] sm:$0xf]  ;;  %v5615_v50 = vld [vmem:[#allocation2 + $0x34] sm:$0xf] }
  0x9f   : > { %4704 = vmatpush3.bf16.msra.mxu0 %v5048_v9  ;;  %v4119_v63 = vcombine.low %v940_v53, %v950_v57  ;;  %v959_v0 = vrot.slane %v958_v54, 4  ;;  %v969_v1 = vrot.slane %v968_v55, 4  ;;  %v985_v7 = vshll.u32 %v5568_v62, 16  ;;  %v5086_v27 = vld [vmem:[%s6372_s1 + $0x130] sm:$0xff]  }
  0xa0   : > { %4736 = vmatpush3.bf16.msra.mxu1 %v5049_v10  ;;  %4705 = vmatprep.subr.bf16.mxu0 %v5050_v11  ;;  %v989_v35 = vshrl.u32 %v5568_v62, 16  ;;  %v995_v2 = vshll.u32 %v5573_v4, 16  ;;  %v978_v10 = vrot.slane %v976_v5, 4  ;;  %v981_v17 = vrot.slane %v979_v6, 5  ;;  %v5068_v6 = vld [vmem:[%s6372_s1 + $0xa0] sm:$0xff]  }
  0xa1   : > { %4737 = vmatprep.subr.bf16.mxu1 %v5051_v12  ;;  %4713 = vmatprep.mubr.bf16.mxu0 %v4119_v63  ;;  %v964_v8 = vsel %vm5547_vm11, %v959_v0, %v963_v48  ;;  %v974_v9 = vsel %vm5547_vm11, %v969_v1, %v973_v56  ;;  %v987_v18 = vrot.slane %v985_v7, 5  ;;  %v1000_v21 = vshrl.u32 %v5580_v40, 16  ;;  %v5067_v56 = vld [vmem:[%s6372_s1 + $0xe8] sm:$0xff]  }
  0xa2   : > { %v991_v19 = vrot.slane %v989_v35, 4  ;;  %v997_v20 = vrot.slane %v995_v2, 5  ;;  %v1003_v22 = vshll.u32 %v5580_v40, 16  ;;  %v982_v24 = vor.u32 %v981_v17, %v978_v10 }
  0xa3   : > { %4706 = vmatpush3.bf16.msra.mxu0 %v5050_v11  ;;  %v5586_v11 = vld [vmem:[#allocation2 + $0x28] sm:$0xf]  ;;  %v4137_v31 = vcombine.low %v5566_v61, %v5568_v62  ;;  %v1024_v53 = vshrl.u32 %v5606_v45, 16  ;;  %v1027_v57 = vshll.u32 %v5606_v45, 16  ;;  %v1037_v0 = vshrl.u32 %v5615_v50, 16 }
  0xa4   : > { %4738 = vmatpush3.bf16.msra.mxu1 %v5051_v12  ;;  %4707 = vmatprep.subr.bf16.mxu0 %v5052_v13  ;;  %v5588_v12 = vld [vmem:[#allocation2 + $0x2c] sm:$0x1]  ;;  %v1009_v23 = vshll.u32 %v5586_v11, 16  ;;  %v992_v25 = vor.u32 %v991_v19, %v987_v18  ;;  %v1005_v33 = vrot.slane %v1003_v22, 5  ;;  %v983_v36 = vrot.slane %v982_v24, 4 }
  0xa5   : > { %4739 = vmatprep.subr.bf16.mxu1 %v5053_v14  ;;  %v1019_v29 = vshll.u32 %v5588_v12, 16  ;;  %v4138_v44 = vcombine.low %v5580_v40, %v5586_v11  ;;  %v1026_v63 = vrot.slane %v1024_v53, 4  ;;  %v1029_v7 = vrot.slane %v1027_v57, 5  ;;  %v5638_v40 = vld [vmem:[#allocation2 + $0x44] sm:$0x1] }
  0xa6   : > { %v1011_v34 = vrot.slane %v1009_v23, 5  ;;  %v993_v37 = vrot.slane %v992_v25, 4  ;;  %v988_v46 = vsel %vm5547_vm11, %v983_v36, %v987_v18  ;;  %v4139_v2 = vcombine.low %v5606_v45, %v5615_v50 }
  0xa7   : > { %4708 = vmatpush3.bf16.msra.mxu0 %v5052_v13  ;;  %v1535_v13 = vrot.slane %v5518_v16, 5  ;;  %v1021_v41 = vrot.slane %v1019_v29, 5  ;;  %v1039_v10 = vrot.slane %v1037_v0, 4  ;;  %v1030_v18 = vor.u32 %v1029_v7, %v1026_v63 }
  0xa8   : > { %4740 = vmatpush3.bf16.msra.mxu1 %v5053_v14  ;;  %4709 = vmatprep.subr.bf16.mxu0 %v5054_v28  ;;  %v4120_v14 = vcombine.low %v964_v8, %v974_v9  ;;  %v998_v47 = vsel %vm5547_vm11, %v993_v37, %v997_v20  ;;  %v5069_v9 = vld [vmem:[%s6372_s1 + $0xe0] sm:$0xff]   ;;  %v1067_v24 = vshll.u32 %v5638_v40, 16  ;;  %v1549_v16 = vrot.slane %v5568_v62, 5  ;;  %v5083_v62 = vld [vmem:[#allocation2 + $0x18] sm:$0xff]  }
  0xa9   : > { %4741 = vmatprep.subr.bf16.mxu1 %v5055_v32  ;;  %v4121_v54 = vcombine.low %v988_v46, %v998_v47  ;;  %v1031_v25 = vrot.slane %v1030_v18, 4  ;;  %v5664_v46 = vld [vmem:[#allocation2 + $0x50] sm:$0x1] }
  0xab   : > { %4710 = vmatpush3.bf16.msra.mxu0 %v5054_v28  ;;  %v1013_v28 = vshrl.u32 %v5586_v11, 16 }
  0xac   : > { %4742 = vmatpush3.bf16.msra.mxu1 %v5055_v32  ;;  %4711 = vmatprep.subr.bf16.mxu0 %v5056_v38  ;;  %v1002_v32 = vrot.slane %v1000_v21, 4 }
  0xad   : > { %4743 = vmatprep.subr.bf16.mxu1 %v5057_v52 }
  0xae   : > { %v1006_v42 = vor.u32 %v1005_v33, %v1002_v32  ;;  %v1069_v33 = vrot.slane %v1067_v24, 5 }
  0xaf   : > { %4712 = vmatpush3.bf16.msra.mxu0 %v5056_v38  ;;  %v1015_v38 = vrot.slane %v1013_v28, 4 }
  0xb0   : > { %4744 = vmatpush3.bf16.msra.mxu1 %v5057_v52  ;;  %4761 = vmatprep.subr.bf16.mxu0 %v5060_v60  ;;  %v5617_v52 = vld [vmem:[#allocation2 + $0x38] sm:$0x1]  ;;  %v1007_v55 = vrot.slane %v1006_v42, 4  ;;  %v5660_v42 = vld [vmem:[#allocation2 + $0x4c] sm:$0xf] }
  0xb1   : > { %4793 = vmatprep.subr.bf16.mxu1 %v5061_v3  ;;  %v1016_v48 = vor.u32 %v1015_v38, %v1011_v34  ;;  %v1043_v1 = vshll.u32 %v5617_v52, 16  ;;  %v1085_v57 = vshrl.u32 %v5660_v42, 16 }
  0xb2   : > { %4714 = vmatmul.mubr.bf16.vlgmr.msra.gmra.mxu0 %v4120_v14  ;;  %v1012_v5 = vsel %vm5547_vm11, %v1007_v55, %v1011_v34  ;;  %v5073_v34 = vld [vmem:[%s6372_s1 + $0xd8] sm:$0xff]   ;;  %v5074_v55 = vld [vmem:[%s6372_s1 + $0x90] sm:$0xff]  }
  0xb3   : > { %4746 = vmatmul.mubr.bf16.vlgmr.msra.gmra.mxu1 %v4136_v59  ;;  %4762 = vmatpush3.bf16.msra.mxu0 %v5060_v60  ;;  %v1033_v59 = vshll.u32 %v5615_v50, 16  ;;  %v5625_v60 = vld [vmem:[#allocation2 + $0x3c] sm:$0xf]  ;;  %v1017_v61 = vrot.slane %v1016_v48, 4  ;;  %v1045_v14 = vrot.slane %v1043_v1, 5  ;;  %v1091_v1 = vshll.u32 %v5664_v46, 16 }
  0xb4   : > { %4794 = vmatpush3.bf16.msra.mxu1 %v5061_v3  ;;  %4763 = vmatprep.subr.bf16.mxu0 %v5062_v15  ;;  %v5629_v3 = vld [vmem:[#allocation2 + $0x40] sm:$0xf]  ;;  %v1051_v19 = vshll.u32 %v5625_v60, 16 }
  0xb5   : > { %4795 = vmatprep.subr.bf16.mxu1 %v5063_v30  ;;  %4749 = vmatprep.mubr.bf16.mxu1 %v4137_v31  ;;  %v1035_v35 = vrot.slane %v1033_v59, 5  ;;  %v1022_v8 = vsel %vm5547_vm11, %v1017_v61, %v1021_v41  ;;  %v1057_v20 = vshll.u32 %v5629_v3, 16  ;;  %v1061_v23 = vshrl.u32 %v5629_v3, 16  ;;  %v896_v41 = vld [vmem:[#allocation2 + $0x48] sm:$0xf]  ;;  %v5075_v61 = vld [vmem:[%s6372_s1 + $0xd0] sm:$0xff]  }
  0xb6   : > { %4717 = vmatprep.mubr.bf16.mxu0 %v4121_v54  ;;  %v4122_v17 = vcombine.low %v1012_v5, %v1022_v8  ;;  %v1053_v28 = vrot.slane %v1051_v19, 5  ;;  %v4140_v38 = vcombine.low %v5625_v60, %v5629_v3  ;;  %v1072_v47 = vshrl.u32 %v896_v41, 16  ;;  %v5673_v59 = vld [vmem:[#allocation2 + $0x58] sm:$0xf]  ;;  %v5679_v5 = vld [vmem:[#allocation2 + $0x5c] sm:$0x1] }
  0xb7   : > { %4764 = vmatpush3.bf16.msra.mxu0 %v5062_v15  ;;  %v1048_v15 = vshrl.u32 %v5625_v60, 16  ;;  %v1040_v21 = vor.u32 %v1039_v10, %v1035_v35  ;;  %v1059_v29 = vrot.slane %v1057_v20, 5  ;;  %v1063_v32 = vrot.slane %v1061_v23, 4  ;;  %v5078_v20 = vld [vmem:[%s6372_s1 + $0x88] sm:$0xff]  }
  0xb8   : > { %4796 = vmatpush3.bf16.msra.mxu1 %v5063_v30  ;;  %4765 = vmatprep.subr.bf16.mxu0 %v5066_v49  ;;  %v5072_v30 = vld [vmem:[%s6372_s1 + $0x98] sm:$0xff]   ;;  %v1036_v36 = vsel %vm5547_vm11, %v1031_v25, %v1035_v35  ;;  %v1075_v48 = vshll.u32 %v896_v41, 16  ;;  %v1074_v63 = vrot.slane %v1072_v47, 4  ;;  %v1093_v10 = vrot.slane %v1091_v1, 5 }
  0xb9   : > { %4797 = vmatprep.subr.bf16.mxu1 %v5067_v56  ;;  %v1050_v22 = vrot.slane %v1048_v15, 4  ;;  %v1041_v31 = vrot.slane %v1040_v21, 4  ;;  %v1064_v45 = vor.u32 %v1063_v32, %v1059_v29  ;;  %v1105_v19 = vshll.u32 %v5673_v59, 16 }
  0xba   : > { %4718 = vmatmul.mubr.bf16.gmra.mxu0 %v4122_v17  ;;  %v1077_v0 = vrot.slane %v1075_v48, 5  ;;  %v1109_v23 = vshrl.u32 %v5673_v59, 16  ;;  %v1115_v24 = vshll.u32 %v5679_v5, 16 }
  0xbb   : > { %4750 = vmatmul.mubr.bf16.gmra.mxu1 %v4138_v44  ;;  %4766 = vmatpush3.bf16.msra.mxu0 %v5066_v49  ;;  %v1054_v37 = vor.u32 %v1053_v28, %v1050_v22  ;;  %v1046_v44 = vsel %vm5547_vm11, %v1041_v31, %v1045_v14  ;;  %v5666_v49 = vld [vmem:[#allocation2 + $0x54] sm:$0xf]  ;;  %v1065_v60 = vrot.slane %v1064_v45, 4  ;;  %v5079_v31 = vld [vmem:[%s6372_s1 + $0xc8] sm:$0xff]   ;;  %v5080_v45 = vld [vmem:[%s6372_s1 + $0x80] sm:$0xff]  }
  0xbc   : > { %4798 = vmatpush3.bf16.msra.mxu1 %v5067_v56  ;;  %4767 = vmatprep.subr.bf16.mxu0 %v5068_v6  ;;  %v4123_v53 = vcombine.low %v1036_v36, %v1046_v44  ;;  %v1081_v56 = vshll.u32 %v5660_v42, 16  ;;  %v1096_v14 = vshrl.u32 %v5666_v49, 16  ;;  %v1099_v18 = vshll.u32 %v5666_v49, 16 }
  0xbd   : > { %4799 = vmatprep.subr.bf16.mxu1 %v5069_v9  ;;  %4753 = vmatprep.mubr.bf16.mxu1 %v4139_v2  ;;  %v1055_v54 = vrot.slane %v1054_v37, 4  ;;  %v1087_v2 = vrot.slane %v1085_v57, 4  ;;  %v1070_v8 = vsel %vm5547_vm11, %v1065_v60, %v1069_v33  ;;  %v1111_v32 = vrot.slane %v1109_v23, 4  ;;  %v1506_v33 = vld [vmem:[#allocation2] sm:$0xe]  ;;  %v5082_v57 = vld [vmem:[#allocation2 + $0xc] sm:$0xff]  }
  0xbe   : > { %4721 = vmatprep.mubr.bf16.mxu0 %v4123_v53  ;;  %v1083_v35 = vrot.slane %v1081_v56, 5  ;;  %v1098_v22 = vrot.slane %v1096_v14, 4  ;;  %v1101_v28 = vrot.slane %v1099_v18, 5  ;;  %v1537_v36 = vrot.slane %v1535_v13, 4  ;;  %v1507_v60 = vld [vmem:[#allocation2 + $0xc] sm:$0xe] }
  0xbf   : > { %4768 = vmatpush3.bf16.msra.mxu0 %v5068_v6  ;;  %v1060_v7 = vsel %vm5547_vm11, %v1055_v54, %v1059_v29  ;;  %v4141_v6 = vcombine.low %v896_v41, %v5660_v42  ;;  %v1107_v29 = vrot.slane %v1105_v19, 5  ;;  %v1542_v37 = vrot.slane %v5528_v26, 5  ;;  %v5081_v26 = vld [vmem:[%s6372_s1 + $0xc0] sm:$0xff]  }
  0xc0   : > { %4800 = vmatpush3.bf16.msra.mxu1 %v5069_v9  ;;  %4769 = vmatprep.subr.bf16.mxu0 %v5072_v30  ;;  %v1078_v9 = vor.u32 %v1077_v0, %v1074_v63  ;;  %v4124_v15 = vcombine.low %v1060_v7, %v1070_v8  ;;  %v1088_v17 = vor.u32 %v1087_v2, %v1083_v35  ;;  %v4151_v47 = vrot.slane %v1506_v33, 9  ;;  %v5085_v2 = vld [vmem:[%s6372_s1 + $0x178] sm:$0xff]   ;;  %v5093_v33 = vld [vmem:[%s6372_s1 + $0x160] sm:$0xff]  }
  0xc1   : > { %4801 = vmatprep.subr.bf16.mxu1 %v5073_v34  ;;  %v1102_v41 = vor.u32 %v1101_v28, %v1098_v22  ;;  %v4142_v44 = vcombine.low %v5666_v49, %v5673_v59  ;;  %v1112_v53 = vor.u32 %v1111_v32, %v1107_v29  ;;  %v1117_v54 = vrot.slane %v1115_v24, 5  ;;  %v1510_v24 = vld [vmem:[#allocation2 + $0x30] sm:$0xe] }
  0xc2   : > { %v1079_v21 = vrot.slane %v1078_v9, 4  ;;  %4722 = vmatmul.mubr.bf16.gmra.mxu0 %v4124_v15  ;;  %v1089_v25 = vrot.slane %v1088_v17, 4  ;;  %v1544_v63 = vrot.slane %v1542_v37, 4  ;;  %v4152_v7 = vrot.slane %v1507_v60, 9  ;;  %v5088_v17 = vld [vmem:[#allocation2 + $0x24] sm:$0xff]   ;;  %v5089_v28 = vld [vmem:[#allocation2 + $0x30] sm:$0xff]  }
  0xc3   : > { %4754 = vmatmul.mubr.bf16.gmra.mxu1 %v4140_v38  ;;  %4770 = vmatpush3.bf16.msra.mxu0 %v5072_v30  ;;  %v1103_v56 = vrot.slane %v1102_v41, 4  ;;  %v1113_v49 = vrot.slane %v1112_v53, 4  ;;  %v1551_v8 = vrot.slane %v1549_v16, 4  ;;  %v1552_v9 = vrot.slane %v5573_v4, 5  ;;  %v1509_v4 = vld [vmem:[#allocation2 + $0x24] sm:$0xe] }
  0xc4   : > { %4802 = vmatpush3.bf16.msra.mxu1 %v5073_v34  ;;  %4771 = vmatprep.subr.bf16.mxu0 %v5074_v55  ;;  %v1084_v30 = vsel %vm5547_vm11, %v1079_v21, %v1083_v35  ;;  %v1094_v38 = vsel %vm5547_vm11, %v1089_v25, %v1093_v10  ;;  %v5087_v10 = vld [vmem:[%s6372_s1 + $0x170] sm:$0xff]   ;;  %v1543_v14 = vsel %vm5701_vm14, %v4152_v7, %v1542_v37  ;;  %v1556_v18 = vrot.slane %v5586_v11, 5 }
  0xc5   : > { %4803 = vmatprep.subr.bf16.mxu1 %v5075_v61  ;;  %4757 = vmatprep.mubr.bf16.mxu1 %v4141_v6  ;;  %v4125_v48 = vcombine.low %v1084_v30, %v1094_v38  ;;  %v1108_v0 = vsel %vm5547_vm11, %v1103_v56, %v1107_v29  ;;  %v1118_v1 = vsel %vm5547_vm11, %v1113_v49, %v1117_v54  ;;  %v1563_v21 = vrot.slane %v5615_v50, 5  ;;  %v5091_v50 = vld [vmem:[%s6372_s1 + $0x168] sm:$0xff]   ;;  %v5094_v38 = vld [vmem:[#allocation2 + $0x3c] sm:$0xff]   ;;  %v1513_v49 = vld [vmem:[#allocation2 + $0x54] sm:$0xe] }
  0xc6   : > { %v4126_v35 = vcombine.low %v1108_v0, %v1118_v1  ;;  %v1546_v15 = vsel %vm5701_vm14, %v1544_v63, %v1545_v58  ;;  %v1559_v58 = vrot.slane %v5588_v12, 5  ;;  %v4154_v11 = vrot.slane %v1509_v4, 9  ;;  %v5090_v12 = vld [vmem:[%s6372_s1 + $0x128] sm:$0xff]  }
  0xc7   : > { %4772 = vmatpush3.bf16.msra.mxu0 %v5074_v55  ;;  %4725 = vmatprep.mubr.bf16.mxu0 %v4125_v48  ;;  %v1536_v55 = vsel %vm5701_vm14, %v4151_v47, %v1535_v13  ;;  %v1508_v13 = vld [vmem:[#allocation2 + $0x18] sm:$0xe]  ;;  %v4176_v22 = vcombine.low %v1543_v14, %v1546_v15  ;;  %v1558_v23 = vrot.slane %v1556_v18, 4  ;;  %v1570_v29 = vrot.slane %v5629_v3, 5  ;;  %v5095_v1 = vld [vmem:[#allocation2 + $0x48] sm:$0xff]  }
  0xc8   : > { %4804 = vmatpush3.bf16.msra.mxu1 %v5075_v61  ;;  %4773 = vmatprep.subr.bf16.mxu0 %v5078_v20  ;;  %v1539_v61 = vsel %vm5701_vm14, %v1537_v36, %v1538_v51  ;;  %v5084_v51 = vld [vmem:[%s6372_s1 + $0x138] sm:$0xff]   ;;  %v4153_v6 = vrot.slane %v1508_v13, 9  ;;  %v1565_v30 = vrot.slane %v1563_v21, 4  ;;  %v1566_v32 = vrot.slane %v5617_v52, 5  ;;  %v2043_v14 = vld [vmem:[#allocation2 + $0x14] sm:$0x1] }
  0xc9   : > { %4805 = vmatprep.subr.bf16.mxu1 %v5079_v31  ;;  %v4175_v43 = vcombine.low %v1536_v55, %v1539_v61  ;;  %v1511_v36 = vld [vmem:[#allocation2 + $0x3c] sm:$0xe]  ;;  %v1557_v3 = vsel %vm5701_vm14, %v4154_v11, %v1556_v18  ;;  %v1560_v37 = vsel %vm5701_vm14, %v1558_v23, %v1559_v58  ;;  %v1577_v52 = vrot.slane %v5660_v42, 5  ;;  %v5103_v18 = vld [vmem:[%s6372_s1 + $0x148] sm:$0xff]  }
  0xca   : > { %4726 = vmatmul.mubr.bf16.gmra.mxu0 %v4126_v35  ;;  %v1550_v19 = vsel %vm5701_vm14, %v4153_v6, %v1549_v16  ;;  %v1572_v41 = vrot.slane %v1570_v29, 4  ;;  %v1567_v47 = vsel %vm5701_vm14, %v1565_v30, %v1566_v32  ;;  %v4156_v48 = vrot.slane %v1511_v36, 9  ;;  %v5097_v61 = vld [vmem:[%s6372_s1 + $0x158] sm:$0xff]   ;;  %v2041_v6 = vld [vmem:[#allocation2 + $0xc] sm:$0xf] }
  0xcb   : > { %4758 = vmatmul.mubr.bf16.gmra.mxu1 %v4142_v44  ;;  %4774 = vmatpush3.bf16.msra.mxu0 %v5078_v20  ;;  %v1553_v20 = vsel %vm5701_vm14, %v1551_v8, %v1552_v9  ;;  %v1573_v44 = vrot.slane %v5638_v40, 5  ;;  %v1580_v53 = vrot.slane %v5664_v46, 5  ;;  %v4178_v54 = vcombine.low %v1557_v3, %v1560_v37  ;;  %v5092_v40 = vld [vmem:[%s6372_s1 + $0x120] sm:$0xff]   ;;  %v5098_v8 = vld [vmem:[%s6372_s1 + $0x110] sm:$0xff]   ;;  %v2045_v30 = vld [vmem:[#allocation2 + $0x1c] sm:$0xf] }
  0xcc   : > { %4806 = vmatpush3.bf16.msra.mxu1 %v5079_v31  ;;  %4775 = vmatprep.subr.bf16.mxu0 %v5080_v45  ;;  %v4177_v25 = vcombine.low %v1550_v19, %v1553_v20  ;;  %v4155_v31 = vrot.slane %v1510_v24, 9  ;;  %v1579_v56 = vrot.slane %v1577_v52, 4  ;;  %v1584_v42 = vrot.slane %v5673_v59, 5  ;;  %v5102_v32 = vld [vmem:[%s6372_s1 + $0x108] sm:$0xff]   ;;  %v2046_v36 = vld [vmem:[#allocation2 + $0x20] sm:$0x1] }
  0xcd   : > { %4807 = vmatprep.subr.bf16.mxu1 %v5081_v26  ;;  %4809 = vmatprep.mubr.bf16.mxu1 %v5082_v57  ;;  %v1587_v46 = vrot.slane %v5679_v5, 5  ;;  %v4158_v59 = vrot.slane %v1513_v49, 9  ;;  %v1571_v63 = vsel %vm5701_vm14, %v4156_v48, %v1570_v29  ;;  %v1574_v0 = vsel %vm5701_vm14, %v1572_v41, %v1573_v44  ;;  %v5096_v5 = vld [vmem:[%s6372_s1 + $0x118] sm:$0xff]  }
  0xce   : > { %4777 = vmatprep.mubr.bf16.mxu0 %v4175_v43  ;;  %v1586_v55 = vrot.slane %v1584_v42, 4  ;;  %v1581_v7 = vsel %vm5701_vm14, %v1579_v56, %v1580_v53  ;;  %v4180_v13 = vcombine.low %v1571_v63, %v1574_v0  ;;  %v2066_v15 = vshrl.u32 %v2041_v6, 16 }
  0xcf   : > { %4776 = vmatpush3.bf16.msra.mxu0 %v5080_v45  ;;  %v1564_v45 = vsel %vm5701_vm14, %v4155_v31, %v1563_v21  ;;  %v5800_v35 = vsel %vm5701_vm14, %v4158_v59, %v1584_v42  ;;  %v2085_v20 = vshll.u32 %v2043_v14, 16  ;;  %v2467_v21 = vld [vmem:[#allocation2 + $0xc] sm:$0xe]  ;;  %v2504_v24 = vrot.slane %v2043_v14, 5  ;;  %v2049_v14 = vld [vmem:[#allocation2 + $0x2c] sm:$0x1] }
  0xd0   : > { %4808 = vmatpush3.bf16.msra.mxu1 %v5081_v26  ;;  %4825 = vmatprep.subr.bf16.mxu0 %v5084_v51  ;;  %v1512_v26 = vld [vmem:[#allocation2 + $0x48] sm:$0xe]  ;;  %v4179_v60 = vcombine.low %v1564_v45, %v1567_v47  ;;  %v5804_v43 = vsel %vm5701_vm14, %v1586_v55, %v1587_v46  ;;  %v2068_v58 = vrot.slane %v2066_v15, 4  ;;  %v4255_v23 = vrot.slane %v2467_v21, 9  ;;  %v5105_v47 = vld [vmem:[%s6372_s1 + $0x140] sm:$0xff]  }
  0xd1   : > { %4857 = vmatprep.subr.bf16.mxu1 %v5085_v2  ;;  %v4157_v57 = vrot.slane %v1512_v26, 9  ;;  %v2099_v44 = vshll.u32 %v2045_v30, 16  ;;  %v2103_v45 = vshrl.u32 %v2045_v30, 16  ;;  %v2508_v46 = vrot.slane %v2045_v30, 5 }
  0xd2   : > { %4778 = vmatmul.mubr.bf16.vlgmr.msra.gmra.mxu0 %v4176_v22  ;;  %v2511_v0 = vrot.slane %v2046_v36, 5 }
  0xd3   : > { %4810 = vmatmul.mubr.bf16.vlgmr.msra.gmra.mxu1 %v5083_v62  ;;  %4826 = vmatpush3.bf16.msra.mxu0 %v5084_v51  ;;  %v1578_v16 = vsel %vm5701_vm14, %v4157_v57, %v1577_v52  ;;  %v5099_v51 = vld [vmem:[%s6372_s1 + $0x150] sm:$0xff]   ;;  %v4182_v62 = vcombine.low %v5800_v35, %v5804_v43  ;;  %v2101_v42 = vrot.slane %v2099_v44, 5  ;;  %v2109_v57 = vshll.u32 %v2046_v36, 16  ;;  %v5106_v35 = vld [vmem:[%s6372_s1 + $0x1b8] sm:$0xff]  }
  0xd4   : > { %4858 = vmatpush3.bf16.msra.mxu1 %v5085_v2  ;;  %4813 = vmatprep.mubr.bf16.mxu1 %v5088_v17  ;;  %v5100_v2 = vld [vmem:[#allocation2 + $0x54] sm:$0xff]   ;;  %v4181_v9 = vcombine.low %v1578_v16, %v1581_v7  ;;  %v2069_v17 = vshll.u32 %v2041_v6, 16  ;;  %v2047_v6 = vld [vmem:[#allocation2 + $0x24] sm:$0xf]  ;;  %v2470_v36 = vld [vmem:[#allocation2 + $0x30] sm:$0xe] }
  0xd5   : > { %4859 = vmatprep.subr.bf16.mxu1 %v5087_v10  ;;  %4827 = vmatprep.subr.bf16.mxu0 %v5086_v27  ;;  %v2111_v63 = vrot.slane %v2109_v57, 5  ;;  %v2114_v15 = vshrl.u32 %v2047_v6, 16 }
  0xd6   : > { %4781 = vmatprep.mubr.bf16.mxu0 %v4177_v25  ;;  %v2071_v11 = vrot.slane %v2069_v17, 5  ;;  %v2044_v25 = vld [vmem:[#allocation2 + $0x18] sm:$0xf]  ;;  %v2117_v17 = vshll.u32 %v2047_v6, 16 }
  0xd7   : > { %4828 = vmatpush3.bf16.msra.mxu0 %v5086_v27  ;;  %v5101_v27 = vld [vmem:[#allocation2 + $0x60] sm:$0xff]   ;;  %v2090_v3 = vshrl.u32 %v2044_v25, 16  ;;  %v2093_v37 = vshll.u32 %v2044_v25, 16 }
  0xd8   : > { %4860 = vmatpush3.bf16.msra.mxu1 %v5087_v10  ;;  %4829 = vmatprep.subr.bf16.mxu0 %v5090_v12  ;;  %v2042_v10 = vld [vmem:[#allocation2 + $0x10] sm:$0xf] }
  0xd9   : > { %4861 = vmatprep.subr.bf16.mxu1 %v5091_v50  ;;  %v2075_v4 = vshll.u32 %v2042_v10, 16  ;;  %v2079_v19 = vshrl.u32 %v2042_v10, 16  ;;  %v2501_v22 = vrot.slane %v2042_v10, 5  ;;  %v2095_v26 = vrot.slane %v2093_v37, 5 }
  0xda   : > { %4782 = vmatmul.mubr.bf16.gmra.mxu0 %v4178_v54  ;;  %v2092_v54 = vrot.slane %v2090_v3, 4 }
  0xdb   : > { %4814 = vmatmul.mubr.bf16.gmra.mxu1 %v5089_v28  ;;  %4830 = vmatpush3.bf16.msra.mxu0 %v5090_v12  ;;  %v2077_v28 = vrot.slane %v2075_v4, 5  ;;  %v2081_v29 = vrot.slane %v2079_v19, 4  ;;  %v2503_v31 = vrot.slane %v2501_v22, 4  ;;  %v2072_v12 = vor.u32 %v2071_v11, %v2068_v58 }
  0xdc   : > { %4862 = vmatpush3.bf16.msra.mxu1 %v5091_v50  ;;  %4817 = vmatprep.mubr.bf16.mxu1 %v5094_v38  ;;  %v2087_v50 = vrot.slane %v2085_v20, 5  ;;  %v2468_v38 = vld [vmem:[#allocation2 + $0x18] sm:$0xe]  ;;  %v2096_v49 = vor.u32 %v2095_v26, %v2092_v54  ;;  %v2050_v20 = vld [vmem:[#allocation2 + $0x30] sm:$0xf]  ;;  %v2119_v58 = vrot.slane %v2117_v17, 5 }
  0xdd   : > { %4863 = vmatprep.subr.bf16.mxu1 %v5093_v33  ;;  %4831 = vmatprep.subr.bf16.mxu0 %v5092_v40  ;;  %v2082_v52 = vor.u32 %v2081_v29, %v2077_v28  ;;  %v2505_v41 = vsel %vm5701_vm14, %v2503_v31, %v2504_v24  ;;  %v2073_v48 = vrot.slane %v2072_v12, 4  ;;  %v4256_v55 = vrot.slane %v2468_v38, 9  ;;  %v5108_v31 = vld [vmem:[%s6372_s1 + $0x1b0] sm:$0xff]  }
  0xde   : > { %4785 = vmatprep.mubr.bf16.mxu0 %v4179_v60  ;;  %v2133_v11 = vshll.u32 %v2049_v14, 16  ;;  %v2518_v12 = vrot.slane %v2049_v14, 5 }
  0xdf   : > { %4832 = vmatpush3.bf16.msra.mxu0 %v5092_v40  ;;  %v2083_v56 = vrot.slane %v2082_v52, 4  ;;  %v2105_v40 = vrot.slane %v2103_v45, 4  ;;  %v2078_v60 = vsel %vm5547_vm11, %v2073_v48, %v2077_v28  ;;  %v2509_v16 = vsel %vm5701_vm14, %v4256_v55, %v2508_v46 }
  0xe0   : > { %4864 = vmatpush3.bf16.msra.mxu1 %v5093_v33  ;;  %4833 = vmatprep.subr.bf16.mxu0 %v5096_v5  ;;  %v2502_v33 = vsel %vm5701_vm14, %v4255_v23, %v2501_v22  ;;  %v5109_v22 = vld [vmem:[%s6372_s1 + $0x1f0] sm:$0xff]   ;;  %v2141_v52 = vshll.u32 %v2050_v20, 16 }
  0xe1   : > { %4865 = vmatprep.subr.bf16.mxu1 %v5097_v61  ;;  %v4279_v53 = vcombine.low %v2502_v33, %v2505_v41  ;;  %v2106_v59 = vor.u32 %v2105_v40, %v2101_v42  ;;  %v2051_v23 = vld [vmem:[#allocation2 + $0x34] sm:$0xf]  ;;  %v2138_v33 = vshrl.u32 %v2050_v20, 16 }
  0xe2   : > { %4786 = vmatmul.mubr.bf16.gmra.mxu0 %v4180_v13  ;;  %v2147_v45 = vshll.u32 %v2051_v23, 16  ;;  %v2143_v54 = vrot.slane %v2141_v52, 5 }
  0xe3   : > { %4818 = vmatmul.mubr.bf16.gmra.mxu1 %v5095_v1  ;;  %4834 = vmatpush3.bf16.msra.mxu0 %v5096_v5  ;;  %v5104_v1 = vld [vmem:[%s6372_s1 + $0x100] sm:$0xff]   ;;  %v2097_v5 = vrot.slane %v2096_v49, 4  ;;  %v2107_v13 = vrot.slane %v2106_v59, 4  ;;  %v2140_v44 = vrot.slane %v2138_v33, 4  ;;  %v2053_v59 = vld [vmem:[#allocation2 + $0x3c] sm:$0xf] }
  0xe4   : > { %4866 = vmatpush3.bf16.msra.mxu1 %v5097_v61  ;;  %4821 = vmatprep.mubr.bf16.mxu1 %v5100_v2  ;;  %v2088_v61 = vsel %vm5547_vm11, %v2083_v56, %v2087_v50  ;;  %v5107_v2 = vld [vmem:[%s6372_s1 + $0x1f8] sm:$0xff]   ;;  %v5111_v56 = vld [vmem:[%s6372_s1 + $0x1e8] sm:$0xff]   ;;  %v2149_v57 = vrot.slane %v2147_v45, 5  ;;  %v2162_v6 = vshrl.u32 %v2053_v59, 16 }
  0xe5   : > { %4867 = vmatprep.subr.bf16.mxu1 %v5099_v51  ;;  %4835 = vmatprep.subr.bf16.mxu0 %v5098_v8  ;;  %v4239_v7 = vcombine.low %v2078_v60, %v2088_v61  ;;  %v2112_v4 = vsel %vm5547_vm11, %v2107_v13, %v2111_v63  ;;  %v5854_v50 = vld [vmem:[#allocation2 + $0x38] sm:$0x1]  ;;  %v2144_v55 = vor.u32 %v2143_v54, %v2140_v44  ;;  %v4258_v61 = vrot.slane %v2470_v36, 9  ;;  %v2472_v33 = vld [vmem:[#allocation2 + $0x48] sm:$0xe] }
  0xe6   : > { %4789 = vmatprep.mubr.bf16.mxu0 %v4181_v9  ;;  %v2102_v9 = vsel %vm5547_vm11, %v2097_v5, %v2101_v42  ;;  %v2157_v26 = vshll.u32 %v5854_v50, 16  ;;  %v5110_v5 = vld [vmem:[%s6372_s1 + $0x1a8] sm:$0xff]  }
  0xe7   : > { %4836 = vmatpush3.bf16.msra.mxu0 %v5098_v8  ;;  %v2048_v8 = vld [vmem:[#allocation2 + $0x28] sm:$0xf]  ;;  %v4240_v21 = vcombine.low %v2102_v9, %v2112_v4  ;;  %v2145_v13 = vrot.slane %v2144_v55, 4 }
  0xe8   : > { %4868 = vmatpush3.bf16.msra.mxu1 %v5099_v51  ;;  %4837 = vmatprep.subr.bf16.mxu0 %v5102_v32  ;;  %v2510_v51 = vrot.slane %v2508_v46, 4  ;;  %v2123_v43 = vshll.u32 %v2048_v8, 16  ;;  %v2515_v29 = vrot.slane %v2048_v8, 5  ;;  %v2159_v46 = vrot.slane %v2157_v26, 5 }
  0xe9   : > { %4869 = vmatprep.subr.bf16.mxu1 %v5103_v18  ;;  %v2150_v4 = vsel %vm5547_vm11, %v2145_v13, %v2149_v57 }
  0xea   : > { %4790 = vmatmul.mubr.bf16.gmra.mxu0 %v4182_v62  ;;  %v2512_v10 = vsel %vm5701_vm14, %v2510_v51, %v2511_v0  ;;  %v2127_v62 = vshrl.u32 %v2048_v8, 16  ;;  %v2125_v24 = vrot.slane %v2123_v43, 5  ;;  %v2517_v38 = vrot.slane %v2515_v29, 4  ;;  %v2054_v51 = vld [vmem:[#allocation2 + $0x40] sm:$0xf] }
  0xeb   : > { %4822 = vmatmul.mubr.bf16.gmra.mxu1 %v5101_v27  ;;  %4838 = vmatpush3.bf16.msra.mxu0 %v5102_v32  ;;  %v4280_v19 = vcombine.low %v2509_v16, %v2512_v10  ;;  %v2116_v27 = vrot.slane %v2114_v15, 4  ;;  %v2135_v32 = vrot.slane %v2133_v11, 5  ;;  %v5113_v16 = vld [vmem:[%s6372_s1 + $0x1e0] sm:$0xff]   ;;  %v2165_v8 = vshll.u32 %v2053_v59, 16  ;;  %v2057_v11 = vld [vmem:[#allocation2 + $0x4c] sm:$0xf] }
  0xec   : > { %4870 = vmatpush3.bf16.msra.mxu1 %v5103_v18  ;;  %4873 = vmatprep.mubr.bf16.mxu1 %v4279_v53  ;;  %v2469_v18 = vld [vmem:[#allocation2 + $0x24] sm:$0xe]  ;;  %v2129_v25 = vrot.slane %v2127_v62, 4  ;;  %v2519_v53 = vsel %vm5701_vm14, %v2517_v38, %v2518_v12  ;;  %v2171_v9 = vshll.u32 %v2054_v51, 16  ;;  %v2175_v17 = vshrl.u32 %v2054_v51, 16 }
  0xed   : > { %4871 = vmatprep.subr.bf16.mxu1 %v5105_v47  ;;  %4839 = vmatprep.subr.bf16.mxu0 %v5104_v1  ;;  %v4257_v28 = vrot.slane %v2469_v18, 9  ;;  %v2120_v30 = vor.u32 %v2119_v58, %v2116_v27  ;;  %v2471_v18 = vld [vmem:[#allocation2 + $0x3c] sm:$0xe]  ;;  %v2167_v43 = vrot.slane %v2165_v8, 5  ;;  %v2056_v58 = vld [vmem:[#allocation2 + $0x48] sm:$0xf] }
  0xee   : > { %4841 = vmatprep.mubr.bf16.mxu0 %v4239_v7  ;;  %v2130_v3 = vor.u32 %v2129_v25, %v2125_v24  ;;  %v2525_v7 = vrot.slane %v5854_v50, 5  ;;  %v2173_v62 = vrot.slane %v2171_v9, 5  ;;  %v5115_v50 = vld [vmem:[%s6372_s1 + $0x1d8] sm:$0xff]   ;;  %v2195_v38 = vshll.u32 %v2057_v11, 16  ;;  %v2059_v59 = vld [vmem:[#allocation2 + $0x54] sm:$0xf] }
  0xef   : > { %4840 = vmatpush3.bf16.msra.mxu0 %v5104_v1  ;;  %v2516_v37 = vsel %vm5701_vm14, %v4257_v28, %v2515_v29  ;;  %v2121_v41 = vrot.slane %v2120_v30, 4  ;;  %v2522_v1 = vrot.slane %v2051_v23, 5  ;;  %v4259_v28 = vrot.slane %v2471_v18, 9  ;;  %v5889_v29 = vld [vmem:[#allocation2 + $0x50] sm:$0x1] }
  0xf0   : > { %4872 = vmatpush3.bf16.msra.mxu1 %v5105_v47  ;;  %4889 = vmatprep.subr.bf16.mxu0 %v5106_v35  ;;  %v2151_v47 = vshrl.u32 %v2051_v23, 16  ;;  %v2131_v48 = vrot.slane %v2130_v3, 4  ;;  %v4281_v40 = vcombine.low %v2516_v37, %v2519_v53  ;;  %v2186_v3 = vshrl.u32 %v2056_v58, 16  ;;  %v2473_v18 = vld [vmem:[#allocation2 + $0x54] sm:$0xe] }
  0xf1   : > { %4921 = vmatprep.subr.bf16.mxu1 %v5107_v2  ;;  %v2126_v42 = vsel %vm5547_vm11, %v2121_v41, %v2125_v24  ;;  %v2523_v14 = vsel %vm5701_vm14, %v4258_v61, %v2522_v1  ;;  %v2524_v15 = vrot.slane %v2522_v1, 4  ;;  %v2189_v37 = vshll.u32 %v2056_v58, 16  ;;  %v2062_v58 = vld [vmem:[#allocation2 + $0x60] sm:$0xf] }
  0xf2   : > { %4842 = vmatmul.mubr.bf16.vlgmr.msra.gmra.mxu0 %v4240_v21  ;;  %v2153_v60 = vrot.slane %v2151_v47, 4  ;;  %v2136_v49 = vsel %vm5547_vm11, %v2131_v48, %v2135_v32  ;;  %v2529_v32 = vrot.slane %v2054_v51, 5  ;;  %v2199_v45 = vshrl.u32 %v2057_v11, 16  ;;  %v5114_v47 = vld [vmem:[%s6372_s1 + $0x198] sm:$0xff]   ;;  %v5119_v51 = vld [vmem:[%s6372_s1 + $0x1c8] sm:$0xff]  }
  0xf3   : > { %4874 = vmatmul.mubr.bf16.vlgmr.msra.gmra.mxu1 %v4280_v19  ;;  %4890 = vmatpush3.bf16.msra.mxu0 %v5106_v35  ;;  %v4241_v63 = vcombine.low %v2126_v42, %v2136_v49  ;;  %v5112_v19 = vld [vmem:[%s6372_s1 + $0x1a0] sm:$0xff]   ;;  %v2164_v35 = vrot.slane %v2162_v6, 4  ;;  %v2526_v21 = vsel %vm5701_vm14, %v2524_v15, %v2525_v7  ;;  %v2188_v53 = vrot.slane %v2186_v3, 4 }
  0xf4   : > { %4922 = vmatpush3.bf16.msra.mxu1 %v5107_v2  ;;  %4891 = vmatprep.subr.bf16.mxu0 %v5108_v31  ;;  %v2154_v0 = vor.u32 %v2153_v60, %v2149_v57  ;;  %v2055_v2 = vld [vmem:[#allocation2 + $0x44] sm:$0x1]  ;;  %v4282_v24 = vcombine.low %v2523_v14, %v2526_v21  ;;  %v2530_v41 = vsel %vm5701_vm14, %v4259_v28, %v2529_v32  ;;  %v2531_v44 = vrot.slane %v2529_v32, 4 }
  0xf5   : > { %4923 = vmatprep.subr.bf16.mxu1 %v5109_v22  ;;  %4877 = vmatprep.mubr.bf16.mxu1 %v4281_v40  ;;  %v2181_v27 = vshll.u32 %v2055_v2, 16  ;;  %v2168_v25 = vor.u32 %v2167_v43, %v2164_v35  ;;  %v2532_v12 = vrot.slane %v2055_v2, 5  ;;  %v2191_v54 = vrot.slane %v2189_v37, 5  ;;  %v2061_v2 = vld [vmem:[#allocation2 + $0x5c] sm:$0x1] }
  0xf6   : > { %4845 = vmatprep.mubr.bf16.mxu0 %v4241_v63  ;;  %v2155_v10 = vrot.slane %v2154_v0, 4  ;;  %v2197_v26 = vrot.slane %v2195_v38, 5  ;;  %v2201_v57 = vrot.slane %v2199_v45, 4  ;;  %v2205_v60 = vshll.u32 %v5889_v29, 16  ;;  %v2060_v63 = vld [vmem:[#allocation2 + $0x58] sm:$0xf] }
  0xf7   : > { %4892 = vmatpush3.bf16.msra.mxu0 %v5108_v31  ;;  %v2183_v30 = vrot.slane %v2181_v27, 5  ;;  %v2169_v36 = vrot.slane %v2168_v25, 4  ;;  %v2533_v40 = vsel %vm5701_vm14, %v2531_v44, %v2532_v12  ;;  %v4260_v61 = vrot.slane %v2472_v33, 9  ;;  %v2474_v33 = vld [vmem:[#allocation2 + $0x60] sm:$0xe] }
  0xf8   : > { %4924 = vmatpush3.bf16.msra.mxu1 %v5109_v22  ;;  %v2160_v20 = vsel %vm5547_vm11, %v2155_v10, %v2159_v46  ;;  %4893 = vmatprep.subr.bf16.mxu0 %v5110_v5  ;;  %v2177_v22 = vrot.slane %v2175_v17, 4  ;;  %v4283_v55 = vcombine.low %v2530_v41, %v2533_v40  ;;  %v2192_v46 = vor.u32 %v2191_v54, %v2188_v53 }
  0xf9   : > { %4925 = vmatprep.subr.bf16.mxu1 %v5111_v56  ;;  %v4242_v23 = vcombine.low %v2150_v4, %v2160_v20  ;;  %v2174_v48 = vsel %vm5547_vm11, %v2169_v36, %v2173_v62  ;;  %v2202_v0 = vor.u32 %v2201_v57, %v2197_v26  ;;  %v2207_v1 = vrot.slane %v2205_v60, 5 }
  0xfa   : > { %v2178_v31 = vor.u32 %v2177_v22, %v2173_v62  ;;  %v2536_v7 = vrot.slane %v2057_v11, 5  ;;  %v2193_v13 = vrot.slane %v2192_v46, 4  ;;  %v2210_v6 = vshrl.u32 %v2059_v59, 16  ;;  %v5118_v62 = vld [vmem:[%s6372_s1 + $0x188] sm:$0xff]   ;;  %v2063_v11 = vld [vmem:[#allocation2 + $0x64] sm:$0xf] }
  0xfb   : > { %4846 = vmatmul.mubr.bf16.gmra.mxu0 %v4242_v23  ;;  %4878 = vmatmul.mubr.bf16.gmra.mxu1 %v4282_v24  ;;  %v2213_v8 = vshll.u32 %v2059_v59, 16  ;;  %v2219_v9 = vshll.u32 %v2060_v63, 16  ;;  %v2203_v10 = vrot.slane %v2202_v0, 4  ;;  %v2223_v17 = vshrl.u32 %v2060_v63, 16 }
  0xfc   : > { %4926 = vmatpush3.bf16.msra.mxu1 %v5111_v56  ;;  %4894 = vmatpush3.bf16.msra.mxu0 %v5110_v5  ;;  %v2179_v52 = vrot.slane %v2178_v31, 4  ;;  %v5117_v56 = vld [vmem:[%s6372_s1 + $0x1d0] sm:$0xff]   ;;  %v2539_v5 = vrot.slane %v5889_v29, 5  ;;  %v2537_v14 = vsel %vm5701_vm14, %v4260_v61, %v2536_v7  ;;  %v2538_v15 = vrot.slane %v2536_v7, 4  ;;  %v5927_v29 = vld [vmem:[#allocation2 + $0x68] sm:$0x1] }
  0xfd   : > { %4927 = vmatprep.subr.bf16.mxu1 %v5113_v16  ;;  %4895 = vmatprep.subr.bf16.mxu0 %v5112_v19  ;;  %v2198_v4 = vsel %vm5547_vm11, %v2193_v13, %v2197_v26  ;;  %v2215_v35 = vrot.slane %v2213_v8, 5  ;;  %v2221_v43 = vrot.slane %v2219_v9, 5  ;;  %v2208_v20 = vsel %vm5547_vm11, %v2203_v10, %v2207_v1  ;;  %v3008_v7 = vld [vmem:[#allocation2 + $0x18] sm:$0xf] }
  0xfe   : > { %v2184_v42 = vsel %vm5547_vm11, %v2179_v52, %v2183_v30  ;;  %4881 = vmatprep.mubr.bf16.mxu1 %v4283_v55  ;;  %v2540_v21 = vsel %vm5701_vm14, %v2538_v15, %v2539_v5  ;;  %v2225_v22 = vrot.slane %v2223_v17, 4  ;;  %v2229_v27 = vshll.u32 %v2061_v2, 16 }
  0xff   : > { %v4243_v49 = vcombine.low %v2174_v48, %v2184_v42  ;;  %v4244_v23 = vcombine.low %v2198_v4, %v2208_v20  ;;  %v4284_v24 = vcombine.low %v2537_v14, %v2540_v21  ;;  %v4261_v28 = vrot.slane %v2473_v18, 9  ;;  %v5122_v14 = vld [vmem:[#allocation2 + $0x18] sm:$0xff]   ;;  %v5966_v20 = vld [vmem:[#allocation2 + $0x28] sm:$0xf] }
 0x100   : > { %4928 = vmatpush3.bf16.msra.mxu1 %v5113_v16  ;;  %4896 = vmatpush3.bf16.msra.mxu0 %v5112_v19  ;;  %v5116_v16 = vld [vmem:[%s6372_s1 + $0x190] sm:$0xff]   ;;  %v2212_v19 = vrot.slane %v2210_v6, 4  ;;  %v2226_v31 = vor.u32 %v2225_v22, %v2221_v43  ;;  %v2231_v30 = vrot.slane %v2229_v27, 5  ;;  %v2543_v32 = vrot.slane %v2060_v63, 5 }
 0x101   : > { %4929 = vmatprep.subr.bf16.mxu1 %v5115_v50  ;;  %4849 = vmatprep.mubr.bf16.mxu0 %v4243_v49  ;;  %v2546_v12 = vrot.slane %v2061_v2, 5  ;;  %v2234_v3 = vshrl.u32 %v2062_v58, 16  ;;  %v2237_v37 = vshll.u32 %v2062_v58, 16  ;;  %v2243_v38 = vshll.u32 %v2063_v11, 16 }
 0x102   : > { %4897 = vmatprep.subr.bf16.mxu0 %v5114_v47  ;;  %v2216_v25 = vor.u32 %v2215_v35, %v2212_v19  ;;  %v2227_v52 = vrot.slane %v2226_v31, 4  ;;  %v2544_v41 = vsel %vm5701_vm14, %v4261_v28, %v2543_v32  ;;  %v2545_v44 = vrot.slane %v2543_v32, 4 }
 0x103   : > { %4850 = vmatmul.mubr.bf16.gmra.mxu0 %v4244_v23  ;;  %4882 = vmatmul.mubr.bf16.gmra.mxu1 %v4284_v24  ;;  %v2247_v45 = vshrl.u32 %v2063_v11, 16  ;;  %v2236_v53 = vrot.slane %v2234_v3, 4  ;;  %v2239_v54 = vrot.slane %v2237_v37, 5  ;;  %v2245_v26 = vrot.slane %v2243_v38, 5  ;;  %v5123_v3 = vld [vmem:[#allocation2 + $0x24] sm:$0xff]  }
 0x104   : > { %4930 = vmatpush3.bf16.msra.mxu1 %v5115_v50  ;;  %4898 = vmatpush3.bf16.msra.mxu0 %v5114_v47  ;;  %v5121_v50 = vld [vmem:[%s6372_s1 + $0x1c0] sm:$0xff]   ;;  %v2217_v36 = vrot.slane %v2216_v25, 4  ;;  %v2232_v42 = vsel %vm5547_vm11, %v2227_v52, %v2231_v30  ;;  %v2547_v40 = vsel %vm5701_vm14, %v2545_v44, %v2546_v12  ;;  %v2253_v60 = vshll.u32 %v5927_v29, 16 }
 0x105   : > { %4931 = vmatprep.subr.bf16.mxu1 %v5117_v56  ;;  %4899 = vmatprep.subr.bf16.mxu0 %v5116_v16  ;;  %v5120_v47 = vld [vmem:[%s6372_s1 + $0x180] sm:$0xff]   ;;  %v2249_v57 = vrot.slane %v2247_v45, 4  ;;  %v4285_v55 = vcombine.low %v2544_v41, %v2547_v40  ;;  %v2240_v46 = vor.u32 %v2239_v54, %v2236_v53  ;;  %v4262_v61 = vrot.slane %v2474_v33, 9  ;;  %v3014_v45 = vld [vmem:[#allocation2 + $0x30] sm:$0xf] }
 0x106   : > { %v2222_v48 = vsel %vm5547_vm11, %v2217_v36, %v2221_v43  ;;  %v2255_v63 = vrot.slane %v2253_v60, 5  ;;  %v2550_v0 = vrot.slane %v2063_v11, 5  ;;  %v2553_v1 = vrot.slane %v5927_v29, 5  ;;  %v5968_v11 = vld [vmem:[#allocation2 + $0x2c] sm:$0x1]  ;;  %v5983_v54 = vld [vmem:[%s6372_s1 + $0x230] sm:$0xff]  }
 0x107   : > { %v4245_v49 = vcombine.low %v2222_v48, %v2232_v42  ;;  %v2250_v59 = vor.u32 %v2249_v57, %v2245_v26  ;;  %4885 = vmatprep.mubr.bf16.mxu1 %v4285_v55  ;;  %v2241_v5 = vrot.slane %v2240_v46, 4  ;;  %v3033_v13 = vshrl.u32 %v3008_v7, 16 }
 0x108   : > { %4932 = vmatpush3.bf16.msra.mxu1 %v5117_v56  ;;  %4900 = vmatpush3.bf16.msra.mxu0 %v5116_v16  ;;  %v5942_v56 = vld [vmem:[%s6372_s1 + $0x238] sm:$0xff]   ;;  %v2551_v6 = vsel %vm5701_vm14, %v4262_v61, %v2550_v0  ;;  %v2552_v8 = vrot.slane %v2550_v0, 4  ;;  %v3036_v9 = vshll.u32 %v3008_v7, 16  ;;  %v3070_v31 = vshrl.u32 %v5966_v20, 16 }
 0x109   : > { %4933 = vmatprep.subr.bf16.mxu1 %v5119_v51  ;;  %4901 = vmatprep.subr.bf16.mxu0 %v5118_v62  ;;  %v5950_v16 = vld [vmem:[#allocation2 + $0x1c] sm:$0xf]  ;;  %v2251_v2 = vrot.slane %v2250_v59, 4  ;;  %v2246_v10 = vsel %vm5547_vm11, %v2241_v5, %v2245_v26  ;;  %v3035_v15 = vrot.slane %v3033_v13, 4  ;;  %v3076_v30 = vshll.u32 %v5968_v11, 16 }
 0x10a   : > { %4853 = vmatprep.mubr.bf16.mxu0 %v4245_v49  ;;  %v3042_v17 = vshll.u32 %v5950_v16, 16  ;;  %v3046_v18 = vshrl.u32 %v5950_v16, 16  ;;  %v2554_v19 = vsel %vm5701_vm14, %v2552_v8, %v2553_v1  ;;  %v3038_v35 = vrot.slane %v3036_v9, 5  ;;  %v5985_v26 = vld [vmem:[#allocation2 + $0x38] sm:$0x1]  ;;  %v5126_v49 = vld [vmem:[#allocation2 + $0x30] sm:$0xff]  }
 0x10b   : > { %v2256_v4 = vsel %vm5547_vm11, %v2251_v2, %v2255_v63  ;;  %v4286_v22 = vcombine.low %v2551_v6, %v2554_v19  ;;  %v3072_v38 = vrot.slane %v3070_v31, 4  ;;  %v3078_v52 = vrot.slane %v3076_v30, 5  ;;  %v3017_v1 = vld [vmem:[#allocation2 + $0x3c] sm:$0xf]  ;;  %v5992_v2 = vld [vmem:[#allocation2 + $0x40] sm:$0xf] }
 0x10c   : > { %4934 = vmatpush3.bf16.msra.mxu1 %v5119_v51  ;;  %4902 = vmatpush3.bf16.msra.mxu0 %v5118_v62  ;;  %v5952_v51 = vld [vmem:[#allocation2 + $0x20] sm:$0x1]  ;;  %v3011_v62 = vld [vmem:[#allocation2 + $0x24] sm:$0xf]  ;;  %v4246_v21 = vcombine.low %v2246_v10, %v2256_v4  ;;  %v3044_v27 = vrot.slane %v3042_v17, 5  ;;  %v3048_v58 = vrot.slane %v3046_v18, 4  ;;  %v3039_v23 = vor.u32 %v3038_v35, %v3035_v15 }
 0x10d   : > { %4935 = vmatprep.subr.bf16.mxu1 %v5121_v50  ;;  %4903 = vmatprep.subr.bf16.mxu0 %v5120_v47  ;;  %v3052_v43 = vshll.u32 %v5952_v51, 16  ;;  %v3057_v25 = vshrl.u32 %v3011_v62, 16  ;;  %v3060_v28 = vshll.u32 %v3011_v62, 16  ;;  %v3081_v42 = vshrl.u32 %v3014_v45, 16  ;;  %v5994_v6 = vld [vmem:[#allocation2 + $0x44] sm:$0x1] }
 0x10e   : > { %4854 = vmatmul.mubr.bf16.gmra.mxu0 %v4246_v21  ;;  %4886 = vmatmul.mubr.bf16.gmra.mxu1 %v4286_v22  ;;  %v3049_v29 = vor.u32 %v3048_v58, %v3044_v27  ;;  %v3040_v32 = vrot.slane %v3039_v23, 4  ;;  %v3084_v40 = vshll.u32 %v3014_v45, 16  ;;  %v3100_v0 = vshll.u32 %v5985_v26, 16  ;;  %v6001_v15 = vld [vmem:[%s6372_s1 + $0x228] sm:$0xff]  }
 0x10f   : > { %v3054_v24 = vrot.slane %v3052_v43, 5  ;;  %4905 = vmatprep.mubr.bf16.mxu0 %v5122_v14  ;;  %v3059_v12 = vrot.slane %v3057_v25, 4  ;;  %v3062_v33 = vrot.slane %v3060_v28, 5  ;;  %v3083_v59 = vrot.slane %v3081_v42, 4  ;;  %v6011_v31 = vld [vmem:[#allocation2 + $0x4c] sm:$0xf] }
 0x110   : > { %4936 = vmatpush3.bf16.msra.mxu1 %v5121_v50  ;;  %4904 = vmatpush3.bf16.msra.mxu0 %v5120_v47  ;;  %v3066_v50 = vshll.u32 %v5966_v20, 16  ;;  %v3050_v36 = vrot.slane %v3049_v29, 4  ;;  %v3045_v41 = vsel %vm5547_vm11, %v3040_v32, %v3044_v27  ;;  %v5976_v47 = vld [vmem:[#allocation2 + $0x34] sm:$0xf]  ;;  %v3086_v63 = vrot.slane %v3084_v40, 5  ;;  %v5127_v27 = vld [vmem:[#allocation2 + $0x3c] sm:$0xff]  }
 0x111   : > { %4985 = vmatprep.subr.bf16.mxu1 %v5942_v56  ;;  %4953 = vmatprep.subr.bf16.mxu0 %v5942_v56  ;;  %v3063_v44 = vor.u32 %v3062_v33, %v3059_v12  ;;  %v3090_v55 = vshll.u32 %v5976_v47, 16  ;;  %v3094_v46 = vshrl.u32 %v5976_v47, 16  ;;  %v3102_v10 = vrot.slane %v3100_v0, 5  ;;  %v5130_v29 = vld [vmem:[#allocation2 + $0x48] sm:$0xff]   ;;  %v6022_v12 = vld [vmem:[#allocation2 + $0x50] sm:$0x1] }
 0x112   : > { %v3068_v37 = vrot.slane %v3066_v50, 5  ;;  %v3055_v48 = vsel %vm5547_vm11, %v3050_v36, %v3054_v24  ;;  %v3087_v9 = vor.u32 %v3086_v63, %v3083_v59  ;;  %v3105_v14 = vshrl.u32 %v3017_v1, 16  ;;  %v3020_v50 = vld [vmem:[#allocation2 + $0x48] sm:$0xf]  ;;  %v6028_v42 = vld [vmem:[#allocation2 + $0x58] sm:$0xf] }
 0x113   : > { %v4343_v57 = vcombine.low %v3045_v41, %v3055_v48  ;;  %v3064_v60 = vrot.slane %v3063_v44, 4  ;;  %v3092_v5 = vrot.slane %v3090_v55, 5  ;;  %v3096_v13 = vrot.slane %v3094_v46, 4  ;;  %v3023_v41 = vld [vmem:[#allocation2 + $0x54] sm:$0xf] }
 0x114   : > { %v3073_v53 = vor.u32 %v3072_v38, %v3068_v37  ;;  %v3108_v4 = vshll.u32 %v3017_v1, 16  ;;  %v3114_v19 = vshll.u32 %v5992_v2, 16  ;;  %v3088_v35 = vrot.slane %v3087_v9, 4 }
 0x115   : > { %4937 = vmatprep.mubr.bf16.mxu1 %v4343_v57  ;;  %v3069_v7 = vsel %vm5547_vm11, %v3064_v60, %v3068_v37  ;;  %v3097_v18 = vor.u32 %v3096_v13, %v3092_v5  ;;  %v3107_v43 = vrot.slane %v3105_v14, 4  ;;  %v3118_v62 = vshrl.u32 %v5992_v2, 16  ;;  %v5132_v14 = vld [vmem:[%s6372_s1 + $0x218] sm:$0xff]  }
 0x116   : > { %v3074_v61 = vrot.slane %v3073_v53, 4  ;;  %4906 = vmatmul.mubr.bf16.vlgmr.msra.gmra.mxu0 %v5123_v3  ;;  %v3124_v21 = vshll.u32 %v5994_v6, 16  ;;  %v3110_v58 = vrot.slane %v3108_v4, 5  ;;  %v3116_v23 = vrot.slane %v3114_v19, 5 }
 0x117   : > { %4954 = vmatpush3.bf16.msra.mxu0 %v5942_v56  ;;  %4909 = vmatprep.mubr.bf16.mxu0 %v5126_v49  ;;  %v3098_v22 = vrot.slane %v3097_v18, 4  ;;  %v3093_v24 = vsel %vm5547_vm11, %v3088_v35, %v3092_v5  ;;  %v3120_v25 = vrot.slane %v3118_v62, 4  ;;  %v3129_v33 = vshrl.u32 %v3020_v50, 16  ;;  %v6031_v49 = vld [vmem:[#allocation2 + $0x5c] sm:$0x1] }
 0x118   : > { %v3079_v8 = vsel %vm5547_vm11, %v3074_v61, %v3078_v52  ;;  %4955 = vmatprep.subr.bf16.mxu0 %v5983_v54  ;;  %v3126_v28 = vrot.slane %v3124_v21, 5  ;;  %v3111_v32 = vor.u32 %v3110_v58, %v3107_v43  ;;  %v3132_v36 = vshll.u32 %v3020_v50, 16 }
 0x119   : > { %v4344_v17 = vcombine.low %v3069_v7, %v3079_v8  ;;  %v3103_v30 = vsel %vm5547_vm11, %v3098_v22, %v3102_v10  ;;  %v3121_v37 = vor.u32 %v3120_v25, %v3116_v23  ;;  %v3138_v38 = vshll.u32 %v6011_v31, 16  ;;  %v5131_v8 = vld [vmem:[#allocation2 + $0x54] sm:$0xff]   ;;  %v3026_v22 = vld [vmem:[#allocation2 + $0x60] sm:$0xf] }
 0x11a   : > { %v4345_v3 = vcombine.low %v3093_v24, %v3103_v30  ;;  %v3142_v52 = vshrl.u32 %v6011_v31, 16  ;;  %v3112_v44 = vrot.slane %v3111_v32, 4  ;;  %v3131_v45 = vrot.slane %v3129_v33, 4  ;;  %v5134_v25 = vld [vmem:[#allocation2 + $0x60] sm:$0xff]  }
 0x11b   : > { %4938 = vmatmul.mubr.bf16.vlgmr.msra.gmra.mxu1 %v4344_v17  ;;  %4956 = vmatpush3.bf16.msra.mxu0 %v5983_v54  ;;  %v3134_v48 = vrot.slane %v3132_v36, 5  ;;  %v3148_v53 = vshll.u32 %v6022_v12, 16  ;;  %v3122_v40 = vrot.slane %v3121_v37, 4  ;;  %v3140_v57 = vrot.slane %v3138_v38, 5 }
 0x11c   : > { %4993 = vmatpush3.bf16.msra.mxu1 %v5942_v56  ;;  %v6020_v56 = vld [vmem:[%s6372_s1 + $0x220] sm:$0xff]   ;;  %4957 = vmatprep.subr.bf16.mxu0 %v6001_v15  ;;  %v3144_v60 = vrot.slane %v3142_v52, 4  ;;  %v3153_v55 = vshrl.u32 %v3023_v41, 16  ;;  %v3117_v46 = vsel %vm5547_vm11, %v3112_v44, %v3116_v23  ;;  %v3156_v63 = vshll.u32 %v3023_v41, 16  ;;  %v3029_v52 = vld [vmem:[#allocation2 + $0x6c] sm:$0xf] }
 0x11d   : > { %4986 = vmatprep.subr.bf16.mxu1 %v5983_v54  ;;  %4941 = vmatprep.mubr.bf16.mxu1 %v4345_v3  ;;  %v3135_v61 = vor.u32 %v3134_v48, %v3131_v45  ;;  %v3150_v59 = vrot.slane %v3148_v53, 5  ;;  %v3127_v0 = vsel %vm5547_vm11, %v3122_v40, %v3126_v28  ;;  %v3162_v7 = vshll.u32 %v6028_v42, 16  ;;  %v6066_v28 = vld [vmem:[#allocation2 + $0x68] sm:$0x1]  ;;  %v6074_v48 = vld [vmem:[#allocation2 + $0x70] sm:$0xf] }
 0x11e   : > { %4910 = vmatmul.mubr.bf16.gmra.mxu0 %v5127_v27  ;;  %v3155_v1 = vrot.slane %v3153_v55, 4  ;;  %v4346_v5 = vcombine.low %v3117_v46, %v3127_v0  ;;  %v3158_v9 = vrot.slane %v3156_v63, 5  ;;  %v3166_v10 = vshrl.u32 %v6028_v42, 16  ;;  %v6057_v27 = vld [vmem:[#allocation2 + $0x64] sm:$0xf] }
 0x11f   : > { %4958 = vmatpush3.bf16.msra.mxu0 %v6001_v15  ;;  %4913 = vmatprep.mubr.bf16.mxu0 %v5130_v29  ;;  %v3136_v13 = vrot.slane %v3135_v61, 4  ;;  %v3164_v18 = vrot.slane %v3162_v7, 5  ;;  %v3172_v4 = vshll.u32 %v6031_v49, 16  ;;  %v3503_v19 = vrot.slane %v6028_v42, 5  ;;  %v6076_v53 = vld [vmem:[#allocation2 + $0x74] sm:$0x1] }
 0x120   : > { %4994 = vmatpush3.bf16.msra.mxu1 %v5983_v54  ;;  %v3145_v54 = vor.u32 %v3144_v60, %v3140_v57  ;;  %4959 = vmatprep.subr.bf16.mxu0 %v6020_v56  ;;  %v3159_v43 = vor.u32 %v3158_v9, %v3155_v1  ;;  %v3168_v62 = vrot.slane %v3166_v10, 4  ;;  %v3506_v21 = vrot.slane %v6031_v49, 5 }
 0x121   : > { %4987 = vmatprep.subr.bf16.mxu1 %v6001_v15  ;;  %v3141_v35 = vsel %vm5547_vm11, %v3136_v13, %v3140_v57  ;;  %v3174_v23 = vrot.slane %v3172_v4, 5  ;;  %v6064_v24 = vrot.slane %v3503_v19, 4  ;;  %v3177_v29 = vshrl.u32 %v3026_v22, 16 }
 0x122   : > { %v3146_v17 = vrot.slane %v3145_v54, 4  ;;  %v3160_v30 = vrot.slane %v3159_v43, 4  ;;  %v3169_v32 = vor.u32 %v3168_v62, %v3164_v18  ;;  %v3180_v33 = vshll.u32 %v3026_v22, 16  ;;  %v3438_v43 = vld [vmem:[#allocation2 + $0x48] sm:$0xe] }
 0x123   : > { %4942 = vmatmul.mubr.bf16.gmra.mxu1 %v4346_v5  ;;  %4960 = vmatpush3.bf16.msra.mxu0 %v6020_v56  ;;  %v3179_v36 = vrot.slane %v3177_v29, 4  ;;  %v3186_v3 = vshll.u32 %v6057_v27, 16  ;;  %v3190_v37 = vshrl.u32 %v6057_v27, 16  ;;  %v3196_v38 = vshll.u32 %v6066_v28, 16  ;;  %v3434_v5 = vld [vmem:[#allocation2 + $0x18] sm:$0xe] }
 0x124   : > { %4995 = vmatpush3.bf16.msra.mxu1 %v6001_v15  ;;  %v6055_v15 = vld [vmem:[%s6372_s1 + $0x210] sm:$0xff]   ;;  %v3151_v58 = vsel %vm5547_vm11, %v3146_v17, %v3150_v59  ;;  %4961 = vmatprep.subr.bf16.mxu0 %v5132_v14  ;;  %v3165_v41 = vsel %vm5547_vm11, %v3160_v30, %v3164_v18  ;;  %v3170_v44 = vrot.slane %v3169_v32, 4  ;;  %v3182_v45 = vrot.slane %v3180_v33, 5  ;;  %v3435_v29 = vld [vmem:[#allocation2 + $0x24] sm:$0xe] }
 0x125   : > { %4988 = vmatprep.subr.bf16.mxu1 %v6020_v56  ;;  %v4347_v50 = vcombine.low %v3141_v35, %v3151_v58  ;;  %v3188_v40 = vrot.slane %v3186_v3, 5  ;;  %v3192_v57 = vrot.slane %v3190_v37, 4  ;;  %v3198_v60 = vrot.slane %v3196_v38, 5 }
 0x126   : > { %4914 = vmatmul.mubr.bf16.gmra.mxu0 %v5131_v8  ;;  %v3201_v55 = vshrl.u32 %v3029_v52, 16  ;;  %v3175_v46 = vsel %vm5547_vm11, %v3170_v44, %v3174_v23  ;;  %v3183_v61 = vor.u32 %v3182_v45, %v3179_v36  ;;  %v3204_v59 = vshll.u32 %v3029_v52, 16  ;;  %v5135_v8 = vld [vmem:[#allocation2 + $0x6c] sm:$0xff]   ;;  %v5137_v23 = vld [vmem:[%s6372_s1 + $0x200] sm:$0xff]  }
 0x127   : > { %4945 = vmatprep.mubr.bf16.mxu1 %v4347_v50  ;;  %4962 = vmatpush3.bf16.msra.mxu0 %v5132_v14  ;;  %v3210_v63 = vshll.u32 %v6074_v48, 16  ;;  %v4348_v0 = vcombine.low %v3165_v41, %v3175_v46  ;;  %v3193_v54 = vor.u32 %v3192_v57, %v3188_v40  ;;  %v3214_v7 = vshrl.u32 %v6074_v48, 16  ;;  %v3436_v44 = vld [vmem:[#allocation2 + $0x30] sm:$0xe] }
 0x128   : > { %4996 = vmatpush3.bf16.msra.mxu1 %v6020_v56  ;;  %v6081_v56 = vld [vmem:[%s6372_s1 + $0x208] sm:$0xff]   ;;  %4963 = vmatprep.subr.bf16.mxu0 %v6055_v15  ;;  %v3203_v1 = vrot.slane %v3201_v55, 4  ;;  %v3184_v13 = vrot.slane %v3183_v61, 4  ;;  %v3206_v9 = vrot.slane %v3204_v59, 5  ;;  %v3220_v17 = vshll.u32 %v6076_v53, 16 }
 0x129   : > { %4989 = vmatprep.subr.bf16.mxu1 %v5132_v14  ;;  %4917 = vmatprep.mubr.bf16.mxu0 %v5134_v25  ;;  %v3212_v10 = vrot.slane %v3210_v63, 5  ;;  %v3194_v18 = vrot.slane %v3193_v54, 4  ;;  %v3216_v4 = vrot.slane %v3214_v7, 4  ;;  %v4359_v35 = vrot.slane %v3434_v5, 9  ;;  %v3440_v54 = vld [vmem:[#allocation2 + $0x60] sm:$0xe] }
 0x12a   : > { %v3189_v62 = vsel %vm5547_vm11, %v3184_v13, %v3188_v40  ;;  %v3207_v22 = vor.u32 %v3206_v9, %v3203_v1  ;;  %v3222_v58 = vrot.slane %v3220_v17, 5  ;;  %v3471_v25 = vrot.slane %v5952_v51, 5  ;;  %v3439_v51 = vld [vmem:[#allocation2 + $0x54] sm:$0xe]  ;;  %v3441_v17 = vld [vmem:[#allocation2 + $0x6c] sm:$0xe] }
 0x12b   : > { %4946 = vmatmul.mubr.bf16.gmra.mxu1 %v4348_v0  ;;  %4964 = vmatpush3.bf16.msra.mxu0 %v6055_v15  ;;  %v3217_v50 = vor.u32 %v3216_v4, %v3212_v10  ;;  %v4363_v3 = vrot.slane %v3438_v43, 9  ;;  %v3496_v37 = vrot.slane %v6011_v31, 5  ;;  %v3499_v52 = vrot.slane %v6022_v12, 5 }
 0x12c   : > { %4997 = vmatpush3.bf16.msra.mxu1 %v5132_v14  ;;  %v3468_v14 = vrot.slane %v5950_v16, 5  ;;  %4965 = vmatprep.subr.bf16.mxu0 %v6081_v56  ;;  %v3199_v16 = vsel %vm5547_vm11, %v3194_v18, %v3198_v60  ;;  %v3208_v36 = vrot.slane %v3207_v22, 4  ;;  %v4360_v41 = vrot.slane %v3435_v29, 9 }
 0x12d   : > { %4990 = vmatprep.subr.bf16.mxu1 %v6055_v15  ;;  %v4349_v33 = vcombine.low %v3189_v62, %v3199_v16  ;;  %v3218_v38 = vrot.slane %v3217_v50, 4  ;;  %v3497_v31 = vsel %vm5701_vm14, %v4363_v3, %v3496_v37  ;;  %v3498_v57 = vrot.slane %v3496_v37, 4 }
 0x12e   : > { %v3469_v30 = vsel %vm5701_vm14, %v4359_v35, %v3468_v14  ;;  %v3470_v32 = vrot.slane %v3468_v14, 4  ;;  %4918 = vmatmul.mubr.bf16.gmra.mxu0 %v5135_v8  ;;  %v3213_v45 = vsel %vm5547_vm11, %v3208_v36, %v3212_v10  ;;  %v3475_v55 = vrot.slane %v5966_v20, 5 }
 0x12f   : > { %4966 = vmatpush3.bf16.msra.mxu0 %v6081_v56  ;;  %4949 = vmatprep.mubr.bf16.mxu1 %v4349_v33  ;;  %v3223_v60 = vsel %vm5547_vm11, %v3218_v38, %v3222_v58  ;;  %v3478_v12 = vrot.slane %v5968_v11, 5  ;;  %v4364_v46 = vrot.slane %v3439_v51, 9  ;;  %v3500_v59 = vsel %vm5701_vm14, %v3498_v57, %v3499_v52  ;;  %v3437_v11 = vld [vmem:[#allocation2 + $0x3c] sm:$0xe] }
 0x130   : > { %4998 = vmatpush3.bf16.msra.mxu1 %v6055_v15  ;;  %v3472_v15 = vsel %vm5701_vm14, %v3470_v32, %v3471_v25  ;;  %4967 = vmatprep.subr.bf16.mxu0 %v5137_v23  ;;  %v4350_v61 = vcombine.low %v3213_v45, %v3223_v60  ;;  %v4361_v63 = vrot.slane %v3436_v44, 9  ;;  %v3482_v0 = vrot.slane %v5976_v47, 5 }
 0x131   : > { %4991 = vmatprep.subr.bf16.mxu1 %v6081_v56  ;;  %v4383_v40 = vcombine.low %v3469_v30, %v3472_v15  ;;  %v4387_v39 = vcombine.low %v3497_v31, %v3500_v59  ;;  %v3477_v1 = vrot.slane %v3475_v55, 4  ;;  %v3507_v20 = vsel %vm5701_vm14, %v6064_v24, %v3506_v21 }
 0x132   : > { %v3504_v47 = vsel %vm5701_vm14, %v4364_v46, %v3503_v19  ;;  %v3483_v7 = vsel %vm5701_vm14, %v4361_v63, %v3482_v0  ;;  %v3484_v5 = vrot.slane %v3482_v0, 4  ;;  %v3485_v13 = vrot.slane %v5985_v26, 5 }
 0x133   : > { %4969 = vmatprep.mubr.bf16.mxu0 %v4383_v40  ;;  %4968 = vmatpush3.bf16.msra.mxu0 %v5137_v23  ;;  %v3479_v49 = vsel %vm5701_vm14, %v3477_v1, %v3478_v12  ;;  %v4365_v8 = vrot.slane %v3440_v54, 9  ;;  %v3510_v21 = vrot.slane %v6057_v27, 5  ;;  %v3513_v24 = vrot.slane %v6066_v28, 5 }
 0x134   : > { %4999 = vmatpush3.bf16.msra.mxu1 %v6081_v56  ;;  %v3476_v56 = vsel %vm5701_vm14, %v4360_v41, %v3475_v55  ;;  %v3486_v19 = vsel %vm5701_vm14, %v3484_v5, %v3485_v13  ;;  %v4362_v9 = vrot.slane %v3437_v11, 9  ;;  %v3489_v10 = vrot.slane %v5992_v2, 5 }
 0x135   : > { %4992 = vmatprep.subr.bf16.mxu1 %v5137_v23  ;;  %4950 = vmatmul.mubr.bf16.gmra.mxu1 %v4350_v61  ;;  %v4384_v42 = vcombine.low %v3476_v56, %v3479_v49  ;;  %v4385_v18 = vcombine.low %v3483_v7, %v3486_v19  ;;  %v3511_v26 = vsel %vm5701_vm14, %v4365_v8, %v3510_v21  ;;  %v3512_v4 = vrot.slane %v3510_v21, 4 }
 0x136   : > { %4977 = vmatprep.mubr.bf16.mxu1 %v4387_v39  ;;  %v3492_v35 = vrot.slane %v5994_v6, 5  ;;  %v4388_v14 = vcombine.low %v3504_v47, %v3507_v20  ;;  %v3491_v27 = vrot.slane %v3489_v10, 4  ;;  %v3517_v28 = vrot.slane %v6074_v48, 5 }
 0x137   : > { %4970 = vmatmul.mubr.bf16.vlgmr.msra.gmra.mxu0 %v4384_v42  ;;  %v3514_v43 = vsel %vm5701_vm14, %v3512_v4, %v3513_v24  ;;  %v3490_v2 = vsel %vm5701_vm14, %v4362_v9, %v3489_v10  ;;  %v4366_v62 = vrot.slane %v3441_v17, 9  ;;  %v3520_v22 = vrot.slane %v6076_v53, 5 }
 0x138   : > { %5000 = vmatpush3.bf16.msra.mxu1 %v5137_v23  ;;  %4973 = vmatprep.mubr.bf16.mxu0 %v4385_v18  ;;  %v4389_v58 = vcombine.low %v3511_v26, %v3514_v43  ;;  %v3493_v23 = vsel %vm5701_vm14, %v3491_v27, %v3492_v35  ;;  %v3519_v6 = vrot.slane %v3517_v28, 4 }
 0x139   : > { %v4386_v25 = vcombine.low %v3490_v2, %v3493_v23  ;;  %v3518_v48 = vsel %vm5701_vm14, %v4366_v62, %v3517_v28 }
 0x13a   : > { %v3521_v29 = vsel %vm5701_vm14, %v3519_v6, %v3520_v22 }
 0x13b   : > { %v4390_v16 = vcombine.low %v3518_v48, %v3521_v29 }
 0x13d   : > { %4978 = vmatmul.mubr.bf16.vlgmr.msra.gmra.mxu1 %v4388_v14 }
 0x13e   : > { %4981 = vmatprep.mubr.bf16.mxu1 %v4389_v58 }
 0x13f   : > { %4974 = vmatmul.mubr.bf16.gmra.mxu0 %v4386_v25 }
 0x145   : > { %4982 = vmatmul.mubr.bf16.gmra.mxu1 %v4390_v16 }
 0x172   : > { %v4715_v50 = vpop.f32.mrf.mxu0 }
 0x173   : > { %v4747_v30 = vpop.f32.mrf.mxu1 }
 0x174   : > { %v1452_v53 = vadd.f32 %v4747_v30, %v4715_v50  ;;  %v1250_v32 = vpop.f32.mrf.mxu0 }
 0x175   : > { %v1443_v33 = vpop.f32.mrf.mxu1 }
 0x176   : > { %v1444_v36 = vadd.f32 %v1443_v33, %v1250_v32  ;;  %v4716_v3 = vpop.f32.mrf.mxu0 }
 0x177   : > { %v4748_v37 = vpop.f32.mrf.mxu1 }
 0x178   : > { %v1455_v51 = vadd.f32 %v4748_v37, %v4716_v3  ;;  %v1253_v38 = vpop.f32.mrf.mxu0 }
 0x179   : > { %v1446_v15 = vpop.f32.mrf.mxu1 }
 0x17a   : > { %v1447_v52 = vadd.f32 %v1446_v15, %v1253_v38  ;;  %v4719_v41 = vpop.f32.mrf.mxu0 }
 0x17b   : > { %v4751_v44 = vpop.f32.mrf.mxu1 }
 0x17c   : > { %v1468_v45 = vadd.f32 %v4751_v44, %v4719_v41  ;;  %v1266_v34 = vpop.f32.mrf.mxu0 }
 0x17d   : > { %v1459_v40 = vpop.f32.mrf.mxu1 }
 0x17e   : > { %v1460_v31 = vadd.f32 %v1459_v40, %v1266_v34  ;;  %v4720_v57 = vpop.f32.mrf.mxu0 }
 0x17f   : > { %v4752_v60 = vpop.f32.mrf.mxu1 }
 0x180   : > { %v1471_v55 = vadd.f32 %v4752_v60, %v4720_v57  ;;  %v1269_v12 = vpop.f32.mrf.mxu0 }
 0x181   : > { %v1462_v46 = vpop.f32.mrf.mxu1 }
 0x182   : > { %v1463_v61 = vadd.f32 %v1462_v46, %v1269_v12  ;;  %v4723_v63 = vpop.f32.mrf.mxu0 }
 0x183   : > { %v4755_v59 = vpop.f32.mrf.mxu1 }
 0x184   : > { %v1484_v54 = vadd.f32 %v4755_v59, %v4723_v63  ;;  %v1282_v39 = vpop.f32.mrf.mxu0 }
 0x185   : > { %v1475_v0 = vpop.f32.mrf.mxu1 }
 0x186   : > { %v1476_v1 = vadd.f32 %v1475_v0, %v1282_v39  ;;  %v4724_v20 = vpop.f32.mrf.mxu0 }
 0x187   : > { %v4756_v56 = vpop.f32.mrf.mxu1 }
 0x188   : > { %v1487_v47 = vadd.f32 %v4756_v56, %v4724_v20  ;;  %v1285_v7 = vpop.f32.mrf.mxu0 }
 0x189   : > { %v1478_v11 = vpop.f32.mrf.mxu1 }
 0x18a   : > { %v1479_v13 = vadd.f32 %v1478_v11, %v1285_v7  ;;  %v4727_v8 = vpop.f32.mrf.mxu0 }
 0x18b   : > { %v4759_v5 = vpop.f32.mrf.mxu1 }
 0x18c   : > { %v1500_v24 = vadd.f32 %v4759_v5, %v4727_v8  ;;  %v1298_v42 = vpop.f32.mrf.mxu0 }
 0x18d   : > { %v1491_v49 = vpop.f32.mrf.mxu1 }
 0x18e   : > { %v1492_v9 = vadd.f32 %v1491_v49, %v1298_v42  ;;  %v4728_v10 = vpop.f32.mrf.mxu0 }
 0x18f   : > { %v4760_v21 = vpop.f32.mrf.mxu1 }
 0x190   : > { %v1503_v18 = vadd.f32 %v4760_v21, %v4728_v10  ;;  %v1301_v26 = vpop.f32.mrf.mxu0 }
 0x191   : > { %v1494_v19 = vpop.f32.mrf.mxu1 }
 0x192   : > { %v6158_v35 = vadd.f32 %v1494_v19, %v1301_v26  ;;  %v4779_v14 = vpop.f32.mrf.mxu0 }
 0x193   : > { %v4811_v17 = vpop.f32.mrf.mxu1  ;;  %v1785_v28 = vadd.f32 %v4779_v14, %v1452_v53 }
 0x194   : > { %v1720_v43 = vpop.f32.mrf.mxu0 }
 0x195   : > { %v1962_v4 = vpop.f32.mrf.mxu1  ;;  %v6160_v62 = vadd.f32 %v4811_v17, %v1785_v28  ;;  %v1783_v22 = vadd.f32 %v1720_v43, %v1444_v36 }
 0x196   : > { %v4780_v58 = vpop.f32.mrf.mxu0 }
 0x197   : > { %v4812_v27 = vpop.f32.mrf.mxu1  ;;  %v6162_v6 = vadd.f32 %v1962_v4, %v1783_v22  ;;  %v1786_v25 = vadd.f32 %v4780_v58, %v1455_v51 }
 0x198   : > { %v1723_v48 = vpop.f32.mrf.mxu0 }
 0x199   : > { %v1965_v2 = vpop.f32.mrf.mxu1  ;;  %v6164_v16 = vadd.f32 %v4812_v27, %v1786_v25  ;;  %v1784_v50 = vadd.f32 %v1723_v48, %v1447_v52 }
 0x19a   : > { %v4783_v30 = vpop.f32.mrf.mxu0 }
 0x19b   : > { %v4815_v23 = vpop.f32.mrf.mxu1  ;;  %v6166_v33 = vadd.f32 %v1965_v2, %v1784_v50  ;;  %v1789_v53 = vadd.f32 %v4783_v30, %v1468_v45 }
 0x19c   : > { %v1736_v3 = vpop.f32.mrf.mxu0 }
 0x19d   : > { %v1978_v29 = vpop.f32.mrf.mxu1  ;;  %v6168_v38 = vadd.f32 %v4815_v23, %v1789_v53  ;;  %v1787_v36 = vadd.f32 %v1736_v3, %v1460_v31 }
 0x19e   : > { %v4784_v15 = vpop.f32.mrf.mxu0 }
 0x19f   : > { %v4816_v32 = vpop.f32.mrf.mxu1  ;;  %v6170_v44 = vadd.f32 %v1978_v29, %v1787_v36  ;;  %v1790_v51 = vadd.f32 %v4784_v15, %v1471_v55 }
 0x1a0   : > { %v1739_v34 = vpop.f32.mrf.mxu0 }
 0x1a1   : > { %v1981_v37 = vpop.f32.mrf.mxu1  ;;  %v6172_v57 = vadd.f32 %v4816_v32, %v1790_v51  ;;  %v1788_v52 = vadd.f32 %v1739_v34, %v1463_v61 }
 0x1a2   : > { %v4787_v60 = vpop.f32.mrf.mxu0 }
 0x1a3   : > { %v4819_v41 = vpop.f32.mrf.mxu1  ;;  %v6174_v46 = vadd.f32 %v1981_v37, %v1788_v52  ;;  %v1793_v45 = vadd.f32 %v4787_v60, %v1484_v54 }
 0x1a4   : > { %v1752_v59 = vpop.f32.mrf.mxu0 }
 0x1a5   : > { %v1994_v40 = vpop.f32.mrf.mxu1  ;;  %v6176_v0 = vadd.f32 %v4819_v41, %v1793_v45  ;;  %v1791_v31 = vadd.f32 %v1752_v59, %v1476_v1 }
 0x1a6   : > { %v4788_v39 = vpop.f32.mrf.mxu0 }
 0x1a7   : > { %v4820_v12 = vpop.f32.mrf.mxu1  ;;  %v6178_v20 = vadd.f32 %v1994_v40, %v1791_v31  ;;  %v1794_v55 = vadd.f32 %v4788_v39, %v1487_v47 }
 0x1a8   : > { %v1755_v11 = vpop.f32.mrf.mxu0 }
 0x1a9   : > { %v1997_v63 = vpop.f32.mrf.mxu1  ;;  %v6180_v5 = vadd.f32 %v4820_v12, %v1794_v55  ;;  %v1792_v61 = vadd.f32 %v1755_v11, %v1479_v13 }
 0x1aa   : > { %v4791_v49 = vpop.f32.mrf.mxu0 }
 0x1ab   : > { %v4823_v56 = vpop.f32.mrf.mxu1  ;;  %v6182_v21 = vadd.f32 %v1997_v63, %v1792_v61  ;;  %v1797_v54 = vadd.f32 %v4791_v49, %v1500_v24 }
 0x1ac   : > { %v1768_v42 = vpop.f32.mrf.mxu0 }
 0x1ad   : > { %v2010_v7 = vpop.f32.mrf.mxu1  ;;  %v6184_v10 = vadd.f32 %v4823_v56, %v1797_v54  ;;  %v1795_v1 = vadd.f32 %v1768_v42, %v1492_v9 }
 0x1ae   : > { %v4792_v17 = vpop.f32.mrf.mxu0 }
 0x1af   : > { %v4824_v8 = vpop.f32.mrf.mxu1  ;;  %v6188_v4 = vadd.f32 %v2010_v7, %v1795_v1  ;;  %v1798_v47 = vadd.f32 %v4792_v17, %v1503_v18 }
 0x1b0   : > { %v1771_v14 = vpop.f32.mrf.mxu0 }
 0x1b1   : > { %v2013_v19 = vpop.f32.mrf.mxu1  ;;  %v6192_v13 = vadd.f32 %v4824_v8, %v1798_v47  ;;  %v1796_v28 = vadd.f32 %v1771_v14, %v6158_v35 }
 0x1b2   : > { %v4843_v43 = vpop.f32.mrf.mxu0 }
 0x1b3   : > { %v6186_v26 = vpop.f32.mrf.mxu1  ;;  %v6195_v24 = vadd.f32 %v2013_v19, %v1796_v28 }
 0x1b4   : > { %v2388_v22 = vpop.f32.mrf.mxu0 }
 0x1b5   : > { %v6190_v27 = vpop.f32.mrf.mxu1  ;;  %6393 = vst [vmem:[#allocation4_spill] sm:$0xff] %v6195_v24 }
 0x1b6   : > { %v4844_v9 = vpop.f32.mrf.mxu0 }
 0x1b7   : > { %v6197_v2 = vpop.f32.mrf.mxu1 }
 0x1b8   : > { %v2391_v23 = vpop.f32.mrf.mxu0 }
 0x1b9   : > { %v6199_v58 = vpop.f32.mrf.mxu1 }
 0x1bb   : > { %v4847_v25 = vpop.f32.mrf.mxu0  ;;  %v6201_v48 = vpop.f32.mrf.mxu1 }
 0x1bd   : > { %v2404_v18 = vpop.f32.mrf.mxu0  ;;  %v6203_v29 = vpop.f32.mrf.mxu1 }
 0x1bf   : > { %v4848_v50 = vpop.f32.mrf.mxu0  ;;  %v6205_v30 = vpop.f32.mrf.mxu1 }
 0x1c1   : > { %v2407_v35 = vpop.f32.mrf.mxu0  ;;  %v6207_v32 = vpop.f32.mrf.mxu1 }
 0x1c3   : > { %v4851_v53 = vpop.f32.mrf.mxu0  ;;  %v6209_v3 = vpop.f32.mrf.mxu1 }
 0x1c5   : > { %v2420_v37 = vpop.f32.mrf.mxu0  ;;  %v6211_v36 = vpop.f32.mrf.mxu1 }
 0x1c7   : > { %v4852_v15 = vpop.f32.mrf.mxu0  ;;  %v6213_v41 = vpop.f32.mrf.mxu1 }
 0x1c9   : > { %v2423_v51 = vpop.f32.mrf.mxu0  ;;  %v6215_v34 = vpop.f32.mrf.mxu1 }
 0x1ce   : > { %v4855_v40 = vpop.f32.mrf.mxu0  ;;  %v6217_v52 = vpop.f32.mrf.mxu1 }
 0x1d0   : > { %v2436_v60 = vpop.f32.mrf.mxu0  ;;  %v6219_v12 = vpop.f32.mrf.mxu1 }
 0x1d1   : > { %6394 = vst [vmem:[#allocation5_spill] sm:$0xff] %v6219_v12 }
 0x1d2   : > { %v4856_v45 = vpop.f32.mrf.mxu0  ;;  %v6221_v59 = vpop.f32.mrf.mxu1 }
 0x1d3   : > { %6395 = vst [vmem:[#allocation6_spill] sm:$0xff] %v6221_v59 }
 0x1d4   : > { %v6223_v63 = vpop.f32.mrf.mxu0  ;;  %v6225_v31 = vpop.f32.mrf.mxu1 }
 0x1d5   : > { %6396 = vst [vmem:[#allocation7_spill] sm:$0xff] %v6223_v63  ;;  %6397 = vst [vmem:[#allocation8_spill] sm:$0xff] %v6225_v31  ;;  %v2452_v63 = vadd.f32 %v2391_v23, %v6166_v33 }
 0x1d6   : > { %v4907_v39 = vpop.f32.mrf.mxu0 }
 0x1d8   : > { %v2929_v56 = vpop.f32.mrf.mxu0 }
 0x1da   : > { %v4908_v11 = vpop.f32.mrf.mxu0 }
 0x1db   : > { %v6227_v55 = vpop.f32.mrf.mxu1 }
 0x1dc   : > { %6398 = vst [vmem:[#allocation9_spill] sm:$0xff] %v6227_v55  ;;  %v2932_v61 = vpop.f32.mrf.mxu0 }
 0x1dd   : > { %v6229_v7 = vpop.f32.mrf.mxu1 }
 0x1de   : > { %6399 = vst [vmem:[#allocation10_spill] sm:$0xff] %v6229_v7  ;;  %v4911_v54 = vpop.f32.mrf.mxu0 }
 0x1df   : > { %v6231_v49 = vpop.f32.mrf.mxu1 }
 0x1e0   : > { %6400 = vst [vmem:[#allocation11_spill] sm:$0xff] %v6231_v49  ;;  %v2945_v42 = vpop.f32.mrf.mxu0 }
 0x1e1   : > { %v6233_v8 = vpop.f32.mrf.mxu1 }
 0x1e2   : > { %6401 = vst [vmem:[#allocation12_spill] sm:$0xff] %v6233_v8  ;;  %v6237_v1 = vpop.f32.mrf.mxu0 }
 0x1e3   : > { %v6235_v19 = vpop.f32.mrf.mxu1  ;;  %6403 = vst [vmem:[#allocation14_spill] sm:$0xff] %v6237_v1 }
 0x1e4   : > { %6402 = vst [vmem:[#allocation13_spill] sm:$0xff] %v6235_v19  ;;  %v6241_v47 = vpop.f32.mrf.mxu0 }
 0x1e5   : > { %v6239_v17 = vpop.f32.mrf.mxu1  ;;  %6405 = vst [vmem:[#allocation16_spill] sm:$0xff] %v6241_v47  ;;  %v2451_v47 = vadd.f32 %v2388_v22, %v6162_v6  ;;  %v2459_v22 = vadd.f32 %v2420_v37, %v6178_v20  ;;  %v2463_v20 = vadd.f32 %v2436_v60, %v6188_v4 }
 0x1e6   : > { %6404 = vst [vmem:[#allocation15_spill] sm:$0xff] %v6239_v17  ;;  %v4915_v28 = vpop.f32.mrf.mxu0  ;;  %v2453_v17 = vadd.f32 %v4843_v43, %v6160_v62  ;;  %v2456_v62 = vadd.f32 %v2407_v35, %v6174_v46  ;;  %v2465_v46 = vadd.f32 %v4855_v40, %v6184_v10 }
 0x1e7   : > { %v6243_v14 = vpop.f32.mrf.mxu1  ;;  %v2749_v43 = vadd.f32 %v6190_v27, %v2451_v47  ;;  %v2757_v10 = vadd.f32 %v6211_v36, %v2459_v22 }
 0x1e8   : > { %6406 = vst [vmem:[#allocation17_spill] sm:$0xff] %v6243_v14  ;;  %v2961_v7 = vpop.f32.mrf.mxu0  ;;  %v2454_v14 = vadd.f32 %v4844_v9, %v6164_v16  ;;  %v2751_v6 = vadd.f32 %v6186_v26, %v2453_v17  ;;  %v2461_v16 = vadd.f32 %v4851_v53, %v6176_v0  ;;  %v2750_v26 = vadd.f32 %v6199_v58, %v2452_v63  ;;  %v6411_v53 = vld [vmem:[#allocation4_spill] sm:$0xff]  ;;  %v6415_v63 = vld [vmem:[#allocation11_spill] sm:$0xff] }
 0x1e9   : > { %v6245_v31 = vpop.f32.mrf.mxu1  ;;  %v2466_v58 = vadd.f32 %v4856_v45, %v6192_v13  ;;  %v3000_v47 = vadd.f32 %v2961_v7, %v2757_v10 }
 0x1ea   : > { %6407 = vst [vmem:[#allocation18_spill] sm:$0xff] %v6245_v31  ;;  %v4916_v59 = vpop.f32.mrf.mxu0 }
 0x1eb   : > { %v6247_v49 = vpop.f32.mrf.mxu1 }
 0x1ec   : > { %6408 = vst [vmem:[#allocation19_spill] sm:$0xff] %v6247_v49  ;;  %v2964_v8 = vpop.f32.mrf.mxu0  ;;  %v2457_v49 = vadd.f32 %v4847_v25, %v6168_v38  ;;  %v2752_v38 = vadd.f32 %v6197_v2, %v2454_v14  ;;  %v2754_v2 = vadd.f32 %v6207_v32, %v2456_v62  ;;  %v6412_v32 = vld [vmem:[#allocation7_spill] sm:$0xff] }
 0x1ed   : > { %v6249_v55 = vpop.f32.mrf.mxu1  ;;  %v2464_v37 = vadd.f32 %v6412_v32, %v6411_v53 }
 0x1ee   : > { %6409 = vst [vmem:[#allocation20_spill] sm:$0xff] %v6249_v55  ;;  %v6251_v12 = vpop.f32.mrf.mxu0  ;;  %v2455_v55 = vadd.f32 %v2404_v18, %v6170_v44  ;;  %v2462_v44 = vadd.f32 %v4852_v15, %v6180_v5  ;;  %v2755_v27 = vadd.f32 %v6201_v48, %v2457_v49  ;;  %v2994_v18 = vadd.f32 %v4907_v39, %v2751_v6  ;;  %v6413_v15 = vld [vmem:[#allocation5_spill] sm:$0xff]  ;;  %v6418_v49 = vld [vmem:[#allocation14_spill] sm:$0xff] }
 0x1ef   : > { %6410 = vst [vmem:[#allocation21_spill] sm:$0xff] %v6251_v12  ;;  %v6253_v19 = vpop.f32.mrf.mxu1  ;;  %v2458_v12 = vadd.f32 %v4848_v50, %v6172_v57  ;;  %v2460_v57 = vadd.f32 %v2423_v51, %v6182_v21  ;;  %v2995_v5 = vadd.f32 %v4908_v11, %v2752_v38  ;;  %v2759_v21 = vadd.f32 %v6209_v3, %v2461_v16  ;;  %v6420_v16 = vld [vmem:[#allocation12_spill] sm:$0xff]  ;;  %v6421_v38 = vld [vmem:[#allocation13_spill] sm:$0xff] }
 0x1f0   : > { %v6257_v1 = vpop.f32.mrf.mxu0  ;;  %v2753_v0 = vadd.f32 %v6203_v29, %v2455_v55  ;;  %v2992_v50 = vadd.f32 %v2929_v56, %v2749_v43  ;;  %v2760_v4 = vadd.f32 %v6213_v41, %v2462_v44  ;;  %v2761_v51 = vadd.f32 %v6413_v15, %v2463_v20 }
 0x1f1   : > { %v6260_v31 = vpop.f32.mrf.mxu1  ;;  %v2756_v25 = vadd.f32 %v6205_v30, %v2458_v12  ;;  %v2758_v35 = vadd.f32 %v6215_v34, %v2460_v57  ;;  %v2763_v30 = vadd.f32 %v6217_v52, %v2465_v46  ;;  %v2993_v3 = vadd.f32 %v2932_v61, %v2750_v26  ;;  %v6414_v12 = vld [vmem:[#allocation9_spill] sm:$0xff]  ;;  %v6416_v34 = vld [vmem:[#allocation6_spill] sm:$0xff] }
 0x1f2   : > { %v6265_v24 = vpop.f32.mrf.mxu0  ;;  %v2998_v40 = vadd.f32 %v4911_v54, %v2755_v27  ;;  %v2996_v36 = vadd.f32 %v2945_v42, %v2753_v0  ;;  %v3420_v45 = vadd.f32 %v6414_v12, %v2994_v18  ;;  %v3421_v39 = vadd.f32 %v6415_v63, %v2995_v5  ;;  %v6417_v52 = vld [vmem:[#allocation10_spill] sm:$0xff]  ;;  %v6419_v54 = vld [vmem:[#allocation8_spill] sm:$0xff] }
 0x1f3   : > { %v3002_v41 = vadd.f32 %v4915_v28, %v2759_v21  ;;  %v3003_v56 = vadd.f32 %v4916_v59, %v2760_v4  ;;  %v2764_v55 = vadd.f32 %v6416_v34, %v2466_v58  ;;  %v3418_v11 = vadd.f32 %v6417_v52, %v2992_v50  ;;  %v6422_v28 = vld [vmem:[#allocation15_spill] sm:$0xff]  ;;  %v6423_v27 = vld [vmem:[#allocation16_spill] sm:$0xff] }
 0x1f4   : > { %v6275_v33 = vpop.f32.mrf.mxu0  ;;  %v2999_v17 = vadd.f32 %v6418_v49, %v2756_v25  ;;  %v2762_v42 = vadd.f32 %v6419_v54, %v2464_v37  ;;  %v3001_v62 = vadd.f32 %v2964_v8, %v2758_v35  ;;  %v3419_v22 = vadd.f32 %v6420_v16, %v2993_v3  ;;  %v6424_v7 = vld [vmem:[#allocation19_spill] sm:$0xff]  ;;  %v6425_v8 = vld [vmem:[#allocation17_spill] sm:$0xff] }
 0x1f5   : > { %v6273_v9 = vpop.f32.mrf.mxu1  ;;  %v3424_v44 = vadd.f32 %v6421_v38, %v2998_v40  ;;  %v3422_v59 = vadd.f32 %v6422_v28, %v2996_v36  ;;  %v2997_v0 = vadd.f32 %v6423_v27, %v2754_v2  ;;  %v3428_v20 = vadd.f32 %v6424_v7, %v3002_v41  ;;  %v6426_v21 = vld [vmem:[#allocation20_spill] sm:$0xff] }
 0x1f6   : > { %v3429_v25 = vadd.f32 %v6253_v19, %v3003_v56  ;;  %v3425_v5 = vadd.f32 %v6425_v8, %v2999_v17  ;;  %v3426_v10 = vadd.f32 %v6426_v21, %v3000_v47  ;;  %v6427_v58 = vld [vmem:[#allocation21_spill] sm:$0xff]  ;;  %v3427_v53 = vadd.f32 %v6260_v31, %v3001_v62 }
 0x1f7   : > { %v6285_v23 = vpop.f32.mrf.mxu1  ;;  %v4971_v29 = vpop.f32.mrf.mxu0  ;;  %v3006_v50 = vadd.f32 %v6427_v58, %v2763_v30  ;;  %v3004_v32 = vadd.f32 %v6257_v1, %v2761_v51  ;;  %v3005_v34 = vadd.f32 %v6275_v33, %v2762_v42 }
 0x1f8   : > { %v3718_v6 = vadd.f32 %v4971_v29, %v3420_v45 }
 0x1f9   : > { %v6292_v48 = vpop.f32.mrf.mxu1  ;;  %v3653_v13 = vpop.f32.mrf.mxu0  ;;  %v3432_v62 = vadd.f32 %v6273_v9, %v3006_v50  ;;  %v3430_v28 = vadd.f32 %v6285_v23, %v3004_v32 }
 0x1fa   : > { %v3716_v57 = vadd.f32 %v3653_v13, %v3418_v11  ;;  %v3007_v13 = vadd.f32 %v6265_v24, %v2764_v55  ;;  %v3836_v1 = vmul.f32 %v3718_v6, %v3718_v6  ;;  %v6428_v24 = vld [vmem:[#allocation18_spill] sm:$0xff] }
 0x1fb   : > { %v6300_v60 = vpop.f32.mrf.mxu1  ;;  %v4972_v61 = vpop.f32.mrf.mxu0  ;;  %v3423_v55 = vadd.f32 %v6428_v24, %v2997_v0 }
 0x1fc   : > { %v3719_v43 = vadd.f32 %v4972_v61, %v3421_v39  ;;  %v3834_v19 = vmul.f32 %v3716_v57, %v3716_v57 }
 0x1fd   : > { %v4979_v14 = vpop.f32.mrf.mxu1  ;;  %v3656_v26 = vpop.f32.mrf.mxu0 }
 0x1fe   : > { %v4506_v18 = vpack.c.bf16 %v3719_v43, %v3718_v6  ;;  %v3717_v4 = vadd.f32 %v3656_v26, %v3419_v22  ;;  %v6319_v2 = vadd.f32 %v4979_v14, %v3428_v20  ;;  %v3837_v17 = vmul.f32 %v3719_v43, %v3719_v43 }
 0x1ff   : > { %v3685_v46 = vpop.f32.mrf.mxu1  ;;  %v4975_v35 = vpop.f32.mrf.mxu0 }
 0x200   : > { %4546 = vst [vmem:[%s5326_s29 + $0x8] sm:$0xff] %v4506_v18   ;;  %v4501_v15 = vpack.c.bf16 %v3717_v4, %v3716_v57  ;;  %v3812_v3 = vadd.f32 %v3717_v4, %v3716_v57  ;;  %v3835_v40 = vmul.f32 %v3717_v4, %v3717_v4  ;;  %v3724_v12 = vadd.f32 %v3685_v46, %v3426_v10 }
 0x201   : > { %v4980_v29 = vpop.f32.mrf.mxu1  ;;  %v3669_v30 = vpop.f32.mrf.mxu0  ;;  %v3722_v11 = vadd.f32 %v4975_v35, %v3424_v44 }
 0x202   : > { %v6322_v37 = vadd.f32 %v4980_v29, %v3429_v25  ;;  %4502 = vst [vmem:[%s5326_s29] sm:$0xff] %v4501_v15   ;;  %v3813_v51 = vadd.f32 %v3812_v3, %v3718_v6  ;;  %v3850_v63 = vadd.f32 %v3835_v40, %v3834_v19  ;;  %v3720_v41 = vadd.f32 %v3669_v30, %v3422_v59 }
 0x203   : > { %v3688_v36 = vpop.f32.mrf.mxu1  ;;  %v4976_v56 = vpop.f32.mrf.mxu0  ;;  %v3433_v6 = vadd.f32 %v6292_v48, %v3007_v13  ;;  %v3431_v59 = vadd.f32 %v6300_v60, %v3005_v34  ;;  %v3840_v25 = vmul.f32 %v3722_v11, %v3722_v11  ;;  %v3842_v10 = vmul.f32 %v3724_v12, %v3724_v12 }
 0x204   : > { %v4526_v31 = vpack.c.bf16 %v6322_v37, %v6319_v2  ;;  %v3725_v45 = vadd.f32 %v3688_v36, %v3427_v53  ;;  %v3723_v49 = vadd.f32 %v4976_v56, %v3425_v5  ;;  %v3851_v47 = vadd.f32 %v3850_v63, %v3836_v1 }
 0x205   : > { %v4983_v39 = vpop.f32.mrf.mxu1  ;;  %v3814_v14 = vadd.f32 %v3813_v51, %v3719_v43  ;;  %v3672_v54 = vpop.f32.mrf.mxu0  ;;  %v3838_v33 = vmul.f32 %v3720_v41, %v3720_v41  ;;  %v3844_v53 = vmul.f32 %v6319_v2, %v6319_v2  ;;  %v3845_v15 = vmul.f32 %v6322_v37, %v6322_v37 }
 0x206   : > { %4550 = vst [vmem:[%s5326_s29 + $0x28] sm:$0xff] %v4526_v31   ;;  %v4521_v52 = vpack.c.bf16 %v3725_v45, %v3724_v12  ;;  %v4516_v16 = vpack.c.bf16 %v3723_v49, %v3722_v11  ;;  %v3852_v42 = vadd.f32 %v3851_v47, %v3837_v17  ;;  %v3721_v44 = vadd.f32 %v3672_v54, %v3423_v55 }
 0x207   : > { %v3701_v61 = vpop.f32.mrf.mxu1  ;;  %v3815_v22 = vadd.f32 %v3814_v14, %v3720_v41  ;;  %v3730_v43 = vadd.f32 %v4983_v39, %v3432_v62  ;;  %v3841_v60 = vmul.f32 %v3723_v49, %v3723_v49  ;;  %v3843_v29 = vmul.f32 %v3725_v45, %v3725_v45 }
 0x208   : > { %4549 = vst [vmem:[%s5326_s29 + $0x20] sm:$0xff] %v4521_v52   ;;  %4548 = vst [vmem:[%s5326_s29 + $0x18] sm:$0xff] %v4516_v16   ;;  %v3853_v46 = vadd.f32 %v3852_v42, %v3838_v33  ;;  %v4511_v9 = vpack.c.bf16 %v3721_v44, %v3720_v41  ;;  %v3839_v26 = vmul.f32 %v3721_v44, %v3721_v44 }
 0x209   : > { %v4984_v38 = vpop.f32.mrf.mxu1  ;;  %v3816_v48 = vadd.f32 %v3815_v22, %v3721_v44  ;;  %v3728_v0 = vadd.f32 %v3701_v61, %v3430_v28  ;;  %v3848_v51 = vmul.f32 %v3730_v43, %v3730_v43 }
 0x20a   : > { %v3731_v57 = vadd.f32 %v4984_v38, %v3433_v6  ;;  %4547 = vst [vmem:[%s5326_s29 + $0x10] sm:$0xff] %v4511_v9   ;;  %v3854_v8 = vadd.f32 %v3853_v46, %v3839_v26 }
 0x20b   : > { %v3704_v27 = vpop.f32.mrf.mxu1  ;;  %v3817_v18 = vadd.f32 %v3816_v48, %v3722_v11  ;;  %v3846_v36 = vmul.f32 %v3728_v0, %v3728_v0 }
 0x20c   : > { %v4536_v7 = vpack.c.bf16 %v3731_v57, %v3730_v43  ;;  %v3729_v20 = vadd.f32 %v3704_v27, %v3431_v59  ;;  %v3855_v21 = vadd.f32 %v3854_v8, %v3840_v25  ;;  %v3849_v39 = vmul.f32 %v3731_v57, %v3731_v57 }
 0x20d   : > { %v3818_v5 = vadd.f32 %v3817_v18, %v3723_v49 }
 0x20e   : > { %4552 = vst [vmem:[%s5326_s29 + $0x38] sm:$0xff] %v4536_v7   ;;  %v4531_v23 = vpack.c.bf16 %v3729_v20, %v3728_v0  ;;  %v3856_v50 = vadd.f32 %v3855_v21, %v3841_v60  ;;  %v3847_v31 = vmul.f32 %v3729_v20, %v3729_v20 }
 0x20f   : > { %v3819_v58 = vadd.f32 %v3818_v5, %v3724_v12 }
 0x210   : > { %4551 = vst [vmem:[%s5326_s29 + $0x30] sm:$0xff] %v4531_v23   ;;  %v3857_v4 = vadd.f32 %v3856_v50, %v3842_v10 }
 0x211   : > { %v3820_v35 = vadd.f32 %v3819_v58, %v3725_v45 }
 0x212   : > { %v3858_v19 = vadd.f32 %v3857_v4, %v3843_v29 }
 0x213   : > { %v3821_v32 = vadd.f32 %v3820_v35, %v6319_v2 }
 0x214   : > { %v3859_v40 = vadd.f32 %v3858_v19, %v3844_v53 }
 0x215   : > { %v3822_v3 = vadd.f32 %v3821_v32, %v6322_v37 }
 0x216   : > { %v3860_v13 = vadd.f32 %v3859_v40, %v3845_v15 }
 0x217   : > { %v3823_v30 = vadd.f32 %v3822_v3, %v3728_v0 }
 0x218   : > { %v3861_v1 = vadd.f32 %v3860_v13, %v3846_v36 }
 0x219   : > { %v3824_v12 = vadd.f32 %v3823_v30, %v3729_v20 }
 0x21a   : > { %v3862_v63 = vadd.f32 %v3861_v1, %v3847_v31 }
 0x21b   : > { %v3825_v45 = vadd.f32 %v3824_v12, %v3730_v43 }
 0x21c   : > { %v3863_v2 = vadd.f32 %v3862_v63, %v3848_v51 }
 0x21d   : > { %v3826_v41 = vadd.f32 %v3825_v45, %v3731_v57 }
 0x21e   : > { %v3864_v34 = vadd.f32 %v3863_v2, %v3849_v39 }
 0x21f   : > { %v3827_v56 = vrot.slane %v3826_v41, 4 }
 0x220   : > { %v3865_v11 = vrot.slane %v3864_v34, 4 }
 0x221   : > { %v3828_v52 = vadd.f32 %v3827_v56, %v3826_v41 }
 0x222   : > { %v3866_v49 = vadd.f32 %v3865_v11, %v3864_v34 }
 0x223   : > { %v3829_v37 = vrot.slane %v3828_v52, 2 }
 0x224   : > { %v3867_v55 = vrot.slane %v3866_v49, 2 }
 0x225   : > { %v3830_v24 = vadd.f32 %v3829_v37, %v3828_v52 }
 0x226   : > { %v3868_v47 = vadd.f32 %v3867_v55, %v3866_v49 }
 0x227   : > { %v3831_v17 = vrot.slane %v3830_v24, 1 }
 0x228   : > { %v3869_v61 = vrot.slane %v3868_v47, 1 }
 0x229   : > { %v3832_v14 = vadd.f32 %v3831_v17, %v3830_v24 }
 0x22a   : > { %v3870_v54 = vadd.f32 %v3869_v61, %v3868_v47 }
 0x22b   : > { %3833 = vst [vmem:[%s306_s20] sm:$0x1] %v3832_v14 }
 0x22c   : > { %3871 = vst [vmem:[%s313_s11] sm:$0x1] %v3870_v54 }
 0x22d PF: > { %s17_s25 = sadd.s32 1, %s5176_s25   ;;  %s6429_s19 = sld [smem:[#allocation3_spill]] }
 0x22e   : > { %p14_p10 = scmp.ge.s32.totalorder %s17_s25, 6   ;;  %s6430_s21 = smov %s5168_s23 }
 0x22f   : > { %s6431_s22 = smov %s5172_s24  ;;  %s6432_s23 = smov %s6435_s26 }
 0x230   :  { %16 = sbr.rel (!%p14_p10) target bundleno = 3 (0x3), region = 112 }
 0x233   : > { %s6433_s24 = smov %s6429_s19 }

</bundles_post_ra>
